<compile_context>
chip_gen: v5e
topology: v5e:2x2
jax: 0.10.0
libtpu: 0.0.40
codegen_flags: <defaults>
</compile_context>

<pallas_src>
import jax
import jax.numpy as jnp
from jax import lax
from jax.experimental import pallas as pl
from jax.experimental.pallas import tpu as pltpu

# ---- small, deterministic hyper-parameters consistent with NTM.__init__ ----
INPUT_SIZE = 8
OUTPUT_SIZE = 8
CTRL_SIZE = 32      # controller_size
N_SLOTS = 128       # N
M_DIM = 20          # M
BATCH = 2
SEQ = 8
EPS = 1e-8


# ------------------------------ Pallas kernel ------------------------------
def ntm_kernel(x_ref, w_gx_ref, w_gr_ref, w_gh_ref, b_g_ref,
               w_heads_ref, b_heads_ref, w_or_ref, mem_init_ref, out_ref):
    B, T, _ = x_ref.shape
    H, M, N = CTRL_SIZE, M_DIM, N_SLOTS

    # Loop-invariant weight loads (hoisted once).
    w_gx = w_gx_ref[...]        # (D, 4H)  gate cols ordered [i, f, o, g]
    w_gr = w_gr_ref[...]        # (M, 4H)
    w_gh = w_gh_ref[...]        # (H, 4H)
    b_g = b_g_ref[...]          # (1, 4H)
    w_heads = w_heads_ref[...]  # (H, 4M+2+O)  cols grouped [tanh | sigmoid | softplus | linear]
    b_heads = b_heads_ref[...]  # (1, 4M+2+O)
    w_or = w_or_ref[...]        # (M, O)
    mem_init = mem_init_ref[...]  # (M, N): N on the lane axis

    def content_weights(k, beta, mem, mem_sq):
        # k: (B, M), beta: (B, 1), mem: (B, M, N), mem_sq: (B, N) = sum_m mem^2
        # MXU batched matvec (flash-style NN einsum) instead of broadcast + XLU reduce.
        dot = jnp.einsum('bqm,bmn->bqn', k[:, None, :], mem,
                         preferred_element_type=jnp.float32)[:, 0, :]       # (B, N)
        k_sq = jnp.sum(k * k, axis=1, keepdims=True)                        # (B, 1)
        sim = dot * lax.rsqrt(mem_sq * k_sq + EPS)                          # cosine sim
        logits = beta * sim
        logits = logits - jnp.max(logits, axis=-1, keepdims=True)
        e = jnp.exp(logits)
        return e / jnp.sum(e, axis=-1, keepdims=True)                       # (B, N)

    # -------- reset() at the start of the sequence --------
    mem = jnp.broadcast_to(mem_init[None], (B, M, N))
    mem_sq = jnp.broadcast_to(
        jnp.sum(mem_init * mem_init, axis=0, keepdims=True), (B, N))
    h = jnp.zeros((B, H), jnp.float32)
    c = jnp.zeros((B, H), jnp.float32)
    r = jnp.zeros((B, M), jnp.float32)

    outs = []
    # Fully unrolled recurrence (T=8); static indices everywhere.
    for t in range(T):
        x = x_ref[:, t, :]                                                  # (B, D)

        # ---- LSTM controller: three small MXU dots (no lane concat) ----
        gates = (jnp.dot(x, w_gx, preferred_element_type=jnp.float32)
                 + jnp.dot(r, w_gr, preferred_element_type=jnp.float32)
                 + jnp.dot(h, w_gh, preferred_element_type=jnp.float32)
                 + b_g)                                                     # (B, 4H) [i,f,o,g]
        sg = jax.nn.sigmoid(gates[:, :3 * H])                               # i, f, o
        g_g = jnp.tanh(gates[:, 3 * H:])                                    # g
        i_g = sg[:, :H]
        f_g = sg[:, H:2 * H]
        o_g = sg[:, 2 * H:3 * H]
        c = f_g * c + i_g * g_g
        h = o_g * jnp.tanh(c)                                               # controller output

        # ---- fused head projections, activation-grouped columns ----
        heads = (jnp.dot(h, w_heads, preferred_element_type=jnp.float32)
                 + b_heads)                                                 # (B, 4M+2+O)
        tg = jnp.tanh(heads[:, :3 * M])                                     # [k_w | add | k_r]
        k_w = tg[:, :M]
        add = tg[:, M:2 * M]
        k_r = tg[:, 2 * M:3 * M]
        erase = jax.nn.sigmoid(heads[:, 3 * M:4 * M])
        betas = jax.nn.softplus(heads[:, 4 * M:4 * M + 2])
        beta_w = betas[:, 0:1]
        beta_r = betas[:, 1:2]
        out_h = heads[:, 4 * M + 2:]                                        # ctrl half of output

        # ---- write head: content addressing (carried mem_sq) + erase/add ----
        w_w = content_weights(k_w, beta_w, mem, mem_sq)                     # (B, N)
        w_w3 = w_w[:, None, :]                                              # (B, 1, N), free
        mem = mem * (1.0 - erase[:, :, None] * w_w3) + add[:, :, None] * w_w3
        mem_sq = jnp.sum(mem * mem, axis=1)                                 # once per step

        # ---- read head on post-write memory; read via MXU (NT einsum) ----
        w_r = content_weights(k_r, beta_r, mem, mem_sq)                     # (B, N)
        r = jnp.einsum('bqn,bmn->bqm', w_r[:, None, :], mem,
                       preferred_element_type=jnp.float32)[:, 0, :]         # (B, M)

        # ---- output layer (ctrl half already in out_h) ----
        outs.append(out_h + jnp.dot(r, w_or, preferred_element_type=jnp.float32))

    # Single dense store instead of 8 masked per-step stores.
    out_ref[...] = jnp.concatenate(outs, axis=1)                            # (B, T*O)


# ------------------------------- wrapper -----------------------------------
def ntm_forward(x_seq, p):
    """x_seq: (B, T, input_size) float32 -> (B, T, output_size) float32."""
    B, T, D = x_seq.shape
    H, M, N, O = CTRL_SIZE, M_DIM, N_SLOTS, OUTPUT_SIZE

    # ---- repack / fuse weights once, outside the kernel ----
    def reorder_gate_cols(w):            # [i, f, g, o] -> [i, f, o, g]
        return jnp.concatenate([w[:, :2 * H], w[:, 3 * H:], w[:, 2 * H:3 * H]], axis=1)

    w_ih = reorder_gate_cols(p["w_ih"])                                   # (D+M, 4H)
    w_gx = w_ih[:D]                                                       # (D, 4H)
    w_gr = w_ih[D:]                                                       # (M, 4H)
    w_gh = reorder_gate_cols(p["w_hh"])                                   # (H, 4H)
    b_g = reorder_gate_cols(p["b_lstm"])                                  # (1, 4H)

    Ww, bw = p["w_write"], p["b_write"]     # cols: [k(M), beta(1), erase(M), add(M)]
    Wr, br = p["w_read"], p["b_read"]       # cols: [k(M), beta(1)]
    w_oh = p["w_out"][:H]                                                 # (H, O)
    w_or = p["w_out"][H:]                                                 # (M, O)
    b_o = p["b_out"]                                                      # (1, O)
    # Group head columns by activation:
    #   [tanh: k_w, add, k_r | sigmoid: erase | softplus: beta_w, beta_r | linear: out]
    w_heads = jnp.concatenate(
        [Ww[:, :M], Ww[:, 2 * M + 1:], Wr[:, :M],
         Ww[:, M + 1:2 * M + 1], Ww[:, M:M + 1], Wr[:, M:M + 1], w_oh], axis=1)
    b_heads = jnp.concatenate(
        [bw[:, :M], bw[:, 2 * M + 1:], br[:, :M],
         bw[:, M + 1:2 * M + 1], bw[:, M:M + 1], br[:, M:M + 1], b_o], axis=1)
    mem_init_mn = jnp.transpose(p["mem_init"])                            # (M, N): N on lanes

    vmem_specs = [pl.BlockSpec(memory_space=pltpu.MemorySpace.VMEM) for _ in range(9)]
    out_flat = pl.pallas_call(
        ntm_kernel,
        out_shape=jax.ShapeDtypeStruct((B, T * O), jnp.float32),
        in_specs=vmem_specs,
        out_specs=pl.BlockSpec(memory_space=pltpu.MemorySpace.VMEM),
    )(x_seq, w_gx, w_gr, w_gh, b_g, w_heads, b_heads, w_or, mem_init_mn)
    return out_flat.reshape(B, T, O)


# ---------------- pure-JAX reference (same math, unfused weights) ----------
def _content_addressing_ref(k, beta, mem):
    # mem: (B, N, M), k: (B, M), beta: (B, 1) -> (B, N)
    dot = jnp.einsum("bnm,bm->bn", mem, k)
    mem_sq = jnp.sum(mem * mem, axis=-1)
    k_sq = jnp.sum(k * k, axis=-1, keepdims=True)
    sim = dot / jnp.sqrt(mem_sq * k_sq + EPS)
    logits = beta * sim
    logits = logits - jnp.max(logits, axis=-1, keepdims=True)
    e = jnp.exp(logits)
    return e / jnp.sum(e, axis=-1, keepdims=True)


def ntm_reference(x_seq, p):
    B, T, _ = x_seq.shape
    H, M = CTRL_SIZE, M_DIM
    mem = jnp.broadcast_to(p["mem_init"][None], (B, N_SLOTS, M))
    h = jnp.zeros((B, H)); c = jnp.zeros((B, H)); r = jnp.zeros((B, M))
    outs = []
    for t in range(T):
        x = x_seq[:, t, :]
        ci = jnp.concatenate([x, r], axis=1)
        gates = ci @ p["w_ih"] + h @ p["w_hh"] + p["b_lstm"]
        i_g = jax.nn.sigmoid(gates[:, :H]); f_g = jax.nn.sigmoid(gates[:, H:2 * H])
        g_g = jnp.tanh(gates[:, 2 * H:3 * H]); o_g = jax.nn.sigmoid(gates[:, 3 * H:])
        c = f_g * c + i_g * g_g
        h = o_g * jnp.tanh(c)
        hw = h @ p["w_write"] + p["b_write"]
        k_w = jnp.tanh(hw[:, :M]); beta_w = jax.nn.softplus(hw[:, M:M + 1])
        erase = jax.nn.sigmoid(hw[:, M + 1:2 * M + 1]); add = jnp.tanh(hw[:, 2 * M + 1:])
        w_w = _content_addressing_ref(k_w, beta_w, mem)
        mem = (mem * (1 - w_w[:, :, None] * erase[:, None, :])
               + w_w[:, :, None] * add[:, None, :])
        hr = h @ p["w_read"] + p["b_read"]
        k_r = jnp.tanh(hr[:, :M]); beta_r = jax.nn.softplus(hr[:, M:M + 1])
        w_r = _content_addressing_ref(k_r, beta_r, mem)
        r = jnp.sum(w_r[:, :, None] * mem, axis=1)
        out = jnp.concatenate([h, r], axis=1) @ p["w_out"] + p["b_out"]
        outs.append(out[:, None, :])
    return jnp.concatenate(outs, axis=1)


def make_params(key):
    I = INPUT_SIZE + M_DIM
    H, M = CTRL_SIZE, M_DIM
    ks = jax.random.split(key, 10)
    s = 0.1
    return dict(
        w_ih=jax.random.normal(ks[0], (I, 4 * H), jnp.float32) * s,
        w_hh=jax.random.normal(ks[1], (H, 4 * H), jnp.float32) * s,
        b_lstm=jax.random.normal(ks[2], (1, 4 * H), jnp.float32) * s,
        w_read=jax.random.normal(ks[3], (H, M + 1), jnp.float32) * s,
        b_read=jax.random.normal(ks[4], (1, M + 1), jnp.float32) * s,
        w_write=jax.random.normal(ks[5], (H, 3 * M + 1), jnp.float32) * s,
        b_write=jax.random.normal(ks[6], (1, 3 * M + 1), jnp.float32) * s,
        w_out=jax.random.normal(ks[7], (H + M, OUTPUT_SIZE), jnp.float32) * s,
        b_out=jax.random.normal(ks[8], (1, OUTPUT_SIZE), jnp.float32) * s,
        mem_init=jax.random.uniform(ks[9], (N_SLOTS, M), jnp.float32, 0.0, 0.1),
    )


if __name__ == "__main__":
    key = jax.random.PRNGKey(0)
    k_x, k_p = jax.random.split(key)
    params = make_params(k_p)
    x_seq = jax.random.normal(k_x, (BATCH, SEQ, INPUT_SIZE), jnp.float32)

    out = jax.jit(ntm_forward)(x_seq, params)
    out = jax.block_until_ready(out)
    assert out.shape == (BATCH, SEQ, OUTPUT_SIZE), out.shape

    ref = jax.block_until_ready(ntm_reference(x_seq, params))
    err = float(jnp.max(jnp.abs(out - ref)))
    assert jnp.allclose(out, ref, atol=2e-3, rtol=2e-3), err

    print("KERNEL_OK")
</pallas_src>

<mosaic_0001>
module attributes {stable_mosaic.version = 11 : i64} {
  func.func @ntm_kernel(%arg0: memref<2x8x8xf32, #tpu.memory_space<vmem>>, %arg1: memref<8x128xf32, #tpu.memory_space<vmem>>, %arg2: memref<20x128xf32, #tpu.memory_space<vmem>>, %arg3: memref<32x128xf32, #tpu.memory_space<vmem>>, %arg4: memref<1x128xf32, #tpu.memory_space<vmem>>, %arg5: memref<32x90xf32, #tpu.memory_space<vmem>>, %arg6: memref<1x90xf32, #tpu.memory_space<vmem>>, %arg7: memref<20x8xf32, #tpu.memory_space<vmem>>, %arg8: memref<20x128xf32, #tpu.memory_space<vmem>>, %arg9: memref<2x64xf32, #tpu.memory_space<vmem>>) attributes {dimension_semantics = [], scalar_prefetch = 0 : i64, scratch_operands = 0 : i64, tpu.core_type = #tpu.core_type<tc>} {
    %c0 = arith.constant 0 : index
    %c0_0 = arith.constant 0 : index
    %0 = vector.load %arg1[%c0, %c0_0] : memref<8x128xf32, #tpu.memory_space<vmem>>, vector<8x128xf32>
    %c0_1 = arith.constant 0 : index
    %c0_2 = arith.constant 0 : index
    %1 = vector.load %arg2[%c0_1, %c0_2] : memref<20x128xf32, #tpu.memory_space<vmem>>, vector<20x128xf32>
    %c0_3 = arith.constant 0 : index
    %c0_4 = arith.constant 0 : index
    %2 = vector.load %arg3[%c0_3, %c0_4] : memref<32x128xf32, #tpu.memory_space<vmem>>, vector<32x128xf32>
    %c0_5 = arith.constant 0 : index
    %c0_6 = arith.constant 0 : index
    %3 = vector.load %arg4[%c0_5, %c0_6] : memref<1x128xf32, #tpu.memory_space<vmem>>, vector<1x128xf32>
    %c0_7 = arith.constant 0 : index
    %c0_8 = arith.constant 0 : index
    %4 = vector.load %arg5[%c0_7, %c0_8] : memref<32x90xf32, #tpu.memory_space<vmem>>, vector<32x90xf32>
    %c0_9 = arith.constant 0 : index
    %c0_10 = arith.constant 0 : index
    %5 = vector.load %arg6[%c0_9, %c0_10] : memref<1x90xf32, #tpu.memory_space<vmem>>, vector<1x90xf32>
    %c0_11 = arith.constant 0 : index
    %c0_12 = arith.constant 0 : index
    %6 = vector.load %arg7[%c0_11, %c0_12] : memref<20x8xf32, #tpu.memory_space<vmem>>, vector<20x8xf32>
    %c0_13 = arith.constant 0 : index
    %c0_14 = arith.constant 0 : index
    %7 = vector.load %arg8[%c0_13, %c0_14] : memref<20x128xf32, #tpu.memory_space<vmem>>, vector<20x128xf32>
    %8 = vector.shape_cast %7 : vector<20x128xf32> to vector<1x20x128xf32>
    %9 = vector.shape_cast %8 : vector<1x20x128xf32> to vector<1x20x128xf32>
    %10 = vector.broadcast %9 : vector<1x20x128xf32> to vector<2x20x128xf32>
    %11 = arith.mulf %7, %7 : vector<20x128xf32>
    %cst = arith.constant dense<0.000000e+00> : vector<128xf32>
    %12 = vector.multi_reduction <add>, %11, %cst [0] : vector<20x128xf32> to vector<128xf32>
    %13 = vector.shape_cast %12 : vector<128xf32> to vector<1x128xf32>
    %14 = vector.shape_cast %13 : vector<1x128xf32> to vector<1x128xf32>
    %15 = vector.broadcast %14 : vector<1x128xf32> to vector<2x128xf32>
    %cst_15 = arith.constant 0.000000e+00 : f32
    %16 = vector.broadcast %cst_15 : f32 to vector<2x32xf32>
    %cst_16 = arith.constant 0.000000e+00 : f32
    %17 = vector.broadcast %cst_16 : f32 to vector<2x32xf32>
    %cst_17 = arith.constant 0.000000e+00 : f32
    %18 = vector.broadcast %cst_17 : f32 to vector<2x20xf32>
    %c0_18 = arith.constant 0 : index
    %c0_19 = arith.constant 0 : index
    %c0_20 = arith.constant 0 : index
    %19 = vector.load %arg0[%c0_18, %c0_19, %c0_20] : memref<2x8x8xf32, #tpu.memory_space<vmem>>, vector<2x1x8xf32>
    %20 = vector.shape_cast %19 : vector<2x1x8xf32> to vector<2x8xf32>
    %cst_21 = arith.constant dense<0.000000e+00> : vector<2x128xf32>
    %21 = tpu.matmul %20, %0, %cst_21 {dimension_numbers = #tpu.dot_dimension_numbers<[1], [0], [0], [1], [0, 0, 1, 1], [], []>} : vector<2x8xf32>, vector<8x128xf32>, vector<2x128xf32> -> vector<2x128xf32>
    %cst_22 = arith.constant dense<0.000000e+00> : vector<2x128xf32>
    %22 = tpu.matmul %18, %1, %cst_22 {dimension_numbers = #tpu.dot_dimension_numbers<[1], [0], [0], [1], [0, 0, 1, 1], [], []>} : vector<2x20xf32>, vector<20x128xf32>, vector<2x128xf32> -> vector<2x128xf32>
    %23 = arith.addf %21, %22 : vector<2x128xf32>
    %cst_23 = arith.constant dense<0.000000e+00> : vector<2x128xf32>
    %24 = tpu.matmul %16, %2, %cst_23 {dimension_numbers = #tpu.dot_dimension_numbers<[1], [0], [0], [1], [0, 0, 1, 1], [], []>} : vector<2x32xf32>, vector<32x128xf32>, vector<2x128xf32> -> vector<2x128xf32>
    %25 = arith.addf %23, %24 : vector<2x128xf32>
    %26 = vector.broadcast %3 : vector<1x128xf32> to vector<2x128xf32>
    %27 = arith.addf %25, %26 : vector<2x128xf32>
    %28 = vector.extract_strided_slice %27 {offsets = [0, 0], sizes = [2, 96], strides = [1, 1]} : vector<2x128xf32> to vector<2x96xf32>
    %29 = arith.negf %28 : vector<2x96xf32>
    %30 = math.exp %29 : vector<2x96xf32>
    %cst_24 = arith.constant 1.000000e+00 : f32
    %31 = vector.broadcast %cst_24 : f32 to vector<2x96xf32>
    %32 = arith.addf %31, %30 : vector<2x96xf32>
    %33 = arith.divf %31, %32 : vector<2x96xf32>
    %34 = vector.extract_strided_slice %27 {offsets = [0, 96], sizes = [2, 32], strides = [1, 1]} : vector<2x128xf32> to vector<2x32xf32>
    %35 = math.tanh %34 : vector<2x32xf32>
    %36 = vector.extract_strided_slice %33 {offsets = [0, 0], sizes = [2, 32], strides = [1, 1]} : vector<2x96xf32> to vector<2x32xf32>
    %37 = vector.extract_strided_slice %33 {offsets = [0, 32], sizes = [2, 32], strides = [1, 1]} : vector<2x96xf32> to vector<2x32xf32>
    %38 = vector.extract_strided_slice %33 {offsets = [0, 64], sizes = [2, 32], strides = [1, 1]} : vector<2x96xf32> to vector<2x32xf32>
    %39 = arith.mulf %37, %17 : vector<2x32xf32>
    %40 = arith.mulf %36, %35 : vector<2x32xf32>
    %41 = arith.addf %39, %40 : vector<2x32xf32>
    %42 = math.tanh %41 : vector<2x32xf32>
    %43 = arith.mulf %38, %42 : vector<2x32xf32>
    %cst_25 = arith.constant dense<0.000000e+00> : vector<2x90xf32>
    %44 = tpu.matmul %43, %4, %cst_25 {dimension_numbers = #tpu.dot_dimension_numbers<[1], [0], [0], [1], [0, 0, 1, 1], [], []>} : vector<2x32xf32>, vector<32x90xf32>, vector<2x90xf32> -> vector<2x90xf32>
    %45 = vector.broadcast %5 : vector<1x90xf32> to vector<2x90xf32>
    %46 = arith.addf %44, %45 : vector<2x90xf32>
    %47 = vector.extract_strided_slice %46 {offsets = [0, 0], sizes = [2, 60], strides = [1, 1]} : vector<2x90xf32> to vector<2x60xf32>
    %48 = math.tanh %47 : vector<2x60xf32>
    %49 = vector.extract_strided_slice %48 {offsets = [0, 0], sizes = [2, 20], strides = [1, 1]} : vector<2x60xf32> to vector<2x20xf32>
    %50 = vector.extract_strided_slice %48 {offsets = [0, 20], sizes = [2, 20], strides = [1, 1]} : vector<2x60xf32> to vector<2x20xf32>
    %51 = vector.extract_strided_slice %48 {offsets = [0, 40], sizes = [2, 20], strides = [1, 1]} : vector<2x60xf32> to vector<2x20xf32>
    %52 = vector.extract_strided_slice %46 {offsets = [0, 60], sizes = [2, 20], strides = [1, 1]} : vector<2x90xf32> to vector<2x20xf32>
    %53 = arith.negf %52 : vector<2x20xf32>
    %54 = math.exp %53 : vector<2x20xf32>
    %cst_26 = arith.constant 1.000000e+00 : f32
    %55 = vector.broadcast %cst_26 : f32 to vector<2x20xf32>
    %56 = arith.addf %55, %54 : vector<2x20xf32>
    %57 = arith.divf %55, %56 : vector<2x20xf32>
    %58 = vector.extract_strided_slice %46 {offsets = [0, 80], sizes = [2, 2], strides = [1, 1]} : vector<2x90xf32> to vector<2x2xf32>
    %cst_27 = arith.constant 0.000000e+00 : f32
    %59 = vector.broadcast %cst_27 : f32 to vector<2x2xf32>
    %60 = arith.maximumf %58, %59 : vector<2x2xf32>
    %61 = vector.broadcast %cst_27 : f32 to vector<2x2xf32>
    %62 = arith.subf %58, %61 : vector<2x2xf32>
    %63 = arith.cmpf one, %62, %62 : vector<2x2xf32>
    %64 = vector.broadcast %cst_27 : f32 to vector<2x2xf32>
    %65 = arith.addf %58, %64 : vector<2x2xf32>
    %66 = math.absf %62 : vector<2x2xf32>
    %cst_28 = arith.constant 0.000000e+00 : f32
    %67 = vector.broadcast %cst_28 : f32 to vector<2x2xf32>
    %68 = arith.subf %67, %66 : vector<2x2xf32>
    %69 = math.exp %68 : vector<2x2xf32>
    %70 = math.log1p %69 : vector<2x2xf32>
    %71 = arith.addf %60, %70 : vector<2x2xf32>
    %72 = arith.select %63, %65, %71 : vector<2x2xi1>, vector<2x2xf32>
    %73 = vector.extract_strided_slice %72 {offsets = [0, 0], sizes = [2, 1], strides = [1, 1]} : vector<2x2xf32> to vector<2x1xf32>
    %74 = vector.extract_strided_slice %72 {offsets = [0, 1], sizes = [2, 1], strides = [1, 1]} : vector<2x2xf32> to vector<2x1xf32>
    %75 = vector.extract_strided_slice %46 {offsets = [0, 82], sizes = [2, 8], strides = [1, 1]} : vector<2x90xf32> to vector<2x8xf32>
    %76 = vector.shape_cast %49 : vector<2x20xf32> to vector<2x1x20xf32>
    "tpu.trace_start"() <{level = 10 : i32, message = "bqm,bmn->bqn"}> : () -> ()
    %cst_29 = arith.constant dense<0.000000e+00> : vector<2x1x128xf32>
    %77 = tpu.matmul %76, %10, %cst_29 {dimension_numbers = #tpu.dot_dimension_numbers<[2], [1], [1], [2], [0, 0, 0, 1, 1, 2], [0], [0]>} : vector<2x1x20xf32>, vector<2x20x128xf32>, vector<2x1x128xf32> -> vector<2x1x128xf32>
    "tpu.trace_stop"() : () -> ()
    %78 = vector.shape_cast %77 : vector<2x1x128xf32> to vector<2x128xf32>
    %79 = arith.mulf %49, %49 : vector<2x20xf32>
    %cst_30 = arith.constant dense<0.000000e+00> : vector<2xf32>
    %80 = vector.multi_reduction <add>, %79, %cst_30 [1] : vector<2x20xf32> to vector<2xf32>
    %81 = vector.shape_cast %80 : vector<2xf32> to vector<2x1xf32>
    %82 = vector.broadcast %81 : vector<2x1xf32> to vector<2x128xf32>
    %83 = arith.mulf %15, %82 : vector<2x128xf32>
    %cst_31 = arith.constant 9.99999993E-9 : f32
    %84 = vector.broadcast %cst_31 : f32 to vector<2x128xf32>
    %85 = arith.addf %83, %84 : vector<2x128xf32>
    %86 = math.rsqrt %85 : vector<2x128xf32>
    %87 = arith.mulf %78, %86 : vector<2x128xf32>
    %88 = vector.broadcast %73 : vector<2x1xf32> to vector<2x128xf32>
    %89 = arith.mulf %88, %87 : vector<2x128xf32>
    %cst_32 = arith.constant dense<0xFF800000> : vector<2xf32>
    %90 = vector.multi_reduction <maximumf>, %89, %cst_32 [1] : vector<2x128xf32> to vector<2xf32>
    %91 = vector.shape_cast %90 : vector<2xf32> to vector<2x1xf32>
    %92 = vector.broadcast %91 : vector<2x1xf32> to vector<2x128xf32>
    %93 = arith.subf %89, %92 : vector<2x128xf32>
    %94 = math.exp %93 : vector<2x128xf32>
    %cst_33 = arith.constant dense<0.000000e+00> : vector<2xf32>
    %95 = vector.multi_reduction <add>, %94, %cst_33 [1] : vector<2x128xf32> to vector<2xf32>
    %96 = vector.shape_cast %95 : vector<2xf32> to vector<2x1xf32>
    %97 = vector.broadcast %96 : vector<2x1xf32> to vector<2x128xf32>
    %98 = arith.divf %94, %97 : vector<2x128xf32>
    %99 = vector.shape_cast %98 : vector<2x128xf32> to vector<2x1x128xf32>
    %100 = vector.shape_cast %57 : vector<2x20xf32> to vector<2x20x1xf32>
    %101 = vector.broadcast %100 : vector<2x20x1xf32> to vector<2x20x128xf32>
    %102 = vector.broadcast %99 : vector<2x1x128xf32> to vector<2x20x128xf32>
    %103 = arith.mulf %101, %102 : vector<2x20x128xf32>
    %cst_34 = arith.constant 1.000000e+00 : f32
    %104 = vector.broadcast %cst_34 : f32 to vector<2x20x128xf32>
    %105 = arith.subf %104, %103 : vector<2x20x128xf32>
    %106 = arith.mulf %10, %105 : vector<2x20x128xf32>
    %107 = vector.shape_cast %50 : vector<2x20xf32> to vector<2x20x1xf32>
    %108 = vector.broadcast %107 : vector<2x20x1xf32> to vector<2x20x128xf32>
    %109 = vector.broadcast %99 : vector<2x1x128xf32> to vector<2x20x128xf32>
    %110 = arith.mulf %108, %109 : vector<2x20x128xf32>
    %111 = arith.addf %106, %110 : vector<2x20x128xf32>
    %112 = arith.mulf %111, %111 : vector<2x20x128xf32>
    %cst_35 = arith.constant dense<0.000000e+00> : vector<2x128xf32>
    %113 = vector.multi_reduction <add>, %112, %cst_35 [1] : vector<2x20x128xf32> to vector<2x128xf32>
    %114 = vector.shape_cast %51 : vector<2x20xf32> to vector<2x1x20xf32>
    "tpu.trace_start"() <{level = 10 : i32, message = "bqm,bmn->bqn"}> : () -> ()
    %cst_36 = arith.constant dense<0.000000e+00> : vector<2x1x128xf32>
    %115 = tpu.matmul %114, %111, %cst_36 {dimension_numbers = #tpu.dot_dimension_numbers<[2], [1], [1], [2], [0, 0, 0, 1, 1, 2], [0], [0]>} : vector<2x1x20xf32>, vector<2x20x128xf32>, vector<2x1x128xf32> -> vector<2x1x128xf32>
    "tpu.trace_stop"() : () -> ()
    %116 = vector.shape_cast %115 : vector<2x1x128xf32> to vector<2x128xf32>
    %117 = arith.mulf %51, %51 : vector<2x20xf32>
    %cst_37 = arith.constant dense<0.000000e+00> : vector<2xf32>
    %118 = vector.multi_reduction <add>, %117, %cst_37 [1] : vector<2x20xf32> to vector<2xf32>
    %119 = vector.shape_cast %118 : vector<2xf32> to vector<2x1xf32>
    %120 = vector.broadcast %119 : vector<2x1xf32> to vector<2x128xf32>
    %121 = arith.mulf %113, %120 : vector<2x128xf32>
    %cst_38 = arith.constant 9.99999993E-9 : f32
    %122 = vector.broadcast %cst_38 : f32 to vector<2x128xf32>
    %123 = arith.addf %121, %122 : vector<2x128xf32>
    %124 = math.rsqrt %123 : vector<2x128xf32>
    %125 = arith.mulf %116, %124 : vector<2x128xf32>
    %126 = vector.broadcast %74 : vector<2x1xf32> to vector<2x128xf32>
    %127 = arith.mulf %126, %125 : vector<2x128xf32>
    %cst_39 = arith.constant dense<0xFF800000> : vector<2xf32>
    %128 = vector.multi_reduction <maximumf>, %127, %cst_39 [1] : vector<2x128xf32> to vector<2xf32>
    %129 = vector.shape_cast %128 : vector<2xf32> to vector<2x1xf32>
    %130 = vector.broadcast %129 : vector<2x1xf32> to vector<2x128xf32>
    %131 = arith.subf %127, %130 : vector<2x128xf32>
    %132 = math.exp %131 : vector<2x128xf32>
    %cst_40 = arith.constant dense<0.000000e+00> : vector<2xf32>
    %133 = vector.multi_reduction <add>, %132, %cst_40 [1] : vector<2x128xf32> to vector<2xf32>
    %134 = vector.shape_cast %133 : vector<2xf32> to vector<2x1xf32>
    %135 = vector.broadcast %134 : vector<2x1xf32> to vector<2x128xf32>
    %136 = arith.divf %132, %135 : vector<2x128xf32>
    %137 = vector.shape_cast %136 : vector<2x128xf32> to vector<2x1x128xf32>
    "tpu.trace_start"() <{level = 10 : i32, message = "bqn,bmn->bqm"}> : () -> ()
    %cst_41 = arith.constant dense<0.000000e+00> : vector<2x1x20xf32>
    %138 = tpu.matmul %137, %111, %cst_41 {dimension_numbers = #tpu.dot_dimension_numbers<[2], [2], [1], [1], [0, 0, 0, 1, 1, 1], [0], [0]>} : vector<2x1x128xf32>, vector<2x20x128xf32>, vector<2x1x20xf32> -> vector<2x1x20xf32>
    "tpu.trace_stop"() : () -> ()
    %139 = vector.shape_cast %138 : vector<2x1x20xf32> to vector<2x20xf32>
    %cst_42 = arith.constant dense<0.000000e+00> : vector<2x8xf32>
    %140 = tpu.matmul %139, %6, %cst_42 {dimension_numbers = #tpu.dot_dimension_numbers<[1], [0], [0], [1], [0, 0, 1, 1], [], []>} : vector<2x20xf32>, vector<20x8xf32>, vector<2x8xf32> -> vector<2x8xf32>
    %141 = arith.addf %75, %140 : vector<2x8xf32>
    %c0_43 = arith.constant 0 : index
    %c1 = arith.constant 1 : index
    %c0_44 = arith.constant 0 : index
    %142 = vector.load %arg0[%c0_43, %c1, %c0_44] : memref<2x8x8xf32, #tpu.memory_space<vmem>>, vector<2x1x8xf32>
    %143 = vector.shape_cast %142 : vector<2x1x8xf32> to vector<2x8xf32>
    %cst_45 = arith.constant dense<0.000000e+00> : vector<2x128xf32>
    %144 = tpu.matmul %143, %0, %cst_45 {dimension_numbers = #tpu.dot_dimension_numbers<[1], [0], [0], [1], [0, 0, 1, 1], [], []>} : vector<2x8xf32>, vector<8x128xf32>, vector<2x128xf32> -> vector<2x128xf32>
    %cst_46 = arith.constant dense<0.000000e+00> : vector<2x128xf32>
    %145 = tpu.matmul %139, %1, %cst_46 {dimension_numbers = #tpu.dot_dimension_numbers<[1], [0], [0], [1], [0, 0, 1, 1], [], []>} : vector<2x20xf32>, vector<20x128xf32>, vector<2x128xf32> -> vector<2x128xf32>
    %146 = arith.addf %144, %145 : vector<2x128xf32>
    %cst_47 = arith.constant dense<0.000000e+00> : vector<2x128xf32>
    %147 = tpu.matmul %43, %2, %cst_47 {dimension_numbers = #tpu.dot_dimension_numbers<[1], [0], [0], [1], [0, 0, 1, 1], [], []>} : vector<2x32xf32>, vector<32x128xf32>, vector<2x128xf32> -> vector<2x128xf32>
    %148 = arith.addf %146, %147 : vector<2x128xf32>
    %149 = vector.broadcast %3 : vector<1x128xf32> to vector<2x128xf32>
    %150 = arith.addf %148, %149 : vector<2x128xf32>
    %151 = vector.extract_strided_slice %150 {offsets = [0, 0], sizes = [2, 96], strides = [1, 1]} : vector<2x128xf32> to vector<2x96xf32>
    %152 = arith.negf %151 : vector<2x96xf32>
    %153 = math.exp %152 : vector<2x96xf32>
    %cst_48 = arith.constant 1.000000e+00 : f32
    %154 = vector.broadcast %cst_48 : f32 to vector<2x96xf32>
    %155 = arith.addf %154, %153 : vector<2x96xf32>
    %156 = arith.divf %154, %155 : vector<2x96xf32>
    %157 = vector.extract_strided_slice %150 {offsets = [0, 96], sizes = [2, 32], strides = [1, 1]} : vector<2x128xf32> to vector<2x32xf32>
    %158 = math.tanh %157 : vector<2x32xf32>
    %159 = vector.extract_strided_slice %156 {offsets = [0, 0], sizes = [2, 32], strides = [1, 1]} : vector<2x96xf32> to vector<2x32xf32>
    %160 = vector.extract_strided_slice %156 {offsets = [0, 32], sizes = [2, 32], strides = [1, 1]} : vector<2x96xf32> to vector<2x32xf32>
    %161 = vector.extract_strided_slice %156 {offsets = [0, 64], sizes = [2, 32], strides = [1, 1]} : vector<2x96xf32> to vector<2x32xf32>
    %162 = arith.mulf %160, %41 : vector<2x32xf32>
    %163 = arith.mulf %159, %158 : vector<2x32xf32>
    %164 = arith.addf %162, %163 : vector<2x32xf32>
    %165 = math.tanh %164 : vector<2x32xf32>
    %166 = arith.mulf %161, %165 : vector<2x32xf32>
    %cst_49 = arith.constant dense<0.000000e+00> : vector<2x90xf32>
    %167 = tpu.matmul %166, %4, %cst_49 {dimension_numbers = #tpu.dot_dimension_numbers<[1], [0], [0], [1], [0, 0, 1, 1], [], []>} : vector<2x32xf32>, vector<32x90xf32>, vector<2x90xf32> -> vector<2x90xf32>
    %168 = vector.broadcast %5 : vector<1x90xf32> to vector<2x90xf32>
    %169 = arith.addf %167, %168 : vector<2x90xf32>
    %170 = vector.extract_strided_slice %169 {offsets = [0, 0], sizes = [2, 60], strides = [1, 1]} : vector<2x90xf32> to vector<2x60xf32>
    %171 = math.tanh %170 : vector<2x60xf32>
    %172 = vector.extract_strided_slice %171 {offsets = [0, 0], sizes = [2, 20], strides = [1, 1]} : vector<2x60xf32> to vector<2x20xf32>
    %173 = vector.extract_strided_slice %171 {offsets = [0, 20], sizes = [2, 20], strides = [1, 1]} : vector<2x60xf32> to vector<2x20xf32>
    %174 = vector.extract_strided_slice %171 {offsets = [0, 40], sizes = [2, 20], strides = [1, 1]} : vector<2x60xf32> to vector<2x20xf32>
    %175 = vector.extract_strided_slice %169 {offsets = [0, 60], sizes = [2, 20], strides = [1, 1]} : vector<2x90xf32> to vector<2x20xf32>
    %176 = arith.negf %175 : vector<2x20xf32>
    %177 = math.exp %176 : vector<2x20xf32>
    %cst_50 = arith.constant 1.000000e+00 : f32
    %178 = vector.broadcast %cst_50 : f32 to vector<2x20xf32>
    %179 = arith.addf %178, %177 : vector<2x20xf32>
    %180 = arith.divf %178, %179 : vector<2x20xf32>
    %181 = vector.extract_strided_slice %169 {offsets = [0, 80], sizes = [2, 2], strides = [1, 1]} : vector<2x90xf32> to vector<2x2xf32>
    %cst_51 = arith.constant 0.000000e+00 : f32
    %182 = vector.broadcast %cst_51 : f32 to vector<2x2xf32>
    %183 = arith.maximumf %181, %182 : vector<2x2xf32>
    %184 = vector.broadcast %cst_51 : f32 to vector<2x2xf32>
    %185 = arith.subf %181, %184 : vector<2x2xf32>
    %186 = arith.cmpf one, %185, %185 : vector<2x2xf32>
    %187 = vector.broadcast %cst_51 : f32 to vector<2x2xf32>
    %188 = arith.addf %181, %187 : vector<2x2xf32>
    %189 = math.absf %185 : vector<2x2xf32>
    %cst_52 = arith.constant 0.000000e+00 : f32
    %190 = vector.broadcast %cst_52 : f32 to vector<2x2xf32>
    %191 = arith.subf %190, %189 : vector<2x2xf32>
    %192 = math.exp %191 : vector<2x2xf32>
    %193 = math.log1p %192 : vector<2x2xf32>
    %194 = arith.addf %183, %193 : vector<2x2xf32>
    %195 = arith.select %186, %188, %194 : vector<2x2xi1>, vector<2x2xf32>
    %196 = vector.extract_strided_slice %195 {offsets = [0, 0], sizes = [2, 1], strides = [1, 1]} : vector<2x2xf32> to vector<2x1xf32>
    %197 = vector.extract_strided_slice %195 {offsets = [0, 1], sizes = [2, 1], strides = [1, 1]} : vector<2x2xf32> to vector<2x1xf32>
    %198 = vector.extract_strided_slice %169 {offsets = [0, 82], sizes = [2, 8], strides = [1, 1]} : vector<2x90xf32> to vector<2x8xf32>
    %199 = vector.shape_cast %172 : vector<2x20xf32> to vector<2x1x20xf32>
    "tpu.trace_start"() <{level = 10 : i32, message = "bqm,bmn->bqn"}> : () -> ()
    %cst_53 = arith.constant dense<0.000000e+00> : vector<2x1x128xf32>
    %200 = tpu.matmul %199, %111, %cst_53 {dimension_numbers = #tpu.dot_dimension_numbers<[2], [1], [1], [2], [0, 0, 0, 1, 1, 2], [0], [0]>} : vector<2x1x20xf32>, vector<2x20x128xf32>, vector<2x1x128xf32> -> vector<2x1x128xf32>
    "tpu.trace_stop"() : () -> ()
    %201 = vector.shape_cast %200 : vector<2x1x128xf32> to vector<2x128xf32>
    %202 = arith.mulf %172, %172 : vector<2x20xf32>
    %cst_54 = arith.constant dense<0.000000e+00> : vector<2xf32>
    %203 = vector.multi_reduction <add>, %202, %cst_54 [1] : vector<2x20xf32> to vector<2xf32>
    %204 = vector.shape_cast %203 : vector<2xf32> to vector<2x1xf32>
    %205 = vector.broadcast %204 : vector<2x1xf32> to vector<2x128xf32>
    %206 = arith.mulf %113, %205 : vector<2x128xf32>
    %cst_55 = arith.constant 9.99999993E-9 : f32
    %207 = vector.broadcast %cst_55 : f32 to vector<2x128xf32>
    %208 = arith.addf %206, %207 : vector<2x128xf32>
    %209 = math.rsqrt %208 : vector<2x128xf32>
    %210 = arith.mulf %201, %209 : vector<2x128xf32>
    %211 = vector.broadcast %196 : vector<2x1xf32> to vector<2x128xf32>
    %212 = arith.mulf %211, %210 : vector<2x128xf32>
    %cst_56 = arith.constant dense<0xFF800000> : vector<2xf32>
    %213 = vector.multi_reduction <maximumf>, %212, %cst_56 [1] : vector<2x128xf32> to vector<2xf32>
    %214 = vector.shape_cast %213 : vector<2xf32> to vector<2x1xf32>
    %215 = vector.broadcast %214 : vector<2x1xf32> to vector<2x128xf32>
    %216 = arith.subf %212, %215 : vector<2x128xf32>
    %217 = math.exp %216 : vector<2x128xf32>
    %cst_57 = arith.constant dense<0.000000e+00> : vector<2xf32>
    %218 = vector.multi_reduction <add>, %217, %cst_57 [1] : vector<2x128xf32> to vector<2xf32>
    %219 = vector.shape_cast %218 : vector<2xf32> to vector<2x1xf32>
    %220 = vector.broadcast %219 : vector<2x1xf32> to vector<2x128xf32>
    %221 = arith.divf %217, %220 : vector<2x128xf32>
    %222 = vector.shape_cast %221 : vector<2x128xf32> to vector<2x1x128xf32>
    %223 = vector.shape_cast %180 : vector<2x20xf32> to vector<2x20x1xf32>
    %224 = vector.broadcast %223 : vector<2x20x1xf32> to vector<2x20x128xf32>
    %225 = vector.broadcast %222 : vector<2x1x128xf32> to vector<2x20x128xf32>
    %226 = arith.mulf %224, %225 : vector<2x20x128xf32>
    %cst_58 = arith.constant 1.000000e+00 : f32
    %227 = vector.broadcast %cst_58 : f32 to vector<2x20x128xf32>
    %228 = arith.subf %227, %226 : vector<2x20x128xf32>
    %229 = arith.mulf %111, %228 : vector<2x20x128xf32>
    %230 = vector.shape_cast %173 : vector<2x20xf32> to vector<2x20x1xf32>
    %231 = vector.broadcast %230 : vector<2x20x1xf32> to vector<2x20x128xf32>
    %232 = vector.broadcast %222 : vector<2x1x128xf32> to vector<2x20x128xf32>
    %233 = arith.mulf %231, %232 : vector<2x20x128xf32>
    %234 = arith.addf %229, %233 : vector<2x20x128xf32>
    %235 = arith.mulf %234, %234 : vector<2x20x128xf32>
    %cst_59 = arith.constant dense<0.000000e+00> : vector<2x128xf32>
    %236 = vector.multi_reduction <add>, %235, %cst_59 [1] : vector<2x20x128xf32> to vector<2x128xf32>
    %237 = vector.shape_cast %174 : vector<2x20xf32> to vector<2x1x20xf32>
    "tpu.trace_start"() <{level = 10 : i32, message = "bqm,bmn->bqn"}> : () -> ()
    %cst_60 = arith.constant dense<0.000000e+00> : vector<2x1x128xf32>
    %238 = tpu.matmul %237, %234, %cst_60 {dimension_numbers = #tpu.dot_dimension_numbers<[2], [1], [1], [2], [0, 0, 0, 1, 1, 2], [0], [0]>} : vector<2x1x20xf32>, vector<2x20x128xf32>, vector<2x1x128xf32> -> vector<2x1x128xf32>
    "tpu.trace_stop"() : () -> ()
    %239 = vector.shape_cast %238 : vector<2x1x128xf32> to vector<2x128xf32>
    %240 = arith.mulf %174, %174 : vector<2x20xf32>
    %cst_61 = arith.constant dense<0.000000e+00> : vector<2xf32>
    %241 = vector.multi_reduction <add>, %240, %cst_61 [1] : vector<2x20xf32> to vector<2xf32>
    %242 = vector.shape_cast %241 : vector<2xf32> to vector<2x1xf32>
    %243 = vector.broadcast %242 : vector<2x1xf32> to vector<2x128xf32>
    %244 = arith.mulf %236, %243 : vector<2x128xf32>
    %cst_62 = arith.constant 9.99999993E-9 : f32
    %245 = vector.broadcast %cst_62 : f32 to vector<2x128xf32>
    %246 = arith.addf %244, %245 : vector<2x128xf32>
    %247 = math.rsqrt %246 : vector<2x128xf32>
    %248 = arith.mulf %239, %247 : vector<2x128xf32>
    %249 = vector.broadcast %197 : vector<2x1xf32> to vector<2x128xf32>
    %250 = arith.mulf %249, %248 : vector<2x128xf32>
    %cst_63 = arith.constant dense<0xFF800000> : vector<2xf32>
    %251 = vector.multi_reduction <maximumf>, %250, %cst_63 [1] : vector<2x128xf32> to vector<2xf32>
    %252 = vector.shape_cast %251 : vector<2xf32> to vector<2x1xf32>
    %253 = vector.broadcast %252 : vector<2x1xf32> to vector<2x128xf32>
    %254 = arith.subf %250, %253 : vector<2x128xf32>
    %255 = math.exp %254 : vector<2x128xf32>
    %cst_64 = arith.constant dense<0.000000e+00> : vector<2xf32>
    %256 = vector.multi_reduction <add>, %255, %cst_64 [1] : vector<2x128xf32> to vector<2xf32>
    %257 = vector.shape_cast %256 : vector<2xf32> to vector<2x1xf32>
    %258 = vector.broadcast %257 : vector<2x1xf32> to vector<2x128xf32>
    %259 = arith.divf %255, %258 : vector<2x128xf32>
    %260 = vector.shape_cast %259 : vector<2x128xf32> to vector<2x1x128xf32>
    "tpu.trace_start"() <{level = 10 : i32, message = "bqn,bmn->bqm"}> : () -> ()
    %cst_65 = arith.constant dense<0.000000e+00> : vector<2x1x20xf32>
    %261 = tpu.matmul %260, %234, %cst_65 {dimension_numbers = #tpu.dot_dimension_numbers<[2], [2], [1], [1], [0, 0, 0, 1, 1, 1], [0], [0]>} : vector<2x1x128xf32>, vector<2x20x128xf32>, vector<2x1x20xf32> -> vector<2x1x20xf32>
    "tpu.trace_stop"() : () -> ()
    %262 = vector.shape_cast %261 : vector<2x1x20xf32> to vector<2x20xf32>
    %cst_66 = arith.constant dense<0.000000e+00> : vector<2x8xf32>
    %263 = tpu.matmul %262, %6, %cst_66 {dimension_numbers = #tpu.dot_dimension_numbers<[1], [0], [0], [1], [0, 0, 1, 1], [], []>} : vector<2x20xf32>, vector<20x8xf32>, vector<2x8xf32> -> vector<2x8xf32>
    %264 = arith.addf %198, %263 : vector<2x8xf32>
    %c0_67 = arith.constant 0 : index
    %c2 = arith.constant 2 : index
    %c0_68 = arith.constant 0 : index
    %265 = vector.load %arg0[%c0_67, %c2, %c0_68] : memref<2x8x8xf32, #tpu.memory_space<vmem>>, vector<2x1x8xf32>
    %266 = vector.shape_cast %265 : vector<2x1x8xf32> to vector<2x8xf32>
    %cst_69 = arith.constant dense<0.000000e+00> : vector<2x128xf32>
    %267 = tpu.matmul %266, %0, %cst_69 {dimension_numbers = #tpu.dot_dimension_numbers<[1], [0], [0], [1], [0, 0, 1, 1], [], []>} : vector<2x8xf32>, vector<8x128xf32>, vector<2x128xf32> -> vector<2x128xf32>
    %cst_70 = arith.constant dense<0.000000e+00> : vector<2x128xf32>
    %268 = tpu.matmul %262, %1, %cst_70 {dimension_numbers = #tpu.dot_dimension_numbers<[1], [0], [0], [1], [0, 0, 1, 1], [], []>} : vector<2x20xf32>, vector<20x128xf32>, vector<2x128xf32> -> vector<2x128xf32>
    %269 = arith.addf %267, %268 : vector<2x128xf32>
    %cst_71 = arith.constant dense<0.000000e+00> : vector<2x128xf32>
    %270 = tpu.matmul %166, %2, %cst_71 {dimension_numbers = #tpu.dot_dimension_numbers<[1], [0], [0], [1], [0, 0, 1, 1], [], []>} : vector<2x32xf32>, vector<32x128xf32>, vector<2x128xf32> -> vector<2x128xf32>
    %271 = arith.addf %269, %270 : vector<2x128xf32>
    %272 = vector.broadcast %3 : vector<1x128xf32> to vector<2x128xf32>
    %273 = arith.addf %271, %272 : vector<2x128xf32>
    %274 = vector.extract_strided_slice %273 {offsets = [0, 0], sizes = [2, 96], strides = [1, 1]} : vector<2x128xf32> to vector<2x96xf32>
    %275 = arith.negf %274 : vector<2x96xf32>
    %276 = math.exp %275 : vector<2x96xf32>
    %cst_72 = arith.constant 1.000000e+00 : f32
    %277 = vector.broadcast %cst_72 : f32 to vector<2x96xf32>
    %278 = arith.addf %277, %276 : vector<2x96xf32>
    %279 = arith.divf %277, %278 : vector<2x96xf32>
    %280 = vector.extract_strided_slice %273 {offsets = [0, 96], sizes = [2, 32], strides = [1, 1]} : vector<2x128xf32> to vector<2x32xf32>
    %281 = math.tanh %280 : vector<2x32xf32>
    %282 = vector.extract_strided_slice %279 {offsets = [0, 0], sizes = [2, 32], strides = [1, 1]} : vector<2x96xf32> to vector<2x32xf32>
    %283 = vector.extract_strided_slice %279 {offsets = [0, 32], sizes = [2, 32], strides = [1, 1]} : vector<2x96xf32> to vector<2x32xf32>
    %284 = vector.extract_strided_slice %279 {offsets = [0, 64], sizes = [2, 32], strides = [1, 1]} : vector<2x96xf32> to vector<2x32xf32>
    %285 = arith.mulf %283, %164 : vector<2x32xf32>
    %286 = arith.mulf %282, %281 : vector<2x32xf32>
    %287 = arith.addf %285, %286 : vector<2x32xf32>
    %288 = math.tanh %287 : vector<2x32xf32>
    %289 = arith.mulf %284, %288 : vector<2x32xf32>
    %cst_73 = arith.constant dense<0.000000e+00> : vector<2x90xf32>
    %290 = tpu.matmul %289, %4, %cst_73 {dimension_numbers = #tpu.dot_dimension_numbers<[1], [0], [0], [1], [0, 0, 1, 1], [], []>} : vector<2x32xf32>, vector<32x90xf32>, vector<2x90xf32> -> vector<2x90xf32>
    %291 = vector.broadcast %5 : vector<1x90xf32> to vector<2x90xf32>
    %292 = arith.addf %290, %291 : vector<2x90xf32>
    %293 = vector.extract_strided_slice %292 {offsets = [0, 0], sizes = [2, 60], strides = [1, 1]} : vector<2x90xf32> to vector<2x60xf32>
    %294 = math.tanh %293 : vector<2x60xf32>
    %295 = vector.extract_strided_slice %294 {offsets = [0, 0], sizes = [2, 20], strides = [1, 1]} : vector<2x60xf32> to vector<2x20xf32>
    %296 = vector.extract_strided_slice %294 {offsets = [0, 20], sizes = [2, 20], strides = [1, 1]} : vector<2x60xf32> to vector<2x20xf32>
    %297 = vector.extract_strided_slice %294 {offsets = [0, 40], sizes = [2, 20], strides = [1, 1]} : vector<2x60xf32> to vector<2x20xf32>
    %298 = vector.extract_strided_slice %292 {offsets = [0, 60], sizes = [2, 20], strides = [1, 1]} : vector<2x90xf32> to vector<2x20xf32>
    %299 = arith.negf %298 : vector<2x20xf32>
    %300 = math.exp %299 : vector<2x20xf32>
    %cst_74 = arith.constant 1.000000e+00 : f32
    %301 = vector.broadcast %cst_74 : f32 to vector<2x20xf32>
    %302 = arith.addf %301, %300 : vector<2x20xf32>
    %303 = arith.divf %301, %302 : vector<2x20xf32>
    %304 = vector.extract_strided_slice %292 {offsets = [0, 80], sizes = [2, 2], strides = [1, 1]} : vector<2x90xf32> to vector<2x2xf32>
    %cst_75 = arith.constant 0.000000e+00 : f32
    %305 = vector.broadcast %cst_75 : f32 to vector<2x2xf32>
    %306 = arith.maximumf %304, %305 : vector<2x2xf32>
    %307 = vector.broadcast %cst_75 : f32 to vector<2x2xf32>
    %308 = arith.subf %304, %307 : vector<2x2xf32>
    %309 = arith.cmpf one, %308, %308 : vector<2x2xf32>
    %310 = vector.broadcast %cst_75 : f32 to vector<2x2xf32>
    %311 = arith.addf %304, %310 : vector<2x2xf32>
    %312 = math.absf %308 : vector<2x2xf32>
    %cst_76 = arith.constant 0.000000e+00 : f32
    %313 = vector.broadcast %cst_76 : f32 to vector<2x2xf32>
    %314 = arith.subf %313, %312 : vector<2x2xf32>
    %315 = math.exp %314 : vector<2x2xf32>
    %316 = math.log1p %315 : vector<2x2xf32>
    %317 = arith.addf %306, %316 : vector<2x2xf32>
    %318 = arith.select %309, %311, %317 : vector<2x2xi1>, vector<2x2xf32>
    %319 = vector.extract_strided_slice %318 {offsets = [0, 0], sizes = [2, 1], strides = [1, 1]} : vector<2x2xf32> to vector<2x1xf32>
    %320 = vector.extract_strided_slice %318 {offsets = [0, 1], sizes = [2, 1], strides = [1, 1]} : vector<2x2xf32> to vector<2x1xf32>
    %321 = vector.extract_strided_slice %292 {offsets = [0, 82], sizes = [2, 8], strides = [1, 1]} : vector<2x90xf32> to vector<2x8xf32>
    %322 = vector.shape_cast %295 : vector<2x20xf32> to vector<2x1x20xf32>
    "tpu.trace_start"() <{level = 10 : i32, message = "bqm,bmn->bqn"}> : () -> ()
    %cst_77 = arith.constant dense<0.000000e+00> : vector<2x1x128xf32>
    %323 = tpu.matmul %322, %234, %cst_77 {dimension_numbers = #tpu.dot_dimension_numbers<[2], [1], [1], [2], [0, 0, 0, 1, 1, 2], [0], [0]>} : vector<2x1x20xf32>, vector<2x20x128xf32>, vector<2x1x128xf32> -> vector<2x1x128xf32>
    "tpu.trace_stop"() : () -> ()
    %324 = vector.shape_cast %323 : vector<2x1x128xf32> to vector<2x128xf32>
    %325 = arith.mulf %295, %295 : vector<2x20xf32>
    %cst_78 = arith.constant dense<0.000000e+00> : vector<2xf32>
    %326 = vector.multi_reduction <add>, %325, %cst_78 [1] : vector<2x20xf32> to vector<2xf32>
    %327 = vector.shape_cast %326 : vector<2xf32> to vector<2x1xf32>
    %328 = vector.broadcast %327 : vector<2x1xf32> to vector<2x128xf32>
    %329 = arith.mulf %236, %328 : vector<2x128xf32>
    %cst_79 = arith.constant 9.99999993E-9 : f32
    %330 = vector.broadcast %cst_79 : f32 to vector<2x128xf32>
    %331 = arith.addf %329, %330 : vector<2x128xf32>
    %332 = math.rsqrt %331 : vector<2x128xf32>
    %333 = arith.mulf %324, %332 : vector<2x128xf32>
    %334 = vector.broadcast %319 : vector<2x1xf32> to vector<2x128xf32>
    %335 = arith.mulf %334, %333 : vector<2x128xf32>
    %cst_80 = arith.constant dense<0xFF800000> : vector<2xf32>
    %336 = vector.multi_reduction <maximumf>, %335, %cst_80 [1] : vector<2x128xf32> to vector<2xf32>
    %337 = vector.shape_cast %336 : vector<2xf32> to vector<2x1xf32>
    %338 = vector.broadcast %337 : vector<2x1xf32> to vector<2x128xf32>
    %339 = arith.subf %335, %338 : vector<2x128xf32>
    %340 = math.exp %339 : vector<2x128xf32>
    %cst_81 = arith.constant dense<0.000000e+00> : vector<2xf32>
    %341 = vector.multi_reduction <add>, %340, %cst_81 [1] : vector<2x128xf32> to vector<2xf32>
    %342 = vector.shape_cast %341 : vector<2xf32> to vector<2x1xf32>
    %343 = vector.broadcast %342 : vector<2x1xf32> to vector<2x128xf32>
    %344 = arith.divf %340, %343 : vector<2x128xf32>
    %345 = vector.shape_cast %344 : vector<2x128xf32> to vector<2x1x128xf32>
    %346 = vector.shape_cast %303 : vector<2x20xf32> to vector<2x20x1xf32>
    %347 = vector.broadcast %346 : vector<2x20x1xf32> to vector<2x20x128xf32>
    %348 = vector.broadcast %345 : vector<2x1x128xf32> to vector<2x20x128xf32>
    %349 = arith.mulf %347, %348 : vector<2x20x128xf32>
    %cst_82 = arith.constant 1.000000e+00 : f32
    %350 = vector.broadcast %cst_82 : f32 to vector<2x20x128xf32>
    %351 = arith.subf %350, %349 : vector<2x20x128xf32>
    %352 = arith.mulf %234, %351 : vector<2x20x128xf32>
    %353 = vector.shape_cast %296 : vector<2x20xf32> to vector<2x20x1xf32>
    %354 = vector.broadcast %353 : vector<2x20x1xf32> to vector<2x20x128xf32>
    %355 = vector.broadcast %345 : vector<2x1x128xf32> to vector<2x20x128xf32>
    %356 = arith.mulf %354, %355 : vector<2x20x128xf32>
    %357 = arith.addf %352, %356 : vector<2x20x128xf32>
    %358 = arith.mulf %357, %357 : vector<2x20x128xf32>
    %cst_83 = arith.constant dense<0.000000e+00> : vector<2x128xf32>
    %359 = vector.multi_reduction <add>, %358, %cst_83 [1] : vector<2x20x128xf32> to vector<2x128xf32>
    %360 = vector.shape_cast %297 : vector<2x20xf32> to vector<2x1x20xf32>
    "tpu.trace_start"() <{level = 10 : i32, message = "bqm,bmn->bqn"}> : () -> ()
    %cst_84 = arith.constant dense<0.000000e+00> : vector<2x1x128xf32>
    %361 = tpu.matmul %360, %357, %cst_84 {dimension_numbers = #tpu.dot_dimension_numbers<[2], [1], [1], [2], [0, 0, 0, 1, 1, 2], [0], [0]>} : vector<2x1x20xf32>, vector<2x20x128xf32>, vector<2x1x128xf32> -> vector<2x1x128xf32>
    "tpu.trace_stop"() : () -> ()
    %362 = vector.shape_cast %361 : vector<2x1x128xf32> to vector<2x128xf32>
    %363 = arith.mulf %297, %297 : vector<2x20xf32>
    %cst_85 = arith.constant dense<0.000000e+00> : vector<2xf32>
    %364 = vector.multi_reduction <add>, %363, %cst_85 [1] : vector<2x20xf32> to vector<2xf32>
    %365 = vector.shape_cast %364 : vector<2xf32> to vector<2x1xf32>
    %366 = vector.broadcast %365 : vector<2x1xf32> to vector<2x128xf32>
    %367 = arith.mulf %359, %366 : vector<2x128xf32>
    %cst_86 = arith.constant 9.99999993E-9 : f32
    %368 = vector.broadcast %cst_86 : f32 to vector<2x128xf32>
    %369 = arith.addf %367, %368 : vector<2x128xf32>
    %370 = math.rsqrt %369 : vector<2x128xf32>
    %371 = arith.mulf %362, %370 : vector<2x128xf32>
    %372 = vector.broadcast %320 : vector<2x1xf32> to vector<2x128xf32>
    %373 = arith.mulf %372, %371 : vector<2x128xf32>
    %cst_87 = arith.constant dense<0xFF800000> : vector<2xf32>
    %374 = vector.multi_reduction <maximumf>, %373, %cst_87 [1] : vector<2x128xf32> to vector<2xf32>
    %375 = vector.shape_cast %374 : vector<2xf32> to vector<2x1xf32>
    %376 = vector.broadcast %375 : vector<2x1xf32> to vector<2x128xf32>
    %377 = arith.subf %373, %376 : vector<2x128xf32>
    %378 = math.exp %377 : vector<2x128xf32>
    %cst_88 = arith.constant dense<0.000000e+00> : vector<2xf32>
    %379 = vector.multi_reduction <add>, %378, %cst_88 [1] : vector<2x128xf32> to vector<2xf32>
    %380 = vector.shape_cast %379 : vector<2xf32> to vector<2x1xf32>
    %381 = vector.broadcast %380 : vector<2x1xf32> to vector<2x128xf32>
    %382 = arith.divf %378, %381 : vector<2x128xf32>
    %383 = vector.shape_cast %382 : vector<2x128xf32> to vector<2x1x128xf32>
    "tpu.trace_start"() <{level = 10 : i32, message = "bqn,bmn->bqm"}> : () -> ()
    %cst_89 = arith.constant dense<0.000000e+00> : vector<2x1x20xf32>
    %384 = tpu.matmul %383, %357, %cst_89 {dimension_numbers = #tpu.dot_dimension_numbers<[2], [2], [1], [1], [0, 0, 0, 1, 1, 1], [0], [0]>} : vector<2x1x128xf32>, vector<2x20x128xf32>, vector<2x1x20xf32> -> vector<2x1x20xf32>
    "tpu.trace_stop"() : () -> ()
    %385 = vector.shape_cast %384 : vector<2x1x20xf32> to vector<2x20xf32>
    %cst_90 = arith.constant dense<0.000000e+00> : vector<2x8xf32>
    %386 = tpu.matmul %385, %6, %cst_90 {dimension_numbers = #tpu.dot_dimension_numbers<[1], [0], [0], [1], [0, 0, 1, 1], [], []>} : vector<2x20xf32>, vector<20x8xf32>, vector<2x8xf32> -> vector<2x8xf32>
    %387 = arith.addf %321, %386 : vector<2x8xf32>
    %c0_91 = arith.constant 0 : index
    %c3 = arith.constant 3 : index
    %c0_92 = arith.constant 0 : index
    %388 = vector.load %arg0[%c0_91, %c3, %c0_92] : memref<2x8x8xf32, #tpu.memory_space<vmem>>, vector<2x1x8xf32>
    %389 = vector.shape_cast %388 : vector<2x1x8xf32> to vector<2x8xf32>
    %cst_93 = arith.constant dense<0.000000e+00> : vector<2x128xf32>
    %390 = tpu.matmul %389, %0, %cst_93 {dimension_numbers = #tpu.dot_dimension_numbers<[1], [0], [0], [1], [0, 0, 1, 1], [], []>} : vector<2x8xf32>, vector<8x128xf32>, vector<2x128xf32> -> vector<2x128xf32>
    %cst_94 = arith.constant dense<0.000000e+00> : vector<2x128xf32>
    %391 = tpu.matmul %385, %1, %cst_94 {dimension_numbers = #tpu.dot_dimension_numbers<[1], [0], [0], [1], [0, 0, 1, 1], [], []>} : vector<2x20xf32>, vector<20x128xf32>, vector<2x128xf32> -> vector<2x128xf32>
    %392 = arith.addf %390, %391 : vector<2x128xf32>
    %cst_95 = arith.constant dense<0.000000e+00> : vector<2x128xf32>
    %393 = tpu.matmul %289, %2, %cst_95 {dimension_numbers = #tpu.dot_dimension_numbers<[1], [0], [0], [1], [0, 0, 1, 1], [], []>} : vector<2x32xf32>, vector<32x128xf32>, vector<2x128xf32> -> vector<2x128xf32>
    %394 = arith.addf %392, %393 : vector<2x128xf32>
    %395 = vector.broadcast %3 : vector<1x128xf32> to vector<2x128xf32>
    %396 = arith.addf %394, %395 : vector<2x128xf32>
    %397 = vector.extract_strided_slice %396 {offsets = [0, 0], sizes = [2, 96], strides = [1, 1]} : vector<2x128xf32> to vector<2x96xf32>
    %398 = arith.negf %397 : vector<2x96xf32>
    %399 = math.exp %398 : vector<2x96xf32>
    %cst_96 = arith.constant 1.000000e+00 : f32
    %400 = vector.broadcast %cst_96 : f32 to vector<2x96xf32>
    %401 = arith.addf %400, %399 : vector<2x96xf32>
    %402 = arith.divf %400, %401 : vector<2x96xf32>
    %403 = vector.extract_strided_slice %396 {offsets = [0, 96], sizes = [2, 32], strides = [1, 1]} : vector<2x128xf32> to vector<2x32xf32>
    %404 = math.tanh %403 : vector<2x32xf32>
    %405 = vector.extract_strided_slice %402 {offsets = [0, 0], sizes = [2, 32], strides = [1, 1]} : vector<2x96xf32> to vector<2x32xf32>
    %406 = vector.extract_strided_slice %402 {offsets = [0, 32], sizes = [2, 32], strides = [1, 1]} : vector<2x96xf32> to vector<2x32xf32>
    %407 = vector.extract_strided_slice %402 {offsets = [0, 64], sizes = [2, 32], strides = [1, 1]} : vector<2x96xf32> to vector<2x32xf32>
    %408 = arith.mulf %406, %287 : vector<2x32xf32>
    %409 = arith.mulf %405, %404 : vector<2x32xf32>
    %410 = arith.addf %408, %409 : vector<2x32xf32>
    %411 = math.tanh %410 : vector<2x32xf32>
    %412 = arith.mulf %407, %411 : vector<2x32xf32>
    %cst_97 = arith.constant dense<0.000000e+00> : vector<2x90xf32>
    %413 = tpu.matmul %412, %4, %cst_97 {dimension_numbers = #tpu.dot_dimension_numbers<[1], [0], [0], [1], [0, 0, 1, 1], [], []>} : vector<2x32xf32>, vector<32x90xf32>, vector<2x90xf32> -> vector<2x90xf32>
    %414 = vector.broadcast %5 : vector<1x90xf32> to vector<2x90xf32>
    %415 = arith.addf %413, %414 : vector<2x90xf32>
    %416 = vector.extract_strided_slice %415 {offsets = [0, 0], sizes = [2, 60], strides = [1, 1]} : vector<2x90xf32> to vector<2x60xf32>
    %417 = math.tanh %416 : vector<2x60xf32>
    %418 = vector.extract_strided_slice %417 {offsets = [0, 0], sizes = [2, 20], strides = [1, 1]} : vector<2x60xf32> to vector<2x20xf32>
    %419 = vector.extract_strided_slice %417 {offsets = [0, 20], sizes = [2, 20], strides = [1, 1]} : vector<2x60xf32> to vector<2x20xf32>
    %420 = vector.extract_strided_slice %417 {offsets = [0, 40], sizes = [2, 20], strides = [1, 1]} : vector<2x60xf32> to vector<2x20xf32>
    %421 = vector.extract_strided_slice %415 {offsets = [0, 60], sizes = [2, 20], strides = [1, 1]} : vector<2x90xf32> to vector<2x20xf32>
    %422 = arith.negf %421 : vector<2x20xf32>
    %423 = math.exp %422 : vector<2x20xf32>
    %cst_98 = arith.constant 1.000000e+00 : f32
    %424 = vector.broadcast %cst_98 : f32 to vector<2x20xf32>
    %425 = arith.addf %424, %423 : vector<2x20xf32>
    %426 = arith.divf %424, %425 : vector<2x20xf32>
    %427 = vector.extract_strided_slice %415 {offsets = [0, 80], sizes = [2, 2], strides = [1, 1]} : vector<2x90xf32> to vector<2x2xf32>
    %cst_99 = arith.constant 0.000000e+00 : f32
    %428 = vector.broadcast %cst_99 : f32 to vector<2x2xf32>
    %429 = arith.maximumf %427, %428 : vector<2x2xf32>
    %430 = vector.broadcast %cst_99 : f32 to vector<2x2xf32>
    %431 = arith.subf %427, %430 : vector<2x2xf32>
    %432 = arith.cmpf one, %431, %431 : vector<2x2xf32>
    %433 = vector.broadcast %cst_99 : f32 to vector<2x2xf32>
    %434 = arith.addf %427, %433 : vector<2x2xf32>
    %435 = math.absf %431 : vector<2x2xf32>
    %cst_100 = arith.constant 0.000000e+00 : f32
    %436 = vector.broadcast %cst_100 : f32 to vector<2x2xf32>
    %437 = arith.subf %436, %435 : vector<2x2xf32>
    %438 = math.exp %437 : vector<2x2xf32>
    %439 = math.log1p %438 : vector<2x2xf32>
    %440 = arith.addf %429, %439 : vector<2x2xf32>
    %441 = arith.select %432, %434, %440 : vector<2x2xi1>, vector<2x2xf32>
    %442 = vector.extract_strided_slice %441 {offsets = [0, 0], sizes = [2, 1], strides = [1, 1]} : vector<2x2xf32> to vector<2x1xf32>
    %443 = vector.extract_strided_slice %441 {offsets = [0, 1], sizes = [2, 1], strides = [1, 1]} : vector<2x2xf32> to vector<2x1xf32>
    %444 = vector.extract_strided_slice %415 {offsets = [0, 82], sizes = [2, 8], strides = [1, 1]} : vector<2x90xf32> to vector<2x8xf32>
    %445 = vector.shape_cast %418 : vector<2x20xf32> to vector<2x1x20xf32>
    "tpu.trace_start"() <{level = 10 : i32, message = "bqm,bmn->bqn"}> : () -> ()
    %cst_101 = arith.constant dense<0.000000e+00> : vector<2x1x128xf32>
    %446 = tpu.matmul %445, %357, %cst_101 {dimension_numbers = #tpu.dot_dimension_numbers<[2], [1], [1], [2], [0, 0, 0, 1, 1, 2], [0], [0]>} : vector<2x1x20xf32>, vector<2x20x128xf32>, vector<2x1x128xf32> -> vector<2x1x128xf32>
    "tpu.trace_stop"() : () -> ()
    %447 = vector.shape_cast %446 : vector<2x1x128xf32> to vector<2x128xf32>
    %448 = arith.mulf %418, %418 : vector<2x20xf32>
    %cst_102 = arith.constant dense<0.000000e+00> : vector<2xf32>
    %449 = vector.multi_reduction <add>, %448, %cst_102 [1] : vector<2x20xf32> to vector<2xf32>
    %450 = vector.shape_cast %449 : vector<2xf32> to vector<2x1xf32>
    %451 = vector.broadcast %450 : vector<2x1xf32> to vector<2x128xf32>
    %452 = arith.mulf %359, %451 : vector<2x128xf32>
    %cst_103 = arith.constant 9.99999993E-9 : f32
    %453 = vector.broadcast %cst_103 : f32 to vector<2x128xf32>
    %454 = arith.addf %452, %453 : vector<2x128xf32>
    %455 = math.rsqrt %454 : vector<2x128xf32>
    %456 = arith.mulf %447, %455 : vector<2x128xf32>
    %457 = vector.broadcast %442 : vector<2x1xf32> to vector<2x128xf32>
    %458 = arith.mulf %457, %456 : vector<2x128xf32>
    %cst_104 = arith.constant dense<0xFF800000> : vector<2xf32>
    %459 = vector.multi_reduction <maximumf>, %458, %cst_104 [1] : vector<2x128xf32> to vector<2xf32>
    %460 = vector.shape_cast %459 : vector<2xf32> to vector<2x1xf32>
    %461 = vector.broadcast %460 : vector<2x1xf32> to vector<2x128xf32>
    %462 = arith.subf %458, %461 : vector<2x128xf32>
    %463 = math.exp %462 : vector<2x128xf32>
    %cst_105 = arith.constant dense<0.000000e+00> : vector<2xf32>
    %464 = vector.multi_reduction <add>, %463, %cst_105 [1] : vector<2x128xf32> to vector<2xf32>
    %465 = vector.shape_cast %464 : vector<2xf32> to vector<2x1xf32>
    %466 = vector.broadcast %465 : vector<2x1xf32> to vector<2x128xf32>
    %467 = arith.divf %463, %466 : vector<2x128xf32>
    %468 = vector.shape_cast %467 : vector<2x128xf32> to vector<2x1x128xf32>
    %469 = vector.shape_cast %426 : vector<2x20xf32> to vector<2x20x1xf32>
    %470 = vector.broadcast %469 : vector<2x20x1xf32> to vector<2x20x128xf32>
    %471 = vector.broadcast %468 : vector<2x1x128xf32> to vector<2x20x128xf32>
    %472 = arith.mulf %470, %471 : vector<2x20x128xf32>
    %cst_106 = arith.constant 1.000000e+00 : f32
    %473 = vector.broadcast %cst_106 : f32 to vector<2x20x128xf32>
    %474 = arith.subf %473, %472 : vector<2x20x128xf32>
    %475 = arith.mulf %357, %474 : vector<2x20x128xf32>
    %476 = vector.shape_cast %419 : vector<2x20xf32> to vector<2x20x1xf32>
    %477 = vector.broadcast %476 : vector<2x20x1xf32> to vector<2x20x128xf32>
    %478 = vector.broadcast %468 : vector<2x1x128xf32> to vector<2x20x128xf32>
    %479 = arith.mulf %477, %478 : vector<2x20x128xf32>
    %480 = arith.addf %475, %479 : vector<2x20x128xf32>
    %481 = arith.mulf %480, %480 : vector<2x20x128xf32>
    %cst_107 = arith.constant dense<0.000000e+00> : vector<2x128xf32>
    %482 = vector.multi_reduction <add>, %481, %cst_107 [1] : vector<2x20x128xf32> to vector<2x128xf32>
    %483 = vector.shape_cast %420 : vector<2x20xf32> to vector<2x1x20xf32>
    "tpu.trace_start"() <{level = 10 : i32, message = "bqm,bmn->bqn"}> : () -> ()
    %cst_108 = arith.constant dense<0.000000e+00> : vector<2x1x128xf32>
    %484 = tpu.matmul %483, %480, %cst_108 {dimension_numbers = #tpu.dot_dimension_numbers<[2], [1], [1], [2], [0, 0, 0, 1, 1, 2], [0], [0]>} : vector<2x1x20xf32>, vector<2x20x128xf32>, vector<2x1x128xf32> -> vector<2x1x128xf32>
    "tpu.trace_stop"() : () -> ()
    %485 = vector.shape_cast %484 : vector<2x1x128xf32> to vector<2x128xf32>
    %486 = arith.mulf %420, %420 : vector<2x20xf32>
    %cst_109 = arith.constant dense<0.000000e+00> : vector<2xf32>
    %487 = vector.multi_reduction <add>, %486, %cst_109 [1] : vector<2x20xf32> to vector<2xf32>
    %488 = vector.shape_cast %487 : vector<2xf32> to vector<2x1xf32>
    %489 = vector.broadcast %488 : vector<2x1xf32> to vector<2x128xf32>
    %490 = arith.mulf %482, %489 : vector<2x128xf32>
    %cst_110 = arith.constant 9.99999993E-9 : f32
    %491 = vector.broadcast %cst_110 : f32 to vector<2x128xf32>
    %492 = arith.addf %490, %491 : vector<2x128xf32>
    %493 = math.rsqrt %492 : vector<2x128xf32>
    %494 = arith.mulf %485, %493 : vector<2x128xf32>
    %495 = vector.broadcast %443 : vector<2x1xf32> to vector<2x128xf32>
    %496 = arith.mulf %495, %494 : vector<2x128xf32>
    %cst_111 = arith.constant dense<0xFF800000> : vector<2xf32>
    %497 = vector.multi_reduction <maximumf>, %496, %cst_111 [1] : vector<2x128xf32> to vector<2xf32>
    %498 = vector.shape_cast %497 : vector<2xf32> to vector<2x1xf32>
    %499 = vector.broadcast %498 : vector<2x1xf32> to vector<2x128xf32>
    %500 = arith.subf %496, %499 : vector<2x128xf32>
    %501 = math.exp %500 : vector<2x128xf32>
    %cst_112 = arith.constant dense<0.000000e+00> : vector<2xf32>
    %502 = vector.multi_reduction <add>, %501, %cst_112 [1] : vector<2x128xf32> to vector<2xf32>
    %503 = vector.shape_cast %502 : vector<2xf32> to vector<2x1xf32>
    %504 = vector.broadcast %503 : vector<2x1xf32> to vector<2x128xf32>
    %505 = arith.divf %501, %504 : vector<2x128xf32>
    %506 = vector.shape_cast %505 : vector<2x128xf32> to vector<2x1x128xf32>
    "tpu.trace_start"() <{level = 10 : i32, message = "bqn,bmn->bqm"}> : () -> ()
    %cst_113 = arith.constant dense<0.000000e+00> : vector<2x1x20xf32>
    %507 = tpu.matmul %506, %480, %cst_113 {dimension_numbers = #tpu.dot_dimension_numbers<[2], [2], [1], [1], [0, 0, 0, 1, 1, 1], [0], [0]>} : vector<2x1x128xf32>, vector<2x20x128xf32>, vector<2x1x20xf32> -> vector<2x1x20xf32>
    "tpu.trace_stop"() : () -> ()
    %508 = vector.shape_cast %507 : vector<2x1x20xf32> to vector<2x20xf32>
    %cst_114 = arith.constant dense<0.000000e+00> : vector<2x8xf32>
    %509 = tpu.matmul %508, %6, %cst_114 {dimension_numbers = #tpu.dot_dimension_numbers<[1], [0], [0], [1], [0, 0, 1, 1], [], []>} : vector<2x20xf32>, vector<20x8xf32>, vector<2x8xf32> -> vector<2x8xf32>
    %510 = arith.addf %444, %509 : vector<2x8xf32>
    %c0_115 = arith.constant 0 : index
    %c4 = arith.constant 4 : index
    %c0_116 = arith.constant 0 : index
    %511 = vector.load %arg0[%c0_115, %c4, %c0_116] : memref<2x8x8xf32, #tpu.memory_space<vmem>>, vector<2x1x8xf32>
    %512 = vector.shape_cast %511 : vector<2x1x8xf32> to vector<2x8xf32>
    %cst_117 = arith.constant dense<0.000000e+00> : vector<2x128xf32>
    %513 = tpu.matmul %512, %0, %cst_117 {dimension_numbers = #tpu.dot_dimension_numbers<[1], [0], [0], [1], [0, 0, 1, 1], [], []>} : vector<2x8xf32>, vector<8x128xf32>, vector<2x128xf32> -> vector<2x128xf32>
    %cst_118 = arith.constant dense<0.000000e+00> : vector<2x128xf32>
    %514 = tpu.matmul %508, %1, %cst_118 {dimension_numbers = #tpu.dot_dimension_numbers<[1], [0], [0], [1], [0, 0, 1, 1], [], []>} : vector<2x20xf32>, vector<20x128xf32>, vector<2x128xf32> -> vector<2x128xf32>
    %515 = arith.addf %513, %514 : vector<2x128xf32>
    %cst_119 = arith.constant dense<0.000000e+00> : vector<2x128xf32>
    %516 = tpu.matmul %412, %2, %cst_119 {dimension_numbers = #tpu.dot_dimension_numbers<[1], [0], [0], [1], [0, 0, 1, 1], [], []>} : vector<2x32xf32>, vector<32x128xf32>, vector<2x128xf32> -> vector<2x128xf32>
    %517 = arith.addf %515, %516 : vector<2x128xf32>
    %518 = vector.broadcast %3 : vector<1x128xf32> to vector<2x128xf32>
    %519 = arith.addf %517, %518 : vector<2x128xf32>
    %520 = vector.extract_strided_slice %519 {offsets = [0, 0], sizes = [2, 96], strides = [1, 1]} : vector<2x128xf32> to vector<2x96xf32>
    %521 = arith.negf %520 : vector<2x96xf32>
    %522 = math.exp %521 : vector<2x96xf32>
    %cst_120 = arith.constant 1.000000e+00 : f32
    %523 = vector.broadcast %cst_120 : f32 to vector<2x96xf32>
    %524 = arith.addf %523, %522 : vector<2x96xf32>
    %525 = arith.divf %523, %524 : vector<2x96xf32>
    %526 = vector.extract_strided_slice %519 {offsets = [0, 96], sizes = [2, 32], strides = [1, 1]} : vector<2x128xf32> to vector<2x32xf32>
    %527 = math.tanh %526 : vector<2x32xf32>
    %528 = vector.extract_strided_slice %525 {offsets = [0, 0], sizes = [2, 32], strides = [1, 1]} : vector<2x96xf32> to vector<2x32xf32>
    %529 = vector.extract_strided_slice %525 {offsets = [0, 32], sizes = [2, 32], strides = [1, 1]} : vector<2x96xf32> to vector<2x32xf32>
    %530 = vector.extract_strided_slice %525 {offsets = [0, 64], sizes = [2, 32], strides = [1, 1]} : vector<2x96xf32> to vector<2x32xf32>
    %531 = arith.mulf %529, %410 : vector<2x32xf32>
    %532 = arith.mulf %528, %527 : vector<2x32xf32>
    %533 = arith.addf %531, %532 : vector<2x32xf32>
    %534 = math.tanh %533 : vector<2x32xf32>
    %535 = arith.mulf %530, %534 : vector<2x32xf32>
    %cst_121 = arith.constant dense<0.000000e+00> : vector<2x90xf32>
    %536 = tpu.matmul %535, %4, %cst_121 {dimension_numbers = #tpu.dot_dimension_numbers<[1], [0], [0], [1], [0, 0, 1, 1], [], []>} : vector<2x32xf32>, vector<32x90xf32>, vector<2x90xf32> -> vector<2x90xf32>
    %537 = vector.broadcast %5 : vector<1x90xf32> to vector<2x90xf32>
    %538 = arith.addf %536, %537 : vector<2x90xf32>
    %539 = vector.extract_strided_slice %538 {offsets = [0, 0], sizes = [2, 60], strides = [1, 1]} : vector<2x90xf32> to vector<2x60xf32>
    %540 = math.tanh %539 : vector<2x60xf32>
    %541 = vector.extract_strided_slice %540 {offsets = [0, 0], sizes = [2, 20], strides = [1, 1]} : vector<2x60xf32> to vector<2x20xf32>
    %542 = vector.extract_strided_slice %540 {offsets = [0, 20], sizes = [2, 20], strides = [1, 1]} : vector<2x60xf32> to vector<2x20xf32>
    %543 = vector.extract_strided_slice %540 {offsets = [0, 40], sizes = [2, 20], strides = [1, 1]} : vector<2x60xf32> to vector<2x20xf32>
    %544 = vector.extract_strided_slice %538 {offsets = [0, 60], sizes = [2, 20], strides = [1, 1]} : vector<2x90xf32> to vector<2x20xf32>
    %545 = arith.negf %544 : vector<2x20xf32>
    %546 = math.exp %545 : vector<2x20xf32>
    %cst_122 = arith.constant 1.000000e+00 : f32
    %547 = vector.broadcast %cst_122 : f32 to vector<2x20xf32>
    %548 = arith.addf %547, %546 : vector<2x20xf32>
    %549 = arith.divf %547, %548 : vector<2x20xf32>
    %550 = vector.extract_strided_slice %538 {offsets = [0, 80], sizes = [2, 2], strides = [1, 1]} : vector<2x90xf32> to vector<2x2xf32>
    %cst_123 = arith.constant 0.000000e+00 : f32
    %551 = vector.broadcast %cst_123 : f32 to vector<2x2xf32>
    %552 = arith.maximumf %550, %551 : vector<2x2xf32>
    %553 = vector.broadcast %cst_123 : f32 to vector<2x2xf32>
    %554 = arith.subf %550, %553 : vector<2x2xf32>
    %555 = arith.cmpf one, %554, %554 : vector<2x2xf32>
    %556 = vector.broadcast %cst_123 : f32 to vector<2x2xf32>
    %557 = arith.addf %550, %556 : vector<2x2xf32>
    %558 = math.absf %554 : vector<2x2xf32>
    %cst_124 = arith.constant 0.000000e+00 : f32
    %559 = vector.broadcast %cst_124 : f32 to vector<2x2xf32>
    %560 = arith.subf %559, %558 : vector<2x2xf32>
    %561 = math.exp %560 : vector<2x2xf32>
    %562 = math.log1p %561 : vector<2x2xf32>
    %563 = arith.addf %552, %562 : vector<2x2xf32>
    %564 = arith.select %555, %557, %563 : vector<2x2xi1>, vector<2x2xf32>
    %565 = vector.extract_strided_slice %564 {offsets = [0, 0], sizes = [2, 1], strides = [1, 1]} : vector<2x2xf32> to vector<2x1xf32>
    %566 = vector.extract_strided_slice %564 {offsets = [0, 1], sizes = [2, 1], strides = [1, 1]} : vector<2x2xf32> to vector<2x1xf32>
    %567 = vector.extract_strided_slice %538 {offsets = [0, 82], sizes = [2, 8], strides = [1, 1]} : vector<2x90xf32> to vector<2x8xf32>
    %568 = vector.shape_cast %541 : vector<2x20xf32> to vector<2x1x20xf32>
    "tpu.trace_start"() <{level = 10 : i32, message = "bqm,bmn->bqn"}> : () -> ()
    %cst_125 = arith.constant dense<0.000000e+00> : vector<2x1x128xf32>
    %569 = tpu.matmul %568, %480, %cst_125 {dimension_numbers = #tpu.dot_dimension_numbers<[2], [1], [1], [2], [0, 0, 0, 1, 1, 2], [0], [0]>} : vector<2x1x20xf32>, vector<2x20x128xf32>, vector<2x1x128xf32> -> vector<2x1x128xf32>
    "tpu.trace_stop"() : () -> ()
    %570 = vector.shape_cast %569 : vector<2x1x128xf32> to vector<2x128xf32>
    %571 = arith.mulf %541, %541 : vector<2x20xf32>
    %cst_126 = arith.constant dense<0.000000e+00> : vector<2xf32>
    %572 = vector.multi_reduction <add>, %571, %cst_126 [1] : vector<2x20xf32> to vector<2xf32>
    %573 = vector.shape_cast %572 : vector<2xf32> to vector<2x1xf32>
    %574 = vector.broadcast %573 : vector<2x1xf32> to vector<2x128xf32>
    %575 = arith.mulf %482, %574 : vector<2x128xf32>
    %cst_127 = arith.constant 9.99999993E-9 : f32
    %576 = vector.broadcast %cst_127 : f32 to vector<2x128xf32>
    %577 = arith.addf %575, %576 : vector<2x128xf32>
    %578 = math.rsqrt %577 : vector<2x128xf32>
    %579 = arith.mulf %570, %578 : vector<2x128xf32>
    %580 = vector.broadcast %565 : vector<2x1xf32> to vector<2x128xf32>
    %581 = arith.mulf %580, %579 : vector<2x128xf32>
    %cst_128 = arith.constant dense<0xFF800000> : vector<2xf32>
    %582 = vector.multi_reduction <maximumf>, %581, %cst_128 [1] : vector<2x128xf32> to vector<2xf32>
    %583 = vector.shape_cast %582 : vector<2xf32> to vector<2x1xf32>
    %584 = vector.broadcast %583 : vector<2x1xf32> to vector<2x128xf32>
    %585 = arith.subf %581, %584 : vector<2x128xf32>
    %586 = math.exp %585 : vector<2x128xf32>
    %cst_129 = arith.constant dense<0.000000e+00> : vector<2xf32>
    %587 = vector.multi_reduction <add>, %586, %cst_129 [1] : vector<2x128xf32> to vector<2xf32>
    %588 = vector.shape_cast %587 : vector<2xf32> to vector<2x1xf32>
    %589 = vector.broadcast %588 : vector<2x1xf32> to vector<2x128xf32>
    %590 = arith.divf %586, %589 : vector<2x128xf32>
    %591 = vector.shape_cast %590 : vector<2x128xf32> to vector<2x1x128xf32>
    %592 = vector.shape_cast %549 : vector<2x20xf32> to vector<2x20x1xf32>
    %593 = vector.broadcast %592 : vector<2x20x1xf32> to vector<2x20x128xf32>
    %594 = vector.broadcast %591 : vector<2x1x128xf32> to vector<2x20x128xf32>
    %595 = arith.mulf %593, %594 : vector<2x20x128xf32>
    %cst_130 = arith.constant 1.000000e+00 : f32
    %596 = vector.broadcast %cst_130 : f32 to vector<2x20x128xf32>
    %597 = arith.subf %596, %595 : vector<2x20x128xf32>
    %598 = arith.mulf %480, %597 : vector<2x20x128xf32>
    %599 = vector.shape_cast %542 : vector<2x20xf32> to vector<2x20x1xf32>
    %600 = vector.broadcast %599 : vector<2x20x1xf32> to vector<2x20x128xf32>
    %601 = vector.broadcast %591 : vector<2x1x128xf32> to vector<2x20x128xf32>
    %602 = arith.mulf %600, %601 : vector<2x20x128xf32>
    %603 = arith.addf %598, %602 : vector<2x20x128xf32>
    %604 = arith.mulf %603, %603 : vector<2x20x128xf32>
    %cst_131 = arith.constant dense<0.000000e+00> : vector<2x128xf32>
    %605 = vector.multi_reduction <add>, %604, %cst_131 [1] : vector<2x20x128xf32> to vector<2x128xf32>
    %606 = vector.shape_cast %543 : vector<2x20xf32> to vector<2x1x20xf32>
    "tpu.trace_start"() <{level = 10 : i32, message = "bqm,bmn->bqn"}> : () -> ()
    %cst_132 = arith.constant dense<0.000000e+00> : vector<2x1x128xf32>
    %607 = tpu.matmul %606, %603, %cst_132 {dimension_numbers = #tpu.dot_dimension_numbers<[2], [1], [1], [2], [0, 0, 0, 1, 1, 2], [0], [0]>} : vector<2x1x20xf32>, vector<2x20x128xf32>, vector<2x1x128xf32> -> vector<2x1x128xf32>
    "tpu.trace_stop"() : () -> ()
    %608 = vector.shape_cast %607 : vector<2x1x128xf32> to vector<2x128xf32>
    %609 = arith.mulf %543, %543 : vector<2x20xf32>
    %cst_133 = arith.constant dense<0.000000e+00> : vector<2xf32>
    %610 = vector.multi_reduction <add>, %609, %cst_133 [1] : vector<2x20xf32> to vector<2xf32>
    %611 = vector.shape_cast %610 : vector<2xf32> to vector<2x1xf32>
    %612 = vector.broadcast %611 : vector<2x1xf32> to vector<2x128xf32>
    %613 = arith.mulf %605, %612 : vector<2x128xf32>
    %cst_134 = arith.constant 9.99999993E-9 : f32
    %614 = vector.broadcast %cst_134 : f32 to vector<2x128xf32>
    %615 = arith.addf %613, %614 : vector<2x128xf32>
    %616 = math.rsqrt %615 : vector<2x128xf32>
    %617 = arith.mulf %608, %616 : vector<2x128xf32>
    %618 = vector.broadcast %566 : vector<2x1xf32> to vector<2x128xf32>
    %619 = arith.mulf %618, %617 : vector<2x128xf32>
    %cst_135 = arith.constant dense<0xFF800000> : vector<2xf32>
    %620 = vector.multi_reduction <maximumf>, %619, %cst_135 [1] : vector<2x128xf32> to vector<2xf32>
    %621 = vector.shape_cast %620 : vector<2xf32> to vector<2x1xf32>
    %622 = vector.broadcast %621 : vector<2x1xf32> to vector<2x128xf32>
    %623 = arith.subf %619, %622 : vector<2x128xf32>
    %624 = math.exp %623 : vector<2x128xf32>
    %cst_136 = arith.constant dense<0.000000e+00> : vector<2xf32>
    %625 = vector.multi_reduction <add>, %624, %cst_136 [1] : vector<2x128xf32> to vector<2xf32>
    %626 = vector.shape_cast %625 : vector<2xf32> to vector<2x1xf32>
    %627 = vector.broadcast %626 : vector<2x1xf32> to vector<2x128xf32>
    %628 = arith.divf %624, %627 : vector<2x128xf32>
    %629 = vector.shape_cast %628 : vector<2x128xf32> to vector<2x1x128xf32>
    "tpu.trace_start"() <{level = 10 : i32, message = "bqn,bmn->bqm"}> : () -> ()
    %cst_137 = arith.constant dense<0.000000e+00> : vector<2x1x20xf32>
    %630 = tpu.matmul %629, %603, %cst_137 {dimension_numbers = #tpu.dot_dimension_numbers<[2], [2], [1], [1], [0, 0, 0, 1, 1, 1], [0], [0]>} : vector<2x1x128xf32>, vector<2x20x128xf32>, vector<2x1x20xf32> -> vector<2x1x20xf32>
    "tpu.trace_stop"() : () -> ()
    %631 = vector.shape_cast %630 : vector<2x1x20xf32> to vector<2x20xf32>
    %cst_138 = arith.constant dense<0.000000e+00> : vector<2x8xf32>
    %632 = tpu.matmul %631, %6, %cst_138 {dimension_numbers = #tpu.dot_dimension_numbers<[1], [0], [0], [1], [0, 0, 1, 1], [], []>} : vector<2x20xf32>, vector<20x8xf32>, vector<2x8xf32> -> vector<2x8xf32>
    %633 = arith.addf %567, %632 : vector<2x8xf32>
    %c0_139 = arith.constant 0 : index
    %c5 = arith.constant 5 : index
    %c0_140 = arith.constant 0 : index
    %634 = vector.load %arg0[%c0_139, %c5, %c0_140] : memref<2x8x8xf32, #tpu.memory_space<vmem>>, vector<2x1x8xf32>
    %635 = vector.shape_cast %634 : vector<2x1x8xf32> to vector<2x8xf32>
    %cst_141 = arith.constant dense<0.000000e+00> : vector<2x128xf32>
    %636 = tpu.matmul %635, %0, %cst_141 {dimension_numbers = #tpu.dot_dimension_numbers<[1], [0], [0], [1], [0, 0, 1, 1], [], []>} : vector<2x8xf32>, vector<8x128xf32>, vector<2x128xf32> -> vector<2x128xf32>
    %cst_142 = arith.constant dense<0.000000e+00> : vector<2x128xf32>
    %637 = tpu.matmul %631, %1, %cst_142 {dimension_numbers = #tpu.dot_dimension_numbers<[1], [0], [0], [1], [0, 0, 1, 1], [], []>} : vector<2x20xf32>, vector<20x128xf32>, vector<2x128xf32> -> vector<2x128xf32>
    %638 = arith.addf %636, %637 : vector<2x128xf32>
    %cst_143 = arith.constant dense<0.000000e+00> : vector<2x128xf32>
    %639 = tpu.matmul %535, %2, %cst_143 {dimension_numbers = #tpu.dot_dimension_numbers<[1], [0], [0], [1], [0, 0, 1, 1], [], []>} : vector<2x32xf32>, vector<32x128xf32>, vector<2x128xf32> -> vector<2x128xf32>
    %640 = arith.addf %638, %639 : vector<2x128xf32>
    %641 = vector.broadcast %3 : vector<1x128xf32> to vector<2x128xf32>
    %642 = arith.addf %640, %641 : vector<2x128xf32>
    %643 = vector.extract_strided_slice %642 {offsets = [0, 0], sizes = [2, 96], strides = [1, 1]} : vector<2x128xf32> to vector<2x96xf32>
    %644 = arith.negf %643 : vector<2x96xf32>
    %645 = math.exp %644 : vector<2x96xf32>
    %cst_144 = arith.constant 1.000000e+00 : f32
    %646 = vector.broadcast %cst_144 : f32 to vector<2x96xf32>
    %647 = arith.addf %646, %645 : vector<2x96xf32>
    %648 = arith.divf %646, %647 : vector<2x96xf32>
    %649 = vector.extract_strided_slice %642 {offsets = [0, 96], sizes = [2, 32], strides = [1, 1]} : vector<2x128xf32> to vector<2x32xf32>
    %650 = math.tanh %649 : vector<2x32xf32>
    %651 = vector.extract_strided_slice %648 {offsets = [0, 0], sizes = [2, 32], strides = [1, 1]} : vector<2x96xf32> to vector<2x32xf32>
    %652 = vector.extract_strided_slice %648 {offsets = [0, 32], sizes = [2, 32], strides = [1, 1]} : vector<2x96xf32> to vector<2x32xf32>
    %653 = vector.extract_strided_slice %648 {offsets = [0, 64], sizes = [2, 32], strides = [1, 1]} : vector<2x96xf32> to vector<2x32xf32>
    %654 = arith.mulf %652, %533 : vector<2x32xf32>
    %655 = arith.mulf %651, %650 : vector<2x32xf32>
    %656 = arith.addf %654, %655 : vector<2x32xf32>
    %657 = math.tanh %656 : vector<2x32xf32>
    %658 = arith.mulf %653, %657 : vector<2x32xf32>
    %cst_145 = arith.constant dense<0.000000e+00> : vector<2x90xf32>
    %659 = tpu.matmul %658, %4, %cst_145 {dimension_numbers = #tpu.dot_dimension_numbers<[1], [0], [0], [1], [0, 0, 1, 1], [], []>} : vector<2x32xf32>, vector<32x90xf32>, vector<2x90xf32> -> vector<2x90xf32>
    %660 = vector.broadcast %5 : vector<1x90xf32> to vector<2x90xf32>
    %661 = arith.addf %659, %660 : vector<2x90xf32>
    %662 = vector.extract_strided_slice %661 {offsets = [0, 0], sizes = [2, 60], strides = [1, 1]} : vector<2x90xf32> to vector<2x60xf32>
    %663 = math.tanh %662 : vector<2x60xf32>
    %664 = vector.extract_strided_slice %663 {offsets = [0, 0], sizes = [2, 20], strides = [1, 1]} : vector<2x60xf32> to vector<2x20xf32>
    %665 = vector.extract_strided_slice %663 {offsets = [0, 20], sizes = [2, 20], strides = [1, 1]} : vector<2x60xf32> to vector<2x20xf32>
    %666 = vector.extract_strided_slice %663 {offsets = [0, 40], sizes = [2, 20], strides = [1, 1]} : vector<2x60xf32> to vector<2x20xf32>
    %667 = vector.extract_strided_slice %661 {offsets = [0, 60], sizes = [2, 20], strides = [1, 1]} : vector<2x90xf32> to vector<2x20xf32>
    %668 = arith.negf %667 : vector<2x20xf32>
    %669 = math.exp %668 : vector<2x20xf32>
    %cst_146 = arith.constant 1.000000e+00 : f32
    %670 = vector.broadcast %cst_146 : f32 to vector<2x20xf32>
    %671 = arith.addf %670, %669 : vector<2x20xf32>
    %672 = arith.divf %670, %671 : vector<2x20xf32>
    %673 = vector.extract_strided_slice %661 {offsets = [0, 80], sizes = [2, 2], strides = [1, 1]} : vector<2x90xf32> to vector<2x2xf32>
    %cst_147 = arith.constant 0.000000e+00 : f32
    %674 = vector.broadcast %cst_147 : f32 to vector<2x2xf32>
    %675 = arith.maximumf %673, %674 : vector<2x2xf32>
    %676 = vector.broadcast %cst_147 : f32 to vector<2x2xf32>
    %677 = arith.subf %673, %676 : vector<2x2xf32>
    %678 = arith.cmpf one, %677, %677 : vector<2x2xf32>
    %679 = vector.broadcast %cst_147 : f32 to vector<2x2xf32>
    %680 = arith.addf %673, %679 : vector<2x2xf32>
    %681 = math.absf %677 : vector<2x2xf32>
    %cst_148 = arith.constant 0.000000e+00 : f32
    %682 = vector.broadcast %cst_148 : f32 to vector<2x2xf32>
    %683 = arith.subf %682, %681 : vector<2x2xf32>
    %684 = math.exp %683 : vector<2x2xf32>
    %685 = math.log1p %684 : vector<2x2xf32>
    %686 = arith.addf %675, %685 : vector<2x2xf32>
    %687 = arith.select %678, %680, %686 : vector<2x2xi1>, vector<2x2xf32>
    %688 = vector.extract_strided_slice %687 {offsets = [0, 0], sizes = [2, 1], strides = [1, 1]} : vector<2x2xf32> to vector<2x1xf32>
    %689 = vector.extract_strided_slice %687 {offsets = [0, 1], sizes = [2, 1], strides = [1, 1]} : vector<2x2xf32> to vector<2x1xf32>
    %690 = vector.extract_strided_slice %661 {offsets = [0, 82], sizes = [2, 8], strides = [1, 1]} : vector<2x90xf32> to vector<2x8xf32>
    %691 = vector.shape_cast %664 : vector<2x20xf32> to vector<2x1x20xf32>
    "tpu.trace_start"() <{level = 10 : i32, message = "bqm,bmn->bqn"}> : () -> ()
    %cst_149 = arith.constant dense<0.000000e+00> : vector<2x1x128xf32>
    %692 = tpu.matmul %691, %603, %cst_149 {dimension_numbers = #tpu.dot_dimension_numbers<[2], [1], [1], [2], [0, 0, 0, 1, 1, 2], [0], [0]>} : vector<2x1x20xf32>, vector<2x20x128xf32>, vector<2x1x128xf32> -> vector<2x1x128xf32>
    "tpu.trace_stop"() : () -> ()
    %693 = vector.shape_cast %692 : vector<2x1x128xf32> to vector<2x128xf32>
    %694 = arith.mulf %664, %664 : vector<2x20xf32>
    %cst_150 = arith.constant dense<0.000000e+00> : vector<2xf32>
    %695 = vector.multi_reduction <add>, %694, %cst_150 [1] : vector<2x20xf32> to vector<2xf32>
    %696 = vector.shape_cast %695 : vector<2xf32> to vector<2x1xf32>
    %697 = vector.broadcast %696 : vector<2x1xf32> to vector<2x128xf32>
    %698 = arith.mulf %605, %697 : vector<2x128xf32>
    %cst_151 = arith.constant 9.99999993E-9 : f32
    %699 = vector.broadcast %cst_151 : f32 to vector<2x128xf32>
    %700 = arith.addf %698, %699 : vector<2x128xf32>
    %701 = math.rsqrt %700 : vector<2x128xf32>
    %702 = arith.mulf %693, %701 : vector<2x128xf32>
    %703 = vector.broadcast %688 : vector<2x1xf32> to vector<2x128xf32>
    %704 = arith.mulf %703, %702 : vector<2x128xf32>
    %cst_152 = arith.constant dense<0xFF800000> : vector<2xf32>
    %705 = vector.multi_reduction <maximumf>, %704, %cst_152 [1] : vector<2x128xf32> to vector<2xf32>
    %706 = vector.shape_cast %705 : vector<2xf32> to vector<2x1xf32>
    %707 = vector.broadcast %706 : vector<2x1xf32> to vector<2x128xf32>
    %708 = arith.subf %704, %707 : vector<2x128xf32>
    %709 = math.exp %708 : vector<2x128xf32>
    %cst_153 = arith.constant dense<0.000000e+00> : vector<2xf32>
    %710 = vector.multi_reduction <add>, %709, %cst_153 [1] : vector<2x128xf32> to vector<2xf32>
    %711 = vector.shape_cast %710 : vector<2xf32> to vector<2x1xf32>
    %712 = vector.broadcast %711 : vector<2x1xf32> to vector<2x128xf32>
    %713 = arith.divf %709, %712 : vector<2x128xf32>
    %714 = vector.shape_cast %713 : vector<2x128xf32> to vector<2x1x128xf32>
    %715 = vector.shape_cast %672 : vector<2x20xf32> to vector<2x20x1xf32>
    %716 = vector.broadcast %715 : vector<2x20x1xf32> to vector<2x20x128xf32>
    %717 = vector.broadcast %714 : vector<2x1x128xf32> to vector<2x20x128xf32>
    %718 = arith.mulf %716, %717 : vector<2x20x128xf32>
    %cst_154 = arith.constant 1.000000e+00 : f32
    %719 = vector.broadcast %cst_154 : f32 to vector<2x20x128xf32>
    %720 = arith.subf %719, %718 : vector<2x20x128xf32>
    %721 = arith.mulf %603, %720 : vector<2x20x128xf32>
    %722 = vector.shape_cast %665 : vector<2x20xf32> to vector<2x20x1xf32>
    %723 = vector.broadcast %722 : vector<2x20x1xf32> to vector<2x20x128xf32>
    %724 = vector.broadcast %714 : vector<2x1x128xf32> to vector<2x20x128xf32>
    %725 = arith.mulf %723, %724 : vector<2x20x128xf32>
    %726 = arith.addf %721, %725 : vector<2x20x128xf32>
    %727 = arith.mulf %726, %726 : vector<2x20x128xf32>
    %cst_155 = arith.constant dense<0.000000e+00> : vector<2x128xf32>
    %728 = vector.multi_reduction <add>, %727, %cst_155 [1] : vector<2x20x128xf32> to vector<2x128xf32>
    %729 = vector.shape_cast %666 : vector<2x20xf32> to vector<2x1x20xf32>
    "tpu.trace_start"() <{level = 10 : i32, message = "bqm,bmn->bqn"}> : () -> ()
    %cst_156 = arith.constant dense<0.000000e+00> : vector<2x1x128xf32>
    %730 = tpu.matmul %729, %726, %cst_156 {dimension_numbers = #tpu.dot_dimension_numbers<[2], [1], [1], [2], [0, 0, 0, 1, 1, 2], [0], [0]>} : vector<2x1x20xf32>, vector<2x20x128xf32>, vector<2x1x128xf32> -> vector<2x1x128xf32>
    "tpu.trace_stop"() : () -> ()
    %731 = vector.shape_cast %730 : vector<2x1x128xf32> to vector<2x128xf32>
    %732 = arith.mulf %666, %666 : vector<2x20xf32>
    %cst_157 = arith.constant dense<0.000000e+00> : vector<2xf32>
    %733 = vector.multi_reduction <add>, %732, %cst_157 [1] : vector<2x20xf32> to vector<2xf32>
    %734 = vector.shape_cast %733 : vector<2xf32> to vector<2x1xf32>
    %735 = vector.broadcast %734 : vector<2x1xf32> to vector<2x128xf32>
    %736 = arith.mulf %728, %735 : vector<2x128xf32>
    %cst_158 = arith.constant 9.99999993E-9 : f32
    %737 = vector.broadcast %cst_158 : f32 to vector<2x128xf32>
    %738 = arith.addf %736, %737 : vector<2x128xf32>
    %739 = math.rsqrt %738 : vector<2x128xf32>
    %740 = arith.mulf %731, %739 : vector<2x128xf32>
    %741 = vector.broadcast %689 : vector<2x1xf32> to vector<2x128xf32>
    %742 = arith.mulf %741, %740 : vector<2x128xf32>
    %cst_159 = arith.constant dense<0xFF800000> : vector<2xf32>
    %743 = vector.multi_reduction <maximumf>, %742, %cst_159 [1] : vector<2x128xf32> to vector<2xf32>
    %744 = vector.shape_cast %743 : vector<2xf32> to vector<2x1xf32>
    %745 = vector.broadcast %744 : vector<2x1xf32> to vector<2x128xf32>
    %746 = arith.subf %742, %745 : vector<2x128xf32>
    %747 = math.exp %746 : vector<2x128xf32>
    %cst_160 = arith.constant dense<0.000000e+00> : vector<2xf32>
    %748 = vector.multi_reduction <add>, %747, %cst_160 [1] : vector<2x128xf32> to vector<2xf32>
    %749 = vector.shape_cast %748 : vector<2xf32> to vector<2x1xf32>
    %750 = vector.broadcast %749 : vector<2x1xf32> to vector<2x128xf32>
    %751 = arith.divf %747, %750 : vector<2x128xf32>
    %752 = vector.shape_cast %751 : vector<2x128xf32> to vector<2x1x128xf32>
    "tpu.trace_start"() <{level = 10 : i32, message = "bqn,bmn->bqm"}> : () -> ()
    %cst_161 = arith.constant dense<0.000000e+00> : vector<2x1x20xf32>
    %753 = tpu.matmul %752, %726, %cst_161 {dimension_numbers = #tpu.dot_dimension_numbers<[2], [2], [1], [1], [0, 0, 0, 1, 1, 1], [0], [0]>} : vector<2x1x128xf32>, vector<2x20x128xf32>, vector<2x1x20xf32> -> vector<2x1x20xf32>
    "tpu.trace_stop"() : () -> ()
    %754 = vector.shape_cast %753 : vector<2x1x20xf32> to vector<2x20xf32>
    %cst_162 = arith.constant dense<0.000000e+00> : vector<2x8xf32>
    %755 = tpu.matmul %754, %6, %cst_162 {dimension_numbers = #tpu.dot_dimension_numbers<[1], [0], [0], [1], [0, 0, 1, 1], [], []>} : vector<2x20xf32>, vector<20x8xf32>, vector<2x8xf32> -> vector<2x8xf32>
    %756 = arith.addf %690, %755 : vector<2x8xf32>
    %c0_163 = arith.constant 0 : index
    %c6 = arith.constant 6 : index
    %c0_164 = arith.constant 0 : index
    %757 = vector.load %arg0[%c0_163, %c6, %c0_164] : memref<2x8x8xf32, #tpu.memory_space<vmem>>, vector<2x1x8xf32>
    %758 = vector.shape_cast %757 : vector<2x1x8xf32> to vector<2x8xf32>
    %cst_165 = arith.constant dense<0.000000e+00> : vector<2x128xf32>
    %759 = tpu.matmul %758, %0, %cst_165 {dimension_numbers = #tpu.dot_dimension_numbers<[1], [0], [0], [1], [0, 0, 1, 1], [], []>} : vector<2x8xf32>, vector<8x128xf32>, vector<2x128xf32> -> vector<2x128xf32>
    %cst_166 = arith.constant dense<0.000000e+00> : vector<2x128xf32>
    %760 = tpu.matmul %754, %1, %cst_166 {dimension_numbers = #tpu.dot_dimension_numbers<[1], [0], [0], [1], [0, 0, 1, 1], [], []>} : vector<2x20xf32>, vector<20x128xf32>, vector<2x128xf32> -> vector<2x128xf32>
    %761 = arith.addf %759, %760 : vector<2x128xf32>
    %cst_167 = arith.constant dense<0.000000e+00> : vector<2x128xf32>
    %762 = tpu.matmul %658, %2, %cst_167 {dimension_numbers = #tpu.dot_dimension_numbers<[1], [0], [0], [1], [0, 0, 1, 1], [], []>} : vector<2x32xf32>, vector<32x128xf32>, vector<2x128xf32> -> vector<2x128xf32>
    %763 = arith.addf %761, %762 : vector<2x128xf32>
    %764 = vector.broadcast %3 : vector<1x128xf32> to vector<2x128xf32>
    %765 = arith.addf %763, %764 : vector<2x128xf32>
    %766 = vector.extract_strided_slice %765 {offsets = [0, 0], sizes = [2, 96], strides = [1, 1]} : vector<2x128xf32> to vector<2x96xf32>
    %767 = arith.negf %766 : vector<2x96xf32>
    %768 = math.exp %767 : vector<2x96xf32>
    %cst_168 = arith.constant 1.000000e+00 : f32
    %769 = vector.broadcast %cst_168 : f32 to vector<2x96xf32>
    %770 = arith.addf %769, %768 : vector<2x96xf32>
    %771 = arith.divf %769, %770 : vector<2x96xf32>
    %772 = vector.extract_strided_slice %765 {offsets = [0, 96], sizes = [2, 32], strides = [1, 1]} : vector<2x128xf32> to vector<2x32xf32>
    %773 = math.tanh %772 : vector<2x32xf32>
    %774 = vector.extract_strided_slice %771 {offsets = [0, 0], sizes = [2, 32], strides = [1, 1]} : vector<2x96xf32> to vector<2x32xf32>
    %775 = vector.extract_strided_slice %771 {offsets = [0, 32], sizes = [2, 32], strides = [1, 1]} : vector<2x96xf32> to vector<2x32xf32>
    %776 = vector.extract_strided_slice %771 {offsets = [0, 64], sizes = [2, 32], strides = [1, 1]} : vector<2x96xf32> to vector<2x32xf32>
    %777 = arith.mulf %775, %656 : vector<2x32xf32>
    %778 = arith.mulf %774, %773 : vector<2x32xf32>
    %779 = arith.addf %777, %778 : vector<2x32xf32>
    %780 = math.tanh %779 : vector<2x32xf32>
    %781 = arith.mulf %776, %780 : vector<2x32xf32>
    %cst_169 = arith.constant dense<0.000000e+00> : vector<2x90xf32>
    %782 = tpu.matmul %781, %4, %cst_169 {dimension_numbers = #tpu.dot_dimension_numbers<[1], [0], [0], [1], [0, 0, 1, 1], [], []>} : vector<2x32xf32>, vector<32x90xf32>, vector<2x90xf32> -> vector<2x90xf32>
    %783 = vector.broadcast %5 : vector<1x90xf32> to vector<2x90xf32>
    %784 = arith.addf %782, %783 : vector<2x90xf32>
    %785 = vector.extract_strided_slice %784 {offsets = [0, 0], sizes = [2, 60], strides = [1, 1]} : vector<2x90xf32> to vector<2x60xf32>
    %786 = math.tanh %785 : vector<2x60xf32>
    %787 = vector.extract_strided_slice %786 {offsets = [0, 0], sizes = [2, 20], strides = [1, 1]} : vector<2x60xf32> to vector<2x20xf32>
    %788 = vector.extract_strided_slice %786 {offsets = [0, 20], sizes = [2, 20], strides = [1, 1]} : vector<2x60xf32> to vector<2x20xf32>
    %789 = vector.extract_strided_slice %786 {offsets = [0, 40], sizes = [2, 20], strides = [1, 1]} : vector<2x60xf32> to vector<2x20xf32>
    %790 = vector.extract_strided_slice %784 {offsets = [0, 60], sizes = [2, 20], strides = [1, 1]} : vector<2x90xf32> to vector<2x20xf32>
    %791 = arith.negf %790 : vector<2x20xf32>
    %792 = math.exp %791 : vector<2x20xf32>
    %cst_170 = arith.constant 1.000000e+00 : f32
    %793 = vector.broadcast %cst_170 : f32 to vector<2x20xf32>
    %794 = arith.addf %793, %792 : vector<2x20xf32>
    %795 = arith.divf %793, %794 : vector<2x20xf32>
    %796 = vector.extract_strided_slice %784 {offsets = [0, 80], sizes = [2, 2], strides = [1, 1]} : vector<2x90xf32> to vector<2x2xf32>
    %cst_171 = arith.constant 0.000000e+00 : f32
    %797 = vector.broadcast %cst_171 : f32 to vector<2x2xf32>
    %798 = arith.maximumf %796, %797 : vector<2x2xf32>
    %799 = vector.broadcast %cst_171 : f32 to vector<2x2xf32>
    %800 = arith.subf %796, %799 : vector<2x2xf32>
    %801 = arith.cmpf one, %800, %800 : vector<2x2xf32>
    %802 = vector.broadcast %cst_171 : f32 to vector<2x2xf32>
    %803 = arith.addf %796, %802 : vector<2x2xf32>
    %804 = math.absf %800 : vector<2x2xf32>
    %cst_172 = arith.constant 0.000000e+00 : f32
    %805 = vector.broadcast %cst_172 : f32 to vector<2x2xf32>
    %806 = arith.subf %805, %804 : vector<2x2xf32>
    %807 = math.exp %806 : vector<2x2xf32>
    %808 = math.log1p %807 : vector<2x2xf32>
    %809 = arith.addf %798, %808 : vector<2x2xf32>
    %810 = arith.select %801, %803, %809 : vector<2x2xi1>, vector<2x2xf32>
    %811 = vector.extract_strided_slice %810 {offsets = [0, 0], sizes = [2, 1], strides = [1, 1]} : vector<2x2xf32> to vector<2x1xf32>
    %812 = vector.extract_strided_slice %810 {offsets = [0, 1], sizes = [2, 1], strides = [1, 1]} : vector<2x2xf32> to vector<2x1xf32>
    %813 = vector.extract_strided_slice %784 {offsets = [0, 82], sizes = [2, 8], strides = [1, 1]} : vector<2x90xf32> to vector<2x8xf32>
    %814 = vector.shape_cast %787 : vector<2x20xf32> to vector<2x1x20xf32>
    "tpu.trace_start"() <{level = 10 : i32, message = "bqm,bmn->bqn"}> : () -> ()
    %cst_173 = arith.constant dense<0.000000e+00> : vector<2x1x128xf32>
    %815 = tpu.matmul %814, %726, %cst_173 {dimension_numbers = #tpu.dot_dimension_numbers<[2], [1], [1], [2], [0, 0, 0, 1, 1, 2], [0], [0]>} : vector<2x1x20xf32>, vector<2x20x128xf32>, vector<2x1x128xf32> -> vector<2x1x128xf32>
    "tpu.trace_stop"() : () -> ()
    %816 = vector.shape_cast %815 : vector<2x1x128xf32> to vector<2x128xf32>
    %817 = arith.mulf %787, %787 : vector<2x20xf32>
    %cst_174 = arith.constant dense<0.000000e+00> : vector<2xf32>
    %818 = vector.multi_reduction <add>, %817, %cst_174 [1] : vector<2x20xf32> to vector<2xf32>
    %819 = vector.shape_cast %818 : vector<2xf32> to vector<2x1xf32>
    %820 = vector.broadcast %819 : vector<2x1xf32> to vector<2x128xf32>
    %821 = arith.mulf %728, %820 : vector<2x128xf32>
    %cst_175 = arith.constant 9.99999993E-9 : f32
    %822 = vector.broadcast %cst_175 : f32 to vector<2x128xf32>
    %823 = arith.addf %821, %822 : vector<2x128xf32>
    %824 = math.rsqrt %823 : vector<2x128xf32>
    %825 = arith.mulf %816, %824 : vector<2x128xf32>
    %826 = vector.broadcast %811 : vector<2x1xf32> to vector<2x128xf32>
    %827 = arith.mulf %826, %825 : vector<2x128xf32>
    %cst_176 = arith.constant dense<0xFF800000> : vector<2xf32>
    %828 = vector.multi_reduction <maximumf>, %827, %cst_176 [1] : vector<2x128xf32> to vector<2xf32>
    %829 = vector.shape_cast %828 : vector<2xf32> to vector<2x1xf32>
    %830 = vector.broadcast %829 : vector<2x1xf32> to vector<2x128xf32>
    %831 = arith.subf %827, %830 : vector<2x128xf32>
    %832 = math.exp %831 : vector<2x128xf32>
    %cst_177 = arith.constant dense<0.000000e+00> : vector<2xf32>
    %833 = vector.multi_reduction <add>, %832, %cst_177 [1] : vector<2x128xf32> to vector<2xf32>
    %834 = vector.shape_cast %833 : vector<2xf32> to vector<2x1xf32>
    %835 = vector.broadcast %834 : vector<2x1xf32> to vector<2x128xf32>
    %836 = arith.divf %832, %835 : vector<2x128xf32>
    %837 = vector.shape_cast %836 : vector<2x128xf32> to vector<2x1x128xf32>
    %838 = vector.shape_cast %795 : vector<2x20xf32> to vector<2x20x1xf32>
    %839 = vector.broadcast %838 : vector<2x20x1xf32> to vector<2x20x128xf32>
    %840 = vector.broadcast %837 : vector<2x1x128xf32> to vector<2x20x128xf32>
    %841 = arith.mulf %839, %840 : vector<2x20x128xf32>
    %cst_178 = arith.constant 1.000000e+00 : f32
    %842 = vector.broadcast %cst_178 : f32 to vector<2x20x128xf32>
    %843 = arith.subf %842, %841 : vector<2x20x128xf32>
    %844 = arith.mulf %726, %843 : vector<2x20x128xf32>
    %845 = vector.shape_cast %788 : vector<2x20xf32> to vector<2x20x1xf32>
    %846 = vector.broadcast %845 : vector<2x20x1xf32> to vector<2x20x128xf32>
    %847 = vector.broadcast %837 : vector<2x1x128xf32> to vector<2x20x128xf32>
    %848 = arith.mulf %846, %847 : vector<2x20x128xf32>
    %849 = arith.addf %844, %848 : vector<2x20x128xf32>
    %850 = arith.mulf %849, %849 : vector<2x20x128xf32>
    %cst_179 = arith.constant dense<0.000000e+00> : vector<2x128xf32>
    %851 = vector.multi_reduction <add>, %850, %cst_179 [1] : vector<2x20x128xf32> to vector<2x128xf32>
    %852 = vector.shape_cast %789 : vector<2x20xf32> to vector<2x1x20xf32>
    "tpu.trace_start"() <{level = 10 : i32, message = "bqm,bmn->bqn"}> : () -> ()
    %cst_180 = arith.constant dense<0.000000e+00> : vector<2x1x128xf32>
    %853 = tpu.matmul %852, %849, %cst_180 {dimension_numbers = #tpu.dot_dimension_numbers<[2], [1], [1], [2], [0, 0, 0, 1, 1, 2], [0], [0]>} : vector<2x1x20xf32>, vector<2x20x128xf32>, vector<2x1x128xf32> -> vector<2x1x128xf32>
    "tpu.trace_stop"() : () -> ()
    %854 = vector.shape_cast %853 : vector<2x1x128xf32> to vector<2x128xf32>
    %855 = arith.mulf %789, %789 : vector<2x20xf32>
    %cst_181 = arith.constant dense<0.000000e+00> : vector<2xf32>
    %856 = vector.multi_reduction <add>, %855, %cst_181 [1] : vector<2x20xf32> to vector<2xf32>
    %857 = vector.shape_cast %856 : vector<2xf32> to vector<2x1xf32>
    %858 = vector.broadcast %857 : vector<2x1xf32> to vector<2x128xf32>
    %859 = arith.mulf %851, %858 : vector<2x128xf32>
    %cst_182 = arith.constant 9.99999993E-9 : f32
    %860 = vector.broadcast %cst_182 : f32 to vector<2x128xf32>
    %861 = arith.addf %859, %860 : vector<2x128xf32>
    %862 = math.rsqrt %861 : vector<2x128xf32>
    %863 = arith.mulf %854, %862 : vector<2x128xf32>
    %864 = vector.broadcast %812 : vector<2x1xf32> to vector<2x128xf32>
    %865 = arith.mulf %864, %863 : vector<2x128xf32>
    %cst_183 = arith.constant dense<0xFF800000> : vector<2xf32>
    %866 = vector.multi_reduction <maximumf>, %865, %cst_183 [1] : vector<2x128xf32> to vector<2xf32>
    %867 = vector.shape_cast %866 : vector<2xf32> to vector<2x1xf32>
    %868 = vector.broadcast %867 : vector<2x1xf32> to vector<2x128xf32>
    %869 = arith.subf %865, %868 : vector<2x128xf32>
    %870 = math.exp %869 : vector<2x128xf32>
    %cst_184 = arith.constant dense<0.000000e+00> : vector<2xf32>
    %871 = vector.multi_reduction <add>, %870, %cst_184 [1] : vector<2x128xf32> to vector<2xf32>
    %872 = vector.shape_cast %871 : vector<2xf32> to vector<2x1xf32>
    %873 = vector.broadcast %872 : vector<2x1xf32> to vector<2x128xf32>
    %874 = arith.divf %870, %873 : vector<2x128xf32>
    %875 = vector.shape_cast %874 : vector<2x128xf32> to vector<2x1x128xf32>
    "tpu.trace_start"() <{level = 10 : i32, message = "bqn,bmn->bqm"}> : () -> ()
    %cst_185 = arith.constant dense<0.000000e+00> : vector<2x1x20xf32>
    %876 = tpu.matmul %875, %849, %cst_185 {dimension_numbers = #tpu.dot_dimension_numbers<[2], [2], [1], [1], [0, 0, 0, 1, 1, 1], [0], [0]>} : vector<2x1x128xf32>, vector<2x20x128xf32>, vector<2x1x20xf32> -> vector<2x1x20xf32>
    "tpu.trace_stop"() : () -> ()
    %877 = vector.shape_cast %876 : vector<2x1x20xf32> to vector<2x20xf32>
    %cst_186 = arith.constant dense<0.000000e+00> : vector<2x8xf32>
    %878 = tpu.matmul %877, %6, %cst_186 {dimension_numbers = #tpu.dot_dimension_numbers<[1], [0], [0], [1], [0, 0, 1, 1], [], []>} : vector<2x20xf32>, vector<20x8xf32>, vector<2x8xf32> -> vector<2x8xf32>
    %879 = arith.addf %813, %878 : vector<2x8xf32>
    %c0_187 = arith.constant 0 : index
    %c7 = arith.constant 7 : index
    %c0_188 = arith.constant 0 : index
    %880 = vector.load %arg0[%c0_187, %c7, %c0_188] : memref<2x8x8xf32, #tpu.memory_space<vmem>>, vector<2x1x8xf32>
    %881 = vector.shape_cast %880 : vector<2x1x8xf32> to vector<2x8xf32>
    %cst_189 = arith.constant dense<0.000000e+00> : vector<2x128xf32>
    %882 = tpu.matmul %881, %0, %cst_189 {dimension_numbers = #tpu.dot_dimension_numbers<[1], [0], [0], [1], [0, 0, 1, 1], [], []>} : vector<2x8xf32>, vector<8x128xf32>, vector<2x128xf32> -> vector<2x128xf32>
    %cst_190 = arith.constant dense<0.000000e+00> : vector<2x128xf32>
    %883 = tpu.matmul %877, %1, %cst_190 {dimension_numbers = #tpu.dot_dimension_numbers<[1], [0], [0], [1], [0, 0, 1, 1], [], []>} : vector<2x20xf32>, vector<20x128xf32>, vector<2x128xf32> -> vector<2x128xf32>
    %884 = arith.addf %882, %883 : vector<2x128xf32>
    %cst_191 = arith.constant dense<0.000000e+00> : vector<2x128xf32>
    %885 = tpu.matmul %781, %2, %cst_191 {dimension_numbers = #tpu.dot_dimension_numbers<[1], [0], [0], [1], [0, 0, 1, 1], [], []>} : vector<2x32xf32>, vector<32x128xf32>, vector<2x128xf32> -> vector<2x128xf32>
    %886 = arith.addf %884, %885 : vector<2x128xf32>
    %887 = vector.broadcast %3 : vector<1x128xf32> to vector<2x128xf32>
    %888 = arith.addf %886, %887 : vector<2x128xf32>
    %889 = vector.extract_strided_slice %888 {offsets = [0, 0], sizes = [2, 96], strides = [1, 1]} : vector<2x128xf32> to vector<2x96xf32>
    %890 = arith.negf %889 : vector<2x96xf32>
    %891 = math.exp %890 : vector<2x96xf32>
    %cst_192 = arith.constant 1.000000e+00 : f32
    %892 = vector.broadcast %cst_192 : f32 to vector<2x96xf32>
    %893 = arith.addf %892, %891 : vector<2x96xf32>
    %894 = arith.divf %892, %893 : vector<2x96xf32>
    %895 = vector.extract_strided_slice %888 {offsets = [0, 96], sizes = [2, 32], strides = [1, 1]} : vector<2x128xf32> to vector<2x32xf32>
    %896 = math.tanh %895 : vector<2x32xf32>
    %897 = vector.extract_strided_slice %894 {offsets = [0, 0], sizes = [2, 32], strides = [1, 1]} : vector<2x96xf32> to vector<2x32xf32>
    %898 = vector.extract_strided_slice %894 {offsets = [0, 32], sizes = [2, 32], strides = [1, 1]} : vector<2x96xf32> to vector<2x32xf32>
    %899 = vector.extract_strided_slice %894 {offsets = [0, 64], sizes = [2, 32], strides = [1, 1]} : vector<2x96xf32> to vector<2x32xf32>
    %900 = arith.mulf %898, %779 : vector<2x32xf32>
    %901 = arith.mulf %897, %896 : vector<2x32xf32>
    %902 = arith.addf %900, %901 : vector<2x32xf32>
    %903 = math.tanh %902 : vector<2x32xf32>
    %904 = arith.mulf %899, %903 : vector<2x32xf32>
    %cst_193 = arith.constant dense<0.000000e+00> : vector<2x90xf32>
    %905 = tpu.matmul %904, %4, %cst_193 {dimension_numbers = #tpu.dot_dimension_numbers<[1], [0], [0], [1], [0, 0, 1, 1], [], []>} : vector<2x32xf32>, vector<32x90xf32>, vector<2x90xf32> -> vector<2x90xf32>
    %906 = vector.broadcast %5 : vector<1x90xf32> to vector<2x90xf32>
    %907 = arith.addf %905, %906 : vector<2x90xf32>
    %908 = vector.extract_strided_slice %907 {offsets = [0, 0], sizes = [2, 60], strides = [1, 1]} : vector<2x90xf32> to vector<2x60xf32>
    %909 = math.tanh %908 : vector<2x60xf32>
    %910 = vector.extract_strided_slice %909 {offsets = [0, 0], sizes = [2, 20], strides = [1, 1]} : vector<2x60xf32> to vector<2x20xf32>
    %911 = vector.extract_strided_slice %909 {offsets = [0, 20], sizes = [2, 20], strides = [1, 1]} : vector<2x60xf32> to vector<2x20xf32>
    %912 = vector.extract_strided_slice %909 {offsets = [0, 40], sizes = [2, 20], strides = [1, 1]} : vector<2x60xf32> to vector<2x20xf32>
    %913 = vector.extract_strided_slice %907 {offsets = [0, 60], sizes = [2, 20], strides = [1, 1]} : vector<2x90xf32> to vector<2x20xf32>
    %914 = arith.negf %913 : vector<2x20xf32>
    %915 = math.exp %914 : vector<2x20xf32>
    %cst_194 = arith.constant 1.000000e+00 : f32
    %916 = vector.broadcast %cst_194 : f32 to vector<2x20xf32>
    %917 = arith.addf %916, %915 : vector<2x20xf32>
    %918 = arith.divf %916, %917 : vector<2x20xf32>
    %919 = vector.extract_strided_slice %907 {offsets = [0, 80], sizes = [2, 2], strides = [1, 1]} : vector<2x90xf32> to vector<2x2xf32>
    %cst_195 = arith.constant 0.000000e+00 : f32
    %920 = vector.broadcast %cst_195 : f32 to vector<2x2xf32>
    %921 = arith.maximumf %919, %920 : vector<2x2xf32>
    %922 = vector.broadcast %cst_195 : f32 to vector<2x2xf32>
    %923 = arith.subf %919, %922 : vector<2x2xf32>
    %924 = arith.cmpf one, %923, %923 : vector<2x2xf32>
    %925 = vector.broadcast %cst_195 : f32 to vector<2x2xf32>
    %926 = arith.addf %919, %925 : vector<2x2xf32>
    %927 = math.absf %923 : vector<2x2xf32>
    %cst_196 = arith.constant 0.000000e+00 : f32
    %928 = vector.broadcast %cst_196 : f32 to vector<2x2xf32>
    %929 = arith.subf %928, %927 : vector<2x2xf32>
    %930 = math.exp %929 : vector<2x2xf32>
    %931 = math.log1p %930 : vector<2x2xf32>
    %932 = arith.addf %921, %931 : vector<2x2xf32>
    %933 = arith.select %924, %926, %932 : vector<2x2xi1>, vector<2x2xf32>
    %934 = vector.extract_strided_slice %933 {offsets = [0, 0], sizes = [2, 1], strides = [1, 1]} : vector<2x2xf32> to vector<2x1xf32>
    %935 = vector.extract_strided_slice %933 {offsets = [0, 1], sizes = [2, 1], strides = [1, 1]} : vector<2x2xf32> to vector<2x1xf32>
    %936 = vector.extract_strided_slice %907 {offsets = [0, 82], sizes = [2, 8], strides = [1, 1]} : vector<2x90xf32> to vector<2x8xf32>
    %937 = vector.shape_cast %910 : vector<2x20xf32> to vector<2x1x20xf32>
    "tpu.trace_start"() <{level = 10 : i32, message = "bqm,bmn->bqn"}> : () -> ()
    %cst_197 = arith.constant dense<0.000000e+00> : vector<2x1x128xf32>
    %938 = tpu.matmul %937, %849, %cst_197 {dimension_numbers = #tpu.dot_dimension_numbers<[2], [1], [1], [2], [0, 0, 0, 1, 1, 2], [0], [0]>} : vector<2x1x20xf32>, vector<2x20x128xf32>, vector<2x1x128xf32> -> vector<2x1x128xf32>
    "tpu.trace_stop"() : () -> ()
    %939 = vector.shape_cast %938 : vector<2x1x128xf32> to vector<2x128xf32>
    %940 = arith.mulf %910, %910 : vector<2x20xf32>
    %cst_198 = arith.constant dense<0.000000e+00> : vector<2xf32>
    %941 = vector.multi_reduction <add>, %940, %cst_198 [1] : vector<2x20xf32> to vector<2xf32>
    %942 = vector.shape_cast %941 : vector<2xf32> to vector<2x1xf32>
    %943 = vector.broadcast %942 : vector<2x1xf32> to vector<2x128xf32>
    %944 = arith.mulf %851, %943 : vector<2x128xf32>
    %cst_199 = arith.constant 9.99999993E-9 : f32
    %945 = vector.broadcast %cst_199 : f32 to vector<2x128xf32>
    %946 = arith.addf %944, %945 : vector<2x128xf32>
    %947 = math.rsqrt %946 : vector<2x128xf32>
    %948 = arith.mulf %939, %947 : vector<2x128xf32>
    %949 = vector.broadcast %934 : vector<2x1xf32> to vector<2x128xf32>
    %950 = arith.mulf %949, %948 : vector<2x128xf32>
    %cst_200 = arith.constant dense<0xFF800000> : vector<2xf32>
    %951 = vector.multi_reduction <maximumf>, %950, %cst_200 [1] : vector<2x128xf32> to vector<2xf32>
    %952 = vector.shape_cast %951 : vector<2xf32> to vector<2x1xf32>
    %953 = vector.broadcast %952 : vector<2x1xf32> to vector<2x128xf32>
    %954 = arith.subf %950, %953 : vector<2x128xf32>
    %955 = math.exp %954 : vector<2x128xf32>
    %cst_201 = arith.constant dense<0.000000e+00> : vector<2xf32>
    %956 = vector.multi_reduction <add>, %955, %cst_201 [1] : vector<2x128xf32> to vector<2xf32>
    %957 = vector.shape_cast %956 : vector<2xf32> to vector<2x1xf32>
    %958 = vector.broadcast %957 : vector<2x1xf32> to vector<2x128xf32>
    %959 = arith.divf %955, %958 : vector<2x128xf32>
    %960 = vector.shape_cast %959 : vector<2x128xf32> to vector<2x1x128xf32>
    %961 = vector.shape_cast %918 : vector<2x20xf32> to vector<2x20x1xf32>
    %962 = vector.broadcast %961 : vector<2x20x1xf32> to vector<2x20x128xf32>
    %963 = vector.broadcast %960 : vector<2x1x128xf32> to vector<2x20x128xf32>
    %964 = arith.mulf %962, %963 : vector<2x20x128xf32>
    %cst_202 = arith.constant 1.000000e+00 : f32
    %965 = vector.broadcast %cst_202 : f32 to vector<2x20x128xf32>
    %966 = arith.subf %965, %964 : vector<2x20x128xf32>
    %967 = arith.mulf %849, %966 : vector<2x20x128xf32>
    %968 = vector.shape_cast %911 : vector<2x20xf32> to vector<2x20x1xf32>
    %969 = vector.broadcast %968 : vector<2x20x1xf32> to vector<2x20x128xf32>
    %970 = vector.broadcast %960 : vector<2x1x128xf32> to vector<2x20x128xf32>
    %971 = arith.mulf %969, %970 : vector<2x20x128xf32>
    %972 = arith.addf %967, %971 : vector<2x20x128xf32>
    %973 = arith.mulf %972, %972 : vector<2x20x128xf32>
    %cst_203 = arith.constant dense<0.000000e+00> : vector<2x128xf32>
    %974 = vector.multi_reduction <add>, %973, %cst_203 [1] : vector<2x20x128xf32> to vector<2x128xf32>
    %975 = vector.shape_cast %912 : vector<2x20xf32> to vector<2x1x20xf32>
    "tpu.trace_start"() <{level = 10 : i32, message = "bqm,bmn->bqn"}> : () -> ()
    %cst_204 = arith.constant dense<0.000000e+00> : vector<2x1x128xf32>
    %976 = tpu.matmul %975, %972, %cst_204 {dimension_numbers = #tpu.dot_dimension_numbers<[2], [1], [1], [2], [0, 0, 0, 1, 1, 2], [0], [0]>} : vector<2x1x20xf32>, vector<2x20x128xf32>, vector<2x1x128xf32> -> vector<2x1x128xf32>
    "tpu.trace_stop"() : () -> ()
    %977 = vector.shape_cast %976 : vector<2x1x128xf32> to vector<2x128xf32>
    %978 = arith.mulf %912, %912 : vector<2x20xf32>
    %cst_205 = arith.constant dense<0.000000e+00> : vector<2xf32>
    %979 = vector.multi_reduction <add>, %978, %cst_205 [1] : vector<2x20xf32> to vector<2xf32>
    %980 = vector.shape_cast %979 : vector<2xf32> to vector<2x1xf32>
    %981 = vector.broadcast %980 : vector<2x1xf32> to vector<2x128xf32>
    %982 = arith.mulf %974, %981 : vector<2x128xf32>
    %cst_206 = arith.constant 9.99999993E-9 : f32
    %983 = vector.broadcast %cst_206 : f32 to vector<2x128xf32>
    %984 = arith.addf %982, %983 : vector<2x128xf32>
    %985 = math.rsqrt %984 : vector<2x128xf32>
    %986 = arith.mulf %977, %985 : vector<2x128xf32>
    %987 = vector.broadcast %935 : vector<2x1xf32> to vector<2x128xf32>
    %988 = arith.mulf %987, %986 : vector<2x128xf32>
    %cst_207 = arith.constant dense<0xFF800000> : vector<2xf32>
    %989 = vector.multi_reduction <maximumf>, %988, %cst_207 [1] : vector<2x128xf32> to vector<2xf32>
    %990 = vector.shape_cast %989 : vector<2xf32> to vector<2x1xf32>
    %991 = vector.broadcast %990 : vector<2x1xf32> to vector<2x128xf32>
    %992 = arith.subf %988, %991 : vector<2x128xf32>
    %993 = math.exp %992 : vector<2x128xf32>
    %cst_208 = arith.constant dense<0.000000e+00> : vector<2xf32>
    %994 = vector.multi_reduction <add>, %993, %cst_208 [1] : vector<2x128xf32> to vector<2xf32>
    %995 = vector.shape_cast %994 : vector<2xf32> to vector<2x1xf32>
    %996 = vector.broadcast %995 : vector<2x1xf32> to vector<2x128xf32>
    %997 = arith.divf %993, %996 : vector<2x128xf32>
    %998 = vector.shape_cast %997 : vector<2x128xf32> to vector<2x1x128xf32>
    "tpu.trace_start"() <{level = 10 : i32, message = "bqn,bmn->bqm"}> : () -> ()
    %cst_209 = arith.constant dense<0.000000e+00> : vector<2x1x20xf32>
    %999 = tpu.matmul %998, %972, %cst_209 {dimension_numbers = #tpu.dot_dimension_numbers<[2], [2], [1], [1], [0, 0, 0, 1, 1, 1], [0], [0]>} : vector<2x1x128xf32>, vector<2x20x128xf32>, vector<2x1x20xf32> -> vector<2x1x20xf32>
    "tpu.trace_stop"() : () -> ()
    %1000 = vector.shape_cast %999 : vector<2x1x20xf32> to vector<2x20xf32>
    %cst_210 = arith.constant dense<0.000000e+00> : vector<2x8xf32>
    %1001 = tpu.matmul %1000, %6, %cst_210 {dimension_numbers = #tpu.dot_dimension_numbers<[1], [0], [0], [1], [0, 0, 1, 1], [], []>} : vector<2x20xf32>, vector<20x8xf32>, vector<2x8xf32> -> vector<2x8xf32>
    %1002 = arith.addf %936, %1001 : vector<2x8xf32>
    %1003 = tpu.concatenate %141, %264, %387, %510, %633, %756, %879, %1002 in 1 : vector<2x8xf32>, vector<2x8xf32>, vector<2x8xf32>, vector<2x8xf32>, vector<2x8xf32>, vector<2x8xf32>, vector<2x8xf32>, vector<2x8xf32> -> vector<2x64xf32>
    %c0_211 = arith.constant 0 : index
    %c0_212 = arith.constant 0 : index
    %1004 = vector.load %arg9[%c0_211, %c0_212] : memref<2x64xf32, #tpu.memory_space<vmem>>, vector<2x64xf32>
    tpu.vector_store %arg9[%c0_211, %c0_212], %1003 {strides = array<i32>} : memref<2x64xf32, #tpu.memory_space<vmem>>, vector<2x64xf32>,
    return
  }
}

</mosaic_0001>

<bundles_post_ra>
// kernel: ntm_forward.1
= control target key start
LH: loop header
LB: loop body
LE: loop exit
PB: predicated region body
PF: predicated region fallthrough
CT: control target
= control target key end

     0   :  { %vm56_vm0 = vcmask 1043456   ;;  %vm97_vm1 = vcmask 1041409   ;;  %vm99_vm2 = vcmask 64512   ;;  %v5682_v12 = vmov 0.0   ;;  %s5683_s10 = smov 32   ;;  %s5684_s19 = smov 64   ;;  %s7416_s3 = inlined_call_operand.vmem [shape: f32[32,128], index: 3, kind: input, shape index: {}]   ;;  %s7417_s1 = inlined_call_operand.vmem [shape: f32[8,128], index: 1, kind: input, shape index: {}]   ;;  %s7418_s0 = inlined_call_operand.vmem [shape: f32[2,8,8], index: 0, kind: input, shape index: {}]   ;;  %s7419_s2 = inlined_call_operand.vmem [shape: f32[20,128], index: 2, kind: input, shape index: {}]   ;;  %s7420_s4 = inlined_call_operand.vmem [shape: f32[1,128], index: 4, kind: input, shape index: {}]   ;;  %s7421_s5 = inlined_call_operand.vmem [shape: f32[32,90], index: 5, kind: input, shape index: {}]   ;;  %s7422_s6 = inlined_call_operand.vmem [shape: f32[1,90], index: 6, kind: input, shape index: {}]   ;;  %s7423_s8 = inlined_call_operand.vmem [shape: f32[20,128], index: 8, kind: input, shape index: {}]   ;;  %s7424_s7 = inlined_call_operand.vmem [shape: f32[20,8], index: 7, kind: input, shape index: {}]   ;;  %s7425_s9 = inlined_call_operand.vmem [shape: f32[2,64], index: 9, kind: output, shape index: {}]  }
   0x1   :  { %v5750_v0 = vld [vmem:[%s7416_s3 + $0x18] sm:$0xff]  ;;  %v5755_v1 = vld [vmem:[%s7416_s3 + $0x10] sm:$0xff]  ;;  %v5760_v2 = vld [vmem:[%s7417_s1] sm:$0xff]  ;;  %vm122_vm7 = vcmask 261120   ;;  %v364_v47 = vlaneseq  ;;  %v7426_v54 = vmov 80   ;;  %vm67_vm8 = vcmask 162816  }
   0x2   :  { %137 = vmatpush.msra.mxu2 %v5750_v0  ;;  %117 = vmatpush.msra.mxu3 %v5760_v2  ;;  %v65_v3 = vld [vmem:[%s7418_s0] sm:$0x1]  ;;  %v66_v4 = vld [vmem:[%s7418_s0 + $0x8] sm:$0x1]  ;;  %v5778_v7 = vld [vmem:[%s7419_s2 + $0x10] sm:$0xf] }
   0x3   :  { %v5773_v5 = vld [vmem:[%s7416_s3 + $0x8] sm:$0xff]  ;;  %v96_v6 = vrot.slane %v66_v4, 7  ;;  %5105 = vmatpush.msk.msra.mxu0 %vm56_vm0, %v5778_v7  ;;  %v5792_v10 = vld [vmem:[%s7416_s3] sm:$0xff]  ;;  %v5819_v40 = vld [vmem:[%s7421_s5 + $0x18] sm:$0xff]  ;;  %v5845_v48 = vshrl.u32 %v364_v47, 7  ;;  %5254 = vset.pattern.permute.xlu2 %v7426_v54  ;;  %vm303_vm9 = vcmask 156672  }
   0x4   :  { %138 = vmatpush.msra.mxu2 %v5755_v1  ;;  %v5786_v8 = vld [vmem:[%s7419_s2 + $0x8] sm:$0xff]  ;;  %v5799_v11 = vld [vmem:[%s7419_s2] sm:$0xff]  ;;  %v5824_v41 = vld [vmem:[%s7421_s5 + $0x10] sm:$0xff]  ;;  %207 = vmatpush.msrb.mxu3 %v5819_v40  ;;  %s5692_s22 = smov 70   ;;  %s5693_s23 = smov 94  }
   0x5   :  { %v98_v9 = vsel %vm97_vm1, %v96_v6, %v65_v3  ;;  %88 = vmatpush.msra.mxu0 %v5786_v8  ;;  %v5807_v16 = vld [vmem:[%s7420_s4] ss:$0 sm:$0xff]  ;;  %v5830_v42 = vld [vmem:[%s7421_s5 + $0x8] sm:$0xff]  ;;  %v5848_v49 = vadd.s32 36, %v5845_v48  ;;  %v5854_v50 = vld [vmem:[%s7423_s8 + $0x10] sm:$0xf] }
   0x6   :  { %139 = vmatpush.msra.mxu2 %v5773_v5  ;;  %5106 = vmatmul.msk.f32.vlgmr.msra.gmra.mxu3 %vm99_vm2, %v98_v9  ;;  %v5836_v43 = vld [vmem:[%s7421_s5] sm:$0xff]  ;;  %v5863_v51 = vld [vmem:[%s7423_s8 + $0x8] sm:$0xff]  ;;  %s5694_s24 = smov 62   ;;  %s5695_s25 = smov 86  }
   0x7   :  { %89 = vmatpush.msra.mxu0 %v5799_v11  ;;  %208 = vmatpush.msrb.mxu3 %v5824_v41  ;;  %v5870_v52 = vld [vmem:[%s7423_s8] sm:$0xff]  ;;  %s5686_s8 = smov 88   ;;  %s5696_s26 = smov 102  }
   0x8   :  { %140 = vmatpush.msra.mxu2 %v5792_v10  ;;  %90 = vmatmul.f32.vlgmr.msra.gmra.mxu0 %v5682_v12  ;;  %v5877_v53 = vld [vmem:[%s7422_s6] ss:$0 sm:$0xff] }
   0x9   :  { %141 = vmatmul.f32.vlgmr.msra.gmra.mxu2 %v5682_v12  ;;  %209 = vmatpush.msrb.mxu3 %v5830_v42  ;;  %v5905_v12 = vadd.s32 28, %v5845_v48 }
   0xa   :  { %5258 = vset.pattern.permute.xlu1 %v5848_v49  ;;  %5110 = vmatpush.msk.msra.mxu1 %vm56_vm0, %v5854_v50 }
   0xb   :  { %210 = vmatpush.msrb.mxu3 %v5836_v43  ;;  %5112 = vmatpush.msk.msrb.mxu0 %vm56_vm0, %v5854_v50 }
   0xc   :  { %274 = vmatpush.msra.mxu1 %v5863_v51 }
   0xd   :  { %296 = vmatpush.msrb.mxu0 %v5863_v51 }
   0xe   :  { %275 = vmatpush.msra.mxu1 %v5870_v52 }
   0xf   :  { %297 = vmatpush.msrb.mxu0 %v5870_v52 }
  0x85   :  { %v91_v13 = vpop.f32.mrf.mxu0 }
  0x89   :  { %v119_v14 = vpop.f32.mrf.mxu3 }
  0x8a   :  { %v120_v15 = vadd.f32 %v119_v14, %v91_v13 }
  0x8c   :  { %v142_v17 = vpop.f32.mrf.mxu2 }
  0x8d   :  { %v145_v18 = vadd.f32 %v142_v17, %v120_v15 }
  0x8f   :  { %v149_v19 = vadd.f32 %v5807_v16, %v145_v18 }
  0x91   :  { %5361 = vtanh.f32 %v149_v19  ;;  %v5107_v21 = vmul.f32 -1.442695, %v149_v19 }
  0x93   :  { %5363 = vpow2.f32 %v5107_v21 }
  0x97   :  { %v5362_v20 = vpop.eup %5361 }
  0x98   :  { %172 = vrot.lane.b32.xlu0 %v5362_v20, %s5683_s10 }
  0x99   :  { %v5364_v22 = vpop.eup %5363 }
  0x9a   :  { %v153_v23 = vadd.f32 1.0, %v5364_v22 }
  0x9c   :  { %5365 = vrcp.f32 %v153_v23  ;;  %v165_v29 = vand.u32 2147483648, %v153_v23  ;;  %vm159_vm4 = vweird.f32 %v153_v23  ;;  %v163_v30 = vand.u32 2147483647, %v153_v23 }
  0x9e   :  { %v166_v32 = vor.u32 1.1754944e-38, %v165_v29  ;;  %vm164_vm6 = vcmp.eq.f32.partialorder %v163_v30, 8.507059e+37  ;;  %v5914_v29 = vadd.s32 20, %v5845_v48 }
  0xa2   :  { %v5366_v24 = vpop.eup %5365 }
  0xa3   :  { %v155_v25 = vmul.f32 %v5366_v24, %v153_v23  ;;  %vm160_vm3 = vweird.f32 %v5366_v24 }
  0xa4   :  { %vm161_vm5 = vmor %vm159_vm4, %vm160_vm3 }
  0xa5   :  { %v156_v26 = vsub.f32 1.0, %v155_v25 }
  0xa7   :  { %v157_v27 = vmul.f32 %v5366_v24, %v156_v26 }
  0xa9   :  { %v158_v28 = vadd.f32 %v5366_v24, %v157_v27 }
  0xab   :  { %v162_v31 = vsel %vm161_vm5, %v5366_v24, %v158_v28 }
  0xac   :  { %v167_v34 = vsel %vm164_vm6, %v166_v32, %v162_v31  ;;  %v5924_v32 = vadd.s32 76, %v5845_v48  ;;  %vm336_vm6 = vcmask 1041408  }
  0xad   :  { %v170_v36 = vmul.f32 0.0, %v167_v34 }
 0x10a   :  { %v173_v33 = vpop.permute.xlu0 %172 }
 0x10b   :  { %v175_v35 = vmul.f32 %v173_v33, %v167_v34 }
 0x10d   :  { %177 = vrot.lane.b32.xlu0 %v175_v35, %s5683_s10 }
 0x17f   :  { %v178_v37 = vpop.permute.xlu0 %177 }
 0x180   :  { %v5812_v38 = vadd.f32 %v178_v37, %v170_v36 }
 0x182   :  { %5367 = vtanh.f32 %v5812_v38 }
 0x188   :  { %v5368_v39 = vpop.eup %5367 }
 0x189   :  { %183 = vrot.lane.b32.xlu1 %v5368_v39, %s5683_s10 }
 0x1fb   :  { %v184_v44 = vpop.permute.xlu1 %183 }
 0x1fc   :  { %v186_v45 = vmul.f32 %v184_v44, %v167_v34 }
 0x1fe   :  { %191 = vrot.lane.b32.xlu1 %v186_v45, %s5684_s19  ;;  %v5928_v45 = vadd.s32 60, %v5845_v48 }
 0x200   :  { %5257 = vset.pattern.permute.xlu0 %v5928_v45 }
 0x270   :  { %v5841_v46 = vpop.permute.xlu1 %191 }
 0x271   :  { %5108 = vmatmul.msk.f32.vlgmr.msrb.gmra.mxu3 %vm122_vm7, %v5841_v46 }
 0x2f4   :  { %v212_v55 = vpop.f32.mrf.mxu3 }
 0x2f5   :  { %v5881_v56 = vadd.f32 %v5877_v53, %v212_v55  ;;  %v5932_v55 = vadd.s32 68, %v5845_v48 }
 0x2f7   :  { %7435 = vst [vmem:[#allocation2_spill] sm:$0xff] %v5881_v56  ;;  %5369 = vtanh.f32 %v5881_v56  ;;  %v238_v57 = vand.u32 2147483647, %v5881_v56  ;;  %v5109_v58 = vmul.f32 -1.442695, %v5881_v56  ;;  %v235_v26 = vmax.f32 %v5881_v56, 0.0 }
 0x2f8   :  { %vm236_vm11 = vcmp.ne.f32.partialorder %v5881_v56, %v5881_v56 }
 0x2f9   :  { %v239_v59 = vsub.f32 0.0, %v238_v57  ;;  %5371 = vpow2.f32 %v5109_v58  ;;  %v53_v57 = vmul.f32 %v5863_v51, %v5863_v51  ;;  %v52_v58 = vmul.f32 %v5870_v52, %v5870_v52 }
 0x2fb   :  { %v240_v60 = vmul.f32 1.442695, %v239_v59  ;;  %v54_v59 = vmul.f32 %v5854_v50, %v5854_v50 }
 0x2fd   :  { %v5886_v61 = vpop.eup %5369  ;;  %5373 = vpow2.f32 %v240_v60  ;;  %v55_v60 = vadd.f32 %v53_v57, %v52_v58 }
 0x2fe   :  { %5111 = vmatmul.msk.f32.vlgmr.msra.gmra.mxu1 %vm67_vm8, %v5886_v61  ;;  %v5891_v62 = vperm.slane %v5886_v61, 1  ;;  %v254_v63 = vrot.slane %v5886_v61, 1  ;;  %v5896_v3 = vmul.f32 %v5886_v61, %v5886_v61  ;;  %v5909_v22 = vperm.slane %v5886_v61, 0 }
 0x2ff   :  { %v5372_v6 = vpop.eup %5371 }
 0x300   :  { %459 = vperm.xlu1 %5258, %v5891_v62   ;;  %5113 = vmatmul.msk.f32.vlgmr.msrb.gmra.mxu0 %vm67_vm8, %v254_v63  ;;  %v304_v4 = vsel %vm303_vm9, %v5896_v3, 0.0  ;;  %v219_v14 = vadd.f32 1.0, %v5372_v6 }
 0x301   :  { %305 = vadd.xlane.f32.xlu2 %v304_v4  ;;  %v57_v4 = vsel %vm56_vm0, %v54_v59, 0.0  ;;  %v7428_v59 = vmov 81  }
 0x302   :  { %v231_v34 = vand.u32 2147483648, %v219_v14  ;;  %vm225_vm13 = vweird.f32 %v219_v14  ;;  %v229_v35 = vand.u32 2147483647, %v219_v14  ;;  %v58_v48 = vadd.f32 %v57_v4, %v55_v60 }
 0x303   :  { %v5374_v9 = vpop.eup %5373 }
 0x304   :  { %v242_v13 = vadd.f32 1.0, %v5374_v9  ;;  %v245_v15 = vmul.f32 -0.5, %v5374_v9  ;;  %v248_v19 = vand.u32 2147483647, %v5374_v9  ;;  %v232_v37 = vor.u32 1.1754944e-38, %v231_v34 }
 0x305   :  { %vm230_vm15 = vcmp.eq.f32.partialorder %v229_v35, 8.507059e+37  ;;  %v59_v6 = vrot.slane %v58_v48, 4 }
 0x306   :  { %5375 = vlog2.f32 %v242_v13  ;;  %v246_v17 = vadd.f32 1.0, %v245_v15  ;;  %vm249_vm10 = vcmp.lt.f32.partialorder %v248_v19, 0.0004427343 }
 0x307   :  { %5377 = vrcp.f32 %v219_v14 }
 0x308   :  { %5262 = vset.pattern.permute.xlu1 %v5905_v12  ;;  %v247_v23 = vmul.f32 %v5374_v9, %v246_v17  ;;  %v60_v9 = vadd.f32 %v59_v6, %v58_v48 }
 0x30a   :  { %v61_v13 = vrot.slane %v60_v9, 2 }
 0x30c   :  { %v5376_v18 = vpop.eup %5375 }
 0x30d   :  { %v244_v20 = vmul.f32 0.6931472, %v5376_v18  ;;  %v5378_v21 = vpop.eup %5377 }
 0x30e   :  { %v221_v25 = vmul.f32 %v5378_v21, %v219_v14  ;;  %vm226_vm12 = vweird.f32 %v5378_v21  ;;  %v62_v14 = vadd.f32 %v61_v13, %v60_v9 }
 0x30f   :  { %v250_v24 = vsel %vm249_vm10, %v247_v23, %v244_v20  ;;  %vm227_vm14 = vmor %vm225_vm13, %vm226_vm12 }
 0x310   :  { %434 = vperm.xlu1 %5262, %v5909_v22   ;;  %v251_v27 = vadd.f32 %v250_v24, %v235_v26  ;;  %v222_v28 = vsub.f32 1.0, %v221_v25  ;;  %v63_v15 = vrot.slane %v62_v14, 1 }
 0x312   :  { %v5919_v30 = vsel %vm236_vm11, %v5881_v56, %v251_v27  ;;  %v223_v31 = vmul.f32 %v5378_v21, %v222_v28  ;;  %v64_v17 = vadd.f32 %v63_v15, %v62_v14 }
 0x314   :  { %v224_v33 = vadd.f32 %v5378_v21, %v223_v31 }
 0x316   :  { %v228_v36 = vsel %vm227_vm14, %v5378_v21, %v224_v33 }
 0x317   :  { %v233_v39 = vsel %vm230_vm15, %v232_v37, %v228_v36 }
 0x318   :  { %5264 = vset.pattern.permute.xlu1 %v5914_v29  ;;  %v382_v44 = vperm.slane %v233_v39, 1  ;;  %v363_v47 = vperm.slane %v233_v39, 0  ;;  %v525_v39 = vperm.slane %v254_v63, 0 }
 0x319   :  { %327 = vperm.xlu2 %5254, %v5919_v30  }
 0x321   :  { %5255 = vset.pattern.permute.xlu2 %v5924_v32 }
 0x329   :  { %399 = vperm.xlu2 %5255, %v382_v44  }
 0x331   :  { %380 = vperm.xlu2 %5255, %v363_v47  }
 0x339   :  { %5256 = vset.pattern.permute.xlu2 %v5932_v55 }
 0x341   :  { %393 = vperm.xlu2 %5256, %v382_v44  }
 0x349   :  { %374 = vperm.xlu2 %5256, %v363_v47  }
 0x351   :  { %5259 = vset.pattern.permute.xlu2 %v5928_v45 }
 0x359   :  { %368 = vperm.xlu2 %5259, %v363_v47  }
 0x361   :  { %5260 = vset.pattern.permute.xlu2 %v5848_v49 }
 0x369   :  { %440 = vperm.xlu2 %5260, %v5909_v22  }
 0x371   :  { %5261 = vset.pattern.permute.xlu2 %v5905_v12 }
 0x374   :  { %v306_v18 = vpop.xlane.xlu2 %305 }
 0x375   :  { %v307_v19 = vmul.f32 %v306_v18, %v64_v17 }
 0x377   :  { %v308_v20 = vadd.f32 1e-08, %v307_v19 }
 0x379   :  { %5379 = vrsqrt.f32 %v308_v20  ;;  %453 = vperm.xlu2 %5261, %v5891_v62   ;;  %vm315_vm4 = vweird.f32 %v308_v20 }
 0x37b   :  { %v277_v35 = vpop.f32.mrf.mxu1 }
 0x37c   :  { %v328_v47 = vpop.permute.xlu2 %327 }
 0x37d   :  { %v299_v33 = vpop.f32.mrf.mxu0 }
 0x37f   :  { %v5380_v21 = vpop.eup %5379 }
 0x380   :  { %v310_v23 = vmul.f32 %v5380_v21, %v308_v20  ;;  %vm316_vm3 = vweird.f32 %v5380_v21 }
 0x381   :  { %5263 = vset.pattern.permute.xlu2 %v5914_v29  ;;  %vm317_vm5 = vmor %vm315_vm4, %vm316_vm3 }
 0x382   :  { %v311_v24 = vmul.f32 %v5380_v21, %v310_v23 }
 0x384   :  { %v312_v25 = vmul.f32 0.5, %v311_v24 }
 0x386   :  { %v313_v26 = vsub.f32 1.5, %v312_v25 }
 0x388   :  { %v314_v27 = vmul.f32 %v5380_v21, %v313_v26 }
 0x389   :  { %447 = vperm.xlu2 %5263, %v5891_v62  }
 0x38a   :  { %v318_v28 = vsel %vm317_vm5, %v5380_v21, %v314_v27 }
 0x38b   :  { %v320_v31 = vrot.slane %v318_v28, 1  ;;  %v323_v36 = vmul.f32 %v318_v28, %v277_v35 }
 0x38d   :  { %v324_v34 = vmul.f32 %v320_v31, %v299_v33 }
 0x38f   :  { %v332_v37 = vrot.slane %v324_v34, 7 }
 0x391   :  { %526 = vrot.lane.b32.xlu2 %v525_v39, %s5686_s8  ;;  %v333_v57 = vsel %vm97_vm1, %v332_v37, %v323_v36 }
 0x392   :  { %v335_v58 = vmul.f32 %v333_v57, %v328_v47  ;;  %5266 = vset.pattern.permute.xlu2 %v7426_v54 }
 0x394   :  { %v337_v62 = vsel %vm336_vm6, %v335_v58, -inf }
 0x395   :  { %338 = vmax.xlane.f32.xlu0 %v337_v62 }
 0x3a9   :  { %387 = vperm.xlu0 %5257, %v382_v44   ;;  %v400_v44 = vpop.permute.xlu2 %399 }
 0x3b1   :  { %498 = vrot.lane.b32.xlu0 %v5909_v22, %s5686_s8  ;;  %v381_v6 = vpop.permute.xlu2 %380 }
 0x3b2   :  { %5265 = vset.pattern.permute.xlu0 %v7428_v59 }
 0x3b9   :  { %591 = vperm.xlu0 %5265, %v5919_v30   ;;  %v460_v30 = vpop.permute.xlu1 %459  ;;  %v394_v9 = vpop.permute.xlu2 %393 }
 0x3c1   :  { %5268 = vset.pattern.permute.xlu0 %v5924_v32  ;;  %v435_v13 = vpop.permute.xlu1 %434  ;;  %v375_v14 = vpop.permute.xlu2 %374 }
 0x3c9   :  { %v369_v17 = vpop.permute.xlu2 %368 }
 0x3d1   :  { %v441_v20 = vpop.permute.xlu2 %440 }
 0x3d9   :  { %v454_v28 = vpop.permute.xlu2 %453 }
 0x408   :  { %v339_v61 = vpop.xlane.xlu0 %338 }
 0x409   :  { %v340_v63 = vsub.f32 %v335_v58, %v339_v61 }
 0x40b   :  { %v341_v60 = vmul.f32 1.442695, %v340_v63 }
 0x40d   :  { %5381 = vpow2.f32 %v341_v60 }
 0x413   :  { %v5382_v4 = vpop.eup %5381 }
 0x414   :  { %v343_v48 = vsel %vm336_vm6, %v5382_v4, 0.0 }
 0x415   :  { %344 = vadd.xlane.f32.xlu1 %v343_v48 }
 0x41b   :  { %v388_v61 = vpop.permute.xlu0 %387 }
 0x42e   :  { %428 = vperm.xlu1 %5264, %v5909_v22  }
 0x436   :  { %554 = vrot.lane.b32.xlu1 %v5896_v3, %s5686_s8 }
 0x437   :  { %5267 = vset.pattern.permute.xlu1 %v5924_v32 }
 0x488   :  { %v345_v15 = vpop.xlane.xlu1 %344 }
 0x489   :  { %5383 = vrcp.f32 %v345_v15  ;;  %v357_v23 = vand.u32 2147483648, %v345_v15  ;;  %v355_v24 = vand.u32 2147483647, %v345_v15  ;;  %vm351_vm11 = vweird.f32 %v345_v15 }
 0x48b   :  { %v358_v25 = vor.u32 1.1754944e-38, %v357_v23  ;;  %vm356_vm13 = vcmp.eq.f32.partialorder %v355_v24, 8.507059e+37 }
 0x48f   :  { %v5384_v18 = vpop.eup %5383 }
 0x490   :  { %v347_v19 = vmul.f32 %v5384_v18, %v345_v15  ;;  %vm352_vm10 = vweird.f32 %v5384_v18  ;;  %v448_v15 = vpop.permute.xlu2 %447 }
 0x491   :  { %vm353_vm12 = vmor %vm351_vm11, %vm352_vm10 }
 0x492   :  { %v348_v21 = vsub.f32 1.0, %v347_v19 }
 0x494   :  { %v349_v22 = vmul.f32 %v5384_v18, %v348_v21 }
 0x496   :  { %v350_v3 = vadd.f32 %v5384_v18, %v349_v22 }
 0x498   :  { %v354_v26 = vsel %vm353_vm12, %v5384_v18, %v350_v3 }
 0x499   :  { %v359_v27 = vsel %vm356_vm13, %v358_v25, %v354_v26 }
 0x49a   :  { %v360_v31 = vmul.f32 %v5382_v4, %v359_v27 }
 0x49c   :  { %v362_v33 = vrot.slane %v360_v31, 1  ;;  %v401_v34 = vperm.slane %v360_v31, 0  ;;  %v499_v31 = vpop.permute.xlu0 %498 }
 0x49e   :  { %v402_v35 = vperm.slane %v362_v33, 0  ;;  %v405_v36 = vmul.f32 %v401_v34, %v369_v17  ;;  %v407_v37 = vmul.f32 %v401_v34, %v381_v6  ;;  %v406_v39 = vmul.f32 %v401_v34, %v375_v14  ;;  %v527_v33 = vpop.permute.xlu2 %526 }
 0x49f   :  { %v463_v63 = vmul.f32 %v441_v20, %v401_v34  ;;  %v462_v19 = vmul.f32 %v435_v13, %v401_v34 }
 0x4a0   :  { %v411_v47 = vsub.f32 1.0, %v405_v36  ;;  %v429_v57 = vpop.permute.xlu1 %428  ;;  %v413_v58 = vsub.f32 1.0, %v407_v37  ;;  %v410_v62 = vmul.f32 %v402_v35, %v400_v44  ;;  %v412_v60 = vsub.f32 1.0, %v406_v39 }
 0x4a1   :  { %v409_v48 = vmul.f32 %v402_v35, %v394_v9  ;;  %v408_v4 = vmul.f32 %v402_v35, %v388_v61  ;;  %v461_v23 = vmul.f32 %v429_v57, %v401_v34  ;;  %v466_v17 = vmul.f32 %v460_v30, %v402_v35 }
 0x4a2   :  { %v419_v18 = vmul.f32 %v413_v58, %v5854_v50  ;;  %v416_v21 = vsub.f32 1.0, %v410_v62  ;;  %v418_v22 = vmul.f32 %v412_v60, %v5863_v51  ;;  %v417_v14 = vmul.f32 %v411_v47, %v5870_v52 }
 0x4a3   :  { %v415_v6 = vsub.f32 1.0, %v409_v48  ;;  %v414_v20 = vsub.f32 1.0, %v408_v4  ;;  %v465_v3 = vmul.f32 %v454_v28, %v402_v35  ;;  %v464_v27 = vmul.f32 %v448_v15, %v402_v35 }
 0x4a4   :  { %v5968_v24 = vadd.f32 %v463_v63, %v419_v18  ;;  %v422_v44 = vmul.f32 %v416_v21, %v5854_v50  ;;  %v5975_v13 = vadd.f32 %v462_v19, %v418_v22  ;;  %v5980_v26 = vadd.f32 %v461_v23, %v417_v14 }
 0x4a5   :  { %v421_v9 = vmul.f32 %v415_v6, %v5863_v51  ;;  %v420_v30 = vmul.f32 %v414_v20, %v5870_v52 }
 0x4a6   :  { %5114 = vmatpush.msk.msrb.mxu2 %vm56_vm0, %v5968_v24  ;;  %640 = vmatpush.xpose.msrb.mxu1 %v5968_v24  ;;  %v5977_v25 = vadd.f32 %v466_v17, %v422_v44 }
 0x4a7   :  { %v5985_v51 = vadd.f32 %v465_v3, %v421_v9  ;;  %v5991_v52 = vadd.f32 %v464_v27, %v420_v30 }
 0x4a8   :  { %519 = vmatpush.msrb.mxu2 %v5975_v13  ;;  %5116 = vmatpush.msk.msra.mxu3 %vm56_vm0, %v5977_v25  ;;  %v555_v50 = vpop.permute.xlu1 %554 }
 0x4a9   :  { %660 = vmatpush.xpose.msra.mxu0 %v5977_v25  ;;  %v557_v28 = vsel %vm303_vm9, %v555_v50, 0.0 }
 0x4aa   :  { %520 = vmatpush.msrb.mxu2 %v5980_v26  ;;  %547 = vmatpush.msra.mxu3 %v5985_v51 }
 0x4ab   :  { %641 = vmatpush.xpose.msrb.mxu1 %v5975_v13  ;;  %558 = vadd.xlane.f32.xlu2 %v557_v28 }
 0x4ac   :  { %5115 = vmatmul.msk.f32.vlgmr.msrb.gmra.mxu2 %vm67_vm8, %v499_v31  ;;  %548 = vmatpush.msra.mxu3 %v5991_v52 }
 0x4ad   :  { %661 = vmatpush.xpose.msra.mxu0 %v5985_v51  ;;  %5117 = vmatmul.msk.f32.vlgmr.msra.gmra.mxu3 %vm67_vm8, %v527_v33 }
 0x4ae   :  { %5120 = vmatpush.msk.msrb.mxu3 %vm56_vm0, %v5778_v7  ;;  %v474_v7 = vmul.f32 %v5975_v13, %v5975_v13 }
 0x4af   :  { %642 = vmatpush.xpose.msrb.mxu1 %v5980_v26 }
 0x4b0   :  { %717 = vmatpush.msrb.mxu3 %v5786_v8  ;;  %v475_v8 = vmul.f32 %v5968_v24, %v5968_v24 }
 0x4b1   :  { %662 = vmatpush.xpose.msra.mxu0 %v5991_v52 }
 0x4b2   :  { %718 = vmatpush.msrb.mxu3 %v5799_v11  ;;  %v477_v11 = vmul.f32 %v5985_v51, %v5985_v51 }
 0x4b3   :  { %744 = vmatpush.msra.mxu1 %v5760_v2  ;;  %v473_v2 = vmul.f32 %v5980_v26, %v5980_v26 }
 0x4b4   :  { %825 = vmatpush.msra.mxu3 %v5819_v40  ;;  %v476_v40 = vmul.f32 %v5991_v52, %v5991_v52 }
 0x4b5   :  { %5127 = vmatpush.msk.msrb.mxu0 %vm56_vm0, %v5968_v24 }
 0x4b6   :  { %826 = vmatpush.msra.mxu3 %v5824_v41  ;;  %v478_v41 = vmul.f32 %v5977_v25, %v5977_v25  ;;  %v488_v34 = vadd.f32 %v477_v11, %v476_v40 }
 0x4b7   :  { %889 = vmatpush.msrb.mxu0 %v5975_v13 }
 0x4b8   :  { %827 = vmatpush.msra.mxu3 %v5830_v42  ;;  %v479_v42 = vadd.f32 %v474_v7, %v473_v2  ;;  %v489_v35 = vsel %vm56_vm0, %v478_v41, 0.0 }
 0x4b9   :  { %890 = vmatpush.msrb.mxu0 %v5980_v26  ;;  %v490_v37 = vadd.f32 %v489_v35, %v488_v34  ;;  %v592_v34 = vpop.permute.xlu0 %591 }
 0x4ba   :  { %828 = vmatpush.msra.mxu3 %v5836_v43  ;;  %v480_v43 = vsel %vm56_vm0, %v475_v8, 0.0 }
 0x4bb   :  { %v481_v36 = vadd.f32 %v480_v43, %v479_v42  ;;  %v491_v47 = vrot.slane %v490_v37, 4 }
 0x4bd   :  { %v482_v39 = vrot.slane %v481_v36, 4  ;;  %v492_v58 = vadd.f32 %v491_v47, %v490_v37 }
 0x4bf   :  { %v483_v57 = vadd.f32 %v482_v39, %v481_v36  ;;  %v493_v61 = vrot.slane %v492_v58, 2 }
 0x4c1   :  { %v484_v62 = vrot.slane %v483_v57, 2  ;;  %v494_v60 = vadd.f32 %v493_v61, %v492_v58 }
 0x4c3   :  { %v485_v63 = vadd.f32 %v484_v62, %v483_v57  ;;  %v495_v15 = vrot.slane %v494_v60, 1 }
 0x4c5   :  { %v486_v48 = vrot.slane %v485_v63, 1  ;;  %v6029_v21 = vadd.f32 %v495_v15, %v494_v60 }
 0x4c7   :  { %v6027_v18 = vadd.f32 %v486_v48, %v485_v63 }
 0x51e   :  { %v559_v19 = vpop.xlane.xlu2 %558 }
 0x51f   :  { %v561_v4 = vrot.slane %v559_v19, 1  ;;  %v564_v23 = vmul.f32 %v559_v19, %v6027_v18 }
 0x521   :  { %v565_v22 = vmul.f32 %v561_v4, %v6029_v21  ;;  %v566_v17 = vadd.f32 1e-08, %v564_v23 }
 0x523   :  { %v567_v6 = vadd.f32 1e-08, %v565_v22  ;;  %5385 = vrsqrt.f32 %v566_v17  ;;  %vm574_vm3 = vweird.f32 %v566_v17 }
 0x525   :  { %5387 = vrsqrt.f32 %v567_v6  ;;  %vm584_vm5 = vweird.f32 %v567_v6 }
 0x529   :  { %v5386_v14 = vpop.eup %5385 }
 0x52a   :  { %v569_v44 = vmul.f32 %v5386_v14, %v566_v17  ;;  %vm575_vm14 = vweird.f32 %v5386_v14 }
 0x52b   :  { %v5388_v20 = vpop.eup %5387  ;;  %vm576_vm4 = vmor %vm574_vm3, %vm575_vm14 }
 0x52c   :  { %v579_v9 = vmul.f32 %v5388_v20, %v567_v6  ;;  %v570_v3 = vmul.f32 %v5386_v14, %v569_v44  ;;  %vm585_vm15 = vweird.f32 %v5388_v20 }
 0x52d   :  { %vm586_vm10 = vmor %vm584_vm5, %vm585_vm15 }
 0x52e   :  { %v571_v30 = vmul.f32 0.5, %v570_v3  ;;  %v580_v50 = vmul.f32 %v5388_v20, %v579_v9  ;;  %v6050_v9 = vld [vmem:[%s7424_s7 + $0x8] sm:$0xff]  ;;  %v6056_v3 = vld [vmem:[%s7424_s7] sm:$0xff] }
 0x52f   :  { %v522_v41 = vpop.f32.mrf.mxu2 }
 0x530   :  { %v572_v27 = vsub.f32 1.5, %v571_v30  ;;  %v581_v28 = vmul.f32 0.5, %v580_v50  ;;  %v550_v8 = vpop.f32.mrf.mxu3  ;;  %v701_v30 = vld [vmem:[%s7418_s0 + $0x1] sm:$0x1]  ;;  %v702_v50 = vld [vmem:[%s7418_s0 + $0x9] sm:$0x1] }
 0x532   :  { %v573_v31 = vmul.f32 %v5386_v14, %v572_v27  ;;  %v582_v33 = vsub.f32 1.5, %v581_v28  ;;  %v725_v27 = vrot.slane %v702_v50, 7 }
 0x534   :  { %v583_v2 = vmul.f32 %v5388_v20, %v582_v33  ;;  %v577_v7 = vsel %vm576_vm4, %v5386_v14, %v573_v31  ;;  %v726_v28 = vsel %vm97_vm1, %v725_v27, %v701_v30 }
 0x535   :  { %v588_v42 = vmul.f32 %v577_v7, %v522_v41 }
 0x536   :  { %v587_v11 = vsel %vm586_vm10, %v5388_v20, %v583_v2  ;;  %v6043_v20 = vld [vmem:[%s7424_s7 + $0x10] sm:$0xf] }
 0x537   :  { %v589_v40 = vmul.f32 %v587_v11, %v550_v8  ;;  %5118 = vmatpush.msk.msra.mxu2 %vm56_vm0, %v6043_v20 }
 0x539   :  { %v596_v43 = vrot.slane %v589_v40, 7  ;;  %690 = vmatpush.msra.mxu2 %v6050_v9 }
 0x53b   :  { %v597_v35 = vsel %vm97_vm1, %v596_v43, %v588_v42  ;;  %691 = vmatpush.msra.mxu2 %v6056_v3 }
 0x53c   :  { %v599_v36 = vmul.f32 %v597_v35, %v592_v34 }
 0x53d   :  { %761 = vmatpush.msrb.mxu2 %v5750_v0 }
 0x53e   :  { %v600_v37 = vsel %vm336_vm6, %v599_v36, -inf }
 0x53f   :  { %601 = vmax.xlane.f32.xlu1 %v600_v37  ;;  %762 = vmatpush.msrb.mxu2 %v5755_v1 }
 0x541   :  { %763 = vmatpush.msrb.mxu2 %v5773_v5 }
 0x543   :  { %764 = vmatpush.msrb.mxu2 %v5792_v10 }
 0x5b2   :  { %v602_v39 = vpop.xlane.xlu1 %601 }
 0x5b3   :  { %v603_v47 = vsub.f32 %v599_v36, %v602_v39 }
 0x5b5   :  { %v604_v57 = vmul.f32 1.442695, %v603_v47 }
 0x5b7   :  { %5389 = vpow2.f32 %v604_v57 }
 0x5bd   :  { %v5390_v58 = vpop.eup %5389 }
 0x5be   :  { %v606_v62 = vsel %vm336_vm6, %v5390_v58, 0.0 }
 0x5bf   :  { %607 = vadd.xlane.f32.xlu0 %v606_v62 }
 0x632   :  { %v608_v61 = vpop.xlane.xlu0 %607 }
 0x633   :  { %5391 = vrcp.f32 %v608_v61  ;;  %v620_v15 = vand.u32 2147483648, %v608_v61  ;;  %v618_v4 = vand.u32 2147483647, %v608_v61  ;;  %vm614_vm12 = vweird.f32 %v608_v61 }
 0x635   :  { %v621_v22 = vor.u32 1.1754944e-38, %v620_v15  ;;  %vm619_vm14 = vcmp.eq.f32.partialorder %v618_v4, 8.507059e+37 }
 0x639   :  { %v5392_v63 = vpop.eup %5391 }
 0x63a   :  { %v610_v60 = vmul.f32 %v5392_v63, %v608_v61  ;;  %vm615_vm11 = vweird.f32 %v5392_v63 }
 0x63b   :  { %vm616_vm13 = vmor %vm614_vm12, %vm615_vm11 }
 0x63c   :  { %v611_v48 = vsub.f32 1.0, %v610_v60 }
 0x63e   :  { %v612_v19 = vmul.f32 %v5392_v63, %v611_v48 }
 0x640   :  { %v613_v23 = vadd.f32 %v5392_v63, %v612_v19 }
 0x642   :  { %v617_v17 = vsel %vm616_vm13, %v5392_v63, %v613_v23 }
 0x643   :  { %v622_v6 = vsel %vm619_vm14, %v621_v22, %v617_v17 }
 0x644   :  { %v623_v14 = vmul.f32 %v5390_v58, %v622_v6 }
 0x646   :  { %v625_v44 = vrot.slane %v623_v14, 1  ;;  %643 = vmatmul.f32.vlgmr.msrb.gmra.mxu1 %v623_v14 }
 0x647   :  { %5129 = vmatpush.msk.msrb.mxu1 %vm56_vm0, %v5977_v25 }
 0x648   :  { %663 = vmatmul.f32.vlgmr.msra.gmra.mxu0 %v625_v44 }
 0x649   :  { %911 = vmatpush.msrb.mxu1 %v5985_v51 }
 0x64b   :  { %912 = vmatpush.msrb.mxu1 %v5991_v52 }
 0x64e   :  { %5122 = vmatmul.msk.f32.vlgmr.msra.gmra.mxu1 %vm99_vm2, %v726_v28 }
 0x6c3   :  { %v644_v2 = vpop.f32.mrf.mxu1 }
 0x6c5   :  { %v664_v31 = vpop.f32.mrf.mxu0 }
 0x6c6   :  { %v669_v33 = vrot.slane %v664_v31, 7 }
 0x6c8   :  { %v670_v7 = vsel %vm97_vm1, %v669_v33, %v644_v2 }
 0x6c9   :  { %5119 = vmatmul.msk.f32.vlgmr.msra.gmra.mxu2 %vm67_vm8, %v670_v7  ;;  %5121 = vmatmul.msk.f32.vlgmr.msrb.gmra.mxu3 %vm67_vm8, %v670_v7 }
 0x6cb   :  { %v746_v8 = vpop.f32.mrf.mxu1 }
 0x6d1   :  { %5123 = vmatmul.msk.f32.vlgmr.msrb.gmra.mxu2 %vm122_vm7, %v5841_v46 }
 0x74c   :  { %v6076_v0 = vpop.f32.mrf.mxu2  ;;  %v720_v1 = vpop.f32.mrf.mxu3 }
 0x74d   :  { %7436 = vst [vmem:[#allocation3_spill] sm:$0xff] %v6076_v0  ;;  %v747_v11 = vadd.f32 %v746_v8, %v720_v1 }
 0x754   :  { %v766_v5 = vpop.f32.mrf.mxu2 }
 0x755   :  { %v769_v40 = vadd.f32 %v766_v5, %v747_v11 }
 0x757   :  { %v770_v10 = vadd.f32 %v5807_v16, %v769_v40 }
 0x759   :  { %5393 = vtanh.f32 %v770_v10  ;;  %v5124_v42 = vmul.f32 -1.442695, %v770_v10 }
 0x75b   :  { %5395 = vpow2.f32 %v5124_v42 }
 0x75f   :  { %v5394_v41 = vpop.eup %5393 }
 0x760   :  { %793 = vrot.lane.b32.xlu2 %v5394_v41, %s5683_s10 }
 0x761   :  { %v5396_v43 = vpop.eup %5395 }
 0x762   :  { %v774_v34 = vadd.f32 1.0, %v5396_v43 }
 0x764   :  { %5397 = vrcp.f32 %v774_v34  ;;  %v786_v47 = vand.u32 2147483648, %v774_v34  ;;  %vm780_vm3 = vweird.f32 %v774_v34  ;;  %v784_v57 = vand.u32 2147483647, %v774_v34 }
 0x766   :  { %v787_v58 = vor.u32 1.1754944e-38, %v786_v47  ;;  %vm785_vm5 = vcmp.eq.f32.partialorder %v784_v57, 8.507059e+37 }
 0x76a   :  { %v5398_v35 = vpop.eup %5397 }
 0x76b   :  { %v776_v46 = vmul.f32 %v5398_v35, %v774_v34  ;;  %vm781_vm15 = vweird.f32 %v5398_v35 }
 0x76c   :  { %vm782_vm4 = vmor %vm780_vm3, %vm781_vm15 }
 0x76d   :  { %v777_v36 = vsub.f32 1.0, %v776_v46 }
 0x76f   :  { %v778_v37 = vmul.f32 %v5398_v35, %v777_v36 }
 0x771   :  { %v779_v39 = vadd.f32 %v5398_v35, %v778_v37 }
 0x773   :  { %v783_v16 = vsel %vm782_vm4, %v5398_v35, %v779_v39 }
 0x774   :  { %v788_v61 = vsel %vm785_vm5, %v787_v58, %v783_v16 }
 0x775   :  { %v791_v60 = vmul.f32 %v788_v61, %v5812_v38 }
 0x7ba   :  { %v794_v62 = vpop.permute.xlu2 %793 }
 0x7bb   :  { %v796_v63 = vmul.f32 %v794_v62, %v788_v61 }
 0x7bd   :  { %798 = vrot.lane.b32.xlu1 %v796_v63, %s5683_s10 }
 0x82f   :  { %v799_v48 = vpop.permute.xlu1 %798 }
 0x830   :  { %v6082_v15 = vadd.f32 %v799_v48, %v791_v60 }
 0x832   :  { %5399 = vtanh.f32 %v6082_v15 }
 0x838   :  { %v5400_v19 = vpop.eup %5399 }
 0x839   :  { %804 = vrot.lane.b32.xlu0 %v5400_v19, %s5683_s10 }
 0x8ab   :  { %v805_v4 = vpop.permute.xlu0 %804 }
 0x8ac   :  { %v807_v23 = vmul.f32 %v805_v4, %v788_v61 }
 0x8ae   :  { %809 = vrot.lane.b32.xlu2 %v807_v23, %s5684_s19 }
 0x908   :  { %v6087_v22 = vpop.permute.xlu2 %809 }
 0x909   :  { %5125 = vmatmul.msk.f32.vlgmr.msra.gmra.mxu3 %vm122_vm7, %v6087_v22 }
 0x98c   :  { %v830_v17 = vpop.f32.mrf.mxu3 }
 0x98d   :  { %v6092_v38 = vadd.f32 %v5877_v53, %v830_v17 }
 0x98f   :  { %7437 = vst [vmem:[#allocation4_spill] sm:$0xff] %v6092_v38  ;;  %5401 = vtanh.f32 %v6092_v38  ;;  %v856_v6 = vand.u32 2147483647, %v6092_v38  ;;  %v5126_v14 = vmul.f32 -1.442695, %v6092_v38  ;;  %v853_v34 = vmax.f32 %v6092_v38, 0.0 }
 0x990   :  { %vm854_vm13 = vcmp.ne.f32.partialorder %v6092_v38, %v6092_v38 }
 0x991   :  { %v857_v44 = vsub.f32 0.0, %v856_v6  ;;  %5403 = vpow2.f32 %v5126_v14 }
 0x993   :  { %v858_v30 = vmul.f32 1.442695, %v857_v44 }
 0x995   :  { %v6097_v50 = vpop.eup %5401  ;;  %5405 = vpow2.f32 %v858_v30 }
 0x996   :  { %5128 = vmatmul.msk.f32.vlgmr.msrb.gmra.mxu0 %vm67_vm8, %v6097_v50  ;;  %v872_v27 = vrot.slane %v6097_v50, 1  ;;  %v6104_v53 = vmul.f32 %v6097_v50, %v6097_v50  ;;  %v1067_v60 = vperm.slane %v6097_v50, 1  ;;  %v1048_v48 = vperm.slane %v6097_v50, 0 }
 0x997   :  { %v5404_v28 = vpop.eup %5403 }
 0x998   :  { %5130 = vmatmul.msk.f32.vlgmr.msrb.gmra.mxu1 %vm67_vm8, %v872_v27  ;;  %v918_v31 = vsel %vm303_vm9, %v6104_v53, 0.0  ;;  %v837_v33 = vadd.f32 1.0, %v5404_v28 }
 0x999   :  { %919 = vadd.xlane.f32.xlu1 %v918_v31 }
 0x99a   :  { %5407 = vrcp.f32 %v837_v33  ;;  %v849_v36 = vand.u32 2147483648, %v837_v33  ;;  %vm843_vm12 = vweird.f32 %v837_v33  ;;  %v847_v47 = vand.u32 2147483647, %v837_v33 }
 0x99b   :  { %v5406_v2 = vpop.eup %5405 }
 0x99c   :  { %v860_v7 = vadd.f32 1.0, %v5406_v2  ;;  %v863_v1 = vmul.f32 -0.5, %v5406_v2  ;;  %v866_v5 = vand.u32 2147483647, %v5406_v2  ;;  %v850_v58 = vor.u32 1.1754944e-38, %v849_v36 }
 0x99d   :  { %vm848_vm15 = vcmp.eq.f32.partialorder %v847_v47, 8.507059e+37 }
 0x99e   :  { %5409 = vlog2.f32 %v860_v7  ;;  %v864_v11 = vadd.f32 1.0, %v863_v1  ;;  %vm867_vm10 = vcmp.lt.f32.partialorder %v866_v5, 0.0004427343 }
 0x9a0   :  { %v5408_v8 = vpop.eup %5407  ;;  %v865_v43 = vmul.f32 %v5406_v2, %v864_v11 }
 0x9a1   :  { %v839_v40 = vmul.f32 %v5408_v8, %v837_v33  ;;  %vm844_vm11 = vweird.f32 %v5408_v8 }
 0x9a2   :  { %vm845_vm14 = vmor %vm843_vm12, %vm844_vm11 }
 0x9a3   :  { %v840_v41 = vsub.f32 1.0, %v839_v40 }
 0x9a4   :  { %v5410_v10 = vpop.eup %5409 }
 0x9a5   :  { %v862_v42 = vmul.f32 0.6931472, %v5410_v10  ;;  %v841_v35 = vmul.f32 %v5408_v8, %v840_v41 }
 0x9a7   :  { %v868_v46 = vsel %vm867_vm10, %v865_v43, %v862_v42  ;;  %v842_v39 = vadd.f32 %v5408_v8, %v841_v35 }
 0x9a8   :  { %v869_v37 = vadd.f32 %v868_v46, %v853_v34 }
 0x9a9   :  { %v846_v16 = vsel %vm845_vm14, %v5408_v8, %v842_v39 }
 0x9aa   :  { %v870_v57 = vsel %vm854_vm13, %v6092_v38, %v869_v37  ;;  %v851_v62 = vsel %vm848_vm15, %v850_v58, %v846_v16 }
 0x9ab   :  { %953 = vperm.xlu2 %5266, %v870_v57   ;;  %v1007_v61 = vperm.slane %v851_v62, 1  ;;  %v988_v63 = vperm.slane %v851_v62, 0  ;;  %v1150_v62 = vperm.slane %v872_v27, 0 }
 0x9b2   :  { %1024 = vperm.xlu1 %5267, %v1007_v61  }
 0x9b3   :  { %5269 = vset.pattern.permute.xlu2 %v5932_v55 }
 0x9ba   :  { %5270 = vset.pattern.permute.xlu1 %v5932_v55 }
 0x9bb   :  { %1018 = vperm.xlu2 %5269, %v1007_v61  }
 0x9c2   :  { %999 = vperm.xlu1 %5270, %v988_v63  }
 0x9c3   :  { %5272 = vset.pattern.permute.xlu2 %v5848_v49 }
 0x9ca   :  { %5271 = vset.pattern.permute.xlu1 %v5928_v45 }
 0x9cb   :  { %1084 = vperm.xlu2 %5272, %v1067_v60  }
 0x9d2   :  { %1012 = vperm.xlu1 %5271, %v1007_v61  }
 0x9d3   :  { %1065 = vperm.xlu2 %5272, %v1048_v48  }
 0x9da   :  { %993 = vperm.xlu1 %5271, %v988_v63  }
 0x9db   :  { %5275 = vset.pattern.permute.xlu2 %v5914_v29 }
 0x9e2   :  { %5273 = vset.pattern.permute.xlu1 %v5905_v12 }
 0x9e3   :  { %1072 = vperm.xlu2 %5275, %v1067_v60  }
 0x9ea   :  { %1078 = vperm.xlu1 %5273, %v1067_v60  }
 0x9eb   :  { %5278 = vset.pattern.permute.xlu2 %v7426_v54 }
 0x9f2   :  { %5276 = vset.pattern.permute.xlu1 %v5914_v29 }
 0x9fa   :  { %1053 = vperm.xlu1 %5276, %v1048_v48  }
 0xa02   :  { %1123 = vrot.lane.b32.xlu1 %v1048_v48, %s5686_s8 }
 0xa03   :  { %5277 = vset.pattern.permute.xlu1 %v7428_v59 }
 0xa05   :  { %v954_v35 = vpop.permute.xlu2 %953 }
 0xa0a   :  { %1216 = vperm.xlu1 %5277, %v870_v57  }
 0xa0c   :  { %v920_v19 = vpop.xlane.xlu1 %919 }
 0xa0d   :  { %v922_v4 = vrot.slane %v920_v19, 1  ;;  %v925_v23 = vmul.f32 %v920_v19, %v6027_v18 }
 0xa0f   :  { %v926_v17 = vmul.f32 %v922_v4, %v6029_v21  ;;  %v927_v6 = vadd.f32 1e-08, %v925_v23 }
 0xa11   :  { %v928_v14 = vadd.f32 1e-08, %v926_v17  ;;  %5411 = vrsqrt.f32 %v927_v6  ;;  %vm935_vm5 = vweird.f32 %v927_v6 }
 0xa12   :  { %5281 = vset.pattern.permute.xlu1 %v5932_v55 }
 0xa13   :  { %5413 = vrsqrt.f32 %v928_v14  ;;  %vm945_vm11 = vweird.f32 %v928_v14  ;;  %v892_v42 = vpop.f32.mrf.mxu0 }
 0xa15   :  { %v914_v40 = vpop.f32.mrf.mxu1 }
 0xa17   :  { %v5412_v44 = vpop.eup %5411 }
 0xa18   :  { %v930_v30 = vmul.f32 %v5412_v44, %v927_v6  ;;  %vm936_vm3 = vweird.f32 %v5412_v44 }
 0xa19   :  { %v5414_v28 = vpop.eup %5413  ;;  %vm937_vm10 = vmor %vm935_vm5, %vm936_vm3 }
 0xa1a   :  { %v940_v31 = vmul.f32 %v5414_v28, %v928_v14  ;;  %v931_v33 = vmul.f32 %v5412_v44, %v930_v30  ;;  %vm946_vm4 = vweird.f32 %v5414_v28 }
 0xa1b   :  { %vm947_vm12 = vmor %vm945_vm11, %vm946_vm4 }
 0xa1c   :  { %v932_v2 = vmul.f32 0.5, %v931_v33  ;;  %v941_v7 = vmul.f32 %v5414_v28, %v940_v31 }
 0xa1e   :  { %v933_v1 = vsub.f32 1.5, %v932_v2  ;;  %v942_v8 = vmul.f32 0.5, %v941_v7 }
 0xa20   :  { %v934_v11 = vmul.f32 %v5412_v44, %v933_v1  ;;  %v943_v18 = vsub.f32 1.5, %v942_v8 }
 0xa22   :  { %v944_v21 = vmul.f32 %v5414_v28, %v943_v18  ;;  %v938_v5 = vsel %vm937_vm10, %v5412_v44, %v934_v11 }
 0xa23   :  { %v949_v43 = vmul.f32 %v938_v5, %v892_v42 }
 0xa24   :  { %v948_v10 = vsel %vm947_vm12, %v5414_v28, %v944_v21  ;;  %v1025_v4 = vpop.permute.xlu1 %1024 }
 0xa25   :  { %v950_v41 = vmul.f32 %v948_v10, %v914_v40 }
 0xa27   :  { %v958_v34 = vrot.slane %v950_v41, 7 }
 0xa29   :  { %v959_v46 = vsel %vm97_vm1, %v958_v34, %v949_v43 }
 0xa2a   :  { %v961_v36 = vmul.f32 %v959_v46, %v954_v35 }
 0xa2c   :  { %v962_v37 = vsel %vm336_vm6, %v961_v36, -inf }
 0xa2d   :  { %963 = vmax.xlane.f32.xlu0 %v962_v37 }
 0xa34   :  { %v1000_v17 = vpop.permute.xlu1 %999 }
 0xa41   :  { %1005 = vperm.xlu0 %5268, %v988_v63  }
 0xa44   :  { %v1013_v14 = vpop.permute.xlu1 %1012 }
 0xa49   :  { %5274 = vset.pattern.permute.xlu0 %v5905_v12 }
 0xa4c   :  { %v994_v50 = vpop.permute.xlu1 %993 }
 0xa51   :  { %1059 = vperm.xlu0 %5274, %v1048_v48   ;;  %v1019_v48 = vpop.permute.xlu2 %1018 }
 0xa59   :  { %1179 = vrot.lane.b32.xlu0 %v6104_v53, %s5686_s8  ;;  %v1085_v19 = vpop.permute.xlu2 %1084 }
 0xa5a   :  { %5279 = vset.pattern.permute.xlu0 %v5924_v32 }
 0xa5c   :  { %v1079_v8 = vpop.permute.xlu1 %1078 }
 0xa61   :  { %v1066_v23 = vpop.permute.xlu2 %1065 }
 0xa69   :  { %v1073_v6 = vpop.permute.xlu2 %1072 }
 0xa6c   :  { %v1054_v34 = vpop.permute.xlu1 %1053 }
 0xaa0   :  { %v964_v39 = vpop.xlane.xlu0 %963 }
 0xaa1   :  { %v965_v47 = vsub.f32 %v961_v36, %v964_v39 }
 0xaa3   :  { %v966_v57 = vmul.f32 1.442695, %v965_v47 }
 0xaa5   :  { %5415 = vpow2.f32 %v966_v57 }
 0xaab   :  { %v5416_v16 = vpop.eup %5415 }
 0xaac   :  { %v968_v58 = vsel %vm336_vm6, %v5416_v16, 0.0 }
 0xaad   :  { %969 = vadd.xlane.f32.xlu2 %v968_v58 }
 0xab3   :  { %v1006_v61 = vpop.permute.xlu0 %1005 }
 0xac3   :  { %v1060_v63 = vpop.permute.xlu0 %1059 }
 0xac5   :  { %1151 = vrot.lane.b32.xlu2 %v1150_v62, %s5686_s8 }
 0xacb   :  { %v1180_v60 = vpop.permute.xlu0 %1179 }
 0xacc   :  { %v1182_v53 = vsel %vm303_vm9, %v1180_v60, 0.0 }
 0xaee   :  { %1183 = vadd.xlane.f32.xlu2 %v1182_v53 }
 0xb20   :  { %v970_v44 = vpop.xlane.xlu2 %969 }
 0xb21   :  { %5417 = vrcp.f32 %v970_v44  ;;  %v982_v31 = vand.u32 2147483648, %v970_v44  ;;  %v980_v2 = vand.u32 2147483647, %v970_v44  ;;  %vm976_vm14 = vweird.f32 %v970_v44 }
 0xb23   :  { %v983_v1 = vor.u32 1.1754944e-38, %v982_v31  ;;  %vm981_vm3 = vcmp.eq.f32.partialorder %v980_v2, 8.507059e+37  ;;  %v6222_v31 = vld [vmem:[%s7416_s3 + $0x10] sm:$0xff]  ;;  %v6235_v2 = vld [vmem:[%s7416_s3 + $0x8] sm:$0xff] }
 0xb27   :  { %v5418_v30 = vpop.eup %5417 }
 0xb28   :  { %v972_v27 = vmul.f32 %v5418_v30, %v970_v44  ;;  %vm977_vm13 = vweird.f32 %v5418_v30 }
 0xb29   :  { %vm978_vm15 = vmor %vm976_vm14, %vm977_vm13 }
 0xb2a   :  { %v973_v28 = vsub.f32 1.0, %v972_v27  ;;  %v6193_v27 = vld [vmem:[%s7419_s2 + $0x8] sm:$0xff] }
 0xb2c   :  { %v974_v33 = vmul.f32 %v5418_v30, %v973_v28  ;;  %v6209_v28 = vld [vmem:[%s7416_s3 + $0x18] sm:$0xff] }
 0xb2e   :  { %v975_v7 = vadd.f32 %v5418_v30, %v974_v33  ;;  %v6228_v33 = vld [vmem:[%s7421_s5 + $0x10] sm:$0xff] }
 0xb30   :  { %v979_v11 = vsel %vm978_vm15, %v5418_v30, %v975_v7  ;;  %v6241_v7 = vld [vmem:[%s7421_s5 + $0x8] sm:$0xff] }
 0xb31   :  { %v984_v18 = vsel %vm981_vm3, %v983_v1, %v979_v11  ;;  %v6247_v1 = vld [vmem:[%s7416_s3] sm:$0xff] }
 0xb32   :  { %v985_v21 = vmul.f32 %v5416_v16, %v984_v18 }
 0xb34   :  { %v987_v5 = vrot.slane %v985_v21, 1  ;;  %v1026_v40 = vperm.slane %v985_v21, 0 }
 0xb36   :  { %v1027_v10 = vperm.slane %v987_v5, 0  ;;  %v1032_v41 = vmul.f32 %v1026_v40, %v1006_v61  ;;  %v1031_v42 = vmul.f32 %v1026_v40, %v1000_v17  ;;  %v1030_v43 = vmul.f32 %v1026_v40, %v994_v50 }
 0xb37   :  { %v1088_v58 = vmul.f32 %v1066_v23, %v1026_v40  ;;  %v1087_v16 = vmul.f32 %v1060_v63, %v1026_v40 }
 0xb38   :  { %v1038_v35 = vsub.f32 1.0, %v1032_v41  ;;  %v1037_v46 = vsub.f32 1.0, %v1031_v42  ;;  %v1035_v36 = vmul.f32 %v1027_v10, %v1025_v4  ;;  %v1036_v37 = vsub.f32 1.0, %v1030_v43 }
 0xb39   :  { %v1034_v39 = vmul.f32 %v1027_v10, %v1019_v48  ;;  %v1033_v47 = vmul.f32 %v1027_v10, %v1013_v14  ;;  %v1091_v17 = vmul.f32 %v1085_v19, %v1027_v10  ;;  %v1086_v4 = vmul.f32 %v1054_v34, %v1026_v40  ;;  %v1124_v19 = vpop.permute.xlu1 %1123 }
 0xb3a   :  { %v1044_v57 = vmul.f32 %v1038_v35, %v5968_v24  ;;  %v1043_v62 = vmul.f32 %v1037_v46, %v5975_v13  ;;  %v1041_v60 = vsub.f32 1.0, %v1035_v36  ;;  %v1042_v50 = vmul.f32 %v1036_v37, %v5980_v26 }
 0xb3b   :  { %v1040_v53 = vsub.f32 1.0, %v1034_v39  ;;  %v1039_v44 = vsub.f32 1.0, %v1033_v47  ;;  %v1090_v14 = vmul.f32 %v1079_v8, %v1027_v10  ;;  %v6253_v8 = vld [vmem:[%s7421_s5] sm:$0xff] }
 0xb3c   :  { %v6143_v30 = vadd.f32 %v1088_v58, %v1044_v57  ;;  %v1047_v61 = vmul.f32 %v1041_v60, %v5977_v25  ;;  %v6151_v24 = vadd.f32 %v1087_v16, %v1043_v62  ;;  %v6159_v25 = vadd.f32 %v1086_v4, %v1042_v50 }
 0xb3d   :  { %v1046_v48 = vmul.f32 %v1040_v53, %v5985_v51  ;;  %v1045_v63 = vmul.f32 %v1039_v44, %v5991_v52  ;;  %v1089_v51 = vmul.f32 %v1073_v6, %v1027_v10  ;;  %v1152_v52 = vpop.permute.xlu2 %1151  ;;  %v6178_v6 = vld [vmem:[%s7419_s2 + $0x10] sm:$0xf] }
 0xb3e   :  { %5131 = vmatpush.msk.msra.mxu2 %vm56_vm0, %v6143_v30  ;;  %1265 = vmatpush.xpose.msra.mxu0 %v6143_v30  ;;  %v6153_v13 = vadd.f32 %v1091_v17, %v1047_v61  ;;  %v1098_v5 = vmul.f32 %v6159_v25, %v6159_v25  ;;  %v1099_v40 = vmul.f32 %v6151_v24, %v6151_v24 }
 0xb3f   :  { %v6161_v26 = vadd.f32 %v1090_v14, %v1046_v48  ;;  %v6166_v23 = vadd.f32 %v1089_v51, %v1045_v63  ;;  %v1100_v10 = vmul.f32 %v6143_v30, %v6143_v30 }
 0xb40   :  { %1144 = vmatpush.msra.mxu2 %v6151_v24  ;;  %5133 = vmatpush.msk.msrb.mxu3 %vm56_vm0, %v6153_v13  ;;  %v1103_v21 = vmul.f32 %v6153_v13, %v6153_v13  ;;  %v1104_v43 = vadd.f32 %v1099_v40, %v1098_v5 }
 0xb41   :  { %1285 = vmatpush.xpose.msra.mxu1 %v6153_v13  ;;  %v1101_v11 = vmul.f32 %v6166_v23, %v6166_v23  ;;  %v1102_v18 = vmul.f32 %v6161_v26, %v6161_v26  ;;  %v1105_v34 = vsel %vm56_vm0, %v1100_v10, 0.0 }
 0xb42   :  { %1145 = vmatpush.msra.mxu2 %v6159_v25  ;;  %1172 = vmatpush.msrb.mxu3 %v6161_v26  ;;  %v1114_v42 = vsel %vm56_vm0, %v1103_v21, 0.0  ;;  %v1106_v46 = vadd.f32 %v1105_v34, %v1104_v43 }
 0xb43   :  { %1266 = vmatpush.xpose.msra.mxu0 %v6151_v24  ;;  %5132 = vmatmul.msk.f32.vlgmr.msra.gmra.mxu2 %vm67_vm8, %v1124_v19  ;;  %v1113_v41 = vadd.f32 %v1102_v18, %v1101_v11 }
 0xb44   :  { %1173 = vmatpush.msrb.mxu3 %v6166_v23  ;;  %5135 = vmatpush.msk.msrb.mxu2 %vm56_vm0, %v6043_v20  ;;  %v6187_v20 = vld [vmem:[%s7417_s1] sm:$0xff]  ;;  %v1107_v37 = vrot.slane %v1106_v46, 4 }
 0xb45   :  { %1286 = vmatpush.xpose.msra.mxu1 %v6161_v26  ;;  %5134 = vmatmul.msk.f32.vlgmr.msrb.gmra.mxu3 %vm67_vm8, %v1152_v52  ;;  %v1115_v35 = vadd.f32 %v1114_v42, %v1113_v41 }
 0xb46   :  { %5137 = vmatpush.msk.msra.mxu3 %vm56_vm0, %v6178_v6  ;;  %1312 = vmatpush.msrb.mxu2 %v6050_v9  ;;  %v6203_v9 = vld [vmem:[%s7419_s2] sm:$0xff]  ;;  %v1108_v47 = vadd.f32 %v1107_v37, %v1106_v46 }
 0xb47   :  { %1267 = vmatpush.xpose.msra.mxu0 %v6159_v25  ;;  %v1116_v36 = vrot.slane %v1115_v35, 4 }
 0xb48   :  { %1339 = vmatpush.msra.mxu3 %v6193_v27  ;;  %1313 = vmatpush.msrb.mxu2 %v6056_v3  ;;  %v6215_v3 = vld [vmem:[%s7421_s5 + $0x18] sm:$0xff]  ;;  %v1109_v58 = vrot.slane %v1108_v47, 2 }
 0xb49   :  { %1287 = vmatpush.xpose.msra.mxu1 %v6166_v23  ;;  %v1117_v39 = vadd.f32 %v1116_v36, %v1115_v35 }
 0xb4a   :  { %1340 = vmatpush.msra.mxu3 %v6203_v9  ;;  %1383 = vmatpush.msra.mxu2 %v6209_v28  ;;  %v1110_v60 = vadd.f32 %v1109_v58, %v1108_v47 }
 0xb4b   :  { %1366 = vmatpush.msrb.mxu0 %v6187_v20  ;;  %v1118_v57 = vrot.slane %v1117_v39, 2 }
 0xb4c   :  { %1447 = vmatpush.msrb.mxu3 %v6215_v3  ;;  %1384 = vmatpush.msra.mxu2 %v6222_v31  ;;  %v1111_v44 = vrot.slane %v1110_v60, 1 }
 0xb4d   :  { %5144 = vmatpush.msk.msrb.mxu1 %vm56_vm0, %v6143_v30  ;;  %v1119_v62 = vadd.f32 %v1118_v57, %v1117_v39  ;;  %v1217_v57 = vpop.permute.xlu1 %1216 }
 0xb4e   :  { %1448 = vmatpush.msrb.mxu3 %v6228_v33  ;;  %1385 = vmatpush.msra.mxu2 %v6235_v2  ;;  %v6272_v50 = vadd.f32 %v1111_v44, %v1110_v60 }
 0xb4f   :  { %1511 = vmatpush.msrb.mxu1 %v6151_v24  ;;  %v1120_v53 = vrot.slane %v1119_v62, 1 }
 0xb50   :  { %1449 = vmatpush.msrb.mxu3 %v6241_v7  ;;  %1386 = vmatpush.msra.mxu2 %v6247_v1 }
 0xb51   :  { %1512 = vmatpush.msrb.mxu1 %v6159_v25  ;;  %v6270_v17 = vadd.f32 %v1120_v53, %v1119_v62 }
 0xb52   :  { %1450 = vmatpush.msrb.mxu3 %v6253_v8 }
 0xb61   :  { %v1184_v16 = vpop.xlane.xlu2 %1183 }
 0xb62   :  { %v1186_v61 = vrot.slane %v1184_v16, 1  ;;  %v1189_v48 = vmul.f32 %v1184_v16, %v6272_v50 }
 0xb64   :  { %v1190_v4 = vmul.f32 %v1186_v61, %v6270_v17  ;;  %v1191_v63 = vadd.f32 1e-08, %v1189_v48 }
 0xb66   :  { %v1192_v14 = vadd.f32 1e-08, %v1190_v4  ;;  %vm1199_vm12 = vweird.f32 %v1191_v63 }
 0xb68   :  { %5419 = vrsqrt.f32 %v1192_v14  ;;  %vm1209_vm10 = vweird.f32 %v1192_v14 }
 0xb69   :  { %5421 = vrsqrt.f32 %v1191_v63 }
 0xb6e   :  { %v5420_v51 = vpop.eup %5419 }
 0xb6f   :  { %v5422_v19 = vpop.eup %5421  ;;  %v1204_v52 = vmul.f32 %v5420_v51, %v1192_v14  ;;  %vm1210_vm4 = vweird.f32 %v5420_v51 }
 0xb70   :  { %v1194_v11 = vmul.f32 %v5422_v19, %v1191_v63  ;;  %vm1200_vm5 = vweird.f32 %v5422_v19  ;;  %vm1211_vm11 = vmor %vm1209_vm10, %vm1210_vm4 }
 0xb71   :  { %v1205_v18 = vmul.f32 %v5420_v51, %v1204_v52  ;;  %vm1201_vm13 = vmor %vm1199_vm12, %vm1200_vm5 }
 0xb72   :  { %v1195_v21 = vmul.f32 %v5422_v19, %v1194_v11 }
 0xb73   :  { %v1206_v5 = vmul.f32 0.5, %v1205_v18 }
 0xb74   :  { %v1196_v40 = vmul.f32 0.5, %v1195_v21 }
 0xb75   :  { %v1207_v10 = vsub.f32 1.5, %v1206_v5 }
 0xb76   :  { %v1197_v41 = vsub.f32 1.5, %v1196_v40 }
 0xb77   :  { %v1208_v42 = vmul.f32 %v5420_v51, %v1207_v10 }
 0xb78   :  { %v1198_v43 = vmul.f32 %v5422_v19, %v1197_v41 }
 0xb79   :  { %v1212_v46 = vsel %vm1211_vm11, %v5420_v51, %v1208_v42  ;;  %v1323_v42 = vld [vmem:[%s7418_s0 + $0x2] sm:$0x1] }
 0xb7a   :  { %v1202_v37 = vsel %vm1201_vm13, %v5422_v19, %v1198_v43  ;;  %v1324_v43 = vld [vmem:[%s7418_s0 + $0xa] sm:$0x1] }
 0xbc6   :  { %v1147_v34 = vpop.f32.mrf.mxu2 }
 0xbc7   :  { %v1213_v39 = vmul.f32 %v1202_v37, %v1147_v34  ;;  %v1347_v34 = vrot.slane %v1324_v43, 7 }
 0xbc8   :  { %v1175_v35 = vpop.f32.mrf.mxu3 }
 0xbc9   :  { %v1214_v36 = vmul.f32 %v1212_v46, %v1175_v35  ;;  %v1348_v35 = vsel %vm97_vm1, %v1347_v34, %v1323_v42 }
 0xbcb   :  { %v1221_v47 = vrot.slane %v1214_v36, 7 }
 0xbcd   :  { %v1222_v58 = vsel %vm97_vm1, %v1221_v47, %v1213_v39 }
 0xbce   :  { %v1224_v62 = vmul.f32 %v1222_v58, %v1217_v57 }
 0xbd0   :  { %v1225_v60 = vsel %vm336_vm6, %v1224_v62, -inf }
 0xbd1   :  { %1226 = vmax.xlane.f32.xlu0 %v1225_v60 }
 0xc44   :  { %v1227_v16 = vpop.xlane.xlu0 %1226 }
 0xc45   :  { %v1228_v53 = vsub.f32 %v1224_v62, %v1227_v16 }
 0xc47   :  { %v1229_v44 = vmul.f32 1.442695, %v1228_v53  ;;  %v6301_v53 = vld [vmem:[%s7420_s4] ss:$0 sm:$0xff] }
 0xc49   :  { %5423 = vpow2.f32 %v1229_v44 }
 0xc4f   :  { %v5424_v61 = vpop.eup %5423 }
 0xc50   :  { %v1231_v4 = vsel %vm336_vm6, %v5424_v61, 0.0 }
 0xc51   :  { %1232 = vadd.xlane.f32.xlu1 %v1231_v4 }
 0xcc4   :  { %v1233_v48 = vpop.xlane.xlu1 %1232 }
 0xcc5   :  { %5425 = vrcp.f32 %v1233_v48  ;;  %v1245_v19 = vand.u32 2147483648, %v1233_v48  ;;  %v1243_v11 = vand.u32 2147483647, %v1233_v48  ;;  %vm1239_vm15 = vweird.f32 %v1233_v48 }
 0xcc7   :  { %v1246_v21 = vor.u32 1.1754944e-38, %v1245_v19  ;;  %vm1244_vm4 = vcmp.eq.f32.partialorder %v1243_v11, 8.507059e+37 }
 0xccb   :  { %v5426_v14 = vpop.eup %5425 }
 0xccc   :  { %v1235_v63 = vmul.f32 %v5426_v14, %v1233_v48  ;;  %vm1240_vm14 = vweird.f32 %v5426_v14 }
 0xccd   :  { %vm1241_vm3 = vmor %vm1239_vm15, %vm1240_vm14 }
 0xcce   :  { %v1236_v51 = vsub.f32 1.0, %v1235_v63 }
 0xcd0   :  { %v1237_v52 = vmul.f32 %v5426_v14, %v1236_v51 }
 0xcd2   :  { %v1238_v18 = vadd.f32 %v5426_v14, %v1237_v52 }
 0xcd4   :  { %v1242_v5 = vsel %vm1241_vm3, %v5426_v14, %v1238_v18 }
 0xcd5   :  { %v1247_v40 = vsel %vm1244_vm4, %v1246_v21, %v1242_v5 }
 0xcd6   :  { %v1248_v10 = vmul.f32 %v5424_v61, %v1247_v40 }
 0xcd8   :  { %1268 = vmatmul.f32.vlgmr.msra.gmra.mxu0 %v1248_v10  ;;  %v1250_v41 = vrot.slane %v1248_v10, 1 }
 0xcd9   :  { %5146 = vmatpush.msk.msra.mxu0 %vm56_vm0, %v6153_v13 }
 0xcda   :  { %1288 = vmatmul.f32.vlgmr.msra.gmra.mxu1 %v1250_v41 }
 0xcdb   :  { %1533 = vmatpush.msra.mxu0 %v6161_v26 }
 0xcdd   :  { %1534 = vmatpush.msra.mxu0 %v6166_v23 }
 0xce0   :  { %5139 = vmatmul.msk.f32.vlgmr.msrb.gmra.mxu0 %vm99_vm2, %v1348_v35 }
 0xd55   :  { %v1269_v37 = vpop.f32.mrf.mxu0 }
 0xd57   :  { %v1289_v46 = vpop.f32.mrf.mxu1 }
 0xd58   :  { %v1294_v36 = vrot.slane %v1289_v46, 7 }
 0xd5a   :  { %v1295_v39 = vsel %vm97_vm1, %v1294_v36, %v1269_v37 }
 0xd5b   :  { %5136 = vmatmul.msk.f32.vlgmr.msrb.gmra.mxu2 %vm67_vm8, %v1295_v39  ;;  %5138 = vmatmul.msk.f32.vlgmr.msra.gmra.mxu3 %vm67_vm8, %v1295_v39 }
 0xd5d   :  { %v1368_v58 = vpop.f32.mrf.mxu0 }
 0xd63   :  { %5140 = vmatmul.msk.f32.vlgmr.msra.gmra.mxu2 %vm122_vm7, %v6087_v22 }
 0xdde   :  { %v6296_v47 = vpop.f32.mrf.mxu2  ;;  %v1342_v57 = vpop.f32.mrf.mxu3 }
 0xddf   :  { %7438 = vst [vmem:[#allocation5_spill] sm:$0xff] %v6296_v47  ;;  %v1369_v62 = vadd.f32 %v1368_v58, %v1342_v57 }
 0xde6   :  { %v1388_v60 = vpop.f32.mrf.mxu2 }
 0xde7   :  { %v1391_v16 = vadd.f32 %v1388_v60, %v1369_v62 }
 0xde9   :  { %v1392_v44 = vadd.f32 %v6301_v53, %v1391_v16 }
 0xdeb   :  { %5427 = vtanh.f32 %v1392_v44  ;;  %v5141_v4 = vmul.f32 -1.442695, %v1392_v44 }
 0xded   :  { %5429 = vpow2.f32 %v5141_v4 }
 0xdf1   :  { %v5428_v61 = vpop.eup %5427 }
 0xdf2   :  { %1415 = vrot.lane.b32.xlu2 %v5428_v61, %s5683_s10 }
 0xdf3   :  { %v5430_v22 = vpop.eup %5429 }
 0xdf4   :  { %v1396_v48 = vadd.f32 1.0, %v5430_v22 }
 0xdf6   :  { %5431 = vrcp.f32 %v1396_v48  ;;  %v1408_v11 = vand.u32 2147483648, %v1396_v48  ;;  %vm1402_vm10 = vweird.f32 %v1396_v48  ;;  %v1406_v18 = vand.u32 2147483647, %v1396_v48 }
 0xdf8   :  { %v1409_v5 = vor.u32 1.1754944e-38, %v1408_v11  ;;  %vm1407_vm12 = vcmp.eq.f32.partialorder %v1406_v18, 8.507059e+37 }
 0xdfc   :  { %v5432_v14 = vpop.eup %5431 }
 0xdfd   :  { %v1398_v63 = vmul.f32 %v5432_v14, %v1396_v48  ;;  %vm1403_vm5 = vweird.f32 %v5432_v14 }
 0xdfe   :  { %vm1404_vm11 = vmor %vm1402_vm10, %vm1403_vm5 }
 0xdff   :  { %v1399_v51 = vsub.f32 1.0, %v1398_v63 }
 0xe01   :  { %v1400_v19 = vmul.f32 %v5432_v14, %v1399_v51 }
 0xe03   :  { %v1401_v52 = vadd.f32 %v5432_v14, %v1400_v19 }
 0xe05   :  { %v1405_v21 = vsel %vm1404_vm11, %v5432_v14, %v1401_v52 }
 0xe06   :  { %v1410_v10 = vsel %vm1407_vm12, %v1409_v5, %v1405_v21 }
 0xe07   :  { %v1413_v42 = vmul.f32 %v1410_v10, %v6082_v15  ;;  %v6319_v15 = vld [vmem:[%s7422_s6] ss:$0 sm:$0xff] }
 0xe4c   :  { %v1416_v40 = vpop.permute.xlu2 %1415 }
 0xe4d   :  { %v1418_v41 = vmul.f32 %v1416_v40, %v1410_v10 }
 0xe4f   :  { %1420 = vrot.lane.b32.xlu0 %v1418_v41, %s5683_s10 }
 0xec1   :  { %v1421_v43 = vpop.permute.xlu0 %1420 }
 0xec2   :  { %v6307_v34 = vadd.f32 %v1421_v43, %v1413_v42 }
 0xec4   :  { %5433 = vtanh.f32 %v6307_v34 }
 0xeca   :  { %v5434_v35 = vpop.eup %5433 }
 0xecb   :  { %1426 = vrot.lane.b32.xlu1 %v5434_v35, %s5683_s10 }
 0xf3d   :  { %v1427_v46 = vpop.permute.xlu1 %1426 }
 0xf3e   :  { %v1429_v36 = vmul.f32 %v1427_v46, %v1410_v10 }
 0xf40   :  { %1431 = vrot.lane.b32.xlu2 %v1429_v36, %s5684_s19 }
 0xf9a   :  { %v6312_v37 = vpop.permute.xlu2 %1431 }
 0xf9b   :  { %5142 = vmatmul.msk.f32.vlgmr.msrb.gmra.mxu3 %vm122_vm7, %v6312_v37 }
0x101e   :  { %v1452_v39 = vpop.f32.mrf.mxu3 }
0x101f   :  { %v6322_v57 = vadd.f32 %v6319_v15, %v1452_v39 }
0x1021   :  { %7439 = vst [vmem:[#allocation6_spill] sm:$0xff] %v6322_v57  ;;  %5435 = vtanh.f32 %v6322_v57  ;;  %v1478_v58 = vand.u32 2147483647, %v6322_v57  ;;  %v5143_v62 = vmul.f32 -1.442695, %v6322_v57  ;;  %v1475_v10 = vmax.f32 %v6322_v57, 0.0 }
0x1022   :  { %vm1476_vm3 = vcmp.ne.f32.partialorder %v6322_v57, %v6322_v57 }
0x1023   :  { %v1479_v60 = vsub.f32 0.0, %v1478_v58  ;;  %5437 = vpow2.f32 %v5143_v62 }
0x1025   :  { %v1480_v16 = vmul.f32 1.442695, %v1479_v60 }
0x1027   :  { %v6327_v44 = vpop.eup %5435  ;;  %5439 = vpow2.f32 %v1480_v16 }
0x1028   :  { %5145 = vmatmul.msk.f32.vlgmr.msrb.gmra.mxu1 %vm67_vm8, %v6327_v44  ;;  %v1494_v61 = vrot.slane %v6327_v44, 1  ;;  %v6334_v4 = vmul.f32 %v6327_v44, %v6327_v44 }
0x1029   :  { %v5438_v22 = vpop.eup %5437 }
0x102a   :  { %5147 = vmatmul.msk.f32.vlgmr.msra.gmra.mxu0 %vm67_vm8, %v1494_v61  ;;  %v1540_v48 = vsel %vm303_vm9, %v6334_v4, 0.0  ;;  %v1459_v14 = vadd.f32 1.0, %v5438_v22 }
0x102b   :  { %1541 = vadd.xlane.f32.xlu0 %v1540_v48 }
0x102c   :  { %5441 = vrcp.f32 %v1459_v14  ;;  %v1471_v43 = vand.u32 2147483648, %v1459_v14  ;;  %v1469_v46 = vand.u32 2147483647, %v1459_v14  ;;  %vm1465_vm15 = vweird.f32 %v1459_v14 }
0x102d   :  { %v5440_v63 = vpop.eup %5439 }
0x102e   :  { %v1482_v51 = vadd.f32 1.0, %v5440_v63  ;;  %v1485_v19 = vmul.f32 -0.5, %v5440_v63  ;;  %v1488_v18 = vand.u32 2147483647, %v5440_v63  ;;  %v1472_v62 = vor.u32 1.1754944e-38, %v1471_v43 }
0x102f   :  { %vm1470_vm5 = vcmp.eq.f32.partialorder %v1469_v46, 8.507059e+37 }
0x1030   :  { %5443 = vlog2.f32 %v1482_v51  ;;  %v1486_v11 = vadd.f32 1.0, %v1485_v19  ;;  %vm1489_vm13 = vcmp.lt.f32.partialorder %v1488_v18, 0.0004427343 }
0x1032   :  { %v5442_v52 = vpop.eup %5441  ;;  %v1487_v42 = vmul.f32 %v5440_v63, %v1486_v11  ;;  %v1670_v63 = vperm.slane %v6327_v44, 0 }
0x1033   :  { %v1461_v21 = vmul.f32 %v5442_v52, %v1459_v14  ;;  %vm1466_vm14 = vweird.f32 %v5442_v52  ;;  %v1689_v14 = vperm.slane %v6327_v44, 1 }
0x1034   :  { %vm1467_vm4 = vmor %vm1465_vm15, %vm1466_vm14 }
0x1035   :  { %v1462_v40 = vsub.f32 1.0, %v1461_v21 }
0x1036   :  { %v5444_v5 = vpop.eup %5443 }
0x1037   :  { %v1484_v41 = vmul.f32 0.6931472, %v5444_v5  ;;  %v1463_v35 = vmul.f32 %v5442_v52, %v1462_v40 }
0x1039   :  { %v1490_v36 = vsel %vm1489_vm13, %v1487_v42, %v1484_v41  ;;  %v1464_v58 = vadd.f32 %v5442_v52, %v1463_v35 }
0x103a   :  { %v1491_v39 = vadd.f32 %v1490_v36, %v1475_v10 }
0x103b   :  { %v1468_v16 = vsel %vm1467_vm4, %v5442_v52, %v1464_v58 }
0x103c   :  { %v6345_v60 = vsel %vm1476_vm3, %v6322_v57, %v1491_v39  ;;  %v1473_v22 = vsel %vm1470_vm5, %v1472_v62, %v1468_v16 }
0x103d   :  { %1575 = vperm.xlu2 %5278, %v6345_v60   ;;  %v1629_v48 = vperm.slane %v1473_v22, 1 }
0x103f   :  { %1640 = vperm.xlu1 %5281, %v1629_v48   ;;  %1646 = vperm.xlu0 %5279, %v1629_v48  }
0x1045   :  { %5280 = vset.pattern.permute.xlu2 %v5924_v32 }
0x1047   :  { %5283 = vset.pattern.permute.xlu1 %v5928_v45  ;;  %5284 = vset.pattern.permute.xlu0 %v5848_v49 }
0x104f   :  { %1634 = vperm.xlu1 %5283, %v1629_v48   ;;  %1706 = vperm.xlu0 %5284, %v1689_v14  }
0x1057   :  { %5286 = vset.pattern.permute.xlu1 %v5848_v49  ;;  %5289 = vset.pattern.permute.xlu0 %v5914_v29 }
0x105f   :  { %1687 = vperm.xlu1 %5286, %v1670_v63   ;;  %1694 = vperm.xlu0 %5289, %v1689_v14  }
0x1067   :  { %5288 = vset.pattern.permute.xlu1 %v5905_v12  ;;  %5293 = vset.pattern.permute.xlu0 %v5924_v32 }
0x106f   :  { %1681 = vperm.xlu1 %5288, %v1670_v63  }
0x1077   :  { %5292 = vset.pattern.permute.xlu1 %v7426_v54 }
0x109e   :  { %v1542_v51 = vpop.xlane.xlu0 %1541 }
0x109f   :  { %v1544_v19 = vrot.slane %v1542_v51, 1  ;;  %v1547_v52 = vmul.f32 %v1542_v51, %v6272_v50 }
0x10a1   :  { %v1548_v11 = vmul.f32 %v1544_v19, %v6270_v17  ;;  %v1549_v18 = vadd.f32 1e-08, %v1547_v52 }
0x10a3   :  { %v1550_v21 = vadd.f32 1e-08, %v1548_v11  ;;  %5445 = vrsqrt.f32 %v1549_v18  ;;  %vm1557_vm12 = vweird.f32 %v1549_v18  ;;  %v1576_v11 = vpop.permute.xlu2 %1575 }
0x10a5   :  { %5447 = vrsqrt.f32 %v1550_v21  ;;  %vm1567_vm14 = vweird.f32 %v1550_v21  ;;  %v1514_v51 = vpop.f32.mrf.mxu1 }
0x10a7   :  { %v1536_v62 = vpop.f32.mrf.mxu0 }
0x10a9   :  { %v5446_v5 = vpop.eup %5445 }
0x10aa   :  { %v1552_v40 = vmul.f32 %v5446_v5, %v1549_v18  ;;  %vm1558_vm10 = vweird.f32 %v5446_v5 }
0x10ab   :  { %v5448_v10 = vpop.eup %5447  ;;  %vm1559_vm13 = vmor %vm1557_vm12, %vm1558_vm10 }
0x10ac   :  { %v1553_v41 = vmul.f32 %v5446_v5, %v1552_v40  ;;  %v1562_v42 = vmul.f32 %v5448_v10, %v1550_v21  ;;  %vm1568_vm11 = vweird.f32 %v5448_v10 }
0x10ad   :  { %vm1569_vm15 = vmor %vm1567_vm14, %vm1568_vm11 }
0x10ae   :  { %v1554_v43 = vmul.f32 0.5, %v1553_v41  ;;  %v1563_v35 = vmul.f32 %v5448_v10, %v1562_v42 }
0x10b0   :  { %v1555_v46 = vsub.f32 1.5, %v1554_v43  ;;  %v1564_v36 = vmul.f32 0.5, %v1563_v35  ;;  %v1610_v43 = vperm.slane %v1473_v22, 0 }
0x10b2   :  { %v1556_v39 = vmul.f32 %v5446_v5, %v1555_v46  ;;  %v1565_v58 = vsub.f32 1.5, %v1564_v36 }
0x10b4   :  { %v1566_v17 = vmul.f32 %v5448_v10, %v1565_v58  ;;  %v1560_v50 = vsel %vm1559_vm13, %v5446_v5, %v1556_v39 }
0x10b5   :  { %v1571_v19 = vmul.f32 %v1560_v50, %v1514_v51 }
0x10b6   :  { %v1570_v16 = vsel %vm1569_vm15, %v5448_v10, %v1566_v17 }
0x10b7   :  { %v1572_v48 = vmul.f32 %v1570_v16, %v1536_v62 }
0x10b9   :  { %v1580_v52 = vrot.slane %v1572_v48, 7 }
0x10bb   :  { %v1581_v40 = vsel %vm97_vm1, %v1580_v52, %v1571_v19  ;;  %v1647_v19 = vpop.permute.xlu0 %1646 }
0x10bc   :  { %v1583_v41 = vmul.f32 %v1581_v40, %v1576_v11 }
0x10be   :  { %v1584_v42 = vsel %vm336_vm6, %v1583_v41, -inf }
0x10bf   :  { %1585 = vmax.xlane.f32.xlu2 %v1584_v42 }
0x10d7   :  { %1627 = vperm.xlu2 %5280, %v1610_v43  }
0x10df   :  { %5282 = vset.pattern.permute.xlu2 %v5932_v55 }
0x10e7   :  { %1621 = vperm.xlu2 %5282, %v1610_v43  }
0x10ef   :  { %5285 = vset.pattern.permute.xlu2 %v5928_v45 }
0x10f7   :  { %1615 = vperm.xlu2 %5285, %v1610_v43  }
0x10ff   :  { %5287 = vset.pattern.permute.xlu2 %v5905_v12 }
0x1107   :  { %1700 = vperm.xlu2 %5287, %v1689_v14   ;;  %v1772_v14 = vperm.slane %v1494_v61, 0 }
0x110f   :  { %5290 = vset.pattern.permute.xlu2 %v5914_v29 }
0x1117   :  { %1675 = vperm.xlu2 %5290, %v1670_v63  }
0x111f   :  { %1745 = vrot.lane.b32.xlu2 %v1670_v63, %s5686_s8  ;;  %v1641_v63 = vpop.permute.xlu1 %1640 }
0x1120   :  { %5291 = vset.pattern.permute.xlu2 %v7428_v59 }
0x1127   :  { %1838 = vperm.xlu2 %5291, %v6345_v60   ;;  %v1635_v60 = vpop.permute.xlu1 %1634 }
0x112f   :  { %5294 = vset.pattern.permute.xlu2 %v5924_v32  ;;  %v1688_v35 = vpop.permute.xlu1 %1687 }
0x1132   :  { %v1586_v22 = vpop.xlane.xlu2 %1585 }
0x1133   :  { %v1587_v18 = vsub.f32 %v1583_v41, %v1586_v22 }
0x1135   :  { %v1588_v21 = vmul.f32 1.442695, %v1587_v18 }
0x1137   :  { %5449 = vpow2.f32 %v1588_v21  ;;  %v1682_v36 = vpop.permute.xlu1 %1681 }
0x113a   :  { %v1628_v46 = vpop.permute.xlu2 %1627 }
0x113d   :  { %v5450_v5 = vpop.eup %5449 }
0x113e   :  { %v1590_v10 = vsel %vm336_vm6, %v5450_v5, 0.0 }
0x113f   :  { %1591 = vadd.xlane.f32.xlu1 %v1590_v10  ;;  %v1707_v10 = vpop.permute.xlu0 %1706 }
0x1142   :  { %v1622_v58 = vpop.permute.xlu2 %1621 }
0x1151   :  { %v1616_v62 = vpop.permute.xlu2 %1615 }
0x1158   :  { %1773 = vrot.lane.b32.xlu1 %v1772_v14, %s5686_s8 }
0x1160   :  { %1801 = vrot.lane.b32.xlu1 %v6334_v4, %s5686_s8 }
0x1161   :  { %v1701_v11 = vpop.permute.xlu2 %1700 }
0x11b2   :  { %v1592_v39 = vpop.xlane.xlu1 %1591 }
0x11b3   :  { %5451 = vrcp.f32 %v1592_v39  ;;  %v1604_v48 = vand.u32 2147483648, %v1592_v39  ;;  %v1602_v61 = vand.u32 2147483647, %v1592_v39  ;;  %vm1598_vm4 = vweird.f32 %v1592_v39 }
0x11b5   :  { %v1605_v4 = vor.u32 1.1754944e-38, %v1604_v48  ;;  %vm1603_vm10 = vcmp.eq.f32.partialorder %v1602_v61, 8.507059e+37 }
0x11b9   :  { %v5452_v17 = vpop.eup %5451 }
0x11ba   :  { %v1594_v50 = vmul.f32 %v5452_v17, %v1592_v39  ;;  %vm1599_vm3 = vweird.f32 %v5452_v17  ;;  %v1676_v39 = vpop.permute.xlu2 %1675 }
0x11bb   :  { %vm1600_vm5 = vmor %vm1598_vm4, %vm1599_vm3 }
0x11bc   :  { %v1595_v16 = vsub.f32 1.0, %v1594_v50 }
0x11be   :  { %v1596_v44 = vmul.f32 %v5452_v17, %v1595_v16 }
0x11c0   :  { %v1597_v51 = vadd.f32 %v5452_v17, %v1596_v44 }
0x11c2   :  { %v1601_v52 = vsel %vm1600_vm5, %v5452_v17, %v1597_v51 }
0x11c3   :  { %v1606_v40 = vsel %vm1603_vm10, %v1605_v4, %v1601_v52 }
0x11c4   :  { %v1607_v41 = vmul.f32 %v5450_v5, %v1606_v40 }
0x11c6   :  { %v1609_v42 = vrot.slane %v1607_v41, 1  ;;  %v1648_v43 = vperm.slane %v1607_v41, 0 }
0x11c8   :  { %v1649_v22 = vperm.slane %v1609_v42, 0  ;;  %v1654_v18 = vmul.f32 %v1648_v43, %v1628_v46  ;;  %v1653_v21 = vmul.f32 %v1648_v43, %v1622_v58  ;;  %v1652_v14 = vmul.f32 %v1648_v43, %v1616_v62  ;;  %v6423_v42 = vld [vmem:[%s7424_s7 + $0x8] sm:$0xff] }
0x11c9   :  { %v1710_v61 = vmul.f32 %v1688_v35, %v1648_v43  ;;  %v1709_v40 = vmul.f32 %v1682_v36, %v1648_v43  ;;  %v1746_v36 = vpop.permute.xlu2 %1745 }
0x11ca   :  { %v1774_v50 = vpop.permute.xlu1 %1773  ;;  %v1660_v16 = vsub.f32 1.0, %v1654_v18  ;;  %v1657_v54 = vmul.f32 %v1649_v22, %v1647_v19  ;;  %v1659_v44 = vsub.f32 1.0, %v1653_v21  ;;  %v1658_v59 = vsub.f32 1.0, %v1652_v14 }
0x11cb   :  { %v1656_v57 = vmul.f32 %v1649_v22, %v1641_v63  ;;  %v1655_v48 = vmul.f32 %v1649_v22, %v1635_v60  ;;  %v1713_v62 = vmul.f32 %v1707_v10, %v1649_v22 }
0x11cc   :  { %v1666_v17 = vmul.f32 %v1660_v16, %v6143_v30  ;;  %v1663_v51 = vsub.f32 1.0, %v1657_v54  ;;  %v1665_v5 = vmul.f32 %v1659_v44, %v6151_v24  ;;  %v1664_v19 = vmul.f32 %v1658_v59, %v6159_v25 }
0x11cd   :  { %v1662_v4 = vsub.f32 1.0, %v1656_v57  ;;  %v1661_v52 = vsub.f32 1.0, %v1655_v48  ;;  %v1712_v30 = vmul.f32 %v1701_v11, %v1649_v22  ;;  %v1695_v57 = vpop.permute.xlu0 %1694  ;;  %v6412_v11 = vld [vmem:[%s7424_s7 + $0x10] sm:$0xf] }
0x11ce   :  { %v6378_v46 = vadd.f32 %v1710_v61, %v1666_v17  ;;  %v1669_v58 = vmul.f32 %v1663_v51, %v6153_v13  ;;  %v6389_v63 = vadd.f32 %v1709_v40, %v1665_v5  ;;  %v1708_v13 = vmul.f32 %v1676_v39, %v1648_v43 }
0x11cf   :  { %v1668_v41 = vmul.f32 %v1662_v4, %v6161_v26  ;;  %v1667_v24 = vmul.f32 %v1661_v52, %v6166_v23  ;;  %v1711_v26 = vmul.f32 %v1695_v57, %v1649_v22 }
0x11d0   :  { %5148 = vmatpush.msk.msrb.mxu2 %vm56_vm0, %v6378_v46  ;;  %1887 = vmatpush.xpose.msra.mxu1 %v6378_v46  ;;  %v6386_v54 = vadd.f32 %v1713_v62, %v1669_v58  ;;  %v6398_v35 = vadd.f32 %v1708_v13, %v1664_v19 }
0x11d1   :  { %v6394_v25 = vadd.f32 %v1712_v30, %v1668_v41  ;;  %v6401_v23 = vadd.f32 %v1711_v26, %v1667_v24 }
0x11d2   :  { %5150 = vmatpush.msk.msra.mxu3 %vm56_vm0, %v6386_v54  ;;  %1907 = vmatpush.xpose.msrb.mxu0 %v6386_v54  ;;  %v1802_v59 = vpop.permute.xlu1 %1801 }
0x11d3   :  { %1766 = vmatpush.msrb.mxu2 %v6389_v63  ;;  %v1804_v60 = vsel %vm303_vm9, %v1802_v59, 0.0 }
0x11d4   :  { %1805 = vadd.xlane.f32.xlu0 %v1804_v60  ;;  %1794 = vmatpush.msra.mxu3 %v6394_v25 }
0x11d5   :  { %1767 = vmatpush.msrb.mxu2 %v6398_v35  ;;  %1888 = vmatpush.xpose.msra.mxu1 %v6389_v63 }
0x11d6   :  { %5149 = vmatmul.msk.f32.vlgmr.msrb.gmra.mxu2 %vm67_vm8, %v1746_v36  ;;  %1795 = vmatpush.msra.mxu3 %v6401_v23 }
0x11d7   :  { %1908 = vmatpush.xpose.msrb.mxu0 %v6394_v25  ;;  %5151 = vmatmul.msk.f32.vlgmr.msra.gmra.mxu3 %vm67_vm8, %v1774_v50 }
0x11d8   :  { %5152 = vmatpush.msk.msra.mxu2 %vm56_vm0, %v6412_v11  ;;  %5154 = vmatpush.msk.msrb.mxu3 %vm56_vm0, %v6178_v6  ;;  %v6433_v6 = vld [vmem:[%s7424_s7] sm:$0xff] }
0x11d9   :  { %1889 = vmatpush.xpose.msra.mxu1 %v6398_v35 }
0x11da   :  { %1934 = vmatpush.msra.mxu2 %v6423_v42  ;;  %1961 = vmatpush.msrb.mxu3 %v6193_v27  ;;  %v1721_v27 = vmul.f32 %v6389_v63, %v6389_v63 }
0x11db   :  { %1909 = vmatpush.xpose.msrb.mxu0 %v6401_v23 }
0x11dc   :  { %1935 = vmatpush.msra.mxu2 %v6433_v6  ;;  %1962 = vmatpush.msrb.mxu3 %v6203_v9  ;;  %v1722_v9 = vmul.f32 %v6378_v46, %v6378_v46 }
0x11dd   :  { %1988 = vmatpush.msrb.mxu1 %v6187_v20  ;;  %v1720_v20 = vmul.f32 %v6398_v35, %v6398_v35 }
0x11de   :  { %2005 = vmatpush.msrb.mxu2 %v6209_v28  ;;  %2069 = vmatpush.msra.mxu3 %v6215_v3  ;;  %v1723_v28 = vmul.f32 %v6401_v23, %v6401_v23  ;;  %v1724_v3 = vmul.f32 %v6394_v25, %v6394_v25 }
0x11df   :  { %5161 = vmatpush.msk.msra.mxu0 %vm56_vm0, %v6378_v46 }
0x11e0   :  { %2006 = vmatpush.msrb.mxu2 %v6222_v31  ;;  %2070 = vmatpush.msra.mxu3 %v6228_v33  ;;  %v1725_v31 = vmul.f32 %v6386_v54, %v6386_v54  ;;  %v1726_v33 = vadd.f32 %v1721_v27, %v1720_v20 }
0x11e1   :  { %2133 = vmatpush.msra.mxu0 %v6389_v63 }
0x11e2   :  { %2007 = vmatpush.msrb.mxu2 %v6235_v2  ;;  %2071 = vmatpush.msra.mxu3 %v6241_v7  ;;  %v1727_v2 = vsel %vm56_vm0, %v1722_v9, 0.0  ;;  %v1735_v7 = vadd.f32 %v1724_v3, %v1723_v28 }
0x11e3   :  { %2134 = vmatpush.msra.mxu0 %v6398_v35 }
0x11e4   :  { %2008 = vmatpush.msrb.mxu2 %v6247_v1  ;;  %2072 = vmatpush.msra.mxu3 %v6253_v8  ;;  %v1736_v1 = vsel %vm56_vm0, %v1725_v31, 0.0  ;;  %v1728_v8 = vadd.f32 %v1727_v2, %v1726_v33 }
0x11e5   :  { %v1737_v43 = vadd.f32 %v1736_v1, %v1735_v7  ;;  %v1839_v7 = vpop.permute.xlu2 %1838 }
0x11e6   :  { %v1729_v22 = vrot.slane %v1728_v8, 4 }
0x11e7   :  { %v1738_v18 = vrot.slane %v1737_v43, 4 }
0x11e8   :  { %v1730_v21 = vadd.f32 %v1729_v22, %v1728_v8 }
0x11e9   :  { %v1739_v10 = vadd.f32 %v1738_v18, %v1737_v43 }
0x11ea   :  { %v1731_v14 = vrot.slane %v1730_v21, 2 }
0x11eb   :  { %v1740_v50 = vrot.slane %v1739_v10, 2 }
0x11ec   :  { %v1732_v16 = vadd.f32 %v1731_v14, %v1730_v21 }
0x11ed   :  { %v1741_v44 = vadd.f32 %v1740_v50, %v1739_v10 }
0x11ee   :  { %v1733_v39 = vrot.slane %v1732_v16, 1 }
0x11ef   :  { %v1742_v48 = vrot.slane %v1741_v44, 1 }
0x11f0   :  { %v6461_v17 = vadd.f32 %v1733_v39, %v1732_v16 }
0x11f1   :  { %v6463_v51 = vadd.f32 %v1742_v48, %v1741_v44 }
0x1247   :  { %v1806_v61 = vpop.xlane.xlu0 %1805 }
0x1248   :  { %v1808_v5 = vrot.slane %v1806_v61, 1  ;;  %v1811_v4 = vmul.f32 %v1806_v61, %v6461_v17 }
0x124a   :  { %v1812_v52 = vmul.f32 %v1808_v5, %v6463_v51  ;;  %v1813_v58 = vadd.f32 1e-08, %v1811_v4 }
0x124c   :  { %v1814_v62 = vadd.f32 1e-08, %v1812_v52  ;;  %5453 = vrsqrt.f32 %v1813_v58  ;;  %vm1821_vm13 = vweird.f32 %v1813_v58 }
0x124e   :  { %5455 = vrsqrt.f32 %v1814_v62  ;;  %vm1831_vm15 = vweird.f32 %v1814_v62 }
0x1252   :  { %v5454_v40 = vpop.eup %5453 }
0x1253   :  { %v1816_v19 = vmul.f32 %v5454_v40, %v1813_v58  ;;  %vm1822_vm11 = vweird.f32 %v5454_v40 }
0x1254   :  { %v5456_v41 = vpop.eup %5455  ;;  %vm1823_vm14 = vmor %vm1821_vm13, %vm1822_vm11 }
0x1255   :  { %v1817_v30 = vmul.f32 %v5454_v40, %v1816_v19  ;;  %v1826_v24 = vmul.f32 %v5456_v41, %v1814_v62  ;;  %vm1832_vm12 = vweird.f32 %v5456_v41 }
0x1256   :  { %vm1833_vm3 = vmor %vm1831_vm15, %vm1832_vm12 }
0x1257   :  { %v1818_v57 = vmul.f32 0.5, %v1817_v30  ;;  %v1827_v13 = vmul.f32 %v5456_v41, %v1826_v24  ;;  %v1946_v30 = vld [vmem:[%s7418_s0 + $0xb] sm:$0x1] }
0x1258   :  { %v1969_v24 = vrot.slane %v1946_v30, 7 }
0x1259   :  { %v1819_v59 = vsub.f32 1.5, %v1818_v57  ;;  %v1828_v26 = vmul.f32 0.5, %v1827_v13  ;;  %v1769_v31 = vpop.f32.mrf.mxu2 }
0x125a   :  { %v1797_v9 = vpop.f32.mrf.mxu3 }
0x125b   :  { %v1820_v60 = vmul.f32 %v5454_v40, %v1819_v59  ;;  %v1829_v36 = vsub.f32 1.5, %v1828_v26 }
0x125d   :  { %v1830_v20 = vmul.f32 %v5456_v41, %v1829_v36  ;;  %v1824_v27 = vsel %vm1823_vm14, %v5454_v40, %v1820_v60 }
0x125e   :  { %v1835_v33 = vmul.f32 %v1824_v27, %v1769_v31 }
0x125f   :  { %v1834_v28 = vsel %vm1833_vm3, %v5456_v41, %v1830_v20  ;;  %v1945_v41 = vld [vmem:[%s7418_s0 + $0x3] sm:$0x1] }
0x1260   :  { %v1836_v3 = vmul.f32 %v1834_v28, %v1797_v9  ;;  %v1970_v57 = vsel %vm97_vm1, %v1969_v24, %v1945_v41 }
0x1262   :  { %v1843_v2 = vrot.slane %v1836_v3, 7 }
0x1264   :  { %v1844_v1 = vsel %vm97_vm1, %v1843_v2, %v1835_v33 }
0x1265   :  { %v1846_v8 = vmul.f32 %v1844_v1, %v1839_v7 }
0x1267   :  { %v1847_v43 = vsel %vm336_vm6, %v1846_v8, -inf }
0x1268   :  { %1848 = vmax.xlane.f32.xlu1 %v1847_v43 }
0x12db   :  { %v1849_v22 = vpop.xlane.xlu1 %1848 }
0x12dc   :  { %v1850_v18 = vsub.f32 %v1846_v8, %v1849_v22 }
0x12de   :  { %v1851_v21 = vmul.f32 1.442695, %v1850_v18 }
0x12e0   :  { %5457 = vpow2.f32 %v1851_v21 }
0x12e6   :  { %v5458_v10 = vpop.eup %5457 }
0x12e7   :  { %v1853_v14 = vsel %vm336_vm6, %v5458_v10, 0.0 }
0x12e8   :  { %1854 = vadd.xlane.f32.xlu2 %v1853_v14 }
0x135b   :  { %v1855_v50 = vpop.xlane.xlu2 %1854 }
0x135c   :  { %5459 = vrcp.f32 %v1855_v50  ;;  %v1867_v48 = vand.u32 2147483648, %v1855_v50  ;;  %v1865_v5 = vand.u32 2147483647, %v1855_v50  ;;  %vm1861_vm5 = vweird.f32 %v1855_v50 }
0x135e   :  { %v1868_v52 = vor.u32 1.1754944e-38, %v1867_v48  ;;  %vm1866_vm11 = vcmp.eq.f32.partialorder %v1865_v5, 8.507059e+37 }
0x1362   :  { %v5460_v16 = vpop.eup %5459 }
0x1363   :  { %v1857_v44 = vmul.f32 %v5460_v16, %v1855_v50  ;;  %vm1862_vm4 = vweird.f32 %v5460_v16 }
0x1364   :  { %vm1863_vm10 = vmor %vm1861_vm5, %vm1862_vm4 }
0x1365   :  { %v1858_v39 = vsub.f32 1.0, %v1857_v44 }
0x1367   :  { %v1859_v61 = vmul.f32 %v5460_v16, %v1858_v39 }
0x1369   :  { %v1860_v4 = vadd.f32 %v5460_v16, %v1859_v61 }
0x136b   :  { %v1864_v58 = vsel %vm1863_vm10, %v5460_v16, %v1860_v4 }
0x136c   :  { %v1869_v62 = vsel %vm1866_vm11, %v1868_v52, %v1864_v58 }
0x136d   :  { %v1870_v40 = vmul.f32 %v5458_v10, %v1869_v62 }
0x136f   :  { %1890 = vmatmul.f32.vlgmr.msra.gmra.mxu1 %v1870_v40  ;;  %v1872_v19 = vrot.slane %v1870_v40, 1 }
0x1370   :  { %5163 = vmatpush.msk.msra.mxu1 %vm56_vm0, %v6386_v54 }
0x1371   :  { %1910 = vmatmul.f32.vlgmr.msrb.gmra.mxu0 %v1872_v19 }
0x1372   :  { %2155 = vmatpush.msra.mxu1 %v6394_v25 }
0x1374   :  { %2156 = vmatpush.msra.mxu1 %v6401_v23 }
0x1377   :  { %5156 = vmatmul.msk.f32.vlgmr.msrb.gmra.mxu1 %vm99_vm2, %v1970_v57 }
0x13ec   :  { %v1891_v26 = vpop.f32.mrf.mxu1 }
0x13ee   :  { %v1911_v13 = vpop.f32.mrf.mxu0 }
0x13ef   :  { %v1916_v59 = vrot.slane %v1911_v13, 7 }
0x13f1   :  { %v1917_v60 = vsel %vm97_vm1, %v1916_v59, %v1891_v26 }
0x13f2   :  { %5153 = vmatmul.msk.f32.vlgmr.msra.gmra.mxu2 %vm67_vm8, %v1917_v60  ;;  %5155 = vmatmul.msk.f32.vlgmr.msrb.gmra.mxu3 %vm67_vm8, %v1917_v60 }
0x13f4   :  { %v1990_v27 = vpop.f32.mrf.mxu1 }
0x13fa   :  { %5157 = vmatmul.msk.f32.vlgmr.msrb.gmra.mxu2 %vm122_vm7, %v6312_v37 }
0x1475   :  { %v6487_v36 = vpop.f32.mrf.mxu2  ;;  %v1964_v20 = vpop.f32.mrf.mxu3 }
0x1476   :  { %7440 = vst [vmem:[#allocation7_spill] sm:$0xff] %v6487_v36  ;;  %v1991_v9 = vadd.f32 %v1990_v27, %v1964_v20 }
0x147d   :  { %v2010_v28 = vpop.f32.mrf.mxu2 }
0x147e   :  { %v2013_v3 = vadd.f32 %v2010_v28, %v1991_v9 }
0x1480   :  { %v2014_v31 = vadd.f32 %v6301_v53, %v2013_v3 }
0x1482   :  { %5461 = vtanh.f32 %v2014_v31  ;;  %v5158_v2 = vmul.f32 -1.442695, %v2014_v31 }
0x1484   :  { %5463 = vpow2.f32 %v5158_v2 }
0x1488   :  { %v5462_v33 = vpop.eup %5461 }
0x1489   :  { %2037 = vrot.lane.b32.xlu0 %v5462_v33, %s5683_s10 }
0x148a   :  { %v5464_v7 = vpop.eup %5463 }
0x148b   :  { %v2018_v1 = vadd.f32 1.0, %v5464_v7 }
0x148d   :  { %5465 = vrcp.f32 %v2018_v1  ;;  %v2030_v21 = vand.u32 2147483648, %v2018_v1  ;;  %vm2024_vm13 = vweird.f32 %v2018_v1  ;;  %v2028_v10 = vand.u32 2147483647, %v2018_v1 }
0x148f   :  { %v2031_v14 = vor.u32 1.1754944e-38, %v2030_v21  ;;  %vm2029_vm15 = vcmp.eq.f32.partialorder %v2028_v10, 8.507059e+37 }
0x1493   :  { %v5466_v8 = vpop.eup %5465 }
0x1494   :  { %v2020_v37 = vmul.f32 %v5466_v8, %v2018_v1  ;;  %vm2025_vm12 = vweird.f32 %v5466_v8 }
0x1495   :  { %vm2026_vm14 = vmor %vm2024_vm13, %vm2025_vm12 }
0x1496   :  { %v2021_v43 = vsub.f32 1.0, %v2020_v37 }
0x1498   :  { %v2022_v22 = vmul.f32 %v5466_v8, %v2021_v43 }
0x149a   :  { %v2023_v18 = vadd.f32 %v5466_v8, %v2022_v22 }
0x149c   :  { %v2027_v53 = vsel %vm2026_vm14, %v5466_v8, %v2023_v18 }
0x149d   :  { %v2032_v16 = vsel %vm2029_vm15, %v2031_v14, %v2027_v53 }
0x149e   :  { %v2035_v39 = vmul.f32 %v2032_v16, %v6307_v34 }
0x14fb   :  { %v2038_v50 = vpop.permute.xlu0 %2037 }
0x14fc   :  { %v2040_v44 = vmul.f32 %v2038_v50, %v2032_v16 }
0x14fe   :  { %2042 = vrot.lane.b32.xlu1 %v2040_v44, %s5683_s10 }
0x1570   :  { %v2043_v48 = vpop.permute.xlu1 %2042 }
0x1571   :  { %v6493_v61 = vadd.f32 %v2043_v48, %v2035_v39 }
0x1573   :  { %5467 = vtanh.f32 %v6493_v61 }
0x1579   :  { %v5468_v5 = vpop.eup %5467 }
0x157a   :  { %2048 = vrot.lane.b32.xlu2 %v5468_v5, %s5683_s10  ;;  %v7442_v5 = vmov 81  }
0x15d4   :  { %v2049_v4 = vpop.permute.xlu2 %2048 }
0x15d5   :  { %v2051_v52 = vmul.f32 %v2049_v4, %v2032_v16  ;;  %v7443_v4 = vmov 80  }
0x15d7   :  { %2053 = vrot.lane.b32.xlu0 %v2051_v52, %s5684_s19 }
0x1649   :  { %v6498_v58 = vpop.permute.xlu0 %2053 }
0x164a   :  { %5159 = vmatmul.msk.f32.vlgmr.msra.gmra.mxu3 %vm122_vm7, %v6498_v58 }
0x16cd   :  { %v2074_v62 = vpop.f32.mrf.mxu3 }
0x16ce   :  { %v6503_v34 = vadd.f32 %v6319_v15, %v2074_v62 }
0x16d0   :  { %7441 = vst [vmem:[#allocation8_spill] sm:$0xff] %v6503_v34  ;;  %5469 = vtanh.f32 %v6503_v34  ;;  %v2100_v40 = vand.u32 2147483647, %v6503_v34  ;;  %v5160_v19 = vmul.f32 -1.442695, %v6503_v34  ;;  %v2097_v7 = vmax.f32 %v6503_v34, 0.0 }
0x16d1   :  { %vm2098_vm10 = vcmp.ne.f32.partialorder %v6503_v34, %v6503_v34 }
0x16d2   :  { %v2101_v41 = vsub.f32 0.0, %v2100_v40  ;;  %5471 = vpow2.f32 %v5160_v19 }
0x16d4   :  { %v2102_v30 = vmul.f32 1.442695, %v2101_v41 }
0x16d6   :  { %v6508_v24 = vpop.eup %5469  ;;  %5473 = vpow2.f32 %v2102_v30 }
0x16d7   :  { %5162 = vmatmul.msk.f32.vlgmr.msra.gmra.mxu0 %vm67_vm8, %v6508_v24  ;;  %v2116_v57 = vrot.slane %v6508_v24, 1  ;;  %v6515_v15 = vmul.f32 %v6508_v24, %v6508_v24  ;;  %v2292_v48 = vperm.slane %v6508_v24, 0 }
0x16d8   :  { %v5472_v13 = vpop.eup %5471 }
0x16d9   :  { %5164 = vmatmul.msk.f32.vlgmr.msra.gmra.mxu1 %vm67_vm8, %v2116_v57  ;;  %v2162_v59 = vsel %vm303_vm9, %v6515_v15, 0.0  ;;  %v2081_v26 = vadd.f32 1.0, %v5472_v13 }
0x16da   :  { %2163 = vadd.xlane.f32.xlu0 %v2162_v59 }
0x16db   :  { %5475 = vrcp.f32 %v2081_v26  ;;  %v2093_v37 = vand.u32 2147483648, %v2081_v26  ;;  %v2091_v22 = vand.u32 2147483647, %v2081_v26  ;;  %vm2087_vm5 = vweird.f32 %v2081_v26 }
0x16dc   :  { %v5474_v60 = vpop.eup %5473 }
0x16dd   :  { %v2104_v20 = vadd.f32 1.0, %v5474_v60  ;;  %v2107_v27 = vmul.f32 -0.5, %v5474_v60  ;;  %v2110_v3 = vand.u32 2147483647, %v5474_v60  ;;  %v2094_v53 = vor.u32 1.1754944e-38, %v2093_v37 }
0x16de   :  { %vm2092_vm12 = vcmp.eq.f32.partialorder %v2091_v22, 8.507059e+37 }
0x16df   :  { %5477 = vlog2.f32 %v2104_v20  ;;  %v2108_v28 = vadd.f32 1.0, %v2107_v27  ;;  %vm2111_vm3 = vcmp.lt.f32.partialorder %v2110_v3, 0.0004427343 }
0x16e1   :  { %v5476_v9 = vpop.eup %5475  ;;  %v2109_v8 = vmul.f32 %v5474_v60, %v2108_v28 }
0x16e2   :  { %v2083_v31 = vmul.f32 %v5476_v9, %v2081_v26  ;;  %vm2088_vm4 = vweird.f32 %v5476_v9 }
0x16e3   :  { %vm2089_vm11 = vmor %vm2087_vm5, %vm2088_vm4 }
0x16e4   :  { %v2084_v2 = vsub.f32 1.0, %v2083_v31 }
0x16e5   :  { %v5478_v33 = vpop.eup %5477 }
0x16e6   :  { %v2106_v1 = vmul.f32 0.6931472, %v5478_v33  ;;  %v2085_v43 = vmul.f32 %v5476_v9, %v2084_v2 }
0x16e8   :  { %v2112_v18 = vsel %vm2111_vm3, %v2109_v8, %v2106_v1  ;;  %v2086_v10 = vadd.f32 %v5476_v9, %v2085_v43 }
0x16e9   :  { %v2113_v21 = vadd.f32 %v2112_v18, %v2097_v7 }
0x16ea   :  { %v2090_v50 = vsel %vm2089_vm11, %v5476_v9, %v2086_v10 }
0x16eb   :  { %v2114_v14 = vsel %vm2098_vm10, %v6503_v34, %v2113_v21  ;;  %v2095_v16 = vsel %vm2092_vm12, %v2094_v53, %v2090_v50  ;;  %v2311_v53 = vperm.slane %v6508_v24, 1 }
0x16ec   :  { %2197 = vperm.xlu1 %5292, %v2114_v14   ;;  %v2251_v44 = vperm.slane %v2095_v16, 1  ;;  %v2232_v39 = vperm.slane %v2095_v16, 0 }
0x16ee   :  { %2268 = vperm.xlu0 %5293, %v2251_v44  }
0x16f4   :  { %5295 = vset.pattern.permute.xlu1 %v5932_v55 }
0x16f6   :  { %5299 = vset.pattern.permute.xlu0 %v5928_v45 }
0x16fc   :  { %2262 = vperm.xlu1 %5295, %v2251_v44  }
0x16fe   :  { %2237 = vperm.xlu0 %5299, %v2232_v39  }
0x1704   :  { %5297 = vset.pattern.permute.xlu1 %v5928_v45 }
0x1706   :  { %5304 = vset.pattern.permute.xlu0 %v5914_v29 }
0x170c   :  { %2256 = vperm.xlu1 %5297, %v2251_v44  }
0x170e   :  { %2297 = vperm.xlu0 %5304, %v2292_v48  }
0x1714   :  { %5300 = vset.pattern.permute.xlu1 %v5848_v49 }
0x1716   :  { %5305 = vset.pattern.permute.xlu0 %v7442_v5 }
0x1717   :  { %2460 = vperm.xlu0 %5305, %v2114_v14  }
0x171c   :  { %2309 = vperm.xlu1 %5300, %v2292_v48  }
0x171f   :  { %5308 = vset.pattern.permute.xlu0 %v5924_v32 }
0x1724   :  { %5302 = vset.pattern.permute.xlu1 %v5905_v12 }
0x172c   :  { %2303 = vperm.xlu1 %5302, %v2292_v48  }
0x1734   :  { %5306 = vset.pattern.permute.xlu1 %v7443_v4 }
0x174d   :  { %v2164_v52 = vpop.xlane.xlu0 %2163 }
0x174e   :  { %v2166_v62 = vrot.slane %v2164_v52, 1  ;;  %v2169_v40 = vmul.f32 %v2164_v52, %v6461_v17  ;;  %v2394_v52 = vperm.slane %v2116_v57, 0 }
0x1750   :  { %v2170_v19 = vmul.f32 %v2166_v62, %v6463_v51  ;;  %v2171_v41 = vadd.f32 1e-08, %v2169_v40 }
0x1752   :  { %v2172_v30 = vadd.f32 1e-08, %v2170_v19  ;;  %5479 = vrsqrt.f32 %v2171_v41  ;;  %vm2179_vm15 = vweird.f32 %v2171_v41 }
0x1754   :  { %5481 = vrsqrt.f32 %v2172_v30  ;;  %vm2189_vm4 = vweird.f32 %v2172_v30  ;;  %v2136_v8 = vpop.f32.mrf.mxu0 }
0x1756   :  { %v2158_v2 = vpop.f32.mrf.mxu1 }
0x1758   :  { %v5480_v13 = vpop.eup %5479 }
0x1759   :  { %v2174_v59 = vmul.f32 %v5480_v13, %v2171_v41  ;;  %vm2180_vm13 = vweird.f32 %v5480_v13 }
0x175a   :  { %v5482_v26 = vpop.eup %5481  ;;  %vm2181_vm3 = vmor %vm2179_vm15, %vm2180_vm13 }
0x175b   :  { %v2175_v60 = vmul.f32 %v5480_v13, %v2174_v59  ;;  %v2184_v20 = vmul.f32 %v5482_v26, %v2172_v30  ;;  %vm2190_vm14 = vweird.f32 %v5482_v26 }
0x175c   :  { %vm2191_vm5 = vmor %vm2189_vm4, %vm2190_vm14 }
0x175d   :  { %v2176_v27 = vmul.f32 0.5, %v2175_v60  ;;  %v2185_v9 = vmul.f32 %v5482_v26, %v2184_v20 }
0x175e   :  { %v2198_v22 = vpop.permute.xlu1 %2197 }
0x175f   :  { %v2177_v28 = vsub.f32 1.5, %v2176_v27  ;;  %v2186_v3 = vmul.f32 0.5, %v2185_v9 }
0x1760   :  { %v2269_v9 = vpop.permute.xlu0 %2268 }
0x1761   :  { %v2178_v31 = vmul.f32 %v5480_v13, %v2177_v28  ;;  %v2187_v33 = vsub.f32 1.5, %v2186_v3 }
0x1763   :  { %v2188_v17 = vmul.f32 %v5482_v26, %v2187_v33  ;;  %v2182_v51 = vsel %vm2181_vm3, %v5480_v13, %v2178_v31 }
0x1764   :  { %v2193_v37 = vmul.f32 %v2182_v51, %v2136_v8 }
0x1765   :  { %v2192_v7 = vsel %vm2191_vm5, %v5482_v26, %v2188_v17 }
0x1766   :  { %v2194_v1 = vmul.f32 %v2192_v7, %v2158_v2 }
0x1768   :  { %v2202_v43 = vrot.slane %v2194_v1, 7 }
0x176a   :  { %v2203_v18 = vsel %vm97_vm1, %v2202_v43, %v2193_v37 }
0x176b   :  { %v2205_v21 = vmul.f32 %v2203_v18, %v2198_v22 }
0x176d   :  { %v2206_v10 = vsel %vm336_vm6, %v2205_v21, -inf }
0x176e   :  { %2207 = vmax.xlane.f32.xlu2 %v2206_v10  ;;  %v2263_v62 = vpop.permute.xlu1 %2262 }
0x1770   :  { %v2238_v7 = vpop.permute.xlu0 %2237 }
0x1786   :  { %2249 = vperm.xlu2 %5294, %v2232_v39  }
0x178e   :  { %5296 = vset.pattern.permute.xlu2 %v5932_v55 }
0x1796   :  { %2243 = vperm.xlu2 %5296, %v2232_v39  }
0x179e   :  { %5298 = vset.pattern.permute.xlu2 %v5848_v49 }
0x17a6   :  { %2328 = vperm.xlu2 %5298, %v2311_v53  }
0x17ae   :  { %5301 = vset.pattern.permute.xlu2 %v5905_v12 }
0x17b6   :  { %2322 = vperm.xlu2 %5301, %v2311_v53  }
0x17be   :  { %5303 = vset.pattern.permute.xlu2 %v5914_v29 }
0x17c6   :  { %2316 = vperm.xlu2 %5303, %v2311_v53  }
0x17ce   :  { %2367 = vrot.lane.b32.xlu2 %v2292_v48, %s5686_s8  ;;  %v2257_v48 = vpop.permute.xlu1 %2256 }
0x17cf   :  { %5307 = vset.pattern.permute.xlu2 %v5924_v32 }
0x17d6   :  { %v2310_v40 = vpop.permute.xlu1 %2309 }
0x17de   :  { %v2304_v41 = vpop.permute.xlu1 %2303 }
0x17e1   :  { %v2208_v14 = vpop.xlane.xlu2 %2207 }
0x17e2   :  { %v2209_v50 = vsub.f32 %v2205_v21, %v2208_v14 }
0x17e4   :  { %v2210_v16 = vmul.f32 1.442695, %v2209_v50 }
0x17e6   :  { %5483 = vpow2.f32 %v2210_v16 }
0x17e9   :  { %v2250_v19 = vpop.permute.xlu2 %2249 }
0x17ec   :  { %v5484_v44 = vpop.eup %5483 }
0x17ed   :  { %v2212_v39 = vsel %vm336_vm6, %v5484_v44, 0.0 }
0x17ee   :  { %2213 = vadd.xlane.f32.xlu1 %v2212_v39 }
0x17f1   :  { %v2244_v13 = vpop.permute.xlu2 %2243 }
0x1800   :  { %v2329_v60 = vpop.permute.xlu2 %2328 }
0x1807   :  { %2395 = vrot.lane.b32.xlu1 %v2394_v52, %s5686_s8 }
0x180f   :  { %2423 = vrot.lane.b32.xlu1 %v6515_v15, %s5686_s8 }
0x1810   :  { %v2323_v31 = vpop.permute.xlu2 %2322 }
0x1820   :  { %v2317_v53 = vpop.permute.xlu2 %2316 }
0x1861   :  { %v2214_v30 = vpop.xlane.xlu1 %2213 }
0x1862   :  { %5485 = vrcp.f32 %v2214_v30  ;;  %v2226_v27 = vand.u32 2147483648, %v2214_v30  ;;  %v2224_v57 = vand.u32 2147483647, %v2214_v30  ;;  %vm2220_vm11 = vweird.f32 %v2214_v30 }
0x1864   :  { %v2227_v15 = vor.u32 1.1754944e-38, %v2226_v27  ;;  %vm2225_vm13 = vcmp.eq.f32.partialorder %v2224_v57, 8.507059e+37  ;;  %v2298_v57 = vpop.permute.xlu0 %2297 }
0x1868   :  { %v5486_v59 = vpop.eup %5485 }
0x1869   :  { %v2216_v26 = vmul.f32 %v5486_v59, %v2214_v30  ;;  %vm2221_vm10 = vweird.f32 %v5486_v59 }
0x186a   :  { %vm2222_vm12 = vmor %vm2220_vm11, %vm2221_vm10 }
0x186b   :  { %v2217_v20 = vsub.f32 1.0, %v2216_v26 }
0x186d   :  { %v2218_v24 = vmul.f32 %v5486_v59, %v2217_v20 }
0x186f   :  { %v2219_v28 = vadd.f32 %v5486_v59, %v2218_v24 }
0x1871   :  { %v2223_v3 = vsel %vm2222_vm12, %v5486_v59, %v2219_v28  ;;  %v2368_v28 = vpop.permute.xlu2 %2367 }
0x1872   :  { %v2228_v33 = vsel %vm2225_vm13, %v2227_v15, %v2223_v3  ;;  %v6592_v15 = vld [vmem:[%s7419_s2 + $0x10] sm:$0xf]  ;;  %v6599_v3 = vld [vmem:[%s7417_s1] sm:$0xff] }
0x1873   :  { %v2229_v17 = vmul.f32 %v5484_v44, %v2228_v33  ;;  %v6635_v33 = vld [vmem:[%s7416_s3 + $0x10] sm:$0xff] }
0x1875   :  { %v2231_v51 = vrot.slane %v2229_v17, 1  ;;  %v2270_v2 = vperm.slane %v2229_v17, 0  ;;  %v6642_v17 = vld [vmem:[%s7421_s5 + $0x10] sm:$0xff] }
0x1877   :  { %v2271_v1 = vperm.slane %v2231_v51, 0  ;;  %v2276_v8 = vmul.f32 %v2270_v2, %v2250_v19  ;;  %v2275_v37 = vmul.f32 %v2270_v2, %v2244_v13  ;;  %v2274_v43 = vmul.f32 %v2270_v2, %v2238_v7  ;;  %v6648_v51 = vld [vmem:[%s7416_s3 + $0x8] sm:$0xff]  ;;  %v6660_v7 = vld [vmem:[%s7416_s3] sm:$0xff] }
0x1878   :  { %v2332_v52 = vmul.f32 %v2310_v40, %v2270_v2  ;;  %v2331_v59 = vmul.f32 %v2304_v41, %v2270_v2 }
0x1879   :  { %v2396_v22 = vpop.permute.xlu1 %2395  ;;  %v2282_v18 = vsub.f32 1.0, %v2276_v8  ;;  %v2281_v21 = vsub.f32 1.0, %v2275_v37  ;;  %v2279_v10 = vmul.f32 %v2271_v1, %v2269_v9  ;;  %v2280_v14 = vsub.f32 1.0, %v2274_v43 }
0x187a   :  { %v2278_v50 = vmul.f32 %v2271_v1, %v2263_v62  ;;  %v2277_v16 = vmul.f32 %v2271_v1, %v2257_v48  ;;  %v2335_v27 = vmul.f32 %v2329_v60, %v2271_v1  ;;  %v2330_v48 = vmul.f32 %v2298_v57, %v2270_v2  ;;  %v6654_v2 = vld [vmem:[%s7421_s5 + $0x8] sm:$0xff] }
0x187b   :  { %v2288_v39 = vmul.f32 %v2282_v18, %v6378_v46  ;;  %v2287_v44 = vmul.f32 %v2281_v21, %v6389_v63  ;;  %v2285_v30 = vsub.f32 1.0, %v2279_v10  ;;  %v2286_v24 = vmul.f32 %v2280_v14, %v6398_v35 }
0x187c   :  { %v2284_v26 = vsub.f32 1.0, %v2278_v50  ;;  %v2283_v20 = vsub.f32 1.0, %v2277_v16  ;;  %v2334_v40 = vmul.f32 %v2323_v31, %v2271_v1  ;;  %v2333_v9 = vmul.f32 %v2317_v53, %v2271_v1  ;;  %v6616_v31 = vld [vmem:[%s7419_s2] sm:$0xff] }
0x187d   :  { %v6555_v19 = vadd.f32 %v2332_v52, %v2288_v39  ;;  %v2291_v13 = vmul.f32 %v2285_v30, %v6386_v54  ;;  %v6563_v46 = vadd.f32 %v2331_v59, %v2287_v44  ;;  %v6666_v1 = vld [vmem:[%s7421_s5] sm:$0xff] }
0x187e   :  { %v2290_v62 = vmul.f32 %v2284_v26, %v6394_v25  ;;  %v2289_v41 = vmul.f32 %v2283_v20, %v6401_v23  ;;  %v6571_v25 = vadd.f32 %v2330_v48, %v2286_v24 }
0x187f   :  { %5165 = vmatpush.msk.msra.mxu2 %vm56_vm0, %v6555_v19  ;;  %2509 = vmatpush.xpose.msrb.mxu0 %v6555_v19  ;;  %v6565_v63 = vadd.f32 %v2335_v27, %v2291_v13  ;;  %v2343_v37 = vmul.f32 %v6563_v46, %v6563_v46  ;;  %v2344_v43 = vmul.f32 %v6555_v19, %v6555_v19 }
0x1880   :  { %v6575_v60 = vadd.f32 %v2334_v40, %v2290_v62  ;;  %v6580_v23 = vadd.f32 %v2333_v9, %v2289_v41  ;;  %v2342_v8 = vmul.f32 %v6571_v25, %v6571_v25 }
0x1881   :  { %v2424_v54 = vpop.permute.xlu1 %2423  ;;  %2388 = vmatpush.msra.mxu2 %v6563_v46  ;;  %5167 = vmatpush.msk.msrb.mxu3 %vm56_vm0, %v6565_v63  ;;  %v2347_v21 = vmul.f32 %v6565_v63, %v6565_v63  ;;  %v2349_v53 = vsel %vm56_vm0, %v2344_v43, 0.0 }
0x1882   :  { %2529 = vmatpush.xpose.msrb.mxu1 %v6565_v63  ;;  %v2426_v35 = vsel %vm303_vm9, %v2424_v54, 0.0  ;;  %v2346_v18 = vmul.f32 %v6575_v60, %v6575_v60  ;;  %v2348_v10 = vadd.f32 %v2343_v37, %v2342_v8 }
0x1883   :  { %2427 = vadd.xlane.f32.xlu2 %v2426_v35  ;;  %2389 = vmatpush.msra.mxu2 %v6571_v25  ;;  %v2358_v50 = vsel %vm56_vm0, %v2347_v21, 0.0 }
0x1884   :  { %2416 = vmatpush.msrb.mxu3 %v6575_v60  ;;  %2510 = vmatpush.xpose.msrb.mxu0 %v6563_v46  ;;  %v2350_v16 = vadd.f32 %v2349_v53, %v2348_v10 }
0x1885   :  { %5166 = vmatmul.msk.f32.vlgmr.msra.gmra.mxu2 %vm67_vm8, %v2368_v28 }
0x1886   :  { %2417 = vmatpush.msrb.mxu3 %v6580_v23  ;;  %2530 = vmatpush.xpose.msrb.mxu1 %v6575_v60  ;;  %v2351_v52 = vrot.slane %v2350_v16, 4 }
0x1887   :  { %5168 = vmatmul.msk.f32.vlgmr.msrb.gmra.mxu3 %vm67_vm8, %v2396_v22  ;;  %5169 = vmatpush.msk.msrb.mxu2 %vm56_vm0, %v6412_v11  ;;  %v6607_v11 = vld [vmem:[%s7419_s2 + $0x8] sm:$0xff]  ;;  %v2345_v22 = vmul.f32 %v6580_v23, %v6580_v23 }
0x1888   :  { %2511 = vmatpush.xpose.msrb.mxu0 %v6571_v25  ;;  %5171 = vmatpush.msk.msra.mxu3 %vm56_vm0, %v6592_v15  ;;  %v2352_v30 = vadd.f32 %v2351_v52, %v2350_v16 }
0x1889   :  { %2556 = vmatpush.msrb.mxu2 %v6423_v42  ;;  %v6622_v42 = vld [vmem:[%s7416_s3 + $0x18] sm:$0xff]  ;;  %v2357_v14 = vadd.f32 %v2346_v18, %v2345_v22 }
0x188a   :  { %2531 = vmatpush.xpose.msrb.mxu1 %v6580_v23  ;;  %2583 = vmatpush.msra.mxu3 %v6607_v11  ;;  %v2353_v26 = vrot.slane %v2352_v30, 2 }
0x188b   :  { %2557 = vmatpush.msrb.mxu2 %v6433_v6  ;;  %v6629_v6 = vld [vmem:[%s7421_s5 + $0x18] sm:$0xff]  ;;  %v2359_v39 = vadd.f32 %v2358_v50, %v2357_v14 }
0x188c   :  { %2610 = vmatpush.msra.mxu0 %v6599_v3  ;;  %2584 = vmatpush.msra.mxu3 %v6616_v31  ;;  %v2354_v13 = vadd.f32 %v2353_v26, %v2352_v30 }
0x188d   :  { %2627 = vmatpush.msra.mxu2 %v6622_v42  ;;  %v2360_v44 = vrot.slane %v2359_v39, 4 }
0x188e   :  { %5178 = vmatpush.msk.msra.mxu1 %vm56_vm0, %v6555_v19  ;;  %2691 = vmatpush.msrb.mxu3 %v6629_v6  ;;  %v2355_v24 = vrot.slane %v2354_v13, 1 }
0x188f   :  { %2628 = vmatpush.msra.mxu2 %v6635_v33  ;;  %v2361_v59 = vadd.f32 %v2360_v44, %v2359_v39 }
0x1890   :  { %2755 = vmatpush.msra.mxu1 %v6563_v46  ;;  %2692 = vmatpush.msrb.mxu3 %v6642_v17  ;;  %v6683_v62 = vadd.f32 %v2355_v24, %v2354_v13 }
0x1891   :  { %2629 = vmatpush.msra.mxu2 %v6648_v51  ;;  %v2362_v20 = vrot.slane %v2361_v59, 2 }
0x1892   :  { %2756 = vmatpush.msra.mxu1 %v6571_v25  ;;  %2693 = vmatpush.msrb.mxu3 %v6654_v2 }
0x1893   :  { %2630 = vmatpush.msra.mxu2 %v6660_v7  ;;  %v2363_v27 = vadd.f32 %v2362_v20, %v2361_v59 }
0x1894   :  { %2694 = vmatpush.msrb.mxu3 %v6666_v1 }
0x1895   :  { %v2364_v57 = vrot.slane %v2363_v27, 1 }
0x1897   :  { %v6685_v40 = vadd.f32 %v2364_v57, %v2363_v27  ;;  %v2461_v27 = vpop.permute.xlu0 %2460 }
0x18f6   :  { %v2428_v48 = vpop.xlane.xlu2 %2427 }
0x18f7   :  { %v2430_v41 = vrot.slane %v2428_v48, 1  ;;  %v2433_v54 = vmul.f32 %v2428_v48, %v6683_v62 }
0x18f9   :  { %v2434_v35 = vmul.f32 %v2430_v41, %v6685_v40  ;;  %v2435_v9 = vadd.f32 1e-08, %v2433_v54 }
0x18fb   :  { %v2436_v28 = vadd.f32 1e-08, %v2434_v35  ;;  %5487 = vrsqrt.f32 %v2435_v9  ;;  %vm2443_vm3 = vweird.f32 %v2435_v9 }
0x18fd   :  { %5489 = vrsqrt.f32 %v2436_v28  ;;  %vm2453_vm5 = vweird.f32 %v2436_v28 }
0x1901   :  { %v5488_v8 = vpop.eup %5487 }
0x1902   :  { %v2438_v37 = vmul.f32 %v5488_v8, %v2435_v9  ;;  %vm2444_vm14 = vweird.f32 %v5488_v8 }
0x1903   :  { %v5490_v43 = vpop.eup %5489  ;;  %vm2445_vm4 = vmor %vm2443_vm3, %vm2444_vm14 }
0x1904   :  { %v2439_v22 = vmul.f32 %v5488_v8, %v2438_v37  ;;  %v2448_v18 = vmul.f32 %v5490_v43, %v2436_v28  ;;  %vm2454_vm15 = vweird.f32 %v5490_v43 }
0x1905   :  { %vm2455_vm10 = vmor %vm2453_vm5, %vm2454_vm15 }
0x1906   :  { %v2440_v21 = vmul.f32 0.5, %v2439_v22  ;;  %v2449_v10 = vmul.f32 %v5490_v43, %v2448_v18 }
0x1908   :  { %v2441_v53 = vsub.f32 1.5, %v2440_v21  ;;  %v2450_v14 = vmul.f32 0.5, %v2449_v10  ;;  %v2391_v26 = vpop.f32.mrf.mxu2 }
0x190a   :  { %v2442_v50 = vmul.f32 %v5488_v8, %v2441_v53  ;;  %v2451_v16 = vsub.f32 1.5, %v2450_v14  ;;  %v2419_v44 = vpop.f32.mrf.mxu3 }
0x190c   :  { %v2452_v39 = vmul.f32 %v5490_v43, %v2451_v16  ;;  %v2446_v52 = vsel %vm2445_vm4, %v5488_v8, %v2442_v50 }
0x190d   :  { %v2457_v20 = vmul.f32 %v2446_v52, %v2391_v26 }
0x190e   :  { %v2456_v30 = vsel %vm2455_vm10, %v5490_v43, %v2452_v39 }
0x190f   :  { %v2458_v59 = vmul.f32 %v2456_v30, %v2419_v44  ;;  %v2567_v44 = vld [vmem:[%s7418_s0 + $0x4] sm:$0x1]  ;;  %v2568_v30 = vld [vmem:[%s7418_s0 + $0xc] sm:$0x1] }
0x1911   :  { %v2465_v13 = vrot.slane %v2458_v59, 7  ;;  %v2591_v59 = vrot.slane %v2568_v30, 7 }
0x1913   :  { %v2466_v24 = vsel %vm97_vm1, %v2465_v13, %v2457_v20  ;;  %v2592_v26 = vsel %vm97_vm1, %v2591_v59, %v2567_v44 }
0x1914   :  { %v2468_v57 = vmul.f32 %v2466_v24, %v2461_v27 }
0x1916   :  { %v2469_v48 = vsel %vm336_vm6, %v2468_v57, -inf }
0x1917   :  { %2470 = vmax.xlane.f32.xlu1 %v2469_v48 }
0x198a   :  { %v2471_v41 = vpop.xlane.xlu1 %2470 }
0x198b   :  { %v2472_v54 = vsub.f32 %v2468_v57, %v2471_v41 }
0x198d   :  { %v2473_v35 = vmul.f32 1.442695, %v2472_v54 }
0x198f   :  { %5491 = vpow2.f32 %v2473_v35 }
0x1995   :  { %v5492_v9 = vpop.eup %5491 }
0x1996   :  { %v2475_v28 = vsel %vm336_vm6, %v5492_v9, 0.0 }
0x1997   :  { %2476 = vadd.xlane.f32.xlu0 %v2475_v28  ;;  %v6714_v28 = vld [vmem:[%s7420_s4] ss:$0 sm:$0xff] }
0x1a0a   :  { %v2477_v8 = vpop.xlane.xlu0 %2476 }
0x1a0b   :  { %5493 = vrcp.f32 %v2477_v8  ;;  %v2489_v18 = vand.u32 2147483648, %v2477_v8  ;;  %v2487_v10 = vand.u32 2147483647, %v2477_v8  ;;  %vm2483_vm12 = vweird.f32 %v2477_v8 }
0x1a0d   :  { %v2490_v14 = vor.u32 1.1754944e-38, %v2489_v18  ;;  %vm2488_vm14 = vcmp.eq.f32.partialorder %v2487_v10, 8.507059e+37 }
0x1a11   :  { %v5494_v37 = vpop.eup %5493 }
0x1a12   :  { %v2479_v43 = vmul.f32 %v5494_v37, %v2477_v8  ;;  %vm2484_vm11 = vweird.f32 %v5494_v37 }
0x1a13   :  { %vm2485_vm13 = vmor %vm2483_vm12, %vm2484_vm11 }
0x1a14   :  { %v2480_v22 = vsub.f32 1.0, %v2479_v43 }
0x1a16   :  { %v2481_v21 = vmul.f32 %v5494_v37, %v2480_v22 }
0x1a18   :  { %v2482_v53 = vadd.f32 %v5494_v37, %v2481_v21 }
0x1a1a   :  { %v2486_v50 = vsel %vm2485_vm13, %v5494_v37, %v2482_v53 }
0x1a1b   :  { %v2491_v16 = vsel %vm2488_vm14, %v2490_v14, %v2486_v50 }
0x1a1c   :  { %v2492_v39 = vmul.f32 %v5492_v9, %v2491_v16 }
0x1a1e   :  { %2512 = vmatmul.f32.vlgmr.msrb.gmra.mxu0 %v2492_v39  ;;  %v2494_v52 = vrot.slane %v2492_v39, 1 }
0x1a1f   :  { %5180 = vmatpush.msk.msrb.mxu0 %vm56_vm0, %v6565_v63 }
0x1a20   :  { %2532 = vmatmul.f32.vlgmr.msrb.gmra.mxu1 %v2494_v52 }
0x1a21   :  { %2777 = vmatpush.msrb.mxu0 %v6575_v60 }
0x1a23   :  { %2778 = vmatpush.msrb.mxu0 %v6580_v23 }
0x1a26   :  { %5173 = vmatmul.msk.f32.vlgmr.msra.gmra.mxu0 %vm99_vm2, %v2592_v26 }
0x1a9b   :  { %v2513_v27 = vpop.f32.mrf.mxu0 }
0x1a9d   :  { %v2533_v20 = vpop.f32.mrf.mxu1 }
0x1a9e   :  { %v2538_v13 = vrot.slane %v2533_v20, 7 }
0x1aa0   :  { %v2539_v24 = vsel %vm97_vm1, %v2538_v13, %v2513_v27 }
0x1aa1   :  { %5170 = vmatmul.msk.f32.vlgmr.msrb.gmra.mxu2 %vm67_vm8, %v2539_v24  ;;  %5172 = vmatmul.msk.f32.vlgmr.msra.gmra.mxu3 %vm67_vm8, %v2539_v24 }
0x1aa3   :  { %v2612_v41 = vpop.f32.mrf.mxu0 }
0x1aa9   :  { %5174 = vmatmul.msk.f32.vlgmr.msra.gmra.mxu2 %vm122_vm7, %v6498_v58 }
0x1b24   :  { %v6709_v57 = vpop.f32.mrf.mxu2  ;;  %v2586_v48 = vpop.f32.mrf.mxu3 }
0x1b25   :  { %7444 = vst [vmem:[#allocation9_spill] sm:$0xff] %v6709_v57  ;;  %v2613_v54 = vadd.f32 %v2612_v41, %v2586_v48 }
0x1b2c   :  { %v2632_v35 = vpop.f32.mrf.mxu2 }
0x1b2d   :  { %v2635_v9 = vadd.f32 %v2632_v35, %v2613_v54 }
0x1b2f   :  { %v2636_v8 = vadd.f32 %v6714_v28, %v2635_v9 }
0x1b31   :  { %5495 = vtanh.f32 %v2636_v8  ;;  %v5175_v43 = vmul.f32 -1.442695, %v2636_v8 }
0x1b33   :  { %5497 = vpow2.f32 %v5175_v43 }
0x1b37   :  { %v5496_v37 = vpop.eup %5495 }
0x1b38   :  { %2659 = vrot.lane.b32.xlu2 %v5496_v37, %s5683_s10 }
0x1b39   :  { %v5498_v58 = vpop.eup %5497 }
0x1b3a   :  { %v2640_v22 = vadd.f32 1.0, %v5498_v58 }
0x1b3c   :  { %5499 = vrcp.f32 %v2640_v22  ;;  %v2652_v50 = vand.u32 2147483648, %v2640_v22  ;;  %vm2646_vm3 = vweird.f32 %v2640_v22  ;;  %v2650_v16 = vand.u32 2147483647, %v2640_v22 }
0x1b3e   :  { %v2653_v52 = vor.u32 1.1754944e-38, %v2652_v50  ;;  %vm2651_vm5 = vcmp.eq.f32.partialorder %v2650_v16, 8.507059e+37 }
0x1b42   :  { %v5500_v18 = vpop.eup %5499 }
0x1b43   :  { %v2642_v21 = vmul.f32 %v5500_v18, %v2640_v22  ;;  %vm2647_vm15 = vweird.f32 %v5500_v18 }
0x1b44   :  { %vm2648_vm4 = vmor %vm2646_vm3, %vm2647_vm15 }
0x1b45   :  { %v2643_v10 = vsub.f32 1.0, %v2642_v21 }
0x1b47   :  { %v2644_v53 = vmul.f32 %v5500_v18, %v2643_v10 }
0x1b49   :  { %v2645_v14 = vadd.f32 %v5500_v18, %v2644_v53 }
0x1b4b   :  { %v2649_v39 = vsel %vm2648_vm4, %v5500_v18, %v2645_v14 }
0x1b4c   :  { %v2654_v30 = vsel %vm2651_vm5, %v2653_v52, %v2649_v39 }
0x1b4d   :  { %v2657_v26 = vmul.f32 %v2654_v30, %v6493_v61  ;;  %v6732_v61 = vld [vmem:[%s7422_s6] ss:$0 sm:$0xff] }
0x1b92   :  { %v2660_v44 = vpop.permute.xlu2 %2659 }
0x1b93   :  { %v2662_v59 = vmul.f32 %v2660_v44, %v2654_v30 }
0x1b95   :  { %2664 = vrot.lane.b32.xlu1 %v2662_v59, %s5683_s10 }
0x1c07   :  { %v2665_v20 = vpop.permute.xlu1 %2664 }
0x1c08   :  { %v6720_v13 = vadd.f32 %v2665_v20, %v2657_v26 }
0x1c0a   :  { %5501 = vtanh.f32 %v6720_v13 }
0x1c10   :  { %v5502_v27 = vpop.eup %5501 }
0x1c11   :  { %2670 = vrot.lane.b32.xlu0 %v5502_v27, %s5683_s10 }
0x1c83   :  { %v2671_v24 = vpop.permute.xlu0 %2670 }
0x1c84   :  { %v2673_v48 = vmul.f32 %v2671_v24, %v2654_v30 }
0x1c86   :  { %2675 = vrot.lane.b32.xlu2 %v2673_v48, %s5684_s19 }
0x1ce0   :  { %v6725_v41 = vpop.permute.xlu2 %2675 }
0x1ce1   :  { %5176 = vmatmul.msk.f32.vlgmr.msrb.gmra.mxu3 %vm122_vm7, %v6725_v41 }
0x1d64   :  { %v2696_v54 = vpop.f32.mrf.mxu3 }
0x1d65   :  { %v6735_v35 = vadd.f32 %v6732_v61, %v2696_v54 }
0x1d67   :  { %7445 = vst [vmem:[#allocation10_spill] sm:$0xff] %v6735_v35  ;;  %5503 = vtanh.f32 %v6735_v35  ;;  %v2722_v9 = vand.u32 2147483647, %v6735_v35  ;;  %v5177_v8 = vmul.f32 -1.442695, %v6735_v35  ;;  %v2719_v20 = vmax.f32 %v6735_v35, 0.0 }
0x1d68   :  { %vm2720_vm13 = vcmp.ne.f32.partialorder %v6735_v35, %v6735_v35 }
0x1d69   :  { %v2723_v37 = vsub.f32 0.0, %v2722_v9  ;;  %5505 = vpow2.f32 %v5177_v8 }
0x1d6b   :  { %v2724_v43 = vmul.f32 1.442695, %v2723_v37 }
0x1d6d   :  { %v6740_v58 = vpop.eup %5503  ;;  %5507 = vpow2.f32 %v2724_v43 }
0x1d6e   :  { %5179 = vmatmul.msk.f32.vlgmr.msra.gmra.mxu1 %vm67_vm8, %v6740_v58  ;;  %v2738_v22 = vrot.slane %v6740_v58, 1  ;;  %v6747_v18 = vmul.f32 %v6740_v58, %v6740_v58 }
0x1d6f   :  { %v5506_v21 = vpop.eup %5505 }
0x1d70   :  { %5181 = vmatmul.msk.f32.vlgmr.msrb.gmra.mxu0 %vm67_vm8, %v2738_v22  ;;  %v2784_v10 = vsel %vm303_vm9, %v6747_v18, 0.0  ;;  %v2703_v53 = vadd.f32 1.0, %v5506_v21 }
0x1d71   :  { %2785 = vadd.xlane.f32.xlu2 %v2784_v10 }
0x1d72   :  { %5509 = vrcp.f32 %v2703_v53  ;;  %v2715_v54 = vand.u32 2147483648, %v2703_v53  ;;  %v2713_v8 = vand.u32 2147483647, %v2703_v53  ;;  %vm2709_vm12 = vweird.f32 %v2703_v53 }
0x1d73   :  { %v5508_v14 = vpop.eup %5507 }
0x1d74   :  { %v2726_v50 = vadd.f32 1.0, %v5508_v14  ;;  %v2729_v16 = vmul.f32 -0.5, %v5508_v14  ;;  %v2732_v44 = vand.u32 2147483647, %v5508_v14  ;;  %vm2714_vm15 = vcmp.eq.f32.partialorder %v2713_v8, 8.507059e+37 }
0x1d76   :  { %5511 = vlog2.f32 %v2726_v50  ;;  %v2730_v52 = vadd.f32 1.0, %v2729_v16  ;;  %vm2733_vm10 = vcmp.lt.f32.partialorder %v2732_v44, 0.0004427343  ;;  %v2716_v50 = vor.u32 1.1754944e-38, %v2715_v54 }
0x1d78   :  { %v5510_v39 = vpop.eup %5509  ;;  %v2731_v24 = vmul.f32 %v5508_v14, %v2730_v52 }
0x1d79   :  { %v2705_v30 = vmul.f32 %v5510_v39, %v2703_v53  ;;  %vm2710_vm11 = vweird.f32 %v5510_v39  ;;  %v2933_v53 = vperm.slane %v6740_v58, 1 }
0x1d7a   :  { %vm2711_vm14 = vmor %vm2709_vm12, %vm2710_vm11 }
0x1d7b   :  { %v2706_v26 = vsub.f32 1.0, %v2705_v30 }
0x1d7c   :  { %v5512_v59 = vpop.eup %5511 }
0x1d7d   :  { %v2728_v27 = vmul.f32 0.6931472, %v5512_v59  ;;  %v2707_v48 = vmul.f32 %v5510_v39, %v2706_v26 }
0x1d7f   :  { %v2734_v9 = vsel %vm2733_vm10, %v2731_v24, %v2728_v27  ;;  %v2708_v43 = vadd.f32 %v5510_v39, %v2707_v48 }
0x1d80   :  { %v2735_v37 = vadd.f32 %v2734_v9, %v2719_v20 }
0x1d81   :  { %v2712_v10 = vsel %vm2711_vm14, %v5510_v39, %v2708_v43  ;;  %v2914_v39 = vperm.slane %v6740_v58, 0 }
0x1d82   :  { %v2736_v21 = vsel %vm2720_vm13, %v6735_v35, %v2735_v37  ;;  %v2717_v14 = vsel %vm2714_vm15, %v2716_v50, %v2712_v10 }
0x1d83   :  { %2819 = vperm.xlu1 %5306, %v2736_v21   ;;  %v2873_v16 = vperm.slane %v2717_v14, 1  ;;  %v2854_v52 = vperm.slane %v2717_v14, 0 }
0x1d89   :  { %2890 = vperm.xlu2 %5307, %v2873_v16  }
0x1d8b   :  { %5309 = vset.pattern.permute.xlu1 %v5932_v55 }
0x1d91   :  { %5310 = vset.pattern.permute.xlu2 %v5932_v55 }
0x1d93   :  { %2884 = vperm.xlu1 %5309, %v2873_v16  }
0x1d99   :  { %2865 = vperm.xlu2 %5310, %v2854_v52  }
0x1d9b   :  { %5312 = vset.pattern.permute.xlu1 %v5848_v49 }
0x1da1   :  { %5311 = vset.pattern.permute.xlu2 %v5928_v45 }
0x1da3   :  { %2950 = vperm.xlu1 %5312, %v2933_v53  }
0x1da9   :  { %2878 = vperm.xlu2 %5311, %v2873_v16  }
0x1dab   :  { %2931 = vperm.xlu1 %5312, %v2914_v39  }
0x1db1   :  { %2859 = vperm.xlu2 %5311, %v2854_v52  }
0x1db3   :  { %5315 = vset.pattern.permute.xlu1 %v5914_v29 }
0x1db9   :  { %5313 = vset.pattern.permute.xlu2 %v5905_v12 }
0x1dbb   :  { %2938 = vperm.xlu1 %5315, %v2933_v53  }
0x1dc1   :  { %2944 = vperm.xlu2 %5313, %v2933_v53  }
0x1dc3   :  { %5318 = vset.pattern.permute.xlu1 %v7443_v4 }
0x1dc9   :  { %5316 = vset.pattern.permute.xlu2 %v5914_v29 }
0x1dd1   :  { %2919 = vperm.xlu2 %5316, %v2914_v39  }
0x1dd9   :  { %2989 = vrot.lane.b32.xlu2 %v2914_v39, %s5686_s8 }
0x1dda   :  { %5317 = vset.pattern.permute.xlu2 %v7442_v5 }
0x1de1   :  { %3082 = vperm.xlu2 %5317, %v2736_v21  }
0x1de4   :  { %v2786_v44 = vpop.xlane.xlu2 %2785 }
0x1de5   :  { %v2788_v30 = vrot.slane %v2786_v44, 1  ;;  %v2791_v59 = vmul.f32 %v2786_v44, %v6683_v62 }
0x1de7   :  { %v2792_v26 = vmul.f32 %v2788_v30, %v6685_v40  ;;  %v2793_v20 = vadd.f32 1e-08, %v2791_v59 }
0x1de9   :  { %v2794_v27 = vadd.f32 1e-08, %v2792_v26  ;;  %5513 = vrsqrt.f32 %v2793_v20  ;;  %5320 = vset.pattern.permute.xlu2 %v5924_v32  ;;  %vm2801_vm5 = vweird.f32 %v2793_v20 }
0x1deb   :  { %5515 = vrsqrt.f32 %v2794_v27  ;;  %vm2811_vm11 = vweird.f32 %v2794_v27  ;;  %v2758_v30 = vpop.f32.mrf.mxu1 }
0x1ded   :  { %v2780_v16 = vpop.f32.mrf.mxu0 }
0x1def   :  { %v5514_v24 = vpop.eup %5513 }
0x1df0   :  { %v2796_v48 = vmul.f32 %v5514_v24, %v2793_v20  ;;  %vm2802_vm3 = vweird.f32 %v5514_v24 }
0x1df1   :  { %v5516_v54 = vpop.eup %5515  ;;  %vm2803_vm10 = vmor %vm2801_vm5, %vm2802_vm3 }
0x1df2   :  { %v2797_v9 = vmul.f32 %v5514_v24, %v2796_v48  ;;  %v2806_v8 = vmul.f32 %v5516_v54, %v2794_v27  ;;  %vm2812_vm4 = vweird.f32 %v5516_v54 }
0x1df3   :  { %vm2813_vm12 = vmor %vm2811_vm11, %vm2812_vm4 }
0x1df4   :  { %v2798_v37 = vmul.f32 0.5, %v2797_v9  ;;  %v2807_v43 = vmul.f32 %v5516_v54, %v2806_v8 }
0x1df5   :  { %v2820_v48 = vpop.permute.xlu1 %2819 }
0x1df6   :  { %v2799_v21 = vsub.f32 1.5, %v2798_v37  ;;  %v2808_v10 = vmul.f32 0.5, %v2807_v43 }
0x1df8   :  { %v2800_v50 = vmul.f32 %v5514_v24, %v2799_v21  ;;  %v2809_v62 = vsub.f32 1.5, %v2808_v10  ;;  %v3016_v21 = vperm.slane %v2738_v22, 0 }
0x1dfa   :  { %v2810_v40 = vmul.f32 %v5516_v54, %v2809_v62  ;;  %v2804_v14 = vsel %vm2803_vm10, %v5514_v24, %v2800_v50 }
0x1dfb   :  { %v2815_v59 = vmul.f32 %v2804_v14, %v2758_v30 }
0x1dfc   :  { %v2814_v53 = vsel %vm2813_vm12, %v5516_v54, %v2810_v40  ;;  %v2891_v40 = vpop.permute.xlu2 %2890 }
0x1dfd   :  { %v2816_v44 = vmul.f32 %v2814_v53, %v2780_v16 }
0x1dff   :  { %v2824_v26 = vrot.slane %v2816_v44, 7 }
0x1e01   :  { %v2825_v9 = vsel %vm97_vm1, %v2824_v26, %v2815_v59 }
0x1e02   :  { %v2827_v8 = vmul.f32 %v2825_v9, %v2820_v48 }
0x1e04   :  { %v2828_v37 = vsel %vm336_vm6, %v2827_v8, -inf  ;;  %v2866_v16 = vpop.permute.xlu2 %2865 }
0x1e05   :  { %2829 = vmax.xlane.f32.xlu0 %v2828_v37  ;;  %v2885_v50 = vpop.permute.xlu1 %2884 }
0x1e0c   :  { %v2879_v44 = vpop.permute.xlu2 %2878 }
0x1e14   :  { %v2860_v58 = vpop.permute.xlu2 %2859 }
0x1e15   :  { %v2951_v62 = vpop.permute.xlu1 %2950 }
0x1e19   :  { %2871 = vperm.xlu0 %5308, %v2854_v52  }
0x1e1d   :  { %v2932_v14 = vpop.permute.xlu1 %2931 }
0x1e21   :  { %5314 = vset.pattern.permute.xlu0 %v5905_v12 }
0x1e29   :  { %2925 = vperm.xlu0 %5314, %v2914_v39  }
0x1e2d   :  { %v2939_v53 = vpop.permute.xlu1 %2938 }
0x1e31   :  { %3045 = vrot.lane.b32.xlu0 %v6747_v18, %s5686_s8 }
0x1e32   :  { %5319 = vset.pattern.permute.xlu0 %v5924_v32 }
0x1e78   :  { %v2830_v20 = vpop.xlane.xlu0 %2829 }
0x1e79   :  { %v2831_v27 = vsub.f32 %v2827_v8, %v2830_v20 }
0x1e7b   :  { %v2832_v24 = vmul.f32 1.442695, %v2831_v27  ;;  %v2945_v27 = vpop.permute.xlu2 %2944 }
0x1e7d   :  { %5517 = vpow2.f32 %v2832_v24 }
0x1e83   :  { %v5518_v54 = vpop.eup %5517 }
0x1e84   :  { %v2834_v43 = vsel %vm336_vm6, %v5518_v54, 0.0 }
0x1e85   :  { %2835 = vadd.xlane.f32.xlu1 %v2834_v43 }
0x1e8b   :  { %v2872_v52 = vpop.permute.xlu0 %2871 }
0x1e9b   :  { %v2926_v39 = vpop.permute.xlu0 %2925 }
0x1e9e   :  { %3017 = vrot.lane.b32.xlu1 %v3016_v21, %s5686_s8 }
0x1ea3   :  { %v3046_v10 = vpop.permute.xlu0 %3045 }
0x1ea4   :  { %v3048_v18 = vsel %vm303_vm9, %v3046_v10, 0.0 }
0x1ec8   :  { %3049 = vadd.xlane.f32.xlu1 %v3048_v18 }
0x1ef8   :  { %v2836_v30 = vpop.xlane.xlu1 %2835 }
0x1ef9   :  { %5519 = vrcp.f32 %v2836_v30  ;;  %v2848_v48 = vand.u32 2147483648, %v2836_v30  ;;  %v2846_v8 = vand.u32 2147483647, %v2836_v30  ;;  %vm2842_vm14 = vweird.f32 %v2836_v30 }
0x1efb   :  { %v2849_v20 = vor.u32 1.1754944e-38, %v2848_v48  ;;  %vm2847_vm3 = vcmp.eq.f32.partialorder %v2846_v8, 8.507059e+37 }
0x1eff   :  { %v5520_v59 = vpop.eup %5519 }
0x1f00   :  { %v2838_v22 = vmul.f32 %v5520_v59, %v2836_v30  ;;  %vm2843_vm13 = vweird.f32 %v5520_v59 }
0x1f01   :  { %vm2844_vm15 = vmor %vm2842_vm14, %vm2843_vm13 }
0x1f02   :  { %v2839_v26 = vsub.f32 1.0, %v2838_v22  ;;  %v2920_v22 = vpop.permute.xlu2 %2919 }
0x1f04   :  { %v2840_v9 = vmul.f32 %v5520_v59, %v2839_v26 }
0x1f06   :  { %v2841_v37 = vadd.f32 %v5520_v59, %v2840_v9 }
0x1f08   :  { %v2845_v24 = vsel %vm2844_vm15, %v5520_v59, %v2841_v37 }
0x1f09   :  { %v2850_v43 = vsel %vm2847_vm3, %v2849_v20, %v2845_v24 }
0x1f0a   :  { %v2851_v21 = vmul.f32 %v5518_v54, %v2850_v43 }
0x1f0c   :  { %v2853_v10 = vrot.slane %v2851_v21, 1  ;;  %v2892_v18 = vperm.slane %v2851_v21, 0 }
0x1f0e   :  { %v2893_v34 = vperm.slane %v2853_v10, 0  ;;  %v2898_v56 = vmul.f32 %v2892_v18, %v2872_v52  ;;  %v2897_v36 = vmul.f32 %v2892_v18, %v2866_v16  ;;  %v2896_v35 = vmul.f32 %v2892_v18, %v2860_v58 }
0x1f0f   :  { %v2954_v0 = vmul.f32 %v2932_v14, %v2892_v18  ;;  %v2953_v54 = vmul.f32 %v2926_v39, %v2892_v18  ;;  %v6838_v39 = vld [vmem:[%s7424_s7] sm:$0xff] }
0x1f10   :  { %v2904_v38 = vsub.f32 1.0, %v2898_v56  ;;  %v2903_v26 = vsub.f32 1.0, %v2897_v36  ;;  %v2901_v57 = vmul.f32 %v2893_v34, %v2891_v40  ;;  %v2902_v47 = vsub.f32 1.0, %v2896_v35 }
0x1f11   :  { %v2900_v9 = vmul.f32 %v2893_v34, %v2885_v50  ;;  %v2899_v30 = vmul.f32 %v2893_v34, %v2879_v44  ;;  %v2957_v16 = vmul.f32 %v2951_v62, %v2893_v34  ;;  %v2952_v36 = vmul.f32 %v2920_v22, %v2892_v18 }
0x1f12   :  { %v2910_v48 = vmul.f32 %v2904_v38, %v6555_v19  ;;  %v2909_v59 = vmul.f32 %v2903_v26, %v6563_v46  ;;  %v2907_v8 = vsub.f32 1.0, %v2901_v57  ;;  %v2908_v56 = vmul.f32 %v2902_v47, %v6571_v25  ;;  %v2990_v25 = vpop.permute.xlu2 %2989  ;;  %v6828_v57 = vld [vmem:[%s7424_s7 + $0x8] sm:$0xff] }
0x1f13   :  { %v2906_v37 = vsub.f32 1.0, %v2900_v9  ;;  %v2905_v20 = vsub.f32 1.0, %v2899_v30  ;;  %v2956_v50 = vmul.f32 %v2945_v27, %v2893_v34 }
0x1f14   :  { %v6786_v24 = vadd.f32 %v2954_v0, %v2910_v48  ;;  %v2913_v52 = vmul.f32 %v2907_v8, %v6565_v63  ;;  %v6794_v38 = vadd.f32 %v2953_v54, %v2909_v59  ;;  %v6802_v47 = vadd.f32 %v2952_v36, %v2908_v56 }
0x1f15   :  { %v2912_v35 = vmul.f32 %v2906_v37, %v6575_v60  ;;  %v2911_v0 = vmul.f32 %v2905_v20, %v6580_v23  ;;  %v2955_v63 = vmul.f32 %v2939_v53, %v2893_v34  ;;  %v3018_v23 = vpop.permute.xlu1 %3017  ;;  %v6817_v34 = vld [vmem:[%s7424_s7 + $0x10] sm:$0xf] }
0x1f16   :  { %5182 = vmatpush.msk.msrb.mxu2 %vm56_vm0, %v6786_v24  ;;  %3131 = vmatpush.xpose.msrb.mxu1 %v6786_v24  ;;  %v6796_v19 = vadd.f32 %v2957_v16, %v2913_v52 }
0x1f17   :  { %v6804_v46 = vadd.f32 %v2956_v50, %v2912_v35  ;;  %v6809_v60 = vadd.f32 %v2955_v63, %v2911_v0 }
0x1f18   :  { %3010 = vmatpush.msrb.mxu2 %v6794_v38  ;;  %5184 = vmatpush.msk.msra.mxu3 %vm56_vm0, %v6796_v19 }
0x1f19   :  { %3151 = vmatpush.xpose.msra.mxu0 %v6796_v19 }
0x1f1a   :  { %3011 = vmatpush.msrb.mxu2 %v6802_v47  ;;  %3038 = vmatpush.msra.mxu3 %v6804_v46 }
0x1f1b   :  { %3132 = vmatpush.xpose.msrb.mxu1 %v6794_v38  ;;  %5183 = vmatmul.msk.f32.vlgmr.msrb.gmra.mxu2 %vm67_vm8, %v2990_v25 }
0x1f1c   :  { %3039 = vmatpush.msra.mxu3 %v6809_v60  ;;  %5186 = vmatpush.msk.msra.mxu2 %vm56_vm0, %v6817_v34 }
0x1f1d   :  { %3152 = vmatpush.xpose.msra.mxu0 %v6804_v46  ;;  %5185 = vmatmul.msk.f32.vlgmr.msra.gmra.mxu3 %vm67_vm8, %v3018_v23 }
0x1f1e   :  { %5188 = vmatpush.msk.msrb.mxu3 %vm56_vm0, %v6592_v15  ;;  %3178 = vmatpush.msra.mxu2 %v6828_v57  ;;  %v2967_v15 = vmul.f32 %v6809_v60, %v6809_v60 }
0x1f1f   :  { %3133 = vmatpush.xpose.msrb.mxu1 %v6802_v47 }
0x1f20   :  { %3205 = vmatpush.msrb.mxu3 %v6607_v11  ;;  %3179 = vmatpush.msra.mxu2 %v6838_v39  ;;  %v2969_v11 = vmul.f32 %v6796_v19, %v6796_v19 }
0x1f21   :  { %3153 = vmatpush.xpose.msra.mxu0 %v6809_v60 }
0x1f22   :  { %3206 = vmatpush.msrb.mxu3 %v6616_v31  ;;  %3249 = vmatpush.msrb.mxu2 %v6622_v42  ;;  %v2964_v31 = vmul.f32 %v6802_v47, %v6802_v47  ;;  %v2965_v42 = vmul.f32 %v6794_v38, %v6794_v38 }
0x1f23   :  { %3232 = vmatpush.msra.mxu1 %v6599_v3  ;;  %v2968_v3 = vmul.f32 %v6804_v46, %v6804_v46 }
0x1f24   :  { %3313 = vmatpush.msra.mxu3 %v6629_v6  ;;  %3250 = vmatpush.msrb.mxu2 %v6635_v33  ;;  %v2966_v6 = vmul.f32 %v6786_v24, %v6786_v24 }
0x1f25   :  { %5195 = vmatpush.msk.msrb.mxu0 %vm56_vm0, %v6786_v24  ;;  %v2979_v33 = vadd.f32 %v2968_v3, %v2967_v15 }
0x1f26   :  { %3314 = vmatpush.msra.mxu3 %v6642_v17  ;;  %3251 = vmatpush.msrb.mxu2 %v6648_v51  ;;  %v2980_v17 = vsel %vm56_vm0, %v2969_v11, 0.0  ;;  %v2970_v51 = vadd.f32 %v2965_v42, %v2964_v31 }
0x1f27   :  { %3377 = vmatpush.msrb.mxu0 %v6794_v38 }
0x1f28   :  { %3315 = vmatpush.msra.mxu3 %v6654_v2  ;;  %3252 = vmatpush.msrb.mxu2 %v6660_v7  ;;  %v2971_v2 = vsel %vm56_vm0, %v2966_v6, 0.0  ;;  %v2981_v7 = vadd.f32 %v2980_v17, %v2979_v33  ;;  %v3083_v33 = vpop.permute.xlu2 %3082 }
0x1f29   :  { %3378 = vmatpush.msrb.mxu0 %v6802_v47 }
0x1f2a   :  { %3316 = vmatpush.msra.mxu3 %v6666_v1  ;;  %v2972_v1 = vadd.f32 %v2971_v2, %v2970_v51  ;;  %v2982_v62 = vrot.slane %v2981_v7, 4 }
0x1f2c   :  { %v2973_v40 = vrot.slane %v2972_v1, 4  ;;  %v2983_v14 = vadd.f32 %v2982_v62, %v2981_v7 }
0x1f2e   :  { %v2974_v53 = vadd.f32 %v2973_v40, %v2972_v1  ;;  %v2984_v44 = vrot.slane %v2983_v14, 2 }
0x1f30   :  { %v2975_v58 = vrot.slane %v2974_v53, 2  ;;  %v2985_v27 = vadd.f32 %v2984_v44, %v2983_v14 }
0x1f32   :  { %v2976_v43 = vadd.f32 %v2975_v58, %v2974_v53  ;;  %v2986_v10 = vrot.slane %v2985_v27, 1 }
0x1f34   :  { %v2977_v18 = vrot.slane %v2976_v43, 1  ;;  %v6868_v26 = vadd.f32 %v2986_v10, %v2985_v27 }
0x1f36   :  { %v6870_v9 = vadd.f32 %v2977_v18, %v2976_v43 }
0x1f3b   :  { %v3050_v21 = vpop.xlane.xlu1 %3049 }
0x1f3c   :  { %v3052_v22 = vrot.slane %v3050_v21, 1  ;;  %v3055_v48 = vmul.f32 %v3050_v21, %v6870_v9 }
0x1f3e   :  { %v3056_v30 = vmul.f32 %v3052_v22, %v6868_v26  ;;  %v3057_v8 = vadd.f32 1e-08, %v3055_v48 }
0x1f40   :  { %v3058_v59 = vadd.f32 1e-08, %v3056_v30  ;;  %vm3065_vm12 = vweird.f32 %v3057_v8 }
0x1f42   :  { %5521 = vrsqrt.f32 %v3058_v59  ;;  %vm3075_vm10 = vweird.f32 %v3058_v59 }
0x1f43   :  { %5523 = vrsqrt.f32 %v3057_v8 }
0x1f48   :  { %v5522_v54 = vpop.eup %5521 }
0x1f49   :  { %v5524_v37 = vpop.eup %5523  ;;  %v3070_v20 = vmul.f32 %v5522_v54, %v3058_v59  ;;  %vm3076_vm4 = vweird.f32 %v5522_v54 }
0x1f4a   :  { %v3060_v52 = vmul.f32 %v5524_v37, %v3057_v8  ;;  %vm3066_vm5 = vweird.f32 %v5524_v37  ;;  %vm3077_vm11 = vmor %vm3075_vm10, %vm3076_vm4 }
0x1f4b   :  { %v3071_v16 = vmul.f32 %v5522_v54, %v3070_v20  ;;  %vm3067_vm13 = vmor %vm3065_vm12, %vm3066_vm5 }
0x1f4c   :  { %v3061_v56 = vmul.f32 %v5524_v37, %v3060_v52 }
0x1f4d   :  { %v3072_v36 = vmul.f32 0.5, %v3071_v16 }
0x1f4e   :  { %v3062_v35 = vmul.f32 0.5, %v3061_v56 }
0x1f4f   :  { %v3073_v50 = vsub.f32 1.5, %v3072_v36 }
0x1f50   :  { %v3063_v0 = vsub.f32 1.5, %v3062_v35 }
0x1f51   :  { %v3074_v63 = vmul.f32 %v5522_v54, %v3073_v50 }
0x1f52   :  { %v3064_v25 = vmul.f32 %v5524_v37, %v3063_v0 }
0x1f53   :  { %v3078_v3 = vsel %vm3077_vm11, %v5522_v54, %v3074_v63  ;;  %v3189_v54 = vld [vmem:[%s7418_s0 + $0x5] sm:$0x1] }
0x1f54   :  { %v3068_v31 = vsel %vm3067_vm13, %v5524_v37, %v3064_v25  ;;  %v3190_v37 = vld [vmem:[%s7418_s0 + $0xd] sm:$0x1] }
0x1f55   :  { %v3213_v20 = vrot.slane %v3190_v37, 7 }
0x1f57   :  { %v3214_v52 = vsel %vm97_vm1, %v3213_v20, %v3189_v54 }
0x1f9e   :  { %v3013_v23 = vpop.f32.mrf.mxu2 }
0x1f9f   :  { %v3079_v42 = vmul.f32 %v3068_v31, %v3013_v23 }
0x1fa0   :  { %v3041_v15 = vpop.f32.mrf.mxu3 }
0x1fa1   :  { %v3080_v11 = vmul.f32 %v3078_v3, %v3041_v15 }
0x1fa3   :  { %v3087_v6 = vrot.slane %v3080_v11, 7 }
0x1fa5   :  { %v3088_v17 = vsel %vm97_vm1, %v3087_v6, %v3079_v42 }
0x1fa6   :  { %v3090_v51 = vmul.f32 %v3088_v17, %v3083_v33 }
0x1fa8   :  { %v3091_v2 = vsel %vm336_vm6, %v3090_v51, -inf }
0x1fa9   :  { %3092 = vmax.xlane.f32.xlu0 %v3091_v2 }
0x201c   :  { %v3093_v7 = vpop.xlane.xlu0 %3092 }
0x201d   :  { %v3094_v1 = vsub.f32 %v3090_v51, %v3093_v7 }
0x201f   :  { %v3095_v62 = vmul.f32 1.442695, %v3094_v1 }
0x2021   :  { %5525 = vpow2.f32 %v3095_v62 }
0x2027   :  { %v5526_v40 = vpop.eup %5525 }
0x2028   :  { %v3097_v14 = vsel %vm336_vm6, %v5526_v40, 0.0 }
0x2029   :  { %3098 = vadd.xlane.f32.xlu2 %v3097_v14 }
0x209c   :  { %v3099_v53 = vpop.xlane.xlu2 %3098 }
0x209d   :  { %5527 = vrcp.f32 %v3099_v53  ;;  %v3111_v43 = vand.u32 2147483648, %v3099_v53  ;;  %v3109_v10 = vand.u32 2147483647, %v3099_v53  ;;  %vm3105_vm15 = vweird.f32 %v3099_v53 }
0x209f   :  { %v3112_v22 = vor.u32 1.1754944e-38, %v3111_v43  ;;  %vm3110_vm4 = vcmp.eq.f32.partialorder %v3109_v10, 8.507059e+37 }
0x20a3   :  { %v5528_v44 = vpop.eup %5527 }
0x20a4   :  { %v3101_v58 = vmul.f32 %v5528_v44, %v3099_v53  ;;  %vm3106_vm14 = vweird.f32 %v5528_v44 }
0x20a5   :  { %vm3107_vm3 = vmor %vm3105_vm15, %vm3106_vm14 }
0x20a6   :  { %v3102_v27 = vsub.f32 1.0, %v3101_v58 }
0x20a8   :  { %v3103_v21 = vmul.f32 %v5528_v44, %v3102_v27 }
0x20aa   :  { %v3104_v18 = vadd.f32 %v5528_v44, %v3103_v21 }
0x20ac   :  { %v3108_v30 = vsel %vm3107_vm3, %v5528_v44, %v3104_v18 }
0x20ad   :  { %v3113_v48 = vsel %vm3110_vm4, %v3112_v22, %v3108_v30 }
0x20ae   :  { %v3114_v59 = vmul.f32 %v5526_v40, %v3113_v48 }
0x20b0   :  { %3134 = vmatmul.f32.vlgmr.msrb.gmra.mxu1 %v3114_v59  ;;  %v3116_v8 = vrot.slane %v3114_v59, 1 }
0x20b1   :  { %5197 = vmatpush.msk.msrb.mxu1 %vm56_vm0, %v6796_v19 }
0x20b2   :  { %3154 = vmatmul.f32.vlgmr.msra.gmra.mxu0 %v3116_v8 }
0x20b3   :  { %3399 = vmatpush.msrb.mxu1 %v6804_v46 }
0x20b5   :  { %3400 = vmatpush.msrb.mxu1 %v6809_v60 }
0x20b8   :  { %5190 = vmatmul.msk.f32.vlgmr.msra.gmra.mxu1 %vm99_vm2, %v3214_v52 }
0x212d   :  { %v3135_v36 = vpop.f32.mrf.mxu1 }
0x212f   :  { %v3155_v16 = vpop.f32.mrf.mxu0 }
0x2130   :  { %v3160_v56 = vrot.slane %v3155_v16, 7 }
0x2132   :  { %v3161_v35 = vsel %vm97_vm1, %v3160_v56, %v3135_v36 }
0x2133   :  { %5187 = vmatmul.msk.f32.vlgmr.msra.gmra.mxu2 %vm67_vm8, %v3161_v35  ;;  %5189 = vmatmul.msk.f32.vlgmr.msrb.gmra.mxu3 %vm67_vm8, %v3161_v35 }
0x2135   :  { %v3234_v63 = vpop.f32.mrf.mxu1 }
0x213b   :  { %5191 = vmatmul.msk.f32.vlgmr.msrb.gmra.mxu2 %vm122_vm7, %v6725_v41 }
0x21b6   :  { %v6894_v50 = vpop.f32.mrf.mxu2  ;;  %v3208_v0 = vpop.f32.mrf.mxu3 }
0x21b7   :  { %v3235_v25 = vadd.f32 %v3234_v63, %v3208_v0 }
0x21be   :  { %v3254_v23 = vpop.f32.mrf.mxu2 }
0x21bf   :  { %v3257_v15 = vadd.f32 %v3254_v23, %v3235_v25 }
0x21c1   :  { %v3258_v3 = vadd.f32 %v6714_v28, %v3257_v15 }
0x21c3   :  { %5529 = vtanh.f32 %v3258_v3  ;;  %v5192_v31 = vmul.f32 -1.442695, %v3258_v3 }
0x21c5   :  { %5531 = vpow2.f32 %v5192_v31 }
0x21c9   :  { %v5530_v11 = vpop.eup %5529 }
0x21ca   :  { %3281 = vrot.lane.b32.xlu1 %v5530_v11, %s5683_s10 }
0x21cb   :  { %v5532_v42 = vpop.eup %5531 }
0x21cc   :  { %v3262_v6 = vadd.f32 1.0, %v5532_v42 }
0x21ce   :  { %5533 = vrcp.f32 %v3262_v6  ;;  %v3274_v7 = vand.u32 2147483648, %v3262_v6  ;;  %vm3268_vm10 = vweird.f32 %v3262_v6  ;;  %v3272_v1 = vand.u32 2147483647, %v3262_v6 }
0x21d0   :  { %v3275_v62 = vor.u32 1.1754944e-38, %v3274_v7  ;;  %vm3273_vm12 = vcmp.eq.f32.partialorder %v3272_v1, 8.507059e+37 }
0x21d4   :  { %v5534_v33 = vpop.eup %5533 }
0x21d5   :  { %v3264_v41 = vmul.f32 %v5534_v33, %v3262_v6  ;;  %vm3269_vm5 = vweird.f32 %v5534_v33 }
0x21d6   :  { %vm3270_vm11 = vmor %vm3268_vm10, %vm3269_vm5 }
0x21d7   :  { %v3265_v17 = vsub.f32 1.0, %v3264_v41 }
0x21d9   :  { %v3266_v51 = vmul.f32 %v5534_v33, %v3265_v17 }
0x21db   :  { %v3267_v2 = vadd.f32 %v5534_v33, %v3266_v51 }
0x21dd   :  { %v3271_v28 = vsel %vm3270_vm11, %v5534_v33, %v3267_v2 }
0x21de   :  { %v3276_v14 = vsel %vm3273_vm12, %v3275_v62, %v3271_v28 }
0x21df   :  { %v3279_v44 = vmul.f32 %v3276_v14, %v6720_v13 }
0x223c   :  { %v3282_v40 = vpop.permute.xlu1 %3281 }
0x223d   :  { %v3284_v53 = vmul.f32 %v3282_v40, %v3276_v14 }
0x223f   :  { %3286 = vrot.lane.b32.xlu0 %v3284_v53, %s5683_s10 }
0x22b1   :  { %v3287_v58 = vpop.permute.xlu0 %3286 }
0x22b2   :  { %v6900_v27 = vadd.f32 %v3287_v58, %v3279_v44 }
0x22b4   :  { %5535 = vtanh.f32 %v6900_v27 }
0x22ba   :  { %v5536_v43 = vpop.eup %5535 }
0x22bb   :  { %3292 = vrot.lane.b32.xlu2 %v5536_v43, %s5683_s10 }
0x2315   :  { %v3293_v21 = vpop.permute.xlu2 %3292 }
0x2316   :  { %v3295_v10 = vmul.f32 %v3293_v21, %v3276_v14 }
0x2318   :  { %3297 = vrot.lane.b32.xlu1 %v3295_v10, %s5684_s19 }
0x238a   :  { %v6905_v18 = vpop.permute.xlu1 %3297 }
0x238b   :  { %5193 = vmatmul.msk.f32.vlgmr.msra.gmra.mxu3 %vm122_vm7, %v6905_v18 }
0x240e   :  { %v3318_v22 = vpop.f32.mrf.mxu3 }
0x240f   :  { %v6910_v13 = vadd.f32 %v6732_v61, %v3318_v22 }
0x2411   :  { %5537 = vtanh.f32 %v6910_v13  ;;  %v3344_v30 = vand.u32 2147483647, %v6910_v13  ;;  %v5194_v48 = vmul.f32 -1.442695, %v6910_v13  ;;  %v3341_v11 = vmax.f32 %v6910_v13, 0.0 }
0x2412   :  { %vm3342_vm3 = vcmp.ne.f32.partialorder %v6910_v13, %v6910_v13 }
0x2413   :  { %v3345_v59 = vsub.f32 0.0, %v3344_v30  ;;  %5539 = vpow2.f32 %v5194_v48 }
0x2415   :  { %v3346_v8 = vmul.f32 1.442695, %v3345_v59 }
0x2417   :  { %v6915_v54 = vpop.eup %5537  ;;  %5541 = vpow2.f32 %v3346_v8 }
0x2418   :  { %5196 = vmatmul.msk.f32.vlgmr.msrb.gmra.mxu0 %vm67_vm8, %v6915_v54  ;;  %v3360_v37 = vrot.slane %v6915_v54, 1  ;;  %v6922_v61 = vmul.f32 %v6915_v54, %v6915_v54  ;;  %v3555_v14 = vperm.slane %v6915_v54, 1  ;;  %v3536_v53 = vperm.slane %v6915_v54, 0 }
0x2419   :  { %v5540_v20 = vpop.eup %5539 }
0x241a   :  { %5198 = vmatmul.msk.f32.vlgmr.msrb.gmra.mxu1 %vm67_vm8, %v3360_v37  ;;  %v3406_v52 = vsel %vm303_vm9, %v6922_v61, 0.0  ;;  %v3325_v16 = vadd.f32 1.0, %v5540_v20 }
0x241b   :  { %3407 = vadd.xlane.f32.xlu0 %v3406_v52 }
0x241c   :  { %5543 = vrcp.f32 %v3325_v16  ;;  %v3337_v6 = vand.u32 2147483648, %v3325_v16  ;;  %v3335_v41 = vand.u32 2147483647, %v3325_v16  ;;  %vm3331_vm15 = vweird.f32 %v3325_v16 }
0x241d   :  { %v5542_v56 = vpop.eup %5541 }
0x241e   :  { %v3348_v36 = vadd.f32 1.0, %v5542_v56  ;;  %v3351_v35 = vmul.f32 -0.5, %v5542_v56  ;;  %v3354_v25 = vand.u32 2147483647, %v5542_v56  ;;  %v3338_v7 = vor.u32 1.1754944e-38, %v3337_v6 }
0x241f   :  { %vm3336_vm5 = vcmp.eq.f32.partialorder %v3335_v41, 8.507059e+37 }
0x2420   :  { %5545 = vlog2.f32 %v3348_v36  ;;  %v3352_v63 = vadd.f32 1.0, %v3351_v35  ;;  %vm3355_vm13 = vcmp.lt.f32.partialorder %v3354_v25, 0.0004427343 }
0x2422   :  { %v5544_v0 = vpop.eup %5543  ;;  %v3353_v42 = vmul.f32 %v5542_v56, %v3352_v63 }
0x2423   :  { %v3327_v23 = vmul.f32 %v5544_v0, %v3325_v16  ;;  %vm3332_vm14 = vweird.f32 %v5544_v0 }
0x2424   :  { %vm3333_vm4 = vmor %vm3331_vm15, %vm3332_vm14 }
0x2425   :  { %v3328_v3 = vsub.f32 1.0, %v3327_v23 }
0x2426   :  { %v5546_v15 = vpop.eup %5545 }
0x2427   :  { %v3350_v31 = vmul.f32 0.6931472, %v5546_v15  ;;  %v3329_v33 = vmul.f32 %v5544_v0, %v3328_v3 }
0x2429   :  { %v3356_v17 = vsel %vm3355_vm13, %v3353_v42, %v3350_v31  ;;  %v3330_v2 = vadd.f32 %v5544_v0, %v3329_v33 }
0x242a   :  { %v3357_v51 = vadd.f32 %v3356_v17, %v3341_v11 }
0x242b   :  { %v3334_v28 = vsel %vm3333_vm4, %v5544_v0, %v3330_v2 }
0x242c   :  { %v6933_v1 = vsel %vm3342_vm3, %v6910_v13, %v3357_v51  ;;  %v3339_v62 = vsel %vm3336_vm5, %v3338_v7, %v3334_v28 }
0x242d   :  { %3441 = vperm.xlu1 %5318, %v6933_v1   ;;  %v3495_v40 = vperm.slane %v3339_v62, 1  ;;  %v3476_v41 = vperm.slane %v3339_v62, 0  ;;  %v3638_v62 = vperm.slane %v3360_v37, 0 }
0x242f   :  { %3512 = vperm.xlu0 %5319, %v3495_v40  }
0x2435   :  { %5321 = vset.pattern.permute.xlu1 %v5932_v55 }
0x2437   :  { %5324 = vset.pattern.permute.xlu0 %v5848_v49 }
0x243d   :  { %3506 = vperm.xlu1 %5321, %v3495_v40  }
0x243f   :  { %3572 = vperm.xlu0 %5324, %v3555_v14  }
0x2445   :  { %5323 = vset.pattern.permute.xlu1 %v5928_v45 }
0x2447   :  { %5329 = vset.pattern.permute.xlu0 %v5914_v29 }
0x244d   :  { %3500 = vperm.xlu1 %5323, %v3495_v40  }
0x244f   :  { %3560 = vperm.xlu0 %5329, %v3555_v14  }
0x2455   :  { %5326 = vset.pattern.permute.xlu1 %v5848_v49 }
0x2457   :  { %5333 = vset.pattern.permute.xlu0 %v5924_v32 }
0x245d   :  { %3553 = vperm.xlu1 %5326, %v3536_v53  }
0x2465   :  { %5328 = vset.pattern.permute.xlu1 %v5905_v12 }
0x246d   :  { %3547 = vperm.xlu1 %5328, %v3536_v53  }
0x2475   :  { %5334 = vset.pattern.permute.xlu1 %v5924_v32 }
0x248e   :  { %v3408_v44 = vpop.xlane.xlu0 %3407 }
0x248f   :  { %v3410_v58 = vrot.slane %v3408_v44, 1  ;;  %v3413_v43 = vmul.f32 %v3408_v44, %v6870_v9 }
0x2491   :  { %v3414_v21 = vmul.f32 %v3410_v58, %v6868_v26  ;;  %v3415_v10 = vadd.f32 1e-08, %v3413_v43 }
0x2493   :  { %v3416_v22 = vadd.f32 1e-08, %v3414_v21  ;;  %5547 = vrsqrt.f32 %v3415_v10  ;;  %vm3423_vm12 = vweird.f32 %v3415_v10 }
0x2495   :  { %5549 = vrsqrt.f32 %v3416_v22  ;;  %vm3433_vm14 = vweird.f32 %v3416_v22  ;;  %v3380_v15 = vpop.f32.mrf.mxu0 }
0x2497   :  { %v3402_v63 = vpop.f32.mrf.mxu1 }
0x2499   :  { %v5548_v30 = vpop.eup %5547 }
0x249a   :  { %v3418_v48 = vmul.f32 %v5548_v30, %v3415_v10  ;;  %vm3424_vm10 = vweird.f32 %v5548_v30 }
0x249b   :  { %v5550_v59 = vpop.eup %5549  ;;  %vm3425_vm13 = vmor %vm3423_vm12, %vm3424_vm10 }
0x249c   :  { %v3419_v8 = vmul.f32 %v5548_v30, %v3418_v48  ;;  %v3428_v20 = vmul.f32 %v5550_v59, %v3416_v22  ;;  %vm3434_vm11 = vweird.f32 %v5550_v59 }
0x249d   :  { %vm3435_vm15 = vmor %vm3433_vm14, %vm3434_vm11 }
0x249e   :  { %v3420_v52 = vmul.f32 0.5, %v3419_v8  ;;  %v3429_v16 = vmul.f32 %v5550_v59, %v3428_v20 }
0x249f   :  { %v3442_v31 = vpop.permute.xlu1 %3441 }
0x24a0   :  { %v3421_v56 = vsub.f32 1.5, %v3420_v52  ;;  %v3430_v36 = vmul.f32 0.5, %v3429_v16 }
0x24a1   :  { %v3513_v8 = vpop.permute.xlu0 %3512 }
0x24a2   :  { %v3422_v35 = vmul.f32 %v5548_v30, %v3421_v56  ;;  %v3431_v0 = vsub.f32 1.5, %v3430_v36 }
0x24a4   :  { %v3432_v26 = vmul.f32 %v5550_v59, %v3431_v0  ;;  %v3426_v9 = vsel %vm3425_vm13, %v5548_v30, %v3422_v35 }
0x24a5   :  { %v3437_v3 = vmul.f32 %v3426_v9, %v3380_v15 }
0x24a6   :  { %v3436_v25 = vsel %vm3435_vm15, %v5550_v59, %v3432_v26 }
0x24a7   :  { %v3438_v23 = vmul.f32 %v3436_v25, %v3402_v63 }
0x24a9   :  { %v3446_v11 = vrot.slane %v3438_v23, 7 }
0x24ab   :  { %v3447_v42 = vsel %vm97_vm1, %v3446_v11, %v3437_v3 }
0x24ac   :  { %v3449_v6 = vmul.f32 %v3447_v42, %v3442_v31 }
0x24ae   :  { %v3450_v33 = vsel %vm336_vm6, %v3449_v6, -inf }
0x24af   :  { %3451 = vmax.xlane.f32.xlu2 %v3450_v33  ;;  %v3507_v40 = vpop.permute.xlu1 %3506 }
0x24b1   :  { %v3573_v63 = vpop.permute.xlu0 %3572 }
0x24c7   :  { %3493 = vperm.xlu2 %5320, %v3476_v41  }
0x24cf   :  { %5322 = vset.pattern.permute.xlu2 %v5932_v55 }
0x24d7   :  { %3487 = vperm.xlu2 %5322, %v3476_v41  }
0x24df   :  { %5325 = vset.pattern.permute.xlu2 %v5928_v45 }
0x24e7   :  { %3481 = vperm.xlu2 %5325, %v3476_v41  }
0x24ef   :  { %5327 = vset.pattern.permute.xlu2 %v5905_v12 }
0x24f7   :  { %3566 = vperm.xlu2 %5327, %v3555_v14  }
0x24ff   :  { %5330 = vset.pattern.permute.xlu2 %v5914_v29 }
0x2507   :  { %3541 = vperm.xlu2 %5330, %v3536_v53  }
0x250f   :  { %3611 = vrot.lane.b32.xlu2 %v3536_v53, %s5686_s8 }
0x2510   :  { %5331 = vset.pattern.permute.xlu2 %v7442_v5 }
0x2517   :  { %3704 = vperm.xlu2 %5331, %v6933_v1   ;;  %v3501_v1 = vpop.permute.xlu1 %3500 }
0x251f   :  { %5332 = vset.pattern.permute.xlu2 %v7443_v4  ;;  %v3554_v14 = vpop.permute.xlu1 %3553 }
0x2522   :  { %v3452_v17 = vpop.xlane.xlu2 %3451 }
0x2523   :  { %v3453_v51 = vsub.f32 %v3449_v6, %v3452_v17 }
0x2525   :  { %v3454_v2 = vmul.f32 1.442695, %v3453_v51 }
0x2527   :  { %5551 = vpow2.f32 %v3454_v2  ;;  %v3548_v44 = vpop.permute.xlu1 %3547 }
0x252a   :  { %v3494_v53 = vpop.permute.xlu2 %3493 }
0x252d   :  { %v5552_v7 = vpop.eup %5551 }
0x252e   :  { %v3456_v28 = vsel %vm336_vm6, %v5552_v7, 0.0 }
0x252f   :  { %3457 = vadd.xlane.f32.xlu1 %v3456_v28 }
0x2532   :  { %v3488_v43 = vpop.permute.xlu2 %3487 }
0x2541   :  { %v3482_v22 = vpop.permute.xlu2 %3481 }
0x2548   :  { %3639 = vrot.lane.b32.xlu1 %v3638_v62, %s5686_s8 }
0x2550   :  { %3667 = vrot.lane.b32.xlu1 %v6922_v61, %s5686_s8 }
0x2551   :  { %v3567_v52 = vpop.permute.xlu2 %3566 }
0x2561   :  { %v3542_v31 = vpop.permute.xlu2 %3541 }
0x25a2   :  { %v3458_v58 = vpop.xlane.xlu1 %3457 }
0x25a3   :  { %5553 = vrcp.f32 %v3458_v58  ;;  %v3470_v48 = vand.u32 2147483648, %v3458_v58  ;;  %v3468_v37 = vand.u32 2147483647, %v3458_v58  ;;  %vm3464_vm4 = vweird.f32 %v3458_v58 }
0x25a5   :  { %v3471_v61 = vor.u32 1.1754944e-38, %v3470_v48  ;;  %vm3469_vm10 = vcmp.eq.f32.partialorder %v3468_v37, 8.507059e+37  ;;  %v3612_v48 = vpop.permute.xlu2 %3611  ;;  %v7010_v37 = vld [vmem:[%s7417_s1] sm:$0xff] }
0x25a9   :  { %v5554_v21 = vpop.eup %5553 }
0x25aa   :  { %v3460_v10 = vmul.f32 %v5554_v21, %v3458_v58  ;;  %vm3465_vm3 = vweird.f32 %v5554_v21 }
0x25ab   :  { %vm3466_vm5 = vmor %vm3464_vm4, %vm3465_vm3 }
0x25ac   :  { %v3461_v30 = vsub.f32 1.0, %v3460_v10 }
0x25ae   :  { %v3462_v54 = vmul.f32 %v5554_v21, %v3461_v30 }
0x25b0   :  { %v3463_v59 = vadd.f32 %v5554_v21, %v3462_v54  ;;  %v7002_v54 = vld [vmem:[%s7419_s2 + $0x10] sm:$0xf] }
0x25b2   :  { %v3467_v20 = vsel %vm3466_vm5, %v5554_v21, %v3463_v59  ;;  %v7027_v59 = vld [vmem:[%s7419_s2] sm:$0xff] }
0x25b3   :  { %v3472_v16 = vsel %vm3469_vm10, %v3471_v61, %v3467_v20  ;;  %v7053_v61 = vld [vmem:[%s7421_s5 + $0x10] sm:$0xff]  ;;  %v7059_v20 = vld [vmem:[%s7416_s3 + $0x8] sm:$0xff] }
0x25b4   :  { %v3473_v56 = vmul.f32 %v5552_v7, %v3472_v16  ;;  %v7071_v16 = vld [vmem:[%s7416_s3] sm:$0xff] }
0x25b6   :  { %v3475_v36 = vrot.slane %v3473_v56, 1  ;;  %v3514_v35 = vperm.slane %v3473_v56, 0  ;;  %v7077_v56 = vld [vmem:[%s7421_s5] sm:$0xff] }
0x25b8   :  { %v3515_v0 = vperm.slane %v3475_v36, 0  ;;  %v3520_v26 = vmul.f32 %v3514_v35, %v3494_v53  ;;  %v3519_v9 = vmul.f32 %v3514_v35, %v3488_v43  ;;  %v3518_v25 = vmul.f32 %v3514_v35, %v3482_v22 }
0x25b9   :  { %v3576_v17 = vmul.f32 %v3554_v14, %v3514_v35  ;;  %v3575_v43 = vmul.f32 %v3548_v44, %v3514_v35 }
0x25ba   :  { %v3640_v23 = vpop.permute.xlu1 %3639  ;;  %v3526_v15 = vsub.f32 1.0, %v3520_v26  ;;  %v3523_v3 = vmul.f32 %v3515_v0, %v3513_v8  ;;  %v3525_v11 = vsub.f32 1.0, %v3519_v9  ;;  %v3524_v42 = vsub.f32 1.0, %v3518_v25  ;;  %v7046_v8 = vld [vmem:[%s7416_s3 + $0x10] sm:$0xff] }
0x25bb   :  { %v3522_v6 = vmul.f32 %v3515_v0, %v3507_v40  ;;  %v3521_v33 = vmul.f32 %v3515_v0, %v3501_v1  ;;  %v3579_v58 = vmul.f32 %v3573_v63, %v3515_v0  ;;  %v3561_v1 = vpop.permute.xlu0 %3560 }
0x25bc   :  { %v3532_v41 = vmul.f32 %v3526_v15, %v6786_v24  ;;  %v3529_v51 = vsub.f32 1.0, %v3523_v3  ;;  %v3531_v2 = vmul.f32 %v3525_v11, %v6794_v38  ;;  %v3530_v21 = vmul.f32 %v3524_v42, %v6802_v47 }
0x25bd   :  { %v3528_v7 = vsub.f32 1.0, %v3522_v6  ;;  %v3527_v28 = vsub.f32 1.0, %v3521_v33  ;;  %v3578_v38 = vmul.f32 %v3567_v52, %v3515_v0  ;;  %v3577_v44 = vmul.f32 %v3561_v1, %v3515_v0  ;;  %v7065_v52 = vld [vmem:[%s7421_s5 + $0x8] sm:$0xff] }
0x25be   :  { %v6966_v62 = vadd.f32 %v3576_v17, %v3532_v41  ;;  %v3535_v53 = vmul.f32 %v3529_v51, %v6796_v19  ;;  %v6977_v14 = vadd.f32 %v3575_v43, %v3531_v2  ;;  %v3574_v19 = vmul.f32 %v3542_v31, %v3514_v35 }
0x25bf   :  { %v3534_v10 = vmul.f32 %v3528_v7, %v6804_v46  ;;  %v3533_v40 = vmul.f32 %v3527_v28, %v6809_v60 }
0x25c0   :  { %5199 = vmatpush.msk.msra.mxu2 %vm56_vm0, %v6966_v62  ;;  %3753 = vmatpush.xpose.msra.mxu0 %v6966_v62  ;;  %v6974_v24 = vadd.f32 %v3579_v58, %v3535_v53  ;;  %v6986_v30 = vadd.f32 %v3574_v19, %v3530_v21  ;;  %v3587_v35 = vmul.f32 %v6977_v14, %v6977_v14 }
0x25c1   :  { %v6982_v46 = vadd.f32 %v3578_v38, %v3534_v10  ;;  %v6989_v60 = vadd.f32 %v3577_v44, %v3533_v40  ;;  %v3588_v0 = vmul.f32 %v6966_v62, %v6966_v62 }
0x25c2   :  { %5201 = vmatpush.msk.msrb.mxu3 %vm56_vm0, %v6974_v24  ;;  %3773 = vmatpush.xpose.msra.mxu1 %v6974_v24  ;;  %v3668_v47 = vpop.permute.xlu1 %3667  ;;  %v3586_v36 = vmul.f32 %v6986_v30, %v6986_v30  ;;  %v3591_v63 = vmul.f32 %v6974_v24, %v6974_v24 }
0x25c3   :  { %3632 = vmatpush.msra.mxu2 %v6977_v14  ;;  %v3670_v22 = vsel %vm303_vm9, %v3668_v47, 0.0  ;;  %v3589_v26 = vmul.f32 %v6989_v60, %v6989_v60  ;;  %v3590_v9 = vmul.f32 %v6982_v46, %v6982_v46 }
0x25c4   :  { %3671 = vadd.xlane.f32.xlu0 %v3670_v22  ;;  %3660 = vmatpush.msrb.mxu3 %v6982_v46  ;;  %v3592_v25 = vadd.f32 %v3587_v35, %v3586_v36  ;;  %v3602_v3 = vsel %vm56_vm0, %v3591_v63, 0.0 }
0x25c5   :  { %3633 = vmatpush.msra.mxu2 %v6986_v30  ;;  %3754 = vmatpush.xpose.msra.mxu0 %v6977_v14  ;;  %v3601_v15 = vadd.f32 %v3590_v9, %v3589_v26 }
0x25c6   :  { %5200 = vmatmul.msk.f32.vlgmr.msra.gmra.mxu2 %vm67_vm8, %v3612_v48  ;;  %3661 = vmatpush.msrb.mxu3 %v6989_v60 }
0x25c7   :  { %3774 = vmatpush.xpose.msra.mxu1 %v6982_v46  ;;  %5202 = vmatmul.msk.f32.vlgmr.msrb.gmra.mxu3 %vm67_vm8, %v3640_v23  ;;  %v3593_v23 = vsel %vm56_vm0, %v3588_v0, 0.0  ;;  %v3603_v31 = vadd.f32 %v3602_v3, %v3601_v15 }
0x25c8   :  { %5203 = vmatpush.msk.msrb.mxu2 %vm56_vm0, %v6817_v34  ;;  %5205 = vmatpush.msk.msra.mxu3 %vm56_vm0, %v7002_v54  ;;  %v7018_v34 = vld [vmem:[%s7419_s2 + $0x8] sm:$0xff]  ;;  %v3594_v11 = vadd.f32 %v3593_v23, %v3592_v25 }
0x25c9   :  { %3755 = vmatpush.xpose.msra.mxu0 %v6986_v30  ;;  %v3604_v6 = vrot.slane %v3603_v31, 4 }
0x25ca   :  { %3800 = vmatpush.msrb.mxu2 %v6828_v57  ;;  %3827 = vmatpush.msra.mxu3 %v7018_v34  ;;  %v7033_v57 = vld [vmem:[%s7416_s3 + $0x18] sm:$0xff]  ;;  %v3595_v42 = vrot.slane %v3594_v11, 4 }
0x25cb   :  { %3775 = vmatpush.xpose.msra.mxu1 %v6989_v60  ;;  %v3605_v41 = vadd.f32 %v3604_v6, %v3603_v31 }
0x25cc   :  { %3801 = vmatpush.msrb.mxu2 %v6838_v39  ;;  %3828 = vmatpush.msra.mxu3 %v7027_v59  ;;  %v7040_v39 = vld [vmem:[%s7421_s5 + $0x18] sm:$0xff]  ;;  %v3596_v33 = vadd.f32 %v3595_v42, %v3594_v11 }
0x25cd   :  { %3854 = vmatpush.msrb.mxu0 %v7010_v37  ;;  %v3606_v51 = vrot.slane %v3605_v41, 2 }
0x25ce   :  { %3871 = vmatpush.msra.mxu2 %v7033_v57  ;;  %3935 = vmatpush.msrb.mxu3 %v7040_v39  ;;  %v3597_v17 = vrot.slane %v3596_v33, 2 }
0x25cf   :  { %5212 = vmatpush.msk.msrb.mxu1 %vm56_vm0, %v6966_v62  ;;  %v3607_v7 = vadd.f32 %v3606_v51, %v3605_v41  ;;  %v3705_v41 = vpop.permute.xlu2 %3704 }
0x25d0   :  { %3872 = vmatpush.msra.mxu2 %v7046_v8  ;;  %3936 = vmatpush.msrb.mxu3 %v7053_v61  ;;  %v3598_v2 = vadd.f32 %v3597_v17, %v3596_v33 }
0x25d1   :  { %3999 = vmatpush.msrb.mxu1 %v6977_v14  ;;  %v3608_v53 = vrot.slane %v3607_v7, 1 }
0x25d2   :  { %3873 = vmatpush.msra.mxu2 %v7059_v20  ;;  %3937 = vmatpush.msrb.mxu3 %v7065_v52  ;;  %v3599_v28 = vrot.slane %v3598_v2, 1 }
0x25d3   :  { %4000 = vmatpush.msrb.mxu1 %v6986_v30  ;;  %v7096_v21 = vadd.f32 %v3608_v53, %v3607_v7 }
0x25d4   :  { %3874 = vmatpush.msra.mxu2 %v7071_v16  ;;  %3938 = vmatpush.msrb.mxu3 %v7077_v56  ;;  %v7094_v58 = vadd.f32 %v3599_v28, %v3598_v2 }
0x2637   :  { %v3672_v43 = vpop.xlane.xlu0 %3671 }
0x2638   :  { %v3674_v10 = vrot.slane %v3672_v43, 1  ;;  %v3677_v38 = vmul.f32 %v3672_v43, %v7094_v58 }
0x263a   :  { %v3678_v40 = vmul.f32 %v3674_v10, %v7096_v21  ;;  %v3679_v1 = vadd.f32 1e-08, %v3677_v38 }
0x263c   :  { %v3680_v19 = vadd.f32 1e-08, %v3678_v40  ;;  %5555 = vrsqrt.f32 %v3679_v1  ;;  %vm3687_vm13 = vweird.f32 %v3679_v1 }
0x263e   :  { %5557 = vrsqrt.f32 %v3680_v19  ;;  %vm3697_vm15 = vweird.f32 %v3680_v19 }
0x2642   :  { %v5556_v47 = vpop.eup %5555 }
0x2643   :  { %v3682_v44 = vmul.f32 %v5556_v47, %v3679_v1  ;;  %vm3688_vm11 = vweird.f32 %v5556_v47 }
0x2644   :  { %v5558_v22 = vpop.eup %5557  ;;  %vm3689_vm14 = vmor %vm3687_vm13, %vm3688_vm11 }
0x2645   :  { %v3683_v48 = vmul.f32 %v5556_v47, %v3682_v44  ;;  %v3692_v36 = vmul.f32 %v5558_v22, %v3680_v19  ;;  %vm3698_vm12 = vweird.f32 %v5558_v22 }
0x2646   :  { %vm3699_vm3 = vmor %vm3697_vm15, %vm3698_vm12 }
0x2647   :  { %v3684_v35 = vmul.f32 0.5, %v3683_v48  ;;  %v3693_v0 = vmul.f32 %v5558_v22, %v3692_v36 }
0x2649   :  { %v3685_v26 = vsub.f32 1.5, %v3684_v35  ;;  %v3694_v9 = vmul.f32 0.5, %v3693_v0  ;;  %v3635_v42 = vpop.f32.mrf.mxu2 }
0x264a   :  { %v3663_v3 = vpop.f32.mrf.mxu3 }
0x264b   :  { %v3686_v63 = vmul.f32 %v5556_v47, %v3685_v26  ;;  %v3695_v25 = vsub.f32 1.5, %v3694_v9 }
0x264d   :  { %v3696_v23 = vmul.f32 %v5558_v22, %v3695_v25  ;;  %v3690_v15 = vsel %vm3689_vm14, %v5556_v47, %v3686_v63  ;;  %v3811_v63 = vld [vmem:[%s7418_s0 + $0x6] sm:$0x1]  ;;  %v3812_v25 = vld [vmem:[%s7418_s0 + $0xe] sm:$0x1] }
0x264e   :  { %v3701_v6 = vmul.f32 %v3690_v15, %v3635_v42 }
0x264f   :  { %v3700_v11 = vsel %vm3699_vm3, %v5558_v22, %v3696_v23  ;;  %v3835_v23 = vrot.slane %v3812_v25, 7 }
0x2650   :  { %v3702_v31 = vmul.f32 %v3700_v11, %v3663_v3 }
0x2651   :  { %v3836_v15 = vsel %vm97_vm1, %v3835_v23, %v3811_v63 }
0x2652   :  { %v3709_v33 = vrot.slane %v3702_v31, 7 }
0x2654   :  { %v3710_v17 = vsel %vm97_vm1, %v3709_v33, %v3701_v6 }
0x2655   :  { %v3712_v51 = vmul.f32 %v3710_v17, %v3705_v41 }
0x2657   :  { %v3713_v2 = vsel %vm336_vm6, %v3712_v51, -inf }
0x2658   :  { %3714 = vmax.xlane.f32.xlu1 %v3713_v2 }
0x26cb   :  { %v3715_v7 = vpop.xlane.xlu1 %3714 }
0x26cc   :  { %v3716_v28 = vsub.f32 %v3712_v51, %v3715_v7  ;;  %v7125_v7 = vld [vmem:[%s7420_s4] ss:$0 sm:$0xff] }
0x26ce   :  { %v3717_v53 = vmul.f32 1.442695, %v3716_v28 }
0x26d0   :  { %5559 = vpow2.f32 %v3717_v53 }
0x26d6   :  { %v5560_v43 = vpop.eup %5559 }
0x26d7   :  { %v3719_v10 = vsel %vm336_vm6, %v5560_v43, 0.0 }
0x26d8   :  { %3720 = vadd.xlane.f32.xlu2 %v3719_v10 }
0x274b   :  { %v3721_v38 = vpop.xlane.xlu2 %3720 }
0x274c   :  { %5561 = vrcp.f32 %v3721_v38  ;;  %v3733_v47 = vand.u32 2147483648, %v3721_v38  ;;  %v3731_v22 = vand.u32 2147483647, %v3721_v38  ;;  %vm3727_vm5 = vweird.f32 %v3721_v38 }
0x274e   :  { %v3734_v36 = vor.u32 1.1754944e-38, %v3733_v47  ;;  %vm3732_vm11 = vcmp.eq.f32.partialorder %v3731_v22, 8.507059e+37 }
0x2752   :  { %v5562_v40 = vpop.eup %5561 }
0x2753   :  { %v3723_v1 = vmul.f32 %v5562_v40, %v3721_v38  ;;  %vm3728_vm4 = vweird.f32 %v5562_v40 }
0x2754   :  { %vm3729_vm10 = vmor %vm3727_vm5, %vm3728_vm4 }
0x2755   :  { %v3724_v19 = vsub.f32 1.0, %v3723_v1 }
0x2757   :  { %v3725_v44 = vmul.f32 %v5562_v40, %v3724_v19 }
0x2759   :  { %v3726_v48 = vadd.f32 %v5562_v40, %v3725_v44 }
0x275b   :  { %v3730_v35 = vsel %vm3729_vm10, %v5562_v40, %v3726_v48 }
0x275c   :  { %v3735_v0 = vsel %vm3732_vm11, %v3734_v36, %v3730_v35 }
0x275d   :  { %v3736_v26 = vmul.f32 %v5560_v43, %v3735_v0 }
0x275f   :  { %3756 = vmatmul.f32.vlgmr.msra.gmra.mxu0 %v3736_v26  ;;  %v3738_v9 = vrot.slane %v3736_v26, 1 }
0x2760   :  { %5214 = vmatpush.msk.msra.mxu0 %vm56_vm0, %v6974_v24 }
0x2761   :  { %3776 = vmatmul.f32.vlgmr.msra.gmra.mxu1 %v3738_v9 }
0x2762   :  { %4021 = vmatpush.msra.mxu0 %v6982_v46 }
0x2764   :  { %4022 = vmatpush.msra.mxu0 %v6989_v60 }
0x2767   :  { %5207 = vmatmul.msk.f32.vlgmr.msrb.gmra.mxu0 %vm99_vm2, %v3836_v15 }
0x27dc   :  { %v3757_v31 = vpop.f32.mrf.mxu0 }
0x27de   :  { %v3777_v3 = vpop.f32.mrf.mxu1 }
0x27df   :  { %v3782_v11 = vrot.slane %v3777_v3, 7 }
0x27e1   :  { %v3783_v42 = vsel %vm97_vm1, %v3782_v11, %v3757_v31 }
0x27e2   :  { %5204 = vmatmul.msk.f32.vlgmr.msrb.gmra.mxu2 %vm67_vm8, %v3783_v42  ;;  %5206 = vmatmul.msk.f32.vlgmr.msra.gmra.mxu3 %vm67_vm8, %v3783_v42 }
0x27e4   :  { %v3856_v41 = vpop.f32.mrf.mxu0 }
0x27ea   :  { %5208 = vmatmul.msk.f32.vlgmr.msra.gmra.mxu2 %vm122_vm7, %v6905_v18 }
0x2865   :  { %v7120_v6 = vpop.f32.mrf.mxu2  ;;  %v3830_v33 = vpop.f32.mrf.mxu3 }
0x2866   :  { %v3857_v17 = vadd.f32 %v3856_v41, %v3830_v33 }
0x286d   :  { %v3876_v51 = vpop.f32.mrf.mxu2 }
0x286e   :  { %v3879_v2 = vadd.f32 %v3876_v51, %v3857_v17 }
0x2870   :  { %v3880_v28 = vadd.f32 %v7125_v7, %v3879_v2 }
0x2872   :  { %5563 = vtanh.f32 %v3880_v28  ;;  %v5209_v43 = vmul.f32 -1.442695, %v3880_v28 }
0x2874   :  { %5565 = vpow2.f32 %v5209_v43 }
0x2878   :  { %v5564_v53 = vpop.eup %5563 }
0x2879   :  { %3903 = vrot.lane.b32.xlu0 %v5564_v53, %s5683_s10 }
0x287a   :  { %v5566_v18 = vpop.eup %5565 }
0x287b   :  { %v3884_v10 = vadd.f32 1.0, %v5566_v18 }
0x287d   :  { %5567 = vrcp.f32 %v3884_v10  ;;  %v3896_v44 = vand.u32 2147483648, %v3884_v10  ;;  %vm3890_vm13 = vweird.f32 %v3884_v10  ;;  %v3894_v22 = vand.u32 2147483647, %v3884_v10 }
0x287f   :  { %v3897_v36 = vor.u32 1.1754944e-38, %v3896_v44  ;;  %vm3895_vm15 = vcmp.eq.f32.partialorder %v3894_v22, 8.507059e+37 }
0x2883   :  { %v5568_v38 = vpop.eup %5567 }
0x2884   :  { %v3886_v40 = vmul.f32 %v5568_v38, %v3884_v10  ;;  %vm3891_vm12 = vweird.f32 %v5568_v38 }
0x2885   :  { %vm3892_vm14 = vmor %vm3890_vm13, %vm3891_vm12 }
0x2886   :  { %v3887_v1 = vsub.f32 1.0, %v3886_v40 }
0x2888   :  { %v3888_v19 = vmul.f32 %v5568_v38, %v3887_v1 }
0x288a   :  { %v3889_v47 = vadd.f32 %v5568_v38, %v3888_v19 }
0x288c   :  { %v3893_v48 = vsel %vm3892_vm14, %v5568_v38, %v3889_v47 }
0x288d   :  { %v3898_v0 = vsel %vm3895_vm15, %v3897_v36, %v3893_v48 }
0x288e   :  { %v3901_v9 = vmul.f32 %v3898_v0, %v6900_v27  ;;  %v7143_v27 = vld [vmem:[%s7422_s6] ss:$0 sm:$0xff] }
0x28eb   :  { %v3904_v35 = vpop.permute.xlu0 %3903 }
0x28ec   :  { %v3906_v26 = vmul.f32 %v3904_v35, %v3898_v0 }
0x28ee   :  { %3908 = vrot.lane.b32.xlu1 %v3906_v26, %s5683_s10 }
0x2960   :  { %v3909_v63 = vpop.permute.xlu1 %3908 }
0x2961   :  { %v7131_v25 = vadd.f32 %v3909_v63, %v3901_v9 }
0x2963   :  { %5569 = vtanh.f32 %v7131_v25 }
0x2969   :  { %v5570_v23 = vpop.eup %5569 }
0x296a   :  { %3914 = vrot.lane.b32.xlu2 %v5570_v23, %s5683_s10 }
0x29c4   :  { %v3915_v15 = vpop.permute.xlu2 %3914 }
0x29c5   :  { %v3917_v3 = vmul.f32 %v3915_v15, %v3898_v0 }
0x29c7   :  { %3919 = vrot.lane.b32.xlu0 %v3917_v3, %s5684_s19 }
0x2a39   :  { %v7136_v11 = vpop.permute.xlu0 %3919 }
0x2a3a   :  { %5210 = vmatmul.msk.f32.vlgmr.msrb.gmra.mxu3 %vm122_vm7, %v7136_v11 }
0x2abd   :  { %v3940_v31 = vpop.f32.mrf.mxu3 }
0x2abe   :  { %v7146_v42 = vadd.f32 %v7143_v27, %v3940_v31 }
0x2ac0   :  { %5571 = vtanh.f32 %v7146_v42  ;;  %v3966_v33 = vand.u32 2147483647, %v7146_v42  ;;  %v5211_v41 = vmul.f32 -1.442695, %v7146_v42  ;;  %v3963_v35 = vmax.f32 %v7146_v42, 0.0 }
0x2ac1   :  { %vm3964_vm10 = vcmp.ne.f32.partialorder %v7146_v42, %v7146_v42 }
0x2ac2   :  { %v3967_v17 = vsub.f32 0.0, %v3966_v33  ;;  %5573 = vpow2.f32 %v5211_v41 }
0x2ac4   :  { %v3968_v51 = vmul.f32 1.442695, %v3967_v17 }
0x2ac6   :  { %v7151_v2 = vpop.eup %5571  ;;  %5575 = vpow2.f32 %v3968_v51 }
0x2ac7   :  { %5213 = vmatmul.msk.f32.vlgmr.msrb.gmra.mxu1 %vm67_vm8, %v7151_v2  ;;  %v3982_v28 = vrot.slane %v7151_v2, 1  ;;  %v7158_v53 = vmul.f32 %v7151_v2, %v7151_v2 }
0x2ac8   :  { %v5574_v43 = vpop.eup %5573 }
0x2ac9   :  { %5215 = vmatmul.msk.f32.vlgmr.msra.gmra.mxu0 %vm67_vm8, %v3982_v28  ;;  %v4028_v18 = vsel %vm303_vm9, %v7158_v53, 0.0  ;;  %v3947_v10 = vadd.f32 1.0, %v5574_v43 }
0x2aca   :  { %4029 = vadd.xlane.f32.xlu0 %v4028_v18 }
0x2acb   :  { %5577 = vrcp.f32 %v3947_v10  ;;  %v3959_v9 = vand.u32 2147483648, %v3947_v10  ;;  %v3957_v23 = vand.u32 2147483647, %v3947_v10  ;;  %vm3953_vm5 = vweird.f32 %v3947_v10 }
0x2acc   :  { %v5576_v38 = vpop.eup %5575 }
0x2acd   :  { %v3970_v40 = vadd.f32 1.0, %v5576_v38  ;;  %v3973_v1 = vmul.f32 -0.5, %v5576_v38  ;;  %v3976_v44 = vand.u32 2147483647, %v5576_v38  ;;  %v3960_v33 = vor.u32 1.1754944e-38, %v3959_v9 }
0x2ace   :  { %vm3958_vm12 = vcmp.eq.f32.partialorder %v3957_v23, 8.507059e+37 }
0x2acf   :  { %5579 = vlog2.f32 %v3970_v40  ;;  %v3974_v47 = vadd.f32 1.0, %v3973_v1  ;;  %vm3977_vm3 = vcmp.lt.f32.partialorder %v3976_v44, 0.0004427343 }
0x2ad1   :  { %v5578_v19 = vpop.eup %5577  ;;  %v3975_v26 = vmul.f32 %v5576_v38, %v3974_v47 }
0x2ad2   :  { %v3949_v22 = vmul.f32 %v5578_v19, %v3947_v10  ;;  %vm3954_vm4 = vweird.f32 %v5578_v19  ;;  %v4158_v10 = vperm.slane %v7151_v2, 0 }
0x2ad3   :  { %vm3955_vm11 = vmor %vm3953_vm5, %vm3954_vm4 }
0x2ad4   :  { %v3950_v36 = vsub.f32 1.0, %v3949_v22 }
0x2ad5   :  { %v5580_v48 = vpop.eup %5579 }
0x2ad6   :  { %v3972_v0 = vmul.f32 0.6931472, %v5580_v48  ;;  %v3951_v63 = vmul.f32 %v5578_v19, %v3950_v36 }
0x2ad8   :  { %v3978_v15 = vsel %vm3977_vm3, %v3975_v26, %v3972_v0  ;;  %v3952_v31 = vadd.f32 %v5578_v19, %v3951_v63 }
0x2ad9   :  { %v3979_v3 = vadd.f32 %v3978_v15, %v3963_v35 }
0x2ada   :  { %v3956_v17 = vsel %vm3955_vm11, %v5578_v19, %v3952_v31 }
0x2adb   :  { %v3980_v41 = vsel %vm3964_vm10, %v7146_v42, %v3979_v3  ;;  %v3961_v51 = vsel %vm3958_vm12, %v3960_v33, %v3956_v17 }
0x2adc   :  { %4063 = vperm.xlu2 %5332, %v3980_v41   ;;  %v4117_v43 = vperm.slane %v3961_v51, 1  ;;  %v4098_v18 = vperm.slane %v3961_v51, 0 }
0x2ade   :  { %4134 = vperm.xlu0 %5333, %v4117_v43  }
0x2ae4   :  { %5335 = vset.pattern.permute.xlu2 %v5932_v55 }
0x2ae6   :  { %5339 = vset.pattern.permute.xlu0 %v5928_v45 }
0x2aec   :  { %4128 = vperm.xlu2 %5335, %v4117_v43  }
0x2aee   :  { %4103 = vperm.xlu0 %5339, %v4098_v18  }
0x2af4   :  { %5337 = vset.pattern.permute.xlu2 %v5928_v45 }
0x2af6   :  { %5344 = vset.pattern.permute.xlu0 %v5914_v29 }
0x2afc   :  { %4122 = vperm.xlu2 %5337, %v4117_v43  }
0x2afe   :  { %4163 = vperm.xlu0 %5344, %v4158_v10  }
0x2b04   :  { %5340 = vset.pattern.permute.xlu2 %v5848_v49 }
0x2b06   :  { %5345 = vset.pattern.permute.xlu0 %v7442_v5 }
0x2b07   :  { %4326 = vperm.xlu0 %5345, %v3980_v41  }
0x2b0c   :  { %4175 = vperm.xlu2 %5340, %v4158_v10  }
0x2b0f   :  { %5348 = vset.pattern.permute.xlu0 %v5924_v32 }
0x2b14   :  { %5342 = vset.pattern.permute.xlu2 %v5905_v12 }
0x2b1c   :  { %4169 = vperm.xlu2 %5342, %v4158_v10  }
0x2b24   :  { %5347 = vset.pattern.permute.xlu2 %v5924_v32 }
0x2b36   :  { %v4064_v43 = vpop.permute.xlu2 %4063 }
0x2b3d   :  { %v4030_v38 = vpop.xlane.xlu0 %4029 }
0x2b3e   :  { %v4032_v40 = vrot.slane %v4030_v38, 1  ;;  %v4035_v1 = vmul.f32 %v4030_v38, %v7094_v58 }
0x2b40   :  { %v4036_v19 = vmul.f32 %v4032_v40, %v7096_v21  ;;  %v4037_v47 = vadd.f32 1e-08, %v4035_v1 }
0x2b42   :  { %v4038_v44 = vadd.f32 1e-08, %v4036_v19  ;;  %5581 = vrsqrt.f32 %v4037_v47  ;;  %vm4045_vm15 = vweird.f32 %v4037_v47  ;;  %v4177_v19 = vperm.slane %v7151_v2, 1 }
0x2b44   :  { %5583 = vrsqrt.f32 %v4038_v44  ;;  %vm4055_vm4 = vweird.f32 %v4038_v44  ;;  %v4002_v41 = vpop.f32.mrf.mxu1 }
0x2b46   :  { %v4024_v3 = vpop.f32.mrf.mxu0 }
0x2b48   :  { %v5582_v22 = vpop.eup %5581 }
0x2b49   :  { %v4040_v48 = vmul.f32 %v5582_v22, %v4037_v47  ;;  %vm4046_vm13 = vweird.f32 %v5582_v22 }
0x2b4a   :  { %v5584_v36 = vpop.eup %5583  ;;  %vm4047_vm3 = vmor %vm4045_vm15, %vm4046_vm13 }
0x2b4b   :  { %v4041_v35 = vmul.f32 %v5582_v22, %v4040_v48  ;;  %v4050_v0 = vmul.f32 %v5584_v36, %v4038_v44  ;;  %vm4056_vm14 = vweird.f32 %v5584_v36 }
0x2b4c   :  { %vm4057_vm5 = vmor %vm4055_vm4, %vm4056_vm14 }
0x2b4d   :  { %v4042_v26 = vmul.f32 0.5, %v4041_v35  ;;  %v4051_v9 = vmul.f32 %v5584_v36, %v4050_v0  ;;  %v4129_v35 = vpop.permute.xlu2 %4128 }
0x2b4f   :  { %v4043_v63 = vsub.f32 1.5, %v4042_v26  ;;  %v4052_v23 = vmul.f32 0.5, %v4051_v9 }
0x2b51   :  { %v4044_v32 = vmul.f32 %v5582_v22, %v4043_v63  ;;  %v4053_v15 = vsub.f32 1.5, %v4052_v23 }
0x2b53   :  { %v4054_v58 = vmul.f32 %v5584_v36, %v4053_v15  ;;  %v4048_v21 = vsel %vm4047_vm3, %v5582_v22, %v4044_v32 }
0x2b54   :  { %v4059_v17 = vmul.f32 %v4048_v21, %v4002_v41  ;;  %v4135_v21 = vpop.permute.xlu0 %4134 }
0x2b55   :  { %v4058_v31 = vsel %vm4057_vm5, %v5584_v36, %v4054_v58  ;;  %v4260_v36 = vperm.slane %v3982_v28, 0 }
0x2b56   :  { %v4060_v33 = vmul.f32 %v4058_v31, %v4024_v3 }
0x2b58   :  { %v4068_v51 = vrot.slane %v4060_v33, 7 }
0x2b5a   :  { %v4069_v38 = vsel %vm97_vm1, %v4068_v51, %v4059_v17 }
0x2b5b   :  { %v4071_v40 = vmul.f32 %v4069_v38, %v4064_v43 }
0x2b5d   :  { %v4072_v1 = vsel %vm336_vm6, %v4071_v40, -inf }
0x2b5e   :  { %4073 = vmax.xlane.f32.xlu1 %v4072_v1 }
0x2b60   :  { %v4104_v1 = vpop.permute.xlu0 %4103 }
0x2b77   :  { %4115 = vperm.xlu1 %5334, %v4098_v18  }
0x2b7f   :  { %5336 = vset.pattern.permute.xlu1 %v5932_v55 }
0x2b87   :  { %4109 = vperm.xlu1 %5336, %v4098_v18  }
0x2b8f   :  { %5338 = vset.pattern.permute.xlu1 %v5848_v49 }
0x2b97   :  { %4194 = vperm.xlu1 %5338, %v4177_v19  }
0x2b9f   :  { %5341 = vset.pattern.permute.xlu1 %v5905_v12 }
0x2ba7   :  { %4188 = vperm.xlu1 %5341, %v4177_v19  }
0x2baf   :  { %5343 = vset.pattern.permute.xlu1 %v5914_v29 }
0x2bb7   :  { %4182 = vperm.xlu1 %5343, %v4177_v19  }
0x2bbf   :  { %4233 = vrot.lane.b32.xlu1 %v4158_v10, %s5686_s8  ;;  %v4123_v10 = vpop.permute.xlu2 %4122 }
0x2bc0   :  { %5346 = vset.pattern.permute.xlu1 %v7443_v4 }
0x2bc7   :  { %v4176_v0 = vpop.permute.xlu2 %4175 }
0x2bcf   :  { %v4170_v4 = vpop.permute.xlu2 %4169 }
0x2bd1   :  { %v4074_v47 = vpop.xlane.xlu1 %4073 }
0x2bd2   :  { %v4075_v44 = vsub.f32 %v4071_v40, %v4074_v47 }
0x2bd4   :  { %v4076_v22 = vmul.f32 1.442695, %v4075_v44 }
0x2bd6   :  { %5585 = vpow2.f32 %v4076_v22 }
0x2bdc   :  { %v5586_v18 = vpop.eup %5585 }
0x2bdd   :  { %v4078_v48 = vsel %vm336_vm6, %v5586_v18, 0.0 }
0x2bde   :  { %4079 = vadd.xlane.f32.xlu2 %v4078_v48 }
0x2be9   :  { %v4116_v26 = vpop.permute.xlu1 %4115 }
0x2bf6   :  { %4261 = vrot.lane.b32.xlu2 %v4260_v36, %s5686_s8 }
0x2bf9   :  { %v4110_v9 = vpop.permute.xlu1 %4109 }
0x2bfe   :  { %4289 = vrot.lane.b32.xlu2 %v7158_v53, %s5686_s8 }
0x2c09   :  { %v4195_v32 = vpop.permute.xlu1 %4194 }
0x2c19   :  { %v4189_v41 = vpop.permute.xlu1 %4188 }
0x2c51   :  { %v4080_v63 = vpop.xlane.xlu2 %4079 }
0x2c52   :  { %5587 = vrcp.f32 %v4080_v63  ;;  %v4092_v28 = vand.u32 2147483648, %v4080_v63  ;;  %v4090_v31 = vand.u32 2147483647, %v4080_v63  ;;  %vm4086_vm11 = vweird.f32 %v4080_v63 }
0x2c54   :  { %v4093_v33 = vor.u32 1.1754944e-38, %v4092_v28  ;;  %vm4091_vm13 = vcmp.eq.f32.partialorder %v4090_v31, 8.507059e+37 }
0x2c58   :  { %v5588_v23 = vpop.eup %5587 }
0x2c59   :  { %v4082_v15 = vmul.f32 %v5588_v23, %v4080_v63  ;;  %v7196_v58 = vpop.permute.xlu2 %4261  ;;  %vm4087_vm10 = vweird.f32 %v5588_v23 }
0x2c5a   :  { %vm4088_vm12 = vmor %vm4086_vm11, %vm4087_vm10 }
0x2c5b   :  { %v4083_v2 = vsub.f32 1.0, %v4082_v15  ;;  %v4183_v15 = vpop.permute.xlu1 %4182 }
0x2c5d   :  { %v4084_v3 = vmul.f32 %v5588_v23, %v4083_v2 }
0x2c5f   :  { %v4085_v53 = vadd.f32 %v5588_v23, %v4084_v3 }
0x2c61   :  { %v4089_v17 = vsel %vm4088_vm12, %v5588_v23, %v4085_v53  ;;  %v4290_v51 = vpop.permute.xlu2 %4289 }
0x2c62   :  { %v4094_v43 = vsel %vm4091_vm13, %v4093_v33, %v4089_v17  ;;  %v4292_v38 = vsel %vm303_vm9, %v4290_v51, 0.0 }
0x2c63   :  { %v4095_v40 = vmul.f32 %v5586_v18, %v4094_v43  ;;  %4293 = vadd.xlane.f32.xlu1 %v4292_v38 }
0x2c65   :  { %v4097_v19 = vrot.slane %v4095_v40, 1  ;;  %v4136_v47 = vperm.slane %v4095_v40, 0  ;;  %v4164_v40 = vpop.permute.xlu0 %4163 }
0x2c67   :  { %v4137_v44 = vperm.slane %v4097_v19, 0  ;;  %v4142_v22 = vmul.f32 %v4136_v47, %v4116_v26  ;;  %v4141_v48 = vmul.f32 %v4136_v47, %v4110_v9  ;;  %v4140_v36 = vmul.f32 %v4136_v47, %v4104_v1 }
0x2c68   :  { %v4198_v33 = vmul.f32 %v4176_v0, %v4136_v47  ;;  %v4197_v51 = vmul.f32 %v4170_v4, %v4136_v47  ;;  %v4196_v19 = vmul.f32 %v4164_v40, %v4136_v47  ;;  %v4234_v4 = vpop.permute.xlu1 %4233 }
0x2c69   :  { %v4148_v63 = vsub.f32 1.0, %v4142_v22  ;;  %v4147_v2 = vsub.f32 1.0, %v4141_v48  ;;  %v4145_v28 = vmul.f32 %v4137_v44, %v4135_v21  ;;  %v4146_v3 = vsub.f32 1.0, %v4140_v36 }
0x2c6a   :  { %v4144_v23 = vmul.f32 %v4137_v44, %v4129_v35  ;;  %v4143_v31 = vmul.f32 %v4137_v44, %v4123_v10  ;;  %v4201_v1 = vmul.f32 %v4195_v32, %v4137_v44  ;;  %v4200_v10 = vmul.f32 %v4189_v41, %v4137_v44  ;;  %v7244_v41 = vld [vmem:[%s7424_s7 + $0x8] sm:$0xff] }
0x2c6b   :  { %v4154_v53 = vmul.f32 %v4148_v63, %v6966_v62  ;;  %v4153_v18 = vmul.f32 %v4147_v2, %v6977_v14  ;;  %v4151_v17 = vsub.f32 1.0, %v4145_v28  ;;  %v4152_v21 = vmul.f32 %v4146_v3, %v6986_v30 }
0x2c6c   :  { %v4150_v43 = vsub.f32 1.0, %v4144_v23  ;;  %v4149_v38 = vsub.f32 1.0, %v4143_v31  ;;  %v4199_v30 = vmul.f32 %v4183_v15, %v4137_v44 }
0x2c6d   :  { %v7201_v26 = vadd.f32 %v4198_v33, %v4154_v53  ;;  %v4157_v9 = vmul.f32 %v4151_v17, %v6974_v24  ;;  %v7209_v62 = vadd.f32 %v4197_v51, %v4153_v18  ;;  %v7217_v24 = vadd.f32 %v4196_v19, %v4152_v21 }
0x2c6e   :  { %v4156_v35 = vmul.f32 %v4150_v43, %v6982_v46  ;;  %v4155_v0 = vmul.f32 %v4149_v38, %v6989_v60  ;;  %v7232_v60 = vld [vmem:[%s7424_s7 + $0x10] sm:$0xf] }
0x2c6f   :  { %5216 = vmatpush.msk.msrb.mxu2 %vm56_vm0, %v7201_v26  ;;  %4375 = vmatpush.xpose.msra.mxu1 %v7201_v26  ;;  %v7211_v14 = vadd.f32 %v4201_v1, %v4157_v9 }
0x2c70   :  { %v7219_v46 = vadd.f32 %v4200_v10, %v4156_v35  ;;  %v7224_v32 = vadd.f32 %v4199_v30, %v4155_v0 }
0x2c71   :  { %4254 = vmatpush.msrb.mxu2 %v7209_v62  ;;  %5218 = vmatpush.msk.msra.mxu3 %vm56_vm0, %v7211_v14 }
0x2c72   :  { %4395 = vmatpush.xpose.msrb.mxu0 %v7211_v14 }
0x2c73   :  { %4255 = vmatpush.msrb.mxu2 %v7217_v24  ;;  %4282 = vmatpush.msra.mxu3 %v7219_v46 }
0x2c74   :  { %4376 = vmatpush.xpose.msra.mxu1 %v7209_v62  ;;  %5217 = vmatmul.msk.f32.vlgmr.msrb.gmra.mxu2 %vm67_vm8, %v4234_v4 }
0x2c75   :  { %4283 = vmatpush.msra.mxu3 %v7224_v32  ;;  %5220 = vmatpush.msk.msra.mxu2 %vm56_vm0, %v7232_v60 }
0x2c76   :  { %4396 = vmatpush.xpose.msrb.mxu0 %v7219_v46  ;;  %5219 = vmatmul.msk.f32.vlgmr.msra.gmra.mxu3 %vm67_vm8, %v7196_v58  ;;  %v7254_v58 = vld [vmem:[%s7424_s7] sm:$0xff] }
0x2c77   :  { %5222 = vmatpush.msk.msrb.mxu3 %vm56_vm0, %v7002_v54  ;;  %4422 = vmatpush.msra.mxu2 %v7244_v41  ;;  %v4208_v54 = vmul.f32 %v7217_v24, %v7217_v24 }
0x2c78   :  { %4377 = vmatpush.xpose.msra.mxu1 %v7217_v24 }
0x2c79   :  { %4449 = vmatpush.msrb.mxu3 %v7018_v34  ;;  %4423 = vmatpush.msra.mxu2 %v7254_v58  ;;  %v4210_v34 = vmul.f32 %v7201_v26, %v7201_v26 }
0x2c7a   :  { %4397 = vmatpush.xpose.msrb.mxu0 %v7224_v32 }
0x2c7b   :  { %4450 = vmatpush.msrb.mxu3 %v7027_v59  ;;  %4493 = vmatpush.msrb.mxu2 %v7033_v57  ;;  %v4211_v59 = vmul.f32 %v7224_v32, %v7224_v32  ;;  %v4212_v57 = vmul.f32 %v7219_v46, %v7219_v46 }
0x2c7c   :  { %4476 = vmatpush.msrb.mxu1 %v7010_v37  ;;  %v4209_v37 = vmul.f32 %v7209_v62, %v7209_v62 }
0x2c7d   :  { %4557 = vmatpush.msra.mxu3 %v7040_v39  ;;  %4494 = vmatpush.msrb.mxu2 %v7046_v8  ;;  %v4213_v39 = vmul.f32 %v7211_v14, %v7211_v14 }
0x2c7e   :  { %5229 = vmatpush.msk.msra.mxu0 %vm56_vm0, %v7201_v26  ;;  %v4214_v8 = vadd.f32 %v4209_v37, %v4208_v54 }
0x2c7f   :  { %4558 = vmatpush.msra.mxu3 %v7053_v61  ;;  %4495 = vmatpush.msrb.mxu2 %v7059_v20  ;;  %v4215_v61 = vsel %vm56_vm0, %v4210_v34, 0.0  ;;  %v4223_v20 = vadd.f32 %v4212_v57, %v4211_v59 }
0x2c80   :  { %4621 = vmatpush.msra.mxu0 %v7209_v62 }
0x2c81   :  { %4559 = vmatpush.msra.mxu3 %v7065_v52  ;;  %4496 = vmatpush.msrb.mxu2 %v7071_v16  ;;  %v4224_v52 = vsel %vm56_vm0, %v4213_v39, 0.0  ;;  %v4216_v16 = vadd.f32 %v4215_v61, %v4214_v8 }
0x2c82   :  { %4622 = vmatpush.msra.mxu0 %v7217_v24 }
0x2c83   :  { %4560 = vmatpush.msra.mxu3 %v7077_v56  ;;  %v4225_v56 = vadd.f32 %v4224_v52, %v4223_v20  ;;  %v4217_v47 = vrot.slane %v4216_v16, 4  ;;  %v4327_v20 = vpop.permute.xlu0 %4326 }
0x2c85   :  { %v4226_v44 = vrot.slane %v4225_v56, 4  ;;  %v4218_v22 = vadd.f32 %v4217_v47, %v4216_v16 }
0x2c87   :  { %v4227_v48 = vadd.f32 %v4226_v44, %v4225_v56  ;;  %v4219_v36 = vrot.slane %v4218_v22, 2 }
0x2c89   :  { %v4228_v15 = vrot.slane %v4227_v48, 2  ;;  %v4220_v63 = vadd.f32 %v4219_v36, %v4218_v22 }
0x2c8b   :  { %v4229_v2 = vadd.f32 %v4228_v15, %v4227_v48  ;;  %v4221_v28 = vrot.slane %v4220_v63, 1 }
0x2c8d   :  { %v4230_v3 = vrot.slane %v4229_v2, 1  ;;  %v7284_v23 = vadd.f32 %v4221_v28, %v4220_v63 }
0x2c8f   :  { %v7286_v53 = vadd.f32 %v4230_v3, %v4229_v2 }
0x2cd6   :  { %v4294_v31 = vpop.xlane.xlu1 %4293 }
0x2cd7   :  { %v4296_v33 = vrot.slane %v4294_v31, 1  ;;  %v4299_v18 = vmul.f32 %v4294_v31, %v7284_v23 }
0x2cd9   :  { %v4300_v17 = vmul.f32 %v4296_v33, %v7286_v53  ;;  %v4301_v51 = vadd.f32 1e-08, %v4299_v18 }
0x2cdb   :  { %v4302_v43 = vadd.f32 1e-08, %v4300_v17  ;;  %vm4309_vm5 = vweird.f32 %v4301_v51 }
0x2cdd   :  { %5589 = vrsqrt.f32 %v4302_v43  ;;  %vm4319_vm3 = vweird.f32 %v4302_v43 }
0x2cde   :  { %5591 = vrsqrt.f32 %v4301_v51 }
0x2ce3   :  { %v5590_v38 = vpop.eup %5589 }
0x2ce4   :  { %v5592_v40 = vpop.eup %5591  ;;  %v4314_v9 = vmul.f32 %v5590_v38, %v4302_v43  ;;  %vm4320_vm14 = vweird.f32 %v5590_v38 }
0x2ce5   :  { %v4304_v1 = vmul.f32 %v5592_v40, %v4301_v51  ;;  %vm4310_vm15 = vweird.f32 %v5592_v40  ;;  %vm4321_vm4 = vmor %vm4319_vm3, %vm4320_vm14 }
0x2ce6   :  { %v4315_v21 = vmul.f32 %v5590_v38, %v4314_v9  ;;  %vm4311_vm10 = vmor %vm4309_vm5, %vm4310_vm15  ;;  %v4433_v9 = vld [vmem:[%s7418_s0 + $0x7] sm:$0x1] }
0x2ce7   :  { %v4305_v19 = vmul.f32 %v5592_v40, %v4304_v1  ;;  %v4434_v1 = vld [vmem:[%s7418_s0 + $0xf] sm:$0x1]  ;;  %s5688_s0 = smov 82  }
0x2ce8   :  { %v4316_v35 = vmul.f32 0.5, %v4315_v21  ;;  %v4457_v21 = vrot.slane %v4434_v1, 7 }
0x2ce9   :  { %v4306_v10 = vmul.f32 0.5, %v4305_v19 }
0x2cea   :  { %v4317_v0 = vsub.f32 1.5, %v4316_v35  ;;  %v4458_v19 = vsel %vm97_vm1, %v4457_v21, %v4433_v9 }
0x2ceb   :  { %v4307_v30 = vsub.f32 1.5, %v4306_v10 }
0x2cec   :  { %v4318_v4 = vmul.f32 %v5590_v38, %v4317_v0 }
0x2ced   :  { %v4308_v54 = vmul.f32 %v5592_v40, %v4307_v30 }
0x2cee   :  { %v4322_v59 = vsel %vm4321_vm4, %v5590_v38, %v4318_v4 }
0x2cef   :  { %v4312_v39 = vsel %vm4311_vm10, %v5592_v40, %v4308_v54 }
0x2cf7   :  { %v4257_v37 = vpop.f32.mrf.mxu2 }
0x2cf8   :  { %v4323_v8 = vmul.f32 %v4312_v39, %v4257_v37 }
0x2cf9   :  { %v4285_v34 = vpop.f32.mrf.mxu3 }
0x2cfa   :  { %v4324_v57 = vmul.f32 %v4322_v59, %v4285_v34 }
0x2cfc   :  { %v4331_v61 = vrot.slane %v4324_v57, 7 }
0x2cfe   :  { %v4332_v52 = vsel %vm97_vm1, %v4331_v61, %v4323_v8 }
0x2cff   :  { %v4334_v16 = vmul.f32 %v4332_v52, %v4327_v20 }
0x2d01   :  { %v4335_v56 = vsel %vm336_vm6, %v4334_v16, -inf }
0x2d02   :  { %4336 = vmax.xlane.f32.xlu2 %v4335_v56 }
0x2d75   :  { %v4337_v47 = vpop.xlane.xlu2 %4336 }
0x2d76   :  { %v4338_v44 = vsub.f32 %v4334_v16, %v4337_v47 }
0x2d78   :  { %v4339_v22 = vmul.f32 1.442695, %v4338_v44 }
0x2d7a   :  { %5593 = vpow2.f32 %v4339_v22 }
0x2d80   :  { %v5594_v48 = vpop.eup %5593 }
0x2d81   :  { %v4341_v36 = vsel %vm336_vm6, %v5594_v48, 0.0 }
0x2d82   :  { %4342 = vadd.xlane.f32.xlu0 %v4341_v36 }
0x2df5   :  { %v4343_v15 = vpop.xlane.xlu0 %4342 }
0x2df6   :  { %5595 = vrcp.f32 %v4343_v15  ;;  %v4355_v3 = vand.u32 2147483648, %v4343_v15  ;;  %v4353_v33 = vand.u32 2147483647, %v4343_v15  ;;  %vm4349_vm12 = vweird.f32 %v4343_v15 }
0x2df8   :  { %v4356_v17 = vor.u32 1.1754944e-38, %v4355_v3  ;;  %vm4354_vm14 = vcmp.eq.f32.partialorder %v4353_v33, 8.507059e+37 }
0x2dfc   :  { %v5596_v63 = vpop.eup %5595 }
0x2dfd   :  { %v4345_v2 = vmul.f32 %v5596_v63, %v4343_v15  ;;  %vm4350_vm11 = vweird.f32 %v5596_v63 }
0x2dfe   :  { %vm4351_vm13 = vmor %vm4349_vm12, %vm4350_vm11 }
0x2dff   :  { %v4346_v28 = vsub.f32 1.0, %v4345_v2 }
0x2e01   :  { %v4347_v31 = vmul.f32 %v5596_v63, %v4346_v28 }
0x2e03   :  { %v4348_v18 = vadd.f32 %v5596_v63, %v4347_v31 }
0x2e05   :  { %v4352_v51 = vsel %vm4351_vm13, %v5596_v63, %v4348_v18 }
0x2e06   :  { %v4357_v43 = vsel %vm4354_vm14, %v4356_v17, %v4352_v51 }
0x2e07   :  { %v4358_v38 = vmul.f32 %v5594_v48, %v4357_v43 }
0x2e09   :  { %4378 = vmatmul.f32.vlgmr.msra.gmra.mxu1 %v4358_v38  ;;  %v4360_v40 = vrot.slane %v4358_v38, 1 }
0x2e0a   :  { %5231 = vmatpush.msk.msra.mxu1 %vm56_vm0, %v7211_v14 }
0x2e0b   :  { %4398 = vmatmul.f32.vlgmr.msrb.gmra.mxu0 %v4360_v40 }
0x2e0c   :  { %4643 = vmatpush.msra.mxu1 %v7219_v46 }
0x2e0e   :  { %4644 = vmatpush.msra.mxu1 %v7224_v32 }
0x2e11   :  { %5224 = vmatmul.msk.f32.vlgmr.msrb.gmra.mxu1 %vm99_vm2, %v4458_v19 }
0x2e86   :  { %v4379_v0 = vpop.f32.mrf.mxu1 }
0x2e88   :  { %v4399_v35 = vpop.f32.mrf.mxu0 }
0x2e89   :  { %v4404_v10 = vrot.slane %v4399_v35, 7 }
0x2e8b   :  { %v4405_v30 = vsel %vm97_vm1, %v4404_v10, %v4379_v0 }
0x2e8c   :  { %5221 = vmatmul.msk.f32.vlgmr.msra.gmra.mxu2 %vm67_vm8, %v4405_v30  ;;  %5223 = vmatmul.msk.f32.vlgmr.msrb.gmra.mxu3 %vm67_vm8, %v4405_v30 }
0x2e8e   :  { %v4478_v37 = vpop.f32.mrf.mxu1 }
0x2e94   :  { %5225 = vmatmul.msk.f32.vlgmr.msrb.gmra.mxu2 %vm122_vm7, %v7136_v11 }
0x2f0f   :  { %v7310_v4 = vpop.f32.mrf.mxu2  ;;  %v4452_v54 = vpop.f32.mrf.mxu3 }
0x2f10   :  { %v4479_v34 = vadd.f32 %v4478_v37, %v4452_v54 }
0x2f17   :  { %v4498_v59 = vpop.f32.mrf.mxu2 }
0x2f18   :  { %v4501_v57 = vadd.f32 %v4498_v59, %v4479_v34 }
0x2f1a   :  { %v4502_v39 = vadd.f32 %v7125_v7, %v4501_v57 }
0x2f1c   :  { %5597 = vtanh.f32 %v4502_v39  ;;  %v5226_v61 = vmul.f32 -1.442695, %v4502_v39 }
0x2f1e   :  { %5599 = vpow2.f32 %v5226_v61 }
0x2f22   :  { %v5598_v8 = vpop.eup %5597 }
0x2f23   :  { %4525 = vrot.lane.b32.xlu1 %v5598_v8, %s5683_s10 }
0x2f24   :  { %v5600_v20 = vpop.eup %5599 }
0x2f25   :  { %v4506_v52 = vadd.f32 1.0, %v5600_v20 }
0x2f27   :  { %5601 = vrcp.f32 %v4506_v52  ;;  %v4518_v22 = vand.u32 2147483648, %v4506_v52  ;;  %vm4512_vm3 = vweird.f32 %v4506_v52  ;;  %v4516_v48 = vand.u32 2147483647, %v4506_v52 }
0x2f29   :  { %v4519_v36 = vor.u32 1.1754944e-38, %v4518_v22  ;;  %vm4517_vm5 = vcmp.eq.f32.partialorder %v4516_v48, 8.507059e+37 }
0x2f2d   :  { %v5602_v16 = vpop.eup %5601 }
0x2f2e   :  { %v4508_v11 = vmul.f32 %v5602_v16, %v4506_v52  ;;  %vm4513_vm15 = vweird.f32 %v5602_v16 }
0x2f2f   :  { %vm4514_vm4 = vmor %vm4512_vm3, %vm4513_vm15 }
0x2f30   :  { %v4509_v56 = vsub.f32 1.0, %v4508_v11 }
0x2f32   :  { %v4510_v47 = vmul.f32 %v5602_v16, %v4509_v56 }
0x2f34   :  { %v4511_v44 = vadd.f32 %v5602_v16, %v4510_v47 }
0x2f36   :  { %v4515_v7 = vsel %vm4514_vm4, %v5602_v16, %v4511_v44 }
0x2f37   :  { %v4520_v63 = vsel %vm4517_vm5, %v4519_v36, %v4515_v7 }
0x2f38   :  { %v4523_v28 = vmul.f32 %v4520_v63, %v7131_v25 }
0x2f95   :  { %v4526_v15 = vpop.permute.xlu1 %4525 }
0x2f96   :  { %v4528_v2 = vmul.f32 %v4526_v15, %v4520_v63 }
0x2f98   :  { %4530 = vrot.lane.b32.xlu2 %v4528_v2, %s5683_s10 }
0x2ff2   :  { %v4531_v3 = vpop.permute.xlu2 %4530 }
0x2ff3   :  { %v4533_v31 = vadd.f32 %v4531_v3, %v4523_v28 }
0x2ff5   :  { %5603 = vtanh.f32 %v4533_v31 }
0x2ffb   :  { %v5604_v33 = vpop.eup %5603 }
0x2ffc   :  { %4536 = vrot.lane.b32.xlu0 %v5604_v33, %s5683_s10  ;;  %s5689_s10 = smov 54  }
0x306e   :  { %v4537_v18 = vpop.permute.xlu0 %4536 }
0x306f   :  { %v4539_v17 = vmul.f32 %v4537_v18, %v4520_v63 }
0x3071   :  { %4541 = vrot.lane.b32.xlu1 %v4539_v17, %s5684_s19  ;;  %s5690_s19 = smov 78  }
0x30e3   :  { %v4542_v51 = vpop.permute.xlu1 %4541 }
0x30e4   :  { %5227 = vmatmul.msk.f32.vlgmr.msra.gmra.mxu3 %vm122_vm7, %v4542_v51 }
0x3167   :  { %v4562_v43 = vpop.f32.mrf.mxu3 }
0x3168   :  { %v7320_v38 = vadd.f32 %v7143_v27, %v4562_v43 }
0x316a   :  { %5605 = vtanh.f32 %v7320_v38  ;;  %v5228_v25 = vmul.f32 -1.442695, %v7320_v38  ;;  %v4588_v40 = vand.u32 2147483647, %v7320_v38  ;;  %v4585_v11 = vmax.f32 %v7320_v38, 0.0 }
0x316b   :  { %vm4586_vm14 = vcmp.ne.f32.partialorder %v7320_v38, %v7320_v38 }
0x316c   :  { %v4589_v9 = vsub.f32 0.0, %v4588_v40  ;;  %5607 = vpow2.f32 %v5228_v25 }
0x316e   :  { %v4590_v1 = vmul.f32 1.442695, %v4589_v9 }
0x3170   :  { %v7325_v21 = vpop.eup %5605  ;;  %5609 = vpow2.f32 %v4590_v1 }
0x3171   :  { %5230 = vmatmul.msk.f32.vlgmr.msra.gmra.mxu0 %vm67_vm8, %v7325_v21  ;;  %v4604_v19 = vrot.slane %v7325_v21, 1  ;;  %v7332_v27 = vmul.f32 %v7325_v21, %v7325_v21  ;;  %v4799_v3 = vperm.slane %v7325_v21, 1  ;;  %v4780_v31 = vperm.slane %v7325_v21, 0 }
0x3172   :  { %v5608_v35 = vpop.eup %5607 }
0x3173   :  { %5232 = vmatmul.msk.f32.vlgmr.msra.gmra.mxu1 %vm67_vm8, %v4604_v19  ;;  %v4650_v10 = vsel %vm303_vm9, %v7332_v27, 0.0  ;;  %v4569_v0 = vadd.f32 1.0, %v5608_v35 }
0x3174   :  { %4651 = vadd.xlane.f32.xlu2 %v4650_v10 }
0x3175   :  { %5611 = vrcp.f32 %v4569_v0  ;;  %v4581_v56 = vand.u32 2147483648, %v4569_v0  ;;  %vm4575_vm12 = vweird.f32 %v4569_v0  ;;  %v4579_v22 = vand.u32 2147483647, %v4569_v0 }
0x3176   :  { %v5610_v30 = vpop.eup %5609 }
0x3177   :  { %v4592_v54 = vadd.f32 1.0, %v5610_v30  ;;  %v4595_v37 = vmul.f32 -0.5, %v5610_v30  ;;  %v4598_v39 = vand.u32 2147483647, %v5610_v30  ;;  %v4582_v15 = vor.u32 1.1754944e-38, %v4581_v56 }
0x3178   :  { %vm4580_vm15 = vcmp.eq.f32.partialorder %v4579_v22, 8.507059e+37  ;;  %v4882_v22 = vperm.slane %v4604_v19, 0 }
0x3179   :  { %5613 = vlog2.f32 %v4592_v54  ;;  %v4596_v59 = vadd.f32 1.0, %v4595_v37  ;;  %vm4599_vm11 = vcmp.lt.f32.partialorder %v4598_v39, 0.0004427343 }
0x317b   :  { %v5612_v34 = vpop.eup %5611  ;;  %v4597_v52 = vmul.f32 %v5610_v30, %v4596_v59 }
0x317c   :  { %v4571_v57 = vmul.f32 %v5612_v34, %v4569_v0  ;;  %vm4576_vm10 = vweird.f32 %v5612_v34 }
0x317d   :  { %vm4577_vm13 = vmor %vm4575_vm12, %vm4576_vm10 }
0x317e   :  { %v4572_v8 = vsub.f32 1.0, %v4571_v57 }
0x317f   :  { %v5614_v61 = vpop.eup %5613 }
0x3180   :  { %v4594_v20 = vmul.f32 0.6931472, %v5614_v61  ;;  %v4573_v16 = vmul.f32 %v5612_v34, %v4572_v8 }
0x3182   :  { %v4600_v47 = vsel %vm4599_vm11, %v4597_v52, %v4594_v20  ;;  %v4574_v44 = vadd.f32 %v5612_v34, %v4573_v16 }
0x3183   :  { %v4601_v48 = vadd.f32 %v4600_v47, %v4585_v11 }
0x3184   :  { %v4578_v7 = vsel %vm4577_vm13, %v5612_v34, %v4574_v44 }
0x3185   :  { %v4602_v36 = vsel %vm4586_vm14, %v7320_v38, %v4601_v48  ;;  %v4583_v63 = vsel %vm4580_vm15, %v4582_v15, %v4578_v7  ;;  %v7446_v15 = vld [vmem:[#allocation3_spill] sm:$0xff] }
0x3186   :  { %4685 = vperm.xlu1 %5346, %v4602_v36   ;;  %v4739_v2 = vperm.slane %v4583_v63, 1  ;;  %v4720_v28 = vperm.slane %v4583_v63, 0 }
0x318c   :  { %4756 = vperm.xlu2 %5347, %v4739_v2  }
0x318e   :  { %5349 = vset.pattern.permute.xlu1 %v5932_v55 }
0x3194   :  { %5350 = vset.pattern.permute.xlu2 %v5932_v55 }
0x3196   :  { %4750 = vperm.xlu1 %5349, %v4739_v2  }
0x319c   :  { %4731 = vperm.xlu2 %5350, %v4720_v28  }
0x319e   :  { %5352 = vset.pattern.permute.xlu1 %v5848_v49 }
0x31a4   :  { %5351 = vset.pattern.permute.xlu2 %v5928_v45 }
0x31a6   :  { %4816 = vperm.xlu1 %5352, %v4799_v3  }
0x31ac   :  { %4744 = vperm.xlu2 %5351, %v4739_v2  }
0x31ae   :  { %4797 = vperm.xlu1 %5352, %v4780_v31  }
0x31b4   :  { %4725 = vperm.xlu2 %5351, %v4720_v28  }
0x31b6   :  { %5355 = vset.pattern.permute.xlu1 %v5914_v29 }
0x31bc   :  { %5353 = vset.pattern.permute.xlu2 %v5905_v12 }
0x31be   :  { %4804 = vperm.xlu1 %5355, %v4799_v3  }
0x31c4   :  { %4810 = vperm.xlu2 %5353, %v4799_v3  }
0x31cc   :  { %5356 = vset.pattern.permute.xlu2 %v5914_v29 }
0x31d4   :  { %4785 = vperm.xlu2 %5356, %v4780_v31  }
0x31dc   :  { %4855 = vrot.lane.b32.xlu2 %v4780_v31, %s5686_s8 }
0x31dd   :  { %5357 = vset.pattern.permute.xlu2 %v7442_v5 }
0x31e4   :  { %4948 = vperm.xlu2 %5357, %v4602_v36  }
0x31e7   :  { %v4652_v49 = vpop.xlane.xlu2 %4651 }
0x31e8   :  { %v4654_v45 = vrot.slane %v4652_v49, 1  ;;  %v4657_v55 = vmul.f32 %v4652_v49, %v7284_v23 }
0x31ea   :  { %v4658_v33 = vmul.f32 %v4654_v45, %v7286_v53  ;;  %v4659_v18 = vadd.f32 1e-08, %v4657_v55 }
0x31ec   :  { %v4660_v17 = vadd.f32 1e-08, %v4658_v33  ;;  %5615 = vrsqrt.f32 %v4659_v18  ;;  %vm4667_vm5 = vweird.f32 %v4659_v18 }
0x31ee   :  { %5617 = vrsqrt.f32 %v4660_v17  ;;  %vm4677_vm11 = vweird.f32 %v4660_v17  ;;  %v4624_v59 = vpop.f32.mrf.mxu0 }
0x31ef   :  { %v4757_v63 = vpop.permute.xlu2 %4756 }
0x31f0   :  { %v4646_v54 = vpop.f32.mrf.mxu1 }
0x31f2   :  { %v5616_v51 = vpop.eup %5615 }
0x31f3   :  { %v4662_v43 = vmul.f32 %v5616_v51, %v4659_v18  ;;  %vm4668_vm3 = vweird.f32 %v5616_v51 }
0x31f4   :  { %v5618_v25 = vpop.eup %5617  ;;  %vm4669_vm10 = vmor %vm4667_vm5, %vm4668_vm3 }
0x31f5   :  { %v4663_v29 = vmul.f32 %v5616_v51, %v4662_v43  ;;  %v4672_v40 = vmul.f32 %v5618_v25, %v4660_v17  ;;  %vm4678_vm4 = vweird.f32 %v5618_v25 }
0x31f6   :  { %vm4679_vm12 = vmor %vm4677_vm11, %vm4678_vm4 }
0x31f7   :  { %v4664_v9 = vmul.f32 0.5, %v4663_v29  ;;  %v4673_v1 = vmul.f32 %v5618_v25, %v4672_v40  ;;  %v4732_v21 = vpop.permute.xlu2 %4731 }
0x31f8   :  { %v4686_v8 = vpop.permute.xlu1 %4685 }
0x31f9   :  { %v4665_v35 = vsub.f32 1.5, %v4664_v9  ;;  %v4674_v10 = vmul.f32 0.5, %v4673_v1 }
0x31fb   :  { %v4666_v0 = vmul.f32 %v5616_v51, %v4665_v35  ;;  %v4675_v30 = vsub.f32 1.5, %v4674_v10 }
0x31fd   :  { %v4676_v23 = vmul.f32 %v5618_v25, %v4675_v30  ;;  %v4670_v53 = vsel %vm4669_vm10, %v5616_v51, %v4666_v0 }
0x31fe   :  { %v4681_v57 = vmul.f32 %v4670_v53, %v4624_v59 }
0x31ff   :  { %v4680_v37 = vsel %vm4679_vm12, %v5618_v25, %v4676_v23 }
0x3200   :  { %v4682_v34 = vmul.f32 %v4680_v37, %v4646_v54 }
0x3202   :  { %v4690_v39 = vrot.slane %v4682_v34, 7 }
0x3204   :  { %v4691_v61 = vsel %vm97_vm1, %v4690_v39, %v4681_v57 }
0x3205   :  { %v4693_v20 = vmul.f32 %v4691_v61, %v4686_v8 }
0x3207   :  { %v4694_v52 = vsel %vm336_vm6, %v4693_v20, -inf }
0x3208   :  { %4695 = vmax.xlane.f32.xlu0 %v4694_v52 }
0x321c   :  { %4737 = vperm.xlu0 %5348, %v4720_v28   ;;  %v4745_v28 = vpop.permute.xlu2 %4744 }
0x3224   :  { %5354 = vset.pattern.permute.xlu0 %v5905_v12  ;;  %v4726_v49 = vpop.permute.xlu2 %4725 }
0x322c   :  { %4791 = vperm.xlu0 %5354, %v4780_v31   ;;  %v4811_v25 = vpop.permute.xlu2 %4810 }
0x3234   :  { %4911 = vrot.lane.b32.xlu0 %v7332_v27, %s5686_s8  ;;  %v4786_v23 = vpop.permute.xlu2 %4785 }
0x3235   :  { %5358 = vset.pattern.permute.xlu0 %v7442_v5  ;;  %v4751_v5 = vpop.permute.xlu1 %4750 }
0x323d   :  { %v4817_v36 = vpop.permute.xlu1 %4816 }
0x3245   :  { %v4798_v2 = vpop.permute.xlu1 %4797 }
0x324d   :  { %v4805_v19 = vpop.permute.xlu1 %4804 }
0x327b   :  { %v4696_v16 = vpop.xlane.xlu0 %4695 }
0x327c   :  { %v4697_v11 = vsub.f32 %v4693_v20, %v4696_v16 }
0x327e   :  { %v4698_v56 = vmul.f32 1.442695, %v4697_v11 }
0x3280   :  { %5619 = vpow2.f32 %v4698_v56 }
0x3286   :  { %v5620_v47 = vpop.eup %5619 }
0x3287   :  { %v4700_v44 = vsel %vm336_vm6, %v5620_v47, 0.0 }
0x3288   :  { %4701 = vadd.xlane.f32.xlu1 %v4700_v44 }
0x328e   :  { %v4738_v12 = vpop.permute.xlu0 %4737 }
0x329e   :  { %v4792_v48 = vpop.permute.xlu0 %4791 }
0x32a1   :  { %4883 = vrot.lane.b32.xlu1 %v4882_v22, %s5686_s8  ;;  %s5691_s8 = smov 46  }
0x32a6   :  { %v4912_v7 = vpop.permute.xlu0 %4911 }
0x32a7   :  { %v4914_v27 = vsel %vm303_vm9, %v4912_v7, 0.0 }
0x32cb   :  { %4915 = vadd.xlane.f32.xlu1 %v4914_v27 }
0x32e4   :  { %697 = vrot.lane.b32.xlu1 %v7446_v15, %s5688_s0 }
0x32ec   :  { %3185 = vrot.lane.b32.xlu1 %v6894_v50, %s5688_s0 }
0x32fb   :  { %v4702_v3 = vpop.xlane.xlu1 %4701 }
0x32fc   :  { %5621 = vrcp.f32 %v4702_v3  ;;  %v4714_v33 = vand.u32 2147483648, %v4702_v3  ;;  %v4712_v17 = vand.u32 2147483647, %v4702_v3  ;;  %vm4708_vm13 = vweird.f32 %v4702_v3 }
0x32fe   :  { %v4715_v43 = vor.u32 1.1754944e-38, %v4714_v33  ;;  %vm4713_vm15 = vcmp.eq.f32.partialorder %v4712_v17, 8.507059e+37 }
0x3302   :  { %v5622_v31 = vpop.eup %5621 }
0x3303   :  { %v4704_v45 = vmul.f32 %v5622_v31, %v4702_v3  ;;  %vm4709_vm9 = vweird.f32 %v5622_v31 }
0x3304   :  { %vm4710_vm14 = vmor %vm4708_vm13, %vm4709_vm9 }
0x3305   :  { %v4705_v55 = vsub.f32 1.0, %v4704_v45 }
0x3307   :  { %v4706_v18 = vmul.f32 %v5622_v31, %v4705_v55 }
0x3309   :  { %v4707_v51 = vadd.f32 %v5622_v31, %v4706_v18 }
0x330b   :  { %v4711_v29 = vsel %vm4710_vm14, %v5622_v31, %v4707_v51  ;;  %vm5093_vm14 = vcmask 326656  }
0x330c   :  { %v4716_v50 = vsel %vm4713_vm15, %v4715_v43, %v4711_v29  ;;  %vm5095_vm15 = vcmask 392192  }
0x330d   :  { %v4717_v40 = vmul.f32 %v5620_v47, %v4716_v50 }
0x330f   :  { %v4719_v9 = vrot.slane %v4717_v40, 1  ;;  %v4758_v1 = vperm.slane %v4717_v40, 0 }
0x3311   :  { %v4759_v35 = vperm.slane %v4719_v9, 0  ;;  %v4764_v10 = vmul.f32 %v4758_v1, %v4738_v12  ;;  %v4763_v0 = vmul.f32 %v4758_v1, %v4732_v21  ;;  %v4762_v30 = vmul.f32 %v4758_v1, %v4726_v49 }
0x3312   :  { %v4820_v54 = vmul.f32 %v4798_v2, %v4758_v1  ;;  %v4819_v59 = vmul.f32 %v4792_v48, %v4758_v1  ;;  %v4818_v16 = vmul.f32 %v4786_v23, %v4758_v1 }
0x3313   :  { %v4770_v53 = vsub.f32 1.0, %v4764_v10  ;;  %v4769_v37 = vsub.f32 1.0, %v4763_v0  ;;  %v4767_v34 = vmul.f32 %v4759_v35, %v4757_v63  ;;  %v4768_v57 = vsub.f32 1.0, %v4762_v30  ;;  %v4884_v55 = vpop.permute.xlu1 %4883 }
0x3314   :  { %v4766_v39 = vmul.f32 %v4759_v35, %v4751_v5  ;;  %v4765_v8 = vmul.f32 %v4759_v35, %v4745_v28  ;;  %v4823_v11 = vmul.f32 %v4817_v36, %v4759_v35  ;;  %v4822_v27 = vmul.f32 %v4811_v25, %v4759_v35 }
0x3315   :  { %v4776_v61 = vmul.f32 %v4770_v53, %v7201_v26  ;;  %v4775_v20 = vmul.f32 %v4769_v37, %v7209_v62  ;;  %v4773_v52 = vsub.f32 1.0, %v4767_v34  ;;  %v4774_v56 = vmul.f32 %v4768_v57, %v7217_v24 }
0x3316   :  { %v4772_v47 = vsub.f32 1.0, %v4766_v39  ;;  %v4771_v44 = vsub.f32 1.0, %v4765_v8  ;;  %v4821_v26 = vmul.f32 %v4805_v19, %v4759_v35  ;;  %v4856_v19 = vpop.permute.xlu2 %4855 }
0x3317   :  { %v4826_v22 = vadd.f32 %v4820_v54, %v4776_v61  ;;  %v4825_v12 = vadd.f32 %v4819_v59, %v4775_v20  ;;  %v4779_v7 = vmul.f32 %v4773_v52, %v7211_v14  ;;  %v4824_v48 = vadd.f32 %v4818_v16, %v4774_v56 }
0x3318   :  { %v4778_v5 = vmul.f32 %v4772_v47, %v7219_v46  ;;  %v4777_v15 = vmul.f32 %v4771_v44, %v7224_v32 }
0x3319   :  { %5233 = vmatpush.msk.msra.mxu2 %vm56_vm0, %v4826_v22  ;;  %4997 = vmatpush.xpose.msrb.mxu0 %v4826_v22  ;;  %v4831_v62 = vmul.f32 %v4825_v12, %v4825_v12  ;;  %v4829_v36 = vadd.f32 %v4823_v11, %v4779_v7  ;;  %v4832_v63 = vmul.f32 %v4826_v22, %v4826_v22 }
0x331a   :  { %v4830_v24 = vmul.f32 %v4824_v48, %v4824_v48  ;;  %v4828_v2 = vadd.f32 %v4822_v27, %v4778_v5  ;;  %v4827_v21 = vadd.f32 %v4821_v26, %v4777_v15  ;;  %v7447_v26 = vld [vmem:[#allocation5_spill] sm:$0xff] }
0x331b   :  { %4876 = vmatpush.msra.mxu2 %v4825_v12  ;;  %5235 = vmatpush.msk.msrb.mxu3 %vm56_vm0, %v4829_v36  ;;  %v4835_v14 = vmul.f32 %v4829_v36, %v4829_v36  ;;  %v4837_v28 = vsel %vm56_vm0, %v4832_v63, 0.0 }
0x331c   :  { %5017 = vmatpush.xpose.msrb.mxu1 %v4829_v36  ;;  %v4836_v46 = vadd.f32 %v4831_v62, %v4830_v24  ;;  %v4834_v3 = vmul.f32 %v4828_v2, %v4828_v2  ;;  %v4833_v32 = vmul.f32 %v4827_v21, %v4827_v21  ;;  %v7448_v62 = vld [vmem:[#allocation9_spill] sm:$0xff] }
0x331d   :  { %4877 = vmatpush.msra.mxu2 %v4824_v48  ;;  %4904 = vmatpush.msrb.mxu3 %v4828_v2  ;;  %v4846_v31 = vsel %vm56_vm0, %v4835_v14, 0.0 }
0x331e   :  { %4998 = vmatpush.xpose.msrb.mxu0 %v4825_v12  ;;  %5234 = vmatmul.msk.f32.vlgmr.msra.gmra.mxu2 %vm67_vm8, %v4856_v19  ;;  %v4845_v49 = vadd.f32 %v4834_v3, %v4833_v32  ;;  %v4838_v45 = vadd.f32 %v4837_v28, %v4836_v46  ;;  %v4949_v27 = vpop.permute.xlu2 %4948  ;;  %v7449_v46 = vld [vmem:[#allocation4_spill] sm:$0xff]  ;;  %v7450_v19 = vld [vmem:[#allocation10_spill] sm:$0xff] }
0x331f   :  { %4905 = vmatpush.msrb.mxu3 %v4827_v21  ;;  %5237 = vmatpush.msk.msrb.mxu2 %vm56_vm0, %v7232_v60 }
0x3320   :  { %5018 = vmatpush.xpose.msrb.mxu1 %v4828_v2  ;;  %5236 = vmatmul.msk.f32.vlgmr.msrb.gmra.mxu3 %vm67_vm8, %v4884_v55  ;;  %v4847_v33 = vadd.f32 %v4846_v31, %v4845_v49  ;;  %v4839_v17 = vrot.slane %v4838_v45, 4  ;;  %v7452_v49 = vld [vmem:[#allocation2_spill] sm:$0xff] }
0x3321   :  { %5044 = vmatpush.msrb.mxu2 %v7244_v41 }
0x3322   :  { %4999 = vmatpush.xpose.msrb.mxu0 %v4824_v48  ;;  %v4848_v18 = vrot.slane %v4847_v33, 4  ;;  %v4840_v43 = vadd.f32 %v4839_v17, %v4838_v45 }
0x3323   :  { %5045 = vmatpush.msrb.mxu2 %v7254_v58 }
0x3324   :  { %5019 = vmatpush.xpose.msrb.mxu1 %v4827_v21  ;;  %v4849_v51 = vadd.f32 %v4848_v18, %v4847_v33  ;;  %v4841_v29 = vrot.slane %v4840_v43, 2  ;;  %v7453_v33 = vld [vmem:[#allocation8_spill] sm:$0xff] }
0x3326   :  { %v4850_v25 = vrot.slane %v4849_v51, 2  ;;  %v4842_v40 = vadd.f32 %v4841_v29, %v4840_v43 }
0x3328   :  { %v4851_v50 = vadd.f32 %v4850_v25, %v4849_v51  ;;  %v4843_v1 = vrot.slane %v4842_v40, 1 }
0x332a   :  { %v4852_v60 = vrot.slane %v4851_v50, 1  ;;  %v4844_v0 = vadd.f32 %v4843_v1, %v4842_v40 }
0x332c   :  { %v4853_v10 = vadd.f32 %v4852_v60, %v4851_v50 }
0x333e   :  { %v4916_v9 = vpop.xlane.xlu1 %4915 }
0x333f   :  { %v4918_v35 = vrot.slane %v4916_v9, 1  ;;  %v4921_v41 = vmul.f32 %v4916_v9, %v4844_v0 }
0x3341   :  { %v4922_v30 = vmul.f32 %v4918_v35, %v4853_v10  ;;  %v4923_v53 = vadd.f32 1e-08, %v4921_v41 }
0x3343   :  { %v4924_v23 = vadd.f32 1e-08, %v4922_v30  ;;  %vm4931_vm10 = vweird.f32 %v4923_v53 }
0x3345   :  { %5623 = vrsqrt.f32 %v4924_v23  ;;  %vm4941_vm4 = vweird.f32 %v4924_v23 }
0x3346   :  { %5625 = vrsqrt.f32 %v4923_v53 }
0x334b   :  { %v5624_v58 = vpop.eup %5623 }
0x334c   :  { %v5626_v54 = vpop.eup %5625  ;;  %v4936_v37 = vmul.f32 %v5624_v58, %v4924_v23  ;;  %vm4942_vm0 = vweird.f32 %v5624_v58 }
0x334d   :  { %v4926_v34 = vmul.f32 %v5626_v54, %v4923_v53  ;;  %vm4932_vm3 = vweird.f32 %v5626_v54  ;;  %vm4943_vm5 = vmor %vm4941_vm4, %vm4942_vm0  ;;  %vm5097_vm0 = vcmask 457728  }
0x334e   :  { %v4937_v59 = vmul.f32 %v5624_v58, %v4936_v37  ;;  %vm4933_vm11 = vmor %vm4931_vm10, %vm4932_vm3  ;;  %v7454_v37 = vld [vmem:[#allocation6_spill] sm:$0xff]  ;;  %vm5099_vm3 = vcmask 517120  }
0x334f   :  { %v4927_v57 = vmul.f32 %v5626_v54, %v4926_v34 }
0x3350   :  { %v4938_v39 = vmul.f32 0.5, %v4937_v59 }
0x3351   :  { %v4928_v8 = vmul.f32 0.5, %v4927_v57 }
0x3352   :  { %v4939_v61 = vsub.f32 1.5, %v4938_v39 }
0x3353   :  { %v4929_v20 = vsub.f32 1.5, %v4928_v8 }
0x3354   :  { %v4940_v52 = vmul.f32 %v5624_v58, %v4939_v61 }
0x3355   :  { %v4930_v16 = vmul.f32 %v5626_v54, %v4929_v20 }
0x3356   :  { %v4944_v47 = vsel %vm4943_vm5, %v5624_v58, %v4940_v52  ;;  %v698_v14 = vpop.permute.xlu1 %697 }
0x3357   :  { %v4934_v22 = vsel %vm4933_vm11, %v5626_v54, %v4930_v16  ;;  %v700_v45 = vadd.f32 %v698_v14, %v7452_v49 }
0x335e   :  { %v3186_v32 = vpop.permute.xlu1 %3185 }
0x335f   :  { %v3188_v31 = vadd.f32 %v3186_v32, %v7450_v19 }
0x33a1   :  { %v4879_v11 = vpop.f32.mrf.mxu2 }
0x33a2   :  { %v4945_v12 = vmul.f32 %v4934_v22, %v4879_v11 }
0x33a3   :  { %v4907_v56 = vpop.f32.mrf.mxu3 }
0x33a4   :  { %v4946_v44 = vmul.f32 %v4944_v47, %v4907_v56 }
0x33a6   :  { %v4953_v7 = vrot.slane %v4946_v44, 7 }
0x33a8   :  { %v4954_v48 = vsel %vm97_vm1, %v4953_v7, %v4945_v12 }
0x33a9   :  { %v4956_v5 = vmul.f32 %v4954_v48, %v4949_v27 }
0x33ab   :  { %v4957_v15 = vsel %vm336_vm6, %v4956_v5, -inf }
0x33ac   :  { %4958 = vmax.xlane.f32.xlu0 %v4957_v15 }
0x33c0   :  { %1319 = vrot.lane.b32.xlu0 %v7447_v26, %s5688_s0 }
0x33c8   :  { %2563 = vrot.lane.b32.xlu0 %v7448_v62, %s5688_s0 }
0x33d0   :  { %4429 = vrot.lane.b32.xlu0 %v7310_v4, %s5688_s0  ;;  %v7451_v4 = vld [vmem:[#allocation7_spill] sm:$0xff] }
0x341f   :  { %v4959_v36 = vpop.xlane.xlu0 %4958 }
0x3420   :  { %v4960_v63 = vsub.f32 %v4956_v5, %v4959_v36 }
0x3422   :  { %v4961_v24 = vmul.f32 1.442695, %v4960_v63 }
0x3424   :  { %5627 = vpow2.f32 %v4961_v24 }
0x342a   :  { %v5628_v2 = vpop.eup %5627 }
0x342b   :  { %v4963_v21 = vsel %vm336_vm6, %v5628_v2, 0.0 }
0x342c   :  { %4964 = vadd.xlane.f32.xlu2 %v4963_v21 }
0x3432   :  { %v1320_v28 = vpop.permute.xlu0 %1319 }
0x3433   :  { %v1322_v3 = vadd.f32 %v1320_v28, %v7449_v46 }
0x3435   :  { %5060 = vrot.lane.b32.xlu0 %v1322_v3, %s5689_s10 }
0x343a   :  { %v2564_v55 = vpop.permute.xlu0 %2563 }
0x343b   :  { %v2566_v18 = vadd.f32 %v2564_v55, %v7453_v33 }
0x343d   :  { %5072 = vrot.lane.b32.xlu0 %v3188_v31, %s5690_s19 }
0x3442   :  { %v4430_v17 = vpop.permute.xlu0 %4429 }
0x3443   :  { %v4432_v51 = vadd.f32 %v4430_v17, %v7146_v42 }
0x3444   :  { %1941 = vrot.lane.b32.xlu2 %v7451_v4, %s5688_s0 }
0x344c   :  { %3807 = vrot.lane.b32.xlu2 %v7120_v6, %s5688_s0 }
0x3454   :  { %5056 = vrot.lane.b32.xlu2 %v700_v45, %s5691_s8 }
0x345c   :  { %5068 = vrot.lane.b32.xlu2 %v2566_v18, %s5692_s22 }
0x3464   :  { %5080 = vrot.lane.b32.xlu2 %v4432_v51, %s5693_s23 }
0x349f   :  { %v4965_v43 = vpop.xlane.xlu2 %4964 }
0x34a0   :  { %5629 = vrcp.f32 %v4965_v43  ;;  %v4977_v6 = vand.u32 2147483648, %v4965_v43  ;;  %v4975_v9 = vand.u32 2147483647, %v4965_v43  ;;  %vm4971_vm12 = vweird.f32 %v4965_v43 }
0x34a2   :  { %v4978_v1 = vor.u32 1.1754944e-38, %v4977_v6  ;;  %vm4976_vm13 = vcmp.eq.f32.partialorder %v4975_v9, 8.507059e+37 }
0x34a6   :  { %v5630_v25 = vpop.eup %5629 }
0x34a7   :  { %v4967_v29 = vmul.f32 %v5630_v25, %v4965_v43  ;;  %vm4972_vm6 = vweird.f32 %v5630_v25  ;;  %v1942_v54 = vpop.permute.xlu2 %1941  ;;  %v5061_v20 = vpop.permute.xlu0 %5060 }
0x34a8   :  { %vm4973_vm9 = vmor %vm4971_vm12, %vm4972_vm6  ;;  %v1944_v34 = vadd.f32 %v1942_v54, %v7454_v37 }
0x34a9   :  { %v4968_v50 = vsub.f32 1.0, %v4967_v29 }
0x34ab   :  { %v4969_v40 = vmul.f32 %v5630_v25, %v4968_v50 }
0x34ad   :  { %v4970_v60 = vadd.f32 %v5630_v25, %v4969_v40 }
0x34af   :  { %v4974_v35 = vsel %vm4973_vm9, %v5630_v25, %v4970_v60  ;;  %v3808_v59 = vpop.permute.xlu2 %3807  ;;  %v5073_v47 = vpop.permute.xlu0 %5072 }
0x34b0   :  { %v4979_v10 = vsel %vm4976_vm13, %v4978_v1, %v4974_v35  ;;  %v3810_v57 = vadd.f32 %v3808_v59, %v6910_v13 }
0x34b1   :  { %v4980_v0 = vmul.f32 %v5628_v2, %v4979_v10 }
0x34b3   :  { %5000 = vmatmul.f32.vlgmr.msrb.gmra.mxu0 %v4980_v0  ;;  %v4982_v42 = vrot.slane %v4980_v0, 1 }
0x34b5   :  { %5020 = vmatmul.f32.vlgmr.msrb.gmra.mxu1 %v4982_v42 }
0x34b7   :  { %v5057_v61 = vpop.permute.xlu2 %5056 }
0x34b8   :  { %v5087_v16 = vsel %vm99_vm2, %v5057_v61, %v5061_v20 }
0x34bf   :  { %v5069_v11 = vpop.permute.xlu2 %5068 }
0x3530   :  { %v5001_v23 = vpop.f32.mrf.mxu0 }
0x3532   :  { %v5021_v30 = vpop.f32.mrf.mxu1 }
0x3533   :  { %v5026_v41 = vrot.slane %v5021_v30, 7 }
0x3535   :  { %v5027_v53 = vsel %vm97_vm1, %v5026_v41, %v5001_v23  ;;  %vm5088_vm1 = vcmask 130048  }
0x3536   :  { %5238 = vmatmul.msk.f32.vlgmr.msrb.gmra.mxu2 %vm67_vm8, %v5027_v53  ;;  %vm5090_vm8 = vcmask 195584  }
0x35b9   :  { %v5047_v58 = vpop.f32.mrf.mxu2 }
0x35ba   :  { %5051 = vrot.lane.b32.xlu1 %v5047_v58, %s5688_s0 }
0x35c2   :  { %5064 = vrot.lane.b32.xlu1 %v1944_v34, %s5694_s24 }
0x35ca   :  { %5076 = vrot.lane.b32.xlu1 %v3810_v57, %s5695_s25 }
0x362c   :  { %v5052_v39 = vpop.permute.xlu1 %5051 }
0x362d   :  { %v5054_v8 = vadd.f32 %v5052_v39, %v7320_v38  ;;  %v5081_v38 = vpop.permute.xlu2 %5080 }
0x362f   :  { %5084 = vrot.lane.b32.xlu0 %v5054_v8, %s5696_s26 }
0x3634   :  { %v5065_v52 = vpop.permute.xlu1 %5064 }
0x3635   :  { %v5089_v56 = vsel %vm5088_vm1, %v5087_v16, %v5065_v52 }
0x3636   :  { %v5091_v44 = vsel %vm5090_vm8, %v5089_v56, %v5069_v11 }
0x3637   :  { %v5092_v22 = vsel %vm122_vm7, %v5091_v44, %v5073_v47 }
0x363c   :  { %v5077_v13 = vpop.permute.xlu1 %5076 }
0x363d   :  { %v5094_v12 = vsel %vm5093_vm14, %v5092_v22, %v5077_v13 }
0x363e   :  { %v5096_v27 = vsel %vm5095_vm15, %v5094_v12, %v5081_v38 }
0x36a1   :  { %v5085_v7 = vpop.permute.xlu0 %5084 }
0x36a2   :  { %v5098_v48 = vsel %vm5097_vm0, %v5096_v27, %v5085_v7 }
0x36a3   :  { %5100 = vst.msk [vmem:[%s7425_s9] sm:$0x3] %vm5099_vm3, %v5098_v48 }

</bundles_post_ra>
